<compile_context>
chip_gen: v7x
topology: tpu7x:2x2x1
jax: 0.10.0
libtpu: 0.0.40
codegen_flags: <defaults>
</compile_context>

<pallas_src>
import jax
import jax.numpy as jnp
from jax import lax
from jax.experimental import pallas as pl
from jax.experimental.pallas import tpu as pltpu


# ---------------------------------------------------------------------------
# Helpers
# ---------------------------------------------------------------------------
def _round_up(x, m):
    return (x + m - 1) // m * m


def _choose_m_tiling(m, max_tile=256, min_split=128):
    """Returns (padded_M, tile_M).

    tile_M is a multiple of 16 (bf16 sublane packing); at least 2 tiles are
    used when M >= min_split so dimension_semantics=('parallel',) can shard
    the grid across both TensorCores on v7x (smaller M stays single-tile: the
    per-tile work would be below the ~0.35us/step grid overhead)."""
    ntiles = -(-m // max_tile)
    if ntiles < 2 and m >= min_split:
        ntiles = 2
    tile = _round_up(-(-m // ntiles), 16)
    return tile * ntiles, tile


_COMPILER_PARAMS = pltpu.CompilerParams(
    dimension_semantics=("parallel",),          # shard M tiles across TCs (v7x)
    vmem_limit_bytes=32 * 1024 * 1024,          # safe on v5e/v6e/v7x
)


# ---------------------------------------------------------------------------
# Pallas kernel: per-tap conv reduction (+ optional fused maxpool + concat)
# ---------------------------------------------------------------------------
def _make_fused_conv_kernel(n_taps, pool_width, pool_first):
    """Kernel refs: tap_0..tap_{n-1} (tile, Cin) bf16, w (n_taps, Cin, Cout)
    bf16 (BN folded, zero-padded cols), bias (1, Cout) f32, out (tile, Ctot).

    conv = relu(sum_t tap_t @ w[t] + bias)  (f32 accumulation on the MXU)
    pool = running max over the taps (only when pool_width > 0); the result is
    written lane-concatenated with the conv output (fused channel concat)."""

    def kernel(*refs):
        tap_refs = refs[:n_taps]
        w_ref = refs[n_taps]
        bias_ref = refs[n_taps + 1]
        o_ref = refs[n_taps + 2]

        acc = jnp.dot(tap_refs[0][...], w_ref[0],
                      preferred_element_type=jnp.float32)
        for t in range(1, n_taps):
            acc += jnp.dot(tap_refs[t][...], w_ref[t],
                           preferred_element_type=jnp.float32)
        conv = jnp.maximum(acc + bias_ref[...], 0.0).astype(o_ref.dtype)

        if pool_width > 0:
            pool = tap_refs[0][...]
            for t in range(1, n_taps):
                pool = jnp.maximum(pool, tap_refs[t][...])
            parts = [pool, conv] if pool_first else [conv, pool]
            o_ref[...] = jnp.concatenate(parts, axis=-1)
        else:
            o_ref[...] = conv

    return kernel


def fused_conv_pool(taps, w, bias, pool_width=0, pool_first=False,
                    out_dtype=jnp.bfloat16, max_tile=256):
    n_taps = len(taps)
    M, cin = taps[0].shape
    _, _, cout_w = w.shape
    if pool_width:
        assert pool_width == cin and n_taps == 9
    c_total = cout_w + pool_width

    Mp, tile = _choose_m_tiling(M, max_tile)
    if Mp != M:
        taps = [jnp.pad(t, ((0, Mp - M), (0, 0))) for t in taps]

    tap_spec = pl.BlockSpec((tile, cin), lambda i: (i, 0))
    out = pl.pallas_call(
        _make_fused_conv_kernel(n_taps, pool_width, pool_first),
        out_shape=jax.ShapeDtypeStruct((Mp, c_total), out_dtype),
        grid=(Mp // tile,),
        in_specs=[tap_spec] * n_taps + [
            pl.BlockSpec((n_taps, cin, cout_w), lambda i: (0, 0, 0)),  # resident
            pl.BlockSpec((1, cout_w), lambda i: (0, 0)),               # resident
        ],
        out_specs=pl.BlockSpec((tile, c_total), lambda i: (i, 0)),
        compiler_params=_COMPILER_PARAMS,
    )(*taps, w, bias)
    return out[:M] if Mp != M else out


# ---------------------------------------------------------------------------
# JAX glue: spatial pad + strided tap extraction (channel range folded in)
# ---------------------------------------------------------------------------
def _extract_taps(x, c0, c1, kh, kw, stride, padding):
    sh, sw = (stride, stride) if isinstance(stride, int) else stride
    ph, pw = (padding, padding) if isinstance(padding, int) else padding
    N, H, W, _ = x.shape
    if ph or pw:
        x = jnp.pad(x, ((0, 0), (ph, ph), (pw, pw), (0, 0)))
    Hp, Wp = H + 2 * ph, W + 2 * pw
    Ho = (Hp - kh) // sh + 1
    Wo = (Wp - kw) // sw + 1
    cin = c1 - c0
    taps = []
    for ikh in range(kh):
        for ikw in range(kw):
            s = lax.slice(
                x,
                (0, ikh, ikw, c0),
                (N, ikh + (Ho - 1) * sh + 1, ikw + (Wo - 1) * sw + 1, c1),
                (1, sh, sw, 1),
            )
            taps.append(s.reshape(N * Ho * Wo, cin))
    return taps, (N, Ho, Wo)


def conv_block(sources, p, kh, kw, stride=1, padding=0,
               pool_width=0, pool_first=False):
    """sources: list of (x NHWC bf16, c0, c1) channel ranges; taps from all
    sources are concatenated along the tap axis (matching the weight)."""
    all_taps = []
    for (x, c0, c1) in sources:
        taps, (N, Ho, Wo) = _extract_taps(x, c0, c1, kh, kw, stride, padding)
        all_taps += taps
    out = fused_conv_pool(all_taps, p["w"], p["bias"],
                          pool_width=pool_width, pool_first=pool_first)
    return out.reshape(N, Ho, Wo, out.shape[-1])


# ---------------------------------------------------------------------------
# Parameter init: Conv weight with folded BatchNorm (inference semantics)
# ---------------------------------------------------------------------------
def init_conv_bn(key, cin, cout, kh, kw, cin_pad=None, cout_pad=None):
    cin_pad = cin if cin_pad is None else cin_pad
    cout_pad = cout if cout_pad is None else cout_pad
    k_w, k_g, k_b, k_m, k_v = jax.random.split(key, 5)
    w = 0.05 * jax.random.normal(k_w, (kh, kw, cin, cout), jnp.float32)
    gamma = 1.0 + 0.1 * jax.random.normal(k_g, (cout,), jnp.float32)
    beta = 0.1 * jax.random.normal(k_b, (cout,), jnp.float32)
    r_mean = 0.1 * jax.random.normal(k_m, (cout,), jnp.float32)
    r_var = 0.5 + jax.random.uniform(k_v, (cout,), jnp.float32)
    eps = 1e-3                                    # nn.BatchNorm2d(eps=0.001)
    scale = gamma / jnp.sqrt(r_var + eps)
    bias = beta - r_mean * scale

    w_folded = w * scale[None, None, None, :]     # fold BN scale into conv
    ref = {"w": w_folded, "b": bias}              # f32 reference copy

    w3 = w_folded.reshape(kh * kw, cin, cout)
    w3 = jnp.pad(w3, ((0, 0), (0, cin_pad - cin), (0, cout_pad - cout)))
    bias_p = jnp.pad(bias, (0, cout_pad - cout)).reshape(1, cout_pad)
    kern = {"w": w3.astype(jnp.bfloat16), "bias": bias_p.astype(jnp.float32)}
    return kern, ref


def init_stem_params(key, in_channels):
    cin_pad = _round_up(max(in_channels, 8), 8)
    ks = jax.random.split(key, 11)
    p, r = {}, {}
    p["conv1a"], r["conv1a"] = init_conv_bn(ks[0], in_channels, 32, 3, 3,
                                            cin_pad=cin_pad, cout_pad=128)
    p["conv2a"], r["conv2a"] = init_conv_bn(ks[1], 32, 32, 3, 3, cout_pad=128)
    p["conv2b"], r["conv2b"] = init_conv_bn(ks[2], 32, 64, 3, 3, cout_pad=128)
    # mixed_3a conv branch: lanes 64..159 of the fused 256-wide output
    p["m3a_conv"], r["m3a_conv"] = init_conv_bn(ks[3], 64, 96, 3, 3, cout_pad=192)
    p_b0_0, r["m4a_b0_0"] = init_conv_bn(ks[4], 160, 64, 1, 1)
    p_b0_1, r["m4a_b0_1"] = init_conv_bn(ks[5], 64, 96, 3, 3)
    p_b1_0, r["m4a_b1_0"] = init_conv_bn(ks[6], 160, 64, 1, 1)
    p["m4a_b1_1"], r["m4a_b1_1"] = init_conv_bn(ks[7], 64, 64, 1, 7, cout_pad=128)
    p["m4a_b1_2"], r["m4a_b1_2"] = init_conv_bn(ks[8], 64, 64, 7, 1, cout_pad=128)
    p_b1_3, r["m4a_b1_3"] = init_conv_bn(ks[9], 64, 96, 3, 3)
    p["m5a_conv"], r["m5a_conv"] = init_conv_bn(ks[10], 192, 192, 3, 3)

    # fuse the two mixed_4a 1x1 convs into one lane-dense Cout=128 matmul
    p["m4a_1x1"] = {
        "w": jnp.concatenate([p_b0_0["w"], p_b1_0["w"]], axis=2),
        "bias": jnp.concatenate([p_b0_0["bias"], p_b1_0["bias"]], axis=1),
    }
    # fuse the two final 3x3 convs of mixed_4a: 18 taps (9 per branch/source),
    # branch0 -> cols 0..95, branch1 -> cols 96..191, zero-pad to 256 lanes
    w = jnp.zeros((18, 64, 256), jnp.bfloat16)
    w = w.at[:9, :, 0:96].set(p_b0_1["w"])
    w = w.at[9:, :, 96:192].set(p_b1_3["w"])
    bias = jnp.zeros((1, 256), jnp.float32)
    bias = bias.at[:, 0:96].set(p_b0_1["bias"])
    bias = bias.at[:, 96:192].set(p_b1_3["bias"])
    p["m4a_3x3"] = {"w": w, "bias": bias}
    return p, r


# ---------------------------------------------------------------------------
# Stem forward (NCHW in / NCHW out, like the PyTorch module) — 9 pallas_calls
# ---------------------------------------------------------------------------
def stem_forward(params, x_nchw):
    x = jnp.transpose(x_nchw, (0, 2, 3, 1)).astype(jnp.bfloat16)  # NCHW -> NHWC
    cin = x.shape[-1]
    cin_pad = _round_up(max(cin, 8), 8)
    if cin_pad != cin:
        x = jnp.pad(x, ((0, 0), (0, 0), (0, 0), (0, cin_pad - cin)))

    x = conv_block([(x, 0, cin_pad)], params["conv1a"], 3, 3, stride=2)     # 32/128
    x = conv_block([(x, 0, 32)], params["conv2a"], 3, 3)                    # 32/128
    x = conv_block([(x, 0, 32)], params["conv2b"], 3, 3, padding=1)         # 64/128

    # mixed_3a: maxpool(64) || conv(96) + concat fused, pool lanes first
    x = conv_block([(x, 0, 64)], params["m3a_conv"], 3, 3, stride=2,
                   pool_width=64, pool_first=True)                          # 160/256

    # mixed_4a: fused 1x1s -> branch0 lanes 0..63, branch1 lanes 64..127
    y = conv_block([(x, 0, 160)], params["m4a_1x1"], 1, 1)                  # 128
    z = conv_block([(y, 64, 128)], params["m4a_b1_1"], 1, 7, padding=(0, 3))  # 64/128
    z = conv_block([(z, 0, 64)], params["m4a_b1_2"], 7, 1, padding=(3, 0))    # 64/128
    # fused dual-source 3x3: writes cat(branch0_96, branch1_96) directly
    x = conv_block([(y, 0, 64), (z, 0, 64)], params["m4a_3x3"], 3, 3)       # 192/256

    # mixed_5a: conv(192) || maxpool(192) + concat fused, conv lanes first
    x = conv_block([(x, 0, 192)], params["m5a_conv"], 3, 3, stride=2,
                   pool_width=192, pool_first=False)                        # 384

    return jnp.transpose(x, (0, 3, 1, 2)).astype(jnp.float32)              # -> NCHW


# ---------------------------------------------------------------------------
# Pure-JAX f32 reference (mirrors the PyTorch graph) for correctness checking
# ---------------------------------------------------------------------------
def _conv_ref(x, rp, stride, padding):
    sh, sw = (stride, stride) if isinstance(stride, int) else stride
    ph, pw = (padding, padding) if isinstance(padding, int) else padding
    y = lax.conv_general_dilated(
        x, rp["w"], window_strides=(sh, sw), padding=((ph, ph), (pw, pw)),
        dimension_numbers=("NHWC", "HWIO", "NHWC"))
    return jnp.maximum(y + rp["b"], 0.0)


def _maxpool_ref(x):
    return lax.reduce_window(x, -jnp.inf, lax.max,
                             (1, 3, 3, 1), (1, 2, 2, 1), "VALID")


def stem_reference(rp, x_nchw):
    x = jnp.transpose(x_nchw, (0, 2, 3, 1))
    x = _conv_ref(x, rp["conv1a"], 2, 0)
    x = _conv_ref(x, rp["conv2a"], 1, 0)
    x = _conv_ref(x, rp["conv2b"], 1, 1)
    x = jnp.concatenate([_maxpool_ref(x), _conv_ref(x, rp["m3a_conv"], 2, 0)], -1)
    b0 = _conv_ref(_conv_ref(x, rp["m4a_b0_0"], 1, 0), rp["m4a_b0_1"], 1, 0)
    b1 = _conv_ref(x, rp["m4a_b1_0"], 1, 0)
    b1 = _conv_ref(b1, rp["m4a_b1_1"], 1, (0, 3))
    b1 = _conv_ref(b1, rp["m4a_b1_2"], 1, (3, 0))
    b1 = _conv_ref(b1, rp["m4a_b1_3"], 1, 0)
    x = jnp.concatenate([b0, b1], -1)
    x = jnp.concatenate([_conv_ref(x, rp["m5a_conv"], 2, 0), _maxpool_ref(x)], -1)
    return jnp.transpose(x, (0, 3, 1, 2))


if __name__ == "__main__":
    key = jax.random.PRNGKey(0)
    k_param, k_x = jax.random.split(key)

    in_channels = 3
    # 31x31 input -> stem output spatial 1x1, channels 384
    x = jax.random.normal(k_x, (2, in_channels, 31, 31), jnp.float32)
    params, ref_params = init_stem_params(k_param, in_channels)

    fwd = jax.jit(stem_forward)
    out = jax.block_until_ready(fwd(params, x))
    assert out.shape == (2, 384, 1, 1), out.shape
    assert bool(jnp.all(jnp.isfinite(out)))

    # Cross-check against the f32 reference (bf16-level tolerance).
    ref = jax.block_until_ready(jax.jit(stem_reference)(ref_params, x))
    max_err = float(jnp.max(jnp.abs(out - ref)))
    scale = float(jnp.max(jnp.abs(ref))) + 1e-6
    assert max_err <= 0.1 * scale + 2e-2, (max_err, scale)

    print("KERNEL_OK")
</pallas_src>

<mosaic_0001>
module attributes {stable_mosaic.version = 11 : i64} {
  func.func @kernel(%arg0: i32, %arg1: memref<240x8xbf16, #tpu.memory_space<vmem>>, %arg2: memref<240x8xbf16, #tpu.memory_space<vmem>>, %arg3: memref<240x8xbf16, #tpu.memory_space<vmem>>, %arg4: memref<240x8xbf16, #tpu.memory_space<vmem>>, %arg5: memref<240x8xbf16, #tpu.memory_space<vmem>>, %arg6: memref<240x8xbf16, #tpu.memory_space<vmem>>, %arg7: memref<240x8xbf16, #tpu.memory_space<vmem>>, %arg8: memref<240x8xbf16, #tpu.memory_space<vmem>>, %arg9: memref<240x8xbf16, #tpu.memory_space<vmem>>, %arg10: memref<9x8x128xbf16, #tpu.memory_space<vmem>>, %arg11: memref<1x128xf32, #tpu.memory_space<vmem>>, %arg12: memref<240x128xbf16, #tpu.memory_space<vmem>>) attributes {dimension_semantics = [#tpu.dimension_semantics<parallel>], iteration_bounds = array<i64: 2>, scalar_prefetch = 0 : i64, scratch_operands = 0 : i64, tpu.core_type = #tpu.core_type<tc>, window_params = [{transform_indices = @transform_0, window_bounds = array<i64: 240, 8>}, {transform_indices = @transform_1, window_bounds = array<i64: 240, 8>}, {transform_indices = @transform_2, window_bounds = array<i64: 240, 8>}, {transform_indices = @transform_3, window_bounds = array<i64: 240, 8>}, {transform_indices = @transform_4, window_bounds = array<i64: 240, 8>}, {transform_indices = @transform_5, window_bounds = array<i64: 240, 8>}, {transform_indices = @transform_6, window_bounds = array<i64: 240, 8>}, {transform_indices = @transform_7, window_bounds = array<i64: 240, 8>}, {transform_indices = @transform_8, window_bounds = array<i64: 240, 8>}, {pipeline_mode = #tpu.pipeline_mode<synchronous>, transform_indices = @transform_9, window_bounds = array<i64: 9, 8, 128>}, {pipeline_mode = #tpu.pipeline_mode<synchronous>, transform_indices = @transform_10, window_bounds = array<i64: 1, 128>}, {transform_indices = @transform_11, window_bounds = array<i64: 240, 128>}]} {
    %c0 = arith.constant 0 : index
    %c0_0 = arith.constant 0 : index
    %0 = vector.load %arg1[%c0, %c0_0] : memref<240x8xbf16, #tpu.memory_space<vmem>>, vector<240x8xbf16>
    %c0_1 = arith.constant 0 : index
    %c0_2 = arith.constant 0 : index
    %c0_3 = arith.constant 0 : index
    %1 = vector.load %arg10[%c0_1, %c0_2, %c0_3] : memref<9x8x128xbf16, #tpu.memory_space<vmem>>, vector<1x8x128xbf16>
    %2 = vector.shape_cast %1 : vector<1x8x128xbf16> to vector<8x128xbf16>
    %cst = arith.constant dense<0.000000e+00> : vector<240x128xf32>
    %3 = tpu.matmul %0, %2, %cst {dimension_numbers = #tpu.dot_dimension_numbers<[1], [0], [0], [1], [0, 0, 1, 1], [], []>} : vector<240x8xbf16>, vector<8x128xbf16>, vector<240x128xf32> -> vector<240x128xf32>
    %c0_4 = arith.constant 0 : index
    %c0_5 = arith.constant 0 : index
    %4 = vector.load %arg2[%c0_4, %c0_5] : memref<240x8xbf16, #tpu.memory_space<vmem>>, vector<240x8xbf16>
    %c1 = arith.constant 1 : index
    %c0_6 = arith.constant 0 : index
    %c0_7 = arith.constant 0 : index
    %5 = vector.load %arg10[%c1, %c0_6, %c0_7] : memref<9x8x128xbf16, #tpu.memory_space<vmem>>, vector<1x8x128xbf16>
    %6 = vector.shape_cast %5 : vector<1x8x128xbf16> to vector<8x128xbf16>
    %cst_8 = arith.constant dense<0.000000e+00> : vector<240x128xf32>
    %7 = tpu.matmul %4, %6, %cst_8 {dimension_numbers = #tpu.dot_dimension_numbers<[1], [0], [0], [1], [0, 0, 1, 1], [], []>} : vector<240x8xbf16>, vector<8x128xbf16>, vector<240x128xf32> -> vector<240x128xf32>
    %8 = arith.addf %3, %7 : vector<240x128xf32>
    %c0_9 = arith.constant 0 : index
    %c0_10 = arith.constant 0 : index
    %9 = vector.load %arg3[%c0_9, %c0_10] : memref<240x8xbf16, #tpu.memory_space<vmem>>, vector<240x8xbf16>
    %c2 = arith.constant 2 : index
    %c0_11 = arith.constant 0 : index
    %c0_12 = arith.constant 0 : index
    %10 = vector.load %arg10[%c2, %c0_11, %c0_12] : memref<9x8x128xbf16, #tpu.memory_space<vmem>>, vector<1x8x128xbf16>
    %11 = vector.shape_cast %10 : vector<1x8x128xbf16> to vector<8x128xbf16>
    %cst_13 = arith.constant dense<0.000000e+00> : vector<240x128xf32>
    %12 = tpu.matmul %9, %11, %cst_13 {dimension_numbers = #tpu.dot_dimension_numbers<[1], [0], [0], [1], [0, 0, 1, 1], [], []>} : vector<240x8xbf16>, vector<8x128xbf16>, vector<240x128xf32> -> vector<240x128xf32>
    %13 = arith.addf %8, %12 : vector<240x128xf32>
    %c0_14 = arith.constant 0 : index
    %c0_15 = arith.constant 0 : index
    %14 = vector.load %arg4[%c0_14, %c0_15] : memref<240x8xbf16, #tpu.memory_space<vmem>>, vector<240x8xbf16>
    %c3 = arith.constant 3 : index
    %c0_16 = arith.constant 0 : index
    %c0_17 = arith.constant 0 : index
    %15 = vector.load %arg10[%c3, %c0_16, %c0_17] : memref<9x8x128xbf16, #tpu.memory_space<vmem>>, vector<1x8x128xbf16>
    %16 = vector.shape_cast %15 : vector<1x8x128xbf16> to vector<8x128xbf16>
    %cst_18 = arith.constant dense<0.000000e+00> : vector<240x128xf32>
    %17 = tpu.matmul %14, %16, %cst_18 {dimension_numbers = #tpu.dot_dimension_numbers<[1], [0], [0], [1], [0, 0, 1, 1], [], []>} : vector<240x8xbf16>, vector<8x128xbf16>, vector<240x128xf32> -> vector<240x128xf32>
    %18 = arith.addf %13, %17 : vector<240x128xf32>
    %c0_19 = arith.constant 0 : index
    %c0_20 = arith.constant 0 : index
    %19 = vector.load %arg5[%c0_19, %c0_20] : memref<240x8xbf16, #tpu.memory_space<vmem>>, vector<240x8xbf16>
    %c4 = arith.constant 4 : index
    %c0_21 = arith.constant 0 : index
    %c0_22 = arith.constant 0 : index
    %20 = vector.load %arg10[%c4, %c0_21, %c0_22] : memref<9x8x128xbf16, #tpu.memory_space<vmem>>, vector<1x8x128xbf16>
    %21 = vector.shape_cast %20 : vector<1x8x128xbf16> to vector<8x128xbf16>
    %cst_23 = arith.constant dense<0.000000e+00> : vector<240x128xf32>
    %22 = tpu.matmul %19, %21, %cst_23 {dimension_numbers = #tpu.dot_dimension_numbers<[1], [0], [0], [1], [0, 0, 1, 1], [], []>} : vector<240x8xbf16>, vector<8x128xbf16>, vector<240x128xf32> -> vector<240x128xf32>
    %23 = arith.addf %18, %22 : vector<240x128xf32>
    %c0_24 = arith.constant 0 : index
    %c0_25 = arith.constant 0 : index
    %24 = vector.load %arg6[%c0_24, %c0_25] : memref<240x8xbf16, #tpu.memory_space<vmem>>, vector<240x8xbf16>
    %c5 = arith.constant 5 : index
    %c0_26 = arith.constant 0 : index
    %c0_27 = arith.constant 0 : index
    %25 = vector.load %arg10[%c5, %c0_26, %c0_27] : memref<9x8x128xbf16, #tpu.memory_space<vmem>>, vector<1x8x128xbf16>
    %26 = vector.shape_cast %25 : vector<1x8x128xbf16> to vector<8x128xbf16>
    %cst_28 = arith.constant dense<0.000000e+00> : vector<240x128xf32>
    %27 = tpu.matmul %24, %26, %cst_28 {dimension_numbers = #tpu.dot_dimension_numbers<[1], [0], [0], [1], [0, 0, 1, 1], [], []>} : vector<240x8xbf16>, vector<8x128xbf16>, vector<240x128xf32> -> vector<240x128xf32>
    %28 = arith.addf %23, %27 : vector<240x128xf32>
    %c0_29 = arith.constant 0 : index
    %c0_30 = arith.constant 0 : index
    %29 = vector.load %arg7[%c0_29, %c0_30] : memref<240x8xbf16, #tpu.memory_space<vmem>>, vector<240x8xbf16>
    %c6 = arith.constant 6 : index
    %c0_31 = arith.constant 0 : index
    %c0_32 = arith.constant 0 : index
    %30 = vector.load %arg10[%c6, %c0_31, %c0_32] : memref<9x8x128xbf16, #tpu.memory_space<vmem>>, vector<1x8x128xbf16>
    %31 = vector.shape_cast %30 : vector<1x8x128xbf16> to vector<8x128xbf16>
    %cst_33 = arith.constant dense<0.000000e+00> : vector<240x128xf32>
    %32 = tpu.matmul %29, %31, %cst_33 {dimension_numbers = #tpu.dot_dimension_numbers<[1], [0], [0], [1], [0, 0, 1, 1], [], []>} : vector<240x8xbf16>, vector<8x128xbf16>, vector<240x128xf32> -> vector<240x128xf32>
    %33 = arith.addf %28, %32 : vector<240x128xf32>
    %c0_34 = arith.constant 0 : index
    %c0_35 = arith.constant 0 : index
    %34 = vector.load %arg8[%c0_34, %c0_35] : memref<240x8xbf16, #tpu.memory_space<vmem>>, vector<240x8xbf16>
    %c7 = arith.constant 7 : index
    %c0_36 = arith.constant 0 : index
    %c0_37 = arith.constant 0 : index
    %35 = vector.load %arg10[%c7, %c0_36, %c0_37] : memref<9x8x128xbf16, #tpu.memory_space<vmem>>, vector<1x8x128xbf16>
    %36 = vector.shape_cast %35 : vector<1x8x128xbf16> to vector<8x128xbf16>
    %cst_38 = arith.constant dense<0.000000e+00> : vector<240x128xf32>
    %37 = tpu.matmul %34, %36, %cst_38 {dimension_numbers = #tpu.dot_dimension_numbers<[1], [0], [0], [1], [0, 0, 1, 1], [], []>} : vector<240x8xbf16>, vector<8x128xbf16>, vector<240x128xf32> -> vector<240x128xf32>
    %38 = arith.addf %33, %37 : vector<240x128xf32>
    %c0_39 = arith.constant 0 : index
    %c0_40 = arith.constant 0 : index
    %39 = vector.load %arg9[%c0_39, %c0_40] : memref<240x8xbf16, #tpu.memory_space<vmem>>, vector<240x8xbf16>
    %c8 = arith.constant 8 : index
    %c0_41 = arith.constant 0 : index
    %c0_42 = arith.constant 0 : index
    %40 = vector.load %arg10[%c8, %c0_41, %c0_42] : memref<9x8x128xbf16, #tpu.memory_space<vmem>>, vector<1x8x128xbf16>
    %41 = vector.shape_cast %40 : vector<1x8x128xbf16> to vector<8x128xbf16>
    %cst_43 = arith.constant dense<0.000000e+00> : vector<240x128xf32>
    %42 = tpu.matmul %39, %41, %cst_43 {dimension_numbers = #tpu.dot_dimension_numbers<[1], [0], [0], [1], [0, 0, 1, 1], [], []>} : vector<240x8xbf16>, vector<8x128xbf16>, vector<240x128xf32> -> vector<240x128xf32>
    %43 = arith.addf %38, %42 : vector<240x128xf32>
    %c0_44 = arith.constant 0 : index
    %c0_45 = arith.constant 0 : index
    %44 = vector.load %arg11[%c0_44, %c0_45] : memref<1x128xf32, #tpu.memory_space<vmem>>, vector<1x128xf32>
    %45 = vector.broadcast %44 : vector<1x128xf32> to vector<240x128xf32>
    %46 = arith.addf %43, %45 : vector<240x128xf32>
    %cst_46 = arith.constant 0.000000e+00 : f32
    %47 = vector.broadcast %cst_46 : f32 to vector<240x128xf32>
    %48 = arith.maximumf %46, %47 : vector<240x128xf32>
    %49 = arith.truncf %48 : vector<240x128xf32> to vector<240x128xbf16>
    %c0_47 = arith.constant 0 : index
    %c0_48 = arith.constant 0 : index
    %50 = vector.load %arg12[%c0_47, %c0_48] : memref<240x128xbf16, #tpu.memory_space<vmem>>, vector<240x128xbf16>
    tpu.vector_store %arg12[%c0_47, %c0_48], %49 {strides = array<i32>} : memref<240x128xbf16, #tpu.memory_space<vmem>>, vector<240x128xbf16>,
    return
  }
  func.func @transform_0(%arg0: i32) -> (i32, i32) {
    %c0_i32 = arith.constant 0 : i32
    %c0_i32_0 = arith.constant 0 : i32
    return %arg0, %c0_i32 : i32, i32
  }
  func.func @transform_1(%arg0: i32) -> (i32, i32) {
    %c0_i32 = arith.constant 0 : i32
    %c0_i32_0 = arith.constant 0 : i32
    return %arg0, %c0_i32 : i32, i32
  }
  func.func @transform_2(%arg0: i32) -> (i32, i32) {
    %c0_i32 = arith.constant 0 : i32
    %c0_i32_0 = arith.constant 0 : i32
    return %arg0, %c0_i32 : i32, i32
  }
  func.func @transform_3(%arg0: i32) -> (i32, i32) {
    %c0_i32 = arith.constant 0 : i32
    %c0_i32_0 = arith.constant 0 : i32
    return %arg0, %c0_i32 : i32, i32
  }
  func.func @transform_4(%arg0: i32) -> (i32, i32) {
    %c0_i32 = arith.constant 0 : i32
    %c0_i32_0 = arith.constant 0 : i32
    return %arg0, %c0_i32 : i32, i32
  }
  func.func @transform_5(%arg0: i32) -> (i32, i32) {
    %c0_i32 = arith.constant 0 : i32
    %c0_i32_0 = arith.constant 0 : i32
    return %arg0, %c0_i32 : i32, i32
  }
  func.func @transform_6(%arg0: i32) -> (i32, i32) {
    %c0_i32 = arith.constant 0 : i32
    %c0_i32_0 = arith.constant 0 : i32
    return %arg0, %c0_i32 : i32, i32
  }
  func.func @transform_7(%arg0: i32) -> (i32, i32) {
    %c0_i32 = arith.constant 0 : i32
    %c0_i32_0 = arith.constant 0 : i32
    return %arg0, %c0_i32 : i32, i32
  }
  func.func @transform_8(%arg0: i32) -> (i32, i32) {
    %c0_i32 = arith.constant 0 : i32
    %c0_i32_0 = arith.constant 0 : i32
    return %arg0, %c0_i32 : i32, i32
  }
  func.func @transform_9(%arg0: i32) -> (i32, i32, i32) {
    %c0_i32 = arith.constant 0 : i32
    %c0_i32_0 = arith.constant 0 : i32
    %c0_i32_1 = arith.constant 0 : i32
    %c0_i32_2 = arith.constant 0 : i32
    return %c0_i32, %c0_i32_0, %c0_i32_1 : i32, i32, i32
  }
  func.func @transform_10(%arg0: i32) -> (i32, i32) {
    %c0_i32 = arith.constant 0 : i32
    %c0_i32_0 = arith.constant 0 : i32
    %c0_i32_1 = arith.constant 0 : i32
    return %c0_i32, %c0_i32_0 : i32, i32
  }
  func.func @transform_11(%arg0: i32) -> (i32, i32) {
    %c0_i32 = arith.constant 0 : i32
    %c0_i32_0 = arith.constant 0 : i32
    return %arg0, %c0_i32 : i32, i32
  }
}

module attributes {stable_mosaic.version = 11 : i64} {
  func.func @kernel(%arg0: i32, %arg1: memref<176x32xbf16, #tpu.memory_space<vmem>>, %arg2: memref<176x32xbf16, #tpu.memory_space<vmem>>, %arg3: memref<176x32xbf16, #tpu.memory_space<vmem>>, %arg4: memref<176x32xbf16, #tpu.memory_space<vmem>>, %arg5: memref<176x32xbf16, #tpu.memory_space<vmem>>, %arg6: memref<176x32xbf16, #tpu.memory_space<vmem>>, %arg7: memref<176x32xbf16, #tpu.memory_space<vmem>>, %arg8: memref<176x32xbf16, #tpu.memory_space<vmem>>, %arg9: memref<176x32xbf16, #tpu.memory_space<vmem>>, %arg10: memref<9x32x128xbf16, #tpu.memory_space<vmem>>, %arg11: memref<1x128xf32, #tpu.memory_space<vmem>>, %arg12: memref<176x128xbf16, #tpu.memory_space<vmem>>) attributes {dimension_semantics = [#tpu.dimension_semantics<parallel>], iteration_bounds = array<i64: 2>, scalar_prefetch = 0 : i64, scratch_operands = 0 : i64, tpu.core_type = #tpu.core_type<tc>, window_params = [{transform_indices = @transform_0, window_bounds = array<i64: 176, 32>}, {transform_indices = @transform_1, window_bounds = array<i64: 176, 32>}, {transform_indices = @transform_2, window_bounds = array<i64: 176, 32>}, {transform_indices = @transform_3, window_bounds = array<i64: 176, 32>}, {transform_indices = @transform_4, window_bounds = array<i64: 176, 32>}, {transform_indices = @transform_5, window_bounds = array<i64: 176, 32>}, {transform_indices = @transform_6, window_bounds = array<i64: 176, 32>}, {transform_indices = @transform_7, window_bounds = array<i64: 176, 32>}, {transform_indices = @transform_8, window_bounds = array<i64: 176, 32>}, {pipeline_mode = #tpu.pipeline_mode<synchronous>, transform_indices = @transform_9, window_bounds = array<i64: 9, 32, 128>}, {pipeline_mode = #tpu.pipeline_mode<synchronous>, transform_indices = @transform_10, window_bounds = array<i64: 1, 128>}, {transform_indices = @transform_11, window_bounds = array<i64: 176, 128>}]} {
    %c0 = arith.constant 0 : index
    %c0_0 = arith.constant 0 : index
    %0 = vector.load %arg1[%c0, %c0_0] : memref<176x32xbf16, #tpu.memory_space<vmem>>, vector<176x32xbf16>
    %c0_1 = arith.constant 0 : index
    %c0_2 = arith.constant 0 : index
    %c0_3 = arith.constant 0 : index
    %1 = vector.load %arg10[%c0_1, %c0_2, %c0_3] : memref<9x32x128xbf16, #tpu.memory_space<vmem>>, vector<1x32x128xbf16>
    %2 = vector.shape_cast %1 : vector<1x32x128xbf16> to vector<32x128xbf16>
    %cst = arith.constant dense<0.000000e+00> : vector<176x128xf32>
    %3 = tpu.matmul %0, %2, %cst {dimension_numbers = #tpu.dot_dimension_numbers<[1], [0], [0], [1], [0, 0, 1, 1], [], []>} : vector<176x32xbf16>, vector<32x128xbf16>, vector<176x128xf32> -> vector<176x128xf32>
    %c0_4 = arith.constant 0 : index
    %c0_5 = arith.constant 0 : index
    %4 = vector.load %arg2[%c0_4, %c0_5] : memref<176x32xbf16, #tpu.memory_space<vmem>>, vector<176x32xbf16>
    %c1 = arith.constant 1 : index
    %c0_6 = arith.constant 0 : index
    %c0_7 = arith.constant 0 : index
    %5 = vector.load %arg10[%c1, %c0_6, %c0_7] : memref<9x32x128xbf16, #tpu.memory_space<vmem>>, vector<1x32x128xbf16>
    %6 = vector.shape_cast %5 : vector<1x32x128xbf16> to vector<32x128xbf16>
    %cst_8 = arith.constant dense<0.000000e+00> : vector<176x128xf32>
    %7 = tpu.matmul %4, %6, %cst_8 {dimension_numbers = #tpu.dot_dimension_numbers<[1], [0], [0], [1], [0, 0, 1, 1], [], []>} : vector<176x32xbf16>, vector<32x128xbf16>, vector<176x128xf32> -> vector<176x128xf32>
    %8 = arith.addf %3, %7 : vector<176x128xf32>
    %c0_9 = arith.constant 0 : index
    %c0_10 = arith.constant 0 : index
    %9 = vector.load %arg3[%c0_9, %c0_10] : memref<176x32xbf16, #tpu.memory_space<vmem>>, vector<176x32xbf16>
    %c2 = arith.constant 2 : index
    %c0_11 = arith.constant 0 : index
    %c0_12 = arith.constant 0 : index
    %10 = vector.load %arg10[%c2, %c0_11, %c0_12] : memref<9x32x128xbf16, #tpu.memory_space<vmem>>, vector<1x32x128xbf16>
    %11 = vector.shape_cast %10 : vector<1x32x128xbf16> to vector<32x128xbf16>
    %cst_13 = arith.constant dense<0.000000e+00> : vector<176x128xf32>
    %12 = tpu.matmul %9, %11, %cst_13 {dimension_numbers = #tpu.dot_dimension_numbers<[1], [0], [0], [1], [0, 0, 1, 1], [], []>} : vector<176x32xbf16>, vector<32x128xbf16>, vector<176x128xf32> -> vector<176x128xf32>
    %13 = arith.addf %8, %12 : vector<176x128xf32>
    %c0_14 = arith.constant 0 : index
    %c0_15 = arith.constant 0 : index
    %14 = vector.load %arg4[%c0_14, %c0_15] : memref<176x32xbf16, #tpu.memory_space<vmem>>, vector<176x32xbf16>
    %c3 = arith.constant 3 : index
    %c0_16 = arith.constant 0 : index
    %c0_17 = arith.constant 0 : index
    %15 = vector.load %arg10[%c3, %c0_16, %c0_17] : memref<9x32x128xbf16, #tpu.memory_space<vmem>>, vector<1x32x128xbf16>
    %16 = vector.shape_cast %15 : vector<1x32x128xbf16> to vector<32x128xbf16>
    %cst_18 = arith.constant dense<0.000000e+00> : vector<176x128xf32>
    %17 = tpu.matmul %14, %16, %cst_18 {dimension_numbers = #tpu.dot_dimension_numbers<[1], [0], [0], [1], [0, 0, 1, 1], [], []>} : vector<176x32xbf16>, vector<32x128xbf16>, vector<176x128xf32> -> vector<176x128xf32>
    %18 = arith.addf %13, %17 : vector<176x128xf32>
    %c0_19 = arith.constant 0 : index
    %c0_20 = arith.constant 0 : index
    %19 = vector.load %arg5[%c0_19, %c0_20] : memref<176x32xbf16, #tpu.memory_space<vmem>>, vector<176x32xbf16>
    %c4 = arith.constant 4 : index
    %c0_21 = arith.constant 0 : index
    %c0_22 = arith.constant 0 : index
    %20 = vector.load %arg10[%c4, %c0_21, %c0_22] : memref<9x32x128xbf16, #tpu.memory_space<vmem>>, vector<1x32x128xbf16>
    %21 = vector.shape_cast %20 : vector<1x32x128xbf16> to vector<32x128xbf16>
    %cst_23 = arith.constant dense<0.000000e+00> : vector<176x128xf32>
    %22 = tpu.matmul %19, %21, %cst_23 {dimension_numbers = #tpu.dot_dimension_numbers<[1], [0], [0], [1], [0, 0, 1, 1], [], []>} : vector<176x32xbf16>, vector<32x128xbf16>, vector<176x128xf32> -> vector<176x128xf32>
    %23 = arith.addf %18, %22 : vector<176x128xf32>
    %c0_24 = arith.constant 0 : index
    %c0_25 = arith.constant 0 : index
    %24 = vector.load %arg6[%c0_24, %c0_25] : memref<176x32xbf16, #tpu.memory_space<vmem>>, vector<176x32xbf16>
    %c5 = arith.constant 5 : index
    %c0_26 = arith.constant 0 : index
    %c0_27 = arith.constant 0 : index
    %25 = vector.load %arg10[%c5, %c0_26, %c0_27] : memref<9x32x128xbf16, #tpu.memory_space<vmem>>, vector<1x32x128xbf16>
    %26 = vector.shape_cast %25 : vector<1x32x128xbf16> to vector<32x128xbf16>
    %cst_28 = arith.constant dense<0.000000e+00> : vector<176x128xf32>
    %27 = tpu.matmul %24, %26, %cst_28 {dimension_numbers = #tpu.dot_dimension_numbers<[1], [0], [0], [1], [0, 0, 1, 1], [], []>} : vector<176x32xbf16>, vector<32x128xbf16>, vector<176x128xf32> -> vector<176x128xf32>
    %28 = arith.addf %23, %27 : vector<176x128xf32>
    %c0_29 = arith.constant 0 : index
    %c0_30 = arith.constant 0 : index
    %29 = vector.load %arg7[%c0_29, %c0_30] : memref<176x32xbf16, #tpu.memory_space<vmem>>, vector<176x32xbf16>
    %c6 = arith.constant 6 : index
    %c0_31 = arith.constant 0 : index
    %c0_32 = arith.constant 0 : index
    %30 = vector.load %arg10[%c6, %c0_31, %c0_32] : memref<9x32x128xbf16, #tpu.memory_space<vmem>>, vector<1x32x128xbf16>
    %31 = vector.shape_cast %30 : vector<1x32x128xbf16> to vector<32x128xbf16>
    %cst_33 = arith.constant dense<0.000000e+00> : vector<176x128xf32>
    %32 = tpu.matmul %29, %31, %cst_33 {dimension_numbers = #tpu.dot_dimension_numbers<[1], [0], [0], [1], [0, 0, 1, 1], [], []>} : vector<176x32xbf16>, vector<32x128xbf16>, vector<176x128xf32> -> vector<176x128xf32>
    %33 = arith.addf %28, %32 : vector<176x128xf32>
    %c0_34 = arith.constant 0 : index
    %c0_35 = arith.constant 0 : index
    %34 = vector.load %arg8[%c0_34, %c0_35] : memref<176x32xbf16, #tpu.memory_space<vmem>>, vector<176x32xbf16>
    %c7 = arith.constant 7 : index
    %c0_36 = arith.constant 0 : index
    %c0_37 = arith.constant 0 : index
    %35 = vector.load %arg10[%c7, %c0_36, %c0_37] : memref<9x32x128xbf16, #tpu.memory_space<vmem>>, vector<1x32x128xbf16>
    %36 = vector.shape_cast %35 : vector<1x32x128xbf16> to vector<32x128xbf16>
    %cst_38 = arith.constant dense<0.000000e+00> : vector<176x128xf32>
    %37 = tpu.matmul %34, %36, %cst_38 {dimension_numbers = #tpu.dot_dimension_numbers<[1], [0], [0], [1], [0, 0, 1, 1], [], []>} : vector<176x32xbf16>, vector<32x128xbf16>, vector<176x128xf32> -> vector<176x128xf32>
    %38 = arith.addf %33, %37 : vector<176x128xf32>
    %c0_39 = arith.constant 0 : index
    %c0_40 = arith.constant 0 : index
    %39 = vector.load %arg9[%c0_39, %c0_40] : memref<176x32xbf16, #tpu.memory_space<vmem>>, vector<176x32xbf16>
    %c8 = arith.constant 8 : index
    %c0_41 = arith.constant 0 : index
    %c0_42 = arith.constant 0 : index
    %40 = vector.load %arg10[%c8, %c0_41, %c0_42] : memref<9x32x128xbf16, #tpu.memory_space<vmem>>, vector<1x32x128xbf16>
    %41 = vector.shape_cast %40 : vector<1x32x128xbf16> to vector<32x128xbf16>
    %cst_43 = arith.constant dense<0.000000e+00> : vector<176x128xf32>
    %42 = tpu.matmul %39, %41, %cst_43 {dimension_numbers = #tpu.dot_dimension_numbers<[1], [0], [0], [1], [0, 0, 1, 1], [], []>} : vector<176x32xbf16>, vector<32x128xbf16>, vector<176x128xf32> -> vector<176x128xf32>
    %43 = arith.addf %38, %42 : vector<176x128xf32>
    %c0_44 = arith.constant 0 : index
    %c0_45 = arith.constant 0 : index
    %44 = vector.load %arg11[%c0_44, %c0_45] : memref<1x128xf32, #tpu.memory_space<vmem>>, vector<1x128xf32>
    %45 = vector.broadcast %44 : vector<1x128xf32> to vector<176x128xf32>
    %46 = arith.addf %43, %45 : vector<176x128xf32>
    %cst_46 = arith.constant 0.000000e+00 : f32
    %47 = vector.broadcast %cst_46 : f32 to vector<176x128xf32>
    %48 = arith.maximumf %46, %47 : vector<176x128xf32>
    %49 = arith.truncf %48 : vector<176x128xf32> to vector<176x128xbf16>
    %c0_47 = arith.constant 0 : index
    %c0_48 = arith.constant 0 : index
    %50 = vector.load %arg12[%c0_47, %c0_48] : memref<176x128xbf16, #tpu.memory_space<vmem>>, vector<176x128xbf16>
    tpu.vector_store %arg12[%c0_47, %c0_48], %49 {strides = array<i32>} : memref<176x128xbf16, #tpu.memory_space<vmem>>, vector<176x128xbf16>,
    return
  }
  func.func @transform_0(%arg0: i32) -> (i32, i32) {
    %c0_i32 = arith.constant 0 : i32
    %c0_i32_0 = arith.constant 0 : i32
    return %arg0, %c0_i32 : i32, i32
  }
  func.func @transform_1(%arg0: i32) -> (i32, i32) {
    %c0_i32 = arith.constant 0 : i32
    %c0_i32_0 = arith.constant 0 : i32
    return %arg0, %c0_i32 : i32, i32
  }
  func.func @transform_2(%arg0: i32) -> (i32, i32) {
    %c0_i32 = arith.constant 0 : i32
    %c0_i32_0 = arith.constant 0 : i32
    return %arg0, %c0_i32 : i32, i32
  }
  func.func @transform_3(%arg0: i32) -> (i32, i32) {
    %c0_i32 = arith.constant 0 : i32
    %c0_i32_0 = arith.constant 0 : i32
    return %arg0, %c0_i32 : i32, i32
  }
  func.func @transform_4(%arg0: i32) -> (i32, i32) {
    %c0_i32 = arith.constant 0 : i32
    %c0_i32_0 = arith.constant 0 : i32
    return %arg0, %c0_i32 : i32, i32
  }
  func.func @transform_5(%arg0: i32) -> (i32, i32) {
    %c0_i32 = arith.constant 0 : i32
    %c0_i32_0 = arith.constant 0 : i32
    return %arg0, %c0_i32 : i32, i32
  }
  func.func @transform_6(%arg0: i32) -> (i32, i32) {
    %c0_i32 = arith.constant 0 : i32
    %c0_i32_0 = arith.constant 0 : i32
    return %arg0, %c0_i32 : i32, i32
  }
  func.func @transform_7(%arg0: i32) -> (i32, i32) {
    %c0_i32 = arith.constant 0 : i32
    %c0_i32_0 = arith.constant 0 : i32
    return %arg0, %c0_i32 : i32, i32
  }
  func.func @transform_8(%arg0: i32) -> (i32, i32) {
    %c0_i32 = arith.constant 0 : i32
    %c0_i32_0 = arith.constant 0 : i32
    return %arg0, %c0_i32 : i32, i32
  }
  func.func @transform_9(%arg0: i32) -> (i32, i32, i32) {
    %c0_i32 = arith.constant 0 : i32
    %c0_i32_0 = arith.constant 0 : i32
    %c0_i32_1 = arith.constant 0 : i32
    %c0_i32_2 = arith.constant 0 : i32
    return %c0_i32, %c0_i32_0, %c0_i32_1 : i32, i32, i32
  }
  func.func @transform_10(%arg0: i32) -> (i32, i32) {
    %c0_i32 = arith.constant 0 : i32
    %c0_i32_0 = arith.constant 0 : i32
    %c0_i32_1 = arith.constant 0 : i32
    return %c0_i32, %c0_i32_0 : i32, i32
  }
  func.func @transform_11(%arg0: i32) -> (i32, i32) {
    %c0_i32 = arith.constant 0 : i32
    %c0_i32_0 = arith.constant 0 : i32
    return %arg0, %c0_i32 : i32, i32
  }
}

module attributes {stable_mosaic.version = 11 : i64} {
  func.func @kernel(%arg0: i32, %arg1: memref<80x64xbf16, #tpu.memory_space<vmem>>, %arg2: memref<80x64xbf16, #tpu.memory_space<vmem>>, %arg3: memref<80x64xbf16, #tpu.memory_space<vmem>>, %arg4: memref<80x64xbf16, #tpu.memory_space<vmem>>, %arg5: memref<80x64xbf16, #tpu.memory_space<vmem>>, %arg6: memref<80x64xbf16, #tpu.memory_space<vmem>>, %arg7: memref<80x64xbf16, #tpu.memory_space<vmem>>, %arg8: memref<80x64xbf16, #tpu.memory_space<vmem>>, %arg9: memref<80x64xbf16, #tpu.memory_space<vmem>>, %arg10: memref<9x64x192xbf16, #tpu.memory_space<vmem>>, %arg11: memref<1x192xf32, #tpu.memory_space<vmem>>, %arg12: memref<80x256xbf16, #tpu.memory_space<vmem>>) attributes {dimension_semantics = [#tpu.dimension_semantics<parallel>], iteration_bounds = array<i64: 1>, scalar_prefetch = 0 : i64, scratch_operands = 0 : i64, tpu.core_type = #tpu.core_type<tc>, window_params = [{transform_indices = @transform_0, window_bounds = array<i64: 80, 64>}, {transform_indices = @transform_1, window_bounds = array<i64: 80, 64>}, {transform_indices = @transform_2, window_bounds = array<i64: 80, 64>}, {transform_indices = @transform_3, window_bounds = array<i64: 80, 64>}, {transform_indices = @transform_4, window_bounds = array<i64: 80, 64>}, {transform_indices = @transform_5, window_bounds = array<i64: 80, 64>}, {transform_indices = @transform_6, window_bounds = array<i64: 80, 64>}, {transform_indices = @transform_7, window_bounds = array<i64: 80, 64>}, {transform_indices = @transform_8, window_bounds = array<i64: 80, 64>}, {pipeline_mode = #tpu.pipeline_mode<synchronous>, transform_indices = @transform_9, window_bounds = array<i64: 9, 64, 192>}, {pipeline_mode = #tpu.pipeline_mode<synchronous>, transform_indices = @transform_10, window_bounds = array<i64: 1, 192>}, {transform_indices = @transform_11, window_bounds = array<i64: 80, 256>}]} {
    %c0 = arith.constant 0 : index
    %c0_0 = arith.constant 0 : index
    %0 = vector.load %arg1[%c0, %c0_0] : memref<80x64xbf16, #tpu.memory_space<vmem>>, vector<80x64xbf16>
    %c0_1 = arith.constant 0 : index
    %c0_2 = arith.constant 0 : index
    %c0_3 = arith.constant 0 : index
    %1 = vector.load %arg10[%c0_1, %c0_2, %c0_3] : memref<9x64x192xbf16, #tpu.memory_space<vmem>>, vector<1x64x192xbf16>
    %2 = vector.shape_cast %1 : vector<1x64x192xbf16> to vector<64x192xbf16>
    %cst = arith.constant dense<0.000000e+00> : vector<80x192xf32>
    %3 = tpu.matmul %0, %2, %cst {dimension_numbers = #tpu.dot_dimension_numbers<[1], [0], [0], [1], [0, 0, 1, 1], [], []>} : vector<80x64xbf16>, vector<64x192xbf16>, vector<80x192xf32> -> vector<80x192xf32>
    %c0_4 = arith.constant 0 : index
    %c0_5 = arith.constant 0 : index
    %4 = vector.load %arg2[%c0_4, %c0_5] : memref<80x64xbf16, #tpu.memory_space<vmem>>, vector<80x64xbf16>
    %c1 = arith.constant 1 : index
    %c0_6 = arith.constant 0 : index
    %c0_7 = arith.constant 0 : index
    %5 = vector.load %arg10[%c1, %c0_6, %c0_7] : memref<9x64x192xbf16, #tpu.memory_space<vmem>>, vector<1x64x192xbf16>
    %6 = vector.shape_cast %5 : vector<1x64x192xbf16> to vector<64x192xbf16>
    %cst_8 = arith.constant dense<0.000000e+00> : vector<80x192xf32>
    %7 = tpu.matmul %4, %6, %cst_8 {dimension_numbers = #tpu.dot_dimension_numbers<[1], [0], [0], [1], [0, 0, 1, 1], [], []>} : vector<80x64xbf16>, vector<64x192xbf16>, vector<80x192xf32> -> vector<80x192xf32>
    %8 = arith.addf %3, %7 : vector<80x192xf32>
    %c0_9 = arith.constant 0 : index
    %c0_10 = arith.constant 0 : index
    %9 = vector.load %arg3[%c0_9, %c0_10] : memref<80x64xbf16, #tpu.memory_space<vmem>>, vector<80x64xbf16>
    %c2 = arith.constant 2 : index
    %c0_11 = arith.constant 0 : index
    %c0_12 = arith.constant 0 : index
    %10 = vector.load %arg10[%c2, %c0_11, %c0_12] : memref<9x64x192xbf16, #tpu.memory_space<vmem>>, vector<1x64x192xbf16>
    %11 = vector.shape_cast %10 : vector<1x64x192xbf16> to vector<64x192xbf16>
    %cst_13 = arith.constant dense<0.000000e+00> : vector<80x192xf32>
    %12 = tpu.matmul %9, %11, %cst_13 {dimension_numbers = #tpu.dot_dimension_numbers<[1], [0], [0], [1], [0, 0, 1, 1], [], []>} : vector<80x64xbf16>, vector<64x192xbf16>, vector<80x192xf32> -> vector<80x192xf32>
    %13 = arith.addf %8, %12 : vector<80x192xf32>
    %c0_14 = arith.constant 0 : index
    %c0_15 = arith.constant 0 : index
    %14 = vector.load %arg4[%c0_14, %c0_15] : memref<80x64xbf16, #tpu.memory_space<vmem>>, vector<80x64xbf16>
    %c3 = arith.constant 3 : index
    %c0_16 = arith.constant 0 : index
    %c0_17 = arith.constant 0 : index
    %15 = vector.load %arg10[%c3, %c0_16, %c0_17] : memref<9x64x192xbf16, #tpu.memory_space<vmem>>, vector<1x64x192xbf16>
    %16 = vector.shape_cast %15 : vector<1x64x192xbf16> to vector<64x192xbf16>
    %cst_18 = arith.constant dense<0.000000e+00> : vector<80x192xf32>
    %17 = tpu.matmul %14, %16, %cst_18 {dimension_numbers = #tpu.dot_dimension_numbers<[1], [0], [0], [1], [0, 0, 1, 1], [], []>} : vector<80x64xbf16>, vector<64x192xbf16>, vector<80x192xf32> -> vector<80x192xf32>
    %18 = arith.addf %13, %17 : vector<80x192xf32>
    %c0_19 = arith.constant 0 : index
    %c0_20 = arith.constant 0 : index
    %19 = vector.load %arg5[%c0_19, %c0_20] : memref<80x64xbf16, #tpu.memory_space<vmem>>, vector<80x64xbf16>
    %c4 = arith.constant 4 : index
    %c0_21 = arith.constant 0 : index
    %c0_22 = arith.constant 0 : index
    %20 = vector.load %arg10[%c4, %c0_21, %c0_22] : memref<9x64x192xbf16, #tpu.memory_space<vmem>>, vector<1x64x192xbf16>
    %21 = vector.shape_cast %20 : vector<1x64x192xbf16> to vector<64x192xbf16>
    %cst_23 = arith.constant dense<0.000000e+00> : vector<80x192xf32>
    %22 = tpu.matmul %19, %21, %cst_23 {dimension_numbers = #tpu.dot_dimension_numbers<[1], [0], [0], [1], [0, 0, 1, 1], [], []>} : vector<80x64xbf16>, vector<64x192xbf16>, vector<80x192xf32> -> vector<80x192xf32>
    %23 = arith.addf %18, %22 : vector<80x192xf32>
    %c0_24 = arith.constant 0 : index
    %c0_25 = arith.constant 0 : index
    %24 = vector.load %arg6[%c0_24, %c0_25] : memref<80x64xbf16, #tpu.memory_space<vmem>>, vector<80x64xbf16>
    %c5 = arith.constant 5 : index
    %c0_26 = arith.constant 0 : index
    %c0_27 = arith.constant 0 : index
    %25 = vector.load %arg10[%c5, %c0_26, %c0_27] : memref<9x64x192xbf16, #tpu.memory_space<vmem>>, vector<1x64x192xbf16>
    %26 = vector.shape_cast %25 : vector<1x64x192xbf16> to vector<64x192xbf16>
    %cst_28 = arith.constant dense<0.000000e+00> : vector<80x192xf32>
    %27 = tpu.matmul %24, %26, %cst_28 {dimension_numbers = #tpu.dot_dimension_numbers<[1], [0], [0], [1], [0, 0, 1, 1], [], []>} : vector<80x64xbf16>, vector<64x192xbf16>, vector<80x192xf32> -> vector<80x192xf32>
    %28 = arith.addf %23, %27 : vector<80x192xf32>
    %c0_29 = arith.constant 0 : index
    %c0_30 = arith.constant 0 : index
    %29 = vector.load %arg7[%c0_29, %c0_30] : memref<80x64xbf16, #tpu.memory_space<vmem>>, vector<80x64xbf16>
    %c6 = arith.constant 6 : index
    %c0_31 = arith.constant 0 : index
    %c0_32 = arith.constant 0 : index
    %30 = vector.load %arg10[%c6, %c0_31, %c0_32] : memref<9x64x192xbf16, #tpu.memory_space<vmem>>, vector<1x64x192xbf16>
    %31 = vector.shape_cast %30 : vector<1x64x192xbf16> to vector<64x192xbf16>
    %cst_33 = arith.constant dense<0.000000e+00> : vector<80x192xf32>
    %32 = tpu.matmul %29, %31, %cst_33 {dimension_numbers = #tpu.dot_dimension_numbers<[1], [0], [0], [1], [0, 0, 1, 1], [], []>} : vector<80x64xbf16>, vector<64x192xbf16>, vector<80x192xf32> -> vector<80x192xf32>
    %33 = arith.addf %28, %32 : vector<80x192xf32>
    %c0_34 = arith.constant 0 : index
    %c0_35 = arith.constant 0 : index
    %34 = vector.load %arg8[%c0_34, %c0_35] : memref<80x64xbf16, #tpu.memory_space<vmem>>, vector<80x64xbf16>
    %c7 = arith.constant 7 : index
    %c0_36 = arith.constant 0 : index
    %c0_37 = arith.constant 0 : index
    %35 = vector.load %arg10[%c7, %c0_36, %c0_37] : memref<9x64x192xbf16, #tpu.memory_space<vmem>>, vector<1x64x192xbf16>
    %36 = vector.shape_cast %35 : vector<1x64x192xbf16> to vector<64x192xbf16>
    %cst_38 = arith.constant dense<0.000000e+00> : vector<80x192xf32>
    %37 = tpu.matmul %34, %36, %cst_38 {dimension_numbers = #tpu.dot_dimension_numbers<[1], [0], [0], [1], [0, 0, 1, 1], [], []>} : vector<80x64xbf16>, vector<64x192xbf16>, vector<80x192xf32> -> vector<80x192xf32>
    %38 = arith.addf %33, %37 : vector<80x192xf32>
    %c0_39 = arith.constant 0 : index
    %c0_40 = arith.constant 0 : index
    %39 = vector.load %arg9[%c0_39, %c0_40] : memref<80x64xbf16, #tpu.memory_space<vmem>>, vector<80x64xbf16>
    %c8 = arith.constant 8 : index
    %c0_41 = arith.constant 0 : index
    %c0_42 = arith.constant 0 : index
    %40 = vector.load %arg10[%c8, %c0_41, %c0_42] : memref<9x64x192xbf16, #tpu.memory_space<vmem>>, vector<1x64x192xbf16>
    %41 = vector.shape_cast %40 : vector<1x64x192xbf16> to vector<64x192xbf16>
    %cst_43 = arith.constant dense<0.000000e+00> : vector<80x192xf32>
    %42 = tpu.matmul %39, %41, %cst_43 {dimension_numbers = #tpu.dot_dimension_numbers<[1], [0], [0], [1], [0, 0, 1, 1], [], []>} : vector<80x64xbf16>, vector<64x192xbf16>, vector<80x192xf32> -> vector<80x192xf32>
    %43 = arith.addf %38, %42 : vector<80x192xf32>
    %c0_44 = arith.constant 0 : index
    %c0_45 = arith.constant 0 : index
    %44 = vector.load %arg11[%c0_44, %c0_45] : memref<1x192xf32, #tpu.memory_space<vmem>>, vector<1x192xf32>
    %45 = vector.broadcast %44 : vector<1x192xf32> to vector<80x192xf32>
    %46 = arith.addf %43, %45 : vector<80x192xf32>
    %cst_46 = arith.constant 0.000000e+00 : f32
    %47 = vector.broadcast %cst_46 : f32 to vector<80x192xf32>
    %48 = arith.maximumf %46, %47 : vector<80x192xf32>
    %49 = arith.truncf %48 : vector<80x192xf32> to vector<80x192xbf16>
    %c0_47 = arith.constant 0 : index
    %c0_48 = arith.constant 0 : index
    %50 = vector.load %arg1[%c0_47, %c0_48] : memref<80x64xbf16, #tpu.memory_space<vmem>>, vector<80x64xbf16>
    %c0_49 = arith.constant 0 : index
    %c0_50 = arith.constant 0 : index
    %51 = vector.load %arg2[%c0_49, %c0_50] : memref<80x64xbf16, #tpu.memory_space<vmem>>, vector<80x64xbf16>
    %52 = arith.maximumf %50, %51 : vector<80x64xbf16>
    %c0_51 = arith.constant 0 : index
    %c0_52 = arith.constant 0 : index
    %53 = vector.load %arg3[%c0_51, %c0_52] : memref<80x64xbf16, #tpu.memory_space<vmem>>, vector<80x64xbf16>
    %54 = arith.maximumf %52, %53 : vector<80x64xbf16>
    %c0_53 = arith.constant 0 : index
    %c0_54 = arith.constant 0 : index
    %55 = vector.load %arg4[%c0_53, %c0_54] : memref<80x64xbf16, #tpu.memory_space<vmem>>, vector<80x64xbf16>
    %56 = arith.maximumf %54, %55 : vector<80x64xbf16>
    %c0_55 = arith.constant 0 : index
    %c0_56 = arith.constant 0 : index
    %57 = vector.load %arg5[%c0_55, %c0_56] : memref<80x64xbf16, #tpu.memory_space<vmem>>, vector<80x64xbf16>
    %58 = arith.maximumf %56, %57 : vector<80x64xbf16>
    %c0_57 = arith.constant 0 : index
    %c0_58 = arith.constant 0 : index
    %59 = vector.load %arg6[%c0_57, %c0_58] : memref<80x64xbf16, #tpu.memory_space<vmem>>, vector<80x64xbf16>
    %60 = arith.maximumf %58, %59 : vector<80x64xbf16>
    %c0_59 = arith.constant 0 : index
    %c0_60 = arith.constant 0 : index
    %61 = vector.load %arg7[%c0_59, %c0_60] : memref<80x64xbf16, #tpu.memory_space<vmem>>, vector<80x64xbf16>
    %62 = arith.maximumf %60, %61 : vector<80x64xbf16>
    %c0_61 = arith.constant 0 : index
    %c0_62 = arith.constant 0 : index
    %63 = vector.load %arg8[%c0_61, %c0_62] : memref<80x64xbf16, #tpu.memory_space<vmem>>, vector<80x64xbf16>
    %64 = arith.maximumf %62, %63 : vector<80x64xbf16>
    %c0_63 = arith.constant 0 : index
    %c0_64 = arith.constant 0 : index
    %65 = vector.load %arg9[%c0_63, %c0_64] : memref<80x64xbf16, #tpu.memory_space<vmem>>, vector<80x64xbf16>
    %66 = arith.maximumf %64, %65 : vector<80x64xbf16>
    %67 = tpu.concatenate %66, %49 in 1 : vector<80x64xbf16>, vector<80x192xbf16> -> vector<80x256xbf16>
    %c0_65 = arith.constant 0 : index
    %c0_66 = arith.constant 0 : index
    %68 = vector.load %arg12[%c0_65, %c0_66] : memref<80x256xbf16, #tpu.memory_space<vmem>>, vector<80x256xbf16>
    tpu.vector_store %arg12[%c0_65, %c0_66], %67 {strides = array<i32>} : memref<80x256xbf16, #tpu.memory_space<vmem>>, vector<80x256xbf16>,
    return
  }
  func.func @transform_0(%arg0: i32) -> (i32, i32) {
    %c0_i32 = arith.constant 0 : i32
    %c0_i32_0 = arith.constant 0 : i32
    return %arg0, %c0_i32 : i32, i32
  }
  func.func @transform_1(%arg0: i32) -> (i32, i32) {
    %c0_i32 = arith.constant 0 : i32
    %c0_i32_0 = arith.constant 0 : i32
    return %arg0, %c0_i32 : i32, i32
  }
  func.func @transform_2(%arg0: i32) -> (i32, i32) {
    %c0_i32 = arith.constant 0 : i32
    %c0_i32_0 = arith.constant 0 : i32
    return %arg0, %c0_i32 : i32, i32
  }
  func.func @transform_3(%arg0: i32) -> (i32, i32) {
    %c0_i32 = arith.constant 0 : i32
    %c0_i32_0 = arith.constant 0 : i32
    return %arg0, %c0_i32 : i32, i32
  }
  func.func @transform_4(%arg0: i32) -> (i32, i32) {
    %c0_i32 = arith.constant 0 : i32
    %c0_i32_0 = arith.constant 0 : i32
    return %arg0, %c0_i32 : i32, i32
  }
  func.func @transform_5(%arg0: i32) -> (i32, i32) {
    %c0_i32 = arith.constant 0 : i32
    %c0_i32_0 = arith.constant 0 : i32
    return %arg0, %c0_i32 : i32, i32
  }
  func.func @transform_6(%arg0: i32) -> (i32, i32) {
    %c0_i32 = arith.constant 0 : i32
    %c0_i32_0 = arith.constant 0 : i32
    return %arg0, %c0_i32 : i32, i32
  }
  func.func @transform_7(%arg0: i32) -> (i32, i32) {
    %c0_i32 = arith.constant 0 : i32
    %c0_i32_0 = arith.constant 0 : i32
    return %arg0, %c0_i32 : i32, i32
  }
  func.func @transform_8(%arg0: i32) -> (i32, i32) {
    %c0_i32 = arith.constant 0 : i32
    %c0_i32_0 = arith.constant 0 : i32
    return %arg0, %c0_i32 : i32, i32
  }
  func.func @transform_9(%arg0: i32) -> (i32, i32, i32) {
    %c0_i32 = arith.constant 0 : i32
    %c0_i32_0 = arith.constant 0 : i32
    %c0_i32_1 = arith.constant 0 : i32
    %c0_i32_2 = arith.constant 0 : i32
    return %c0_i32, %c0_i32_0, %c0_i32_1 : i32, i32, i32
  }
  func.func @transform_10(%arg0: i32) -> (i32, i32) {
    %c0_i32 = arith.constant 0 : i32
    %c0_i32_0 = arith.constant 0 : i32
    %c0_i32_1 = arith.constant 0 : i32
    return %c0_i32, %c0_i32_0 : i32, i32
  }
  func.func @transform_11(%arg0: i32) -> (i32, i32) {
    %c0_i32 = arith.constant 0 : i32
    %c0_i32_0 = arith.constant 0 : i32
    return %arg0, %c0_i32 : i32, i32
  }
}

module attributes {stable_mosaic.version = 11 : i64} {
  func.func @kernel(%arg0: i32, %arg1: memref<80x160xbf16, #tpu.memory_space<vmem>>, %arg2: memref<1x160x128xbf16, #tpu.memory_space<vmem>>, %arg3: memref<1x128xf32, #tpu.memory_space<vmem>>, %arg4: memref<80x128xbf16, #tpu.memory_space<vmem>>) attributes {dimension_semantics = [#tpu.dimension_semantics<parallel>], iteration_bounds = array<i64: 1>, scalar_prefetch = 0 : i64, scratch_operands = 0 : i64, tpu.core_type = #tpu.core_type<tc>, window_params = [{transform_indices = @transform_0, window_bounds = array<i64: 80, 160>}, {pipeline_mode = #tpu.pipeline_mode<synchronous>, transform_indices = @transform_1, window_bounds = array<i64: 1, 160, 128>}, {pipeline_mode = #tpu.pipeline_mode<synchronous>, transform_indices = @transform_2, window_bounds = array<i64: 1, 128>}, {transform_indices = @transform_3, window_bounds = array<i64: 80, 128>}]} {
    %c0 = arith.constant 0 : index
    %c0_0 = arith.constant 0 : index
    %0 = vector.load %arg1[%c0, %c0_0] : memref<80x160xbf16, #tpu.memory_space<vmem>>, vector<80x160xbf16>
    %c0_1 = arith.constant 0 : index
    %c0_2 = arith.constant 0 : index
    %c0_3 = arith.constant 0 : index
    %1 = vector.load %arg2[%c0_1, %c0_2, %c0_3] : memref<1x160x128xbf16, #tpu.memory_space<vmem>>, vector<1x160x128xbf16>
    %2 = vector.shape_cast %1 : vector<1x160x128xbf16> to vector<160x128xbf16>
    %cst = arith.constant dense<0.000000e+00> : vector<80x128xf32>
    %3 = tpu.matmul %0, %2, %cst {dimension_numbers = #tpu.dot_dimension_numbers<[1], [0], [0], [1], [0, 0, 1, 1], [], []>} : vector<80x160xbf16>, vector<160x128xbf16>, vector<80x128xf32> -> vector<80x128xf32>
    %c0_4 = arith.constant 0 : index
    %c0_5 = arith.constant 0 : index
    %4 = vector.load %arg3[%c0_4, %c0_5] : memref<1x128xf32, #tpu.memory_space<vmem>>, vector<1x128xf32>
    %5 = vector.broadcast %4 : vector<1x128xf32> to vector<80x128xf32>
    %6 = arith.addf %3, %5 : vector<80x128xf32>
    %cst_6 = arith.constant 0.000000e+00 : f32
    %7 = vector.broadcast %cst_6 : f32 to vector<80x128xf32>
    %8 = arith.maximumf %6, %7 : vector<80x128xf32>
    %9 = arith.truncf %8 : vector<80x128xf32> to vector<80x128xbf16>
    %c0_7 = arith.constant 0 : index
    %c0_8 = arith.constant 0 : index
    %10 = vector.load %arg4[%c0_7, %c0_8] : memref<80x128xbf16, #tpu.memory_space<vmem>>, vector<80x128xbf16>
    tpu.vector_store %arg4[%c0_7, %c0_8], %9 {strides = array<i32>} : memref<80x128xbf16, #tpu.memory_space<vmem>>, vector<80x128xbf16>,
    return
  }
  func.func @transform_0(%arg0: i32) -> (i32, i32) {
    %c0_i32 = arith.constant 0 : i32
    %c0_i32_0 = arith.constant 0 : i32
    return %arg0, %c0_i32 : i32, i32
  }
  func.func @transform_1(%arg0: i32) -> (i32, i32, i32) {
    %c0_i32 = arith.constant 0 : i32
    %c0_i32_0 = arith.constant 0 : i32
    %c0_i32_1 = arith.constant 0 : i32
    %c0_i32_2 = arith.constant 0 : i32
    return %c0_i32, %c0_i32_0, %c0_i32_1 : i32, i32, i32
  }
  func.func @transform_2(%arg0: i32) -> (i32, i32) {
    %c0_i32 = arith.constant 0 : i32
    %c0_i32_0 = arith.constant 0 : i32
    %c0_i32_1 = arith.constant 0 : i32
    return %c0_i32, %c0_i32_0 : i32, i32
  }
  func.func @transform_3(%arg0: i32) -> (i32, i32) {
    %c0_i32 = arith.constant 0 : i32
    %c0_i32_0 = arith.constant 0 : i32
    return %arg0, %c0_i32 : i32, i32
  }
}

module attributes {stable_mosaic.version = 11 : i64} {
  func.func @kernel(%arg0: i32, %arg1: memref<80x64xbf16, #tpu.memory_space<vmem>>, %arg2: memref<80x64xbf16, #tpu.memory_space<vmem>>, %arg3: memref<80x64xbf16, #tpu.memory_space<vmem>>, %arg4: memref<80x64xbf16, #tpu.memory_space<vmem>>, %arg5: memref<80x64xbf16, #tpu.memory_space<vmem>>, %arg6: memref<80x64xbf16, #tpu.memory_space<vmem>>, %arg7: memref<80x64xbf16, #tpu.memory_space<vmem>>, %arg8: memref<7x64x128xbf16, #tpu.memory_space<vmem>>, %arg9: memref<1x128xf32, #tpu.memory_space<vmem>>, %arg10: memref<80x128xbf16, #tpu.memory_space<vmem>>) attributes {dimension_semantics = [#tpu.dimension_semantics<parallel>], iteration_bounds = array<i64: 1>, scalar_prefetch = 0 : i64, scratch_operands = 0 : i64, tpu.core_type = #tpu.core_type<tc>, window_params = [{transform_indices = @transform_0, window_bounds = array<i64: 80, 64>}, {transform_indices = @transform_1, window_bounds = array<i64: 80, 64>}, {transform_indices = @transform_2, window_bounds = array<i64: 80, 64>}, {transform_indices = @transform_3, window_bounds = array<i64: 80, 64>}, {transform_indices = @transform_4, window_bounds = array<i64: 80, 64>}, {transform_indices = @transform_5, window_bounds = array<i64: 80, 64>}, {transform_indices = @transform_6, window_bounds = array<i64: 80, 64>}, {pipeline_mode = #tpu.pipeline_mode<synchronous>, transform_indices = @transform_7, window_bounds = array<i64: 7, 64, 128>}, {pipeline_mode = #tpu.pipeline_mode<synchronous>, transform_indices = @transform_8, window_bounds = array<i64: 1, 128>}, {transform_indices = @transform_9, window_bounds = array<i64: 80, 128>}]} {
    %c0 = arith.constant 0 : index
    %c0_0 = arith.constant 0 : index
    %0 = vector.load %arg1[%c0, %c0_0] : memref<80x64xbf16, #tpu.memory_space<vmem>>, vector<80x64xbf16>
    %c0_1 = arith.constant 0 : index
    %c0_2 = arith.constant 0 : index
    %c0_3 = arith.constant 0 : index
    %1 = vector.load %arg8[%c0_1, %c0_2, %c0_3] : memref<7x64x128xbf16, #tpu.memory_space<vmem>>, vector<1x64x128xbf16>
    %2 = vector.shape_cast %1 : vector<1x64x128xbf16> to vector<64x128xbf16>
    %cst = arith.constant dense<0.000000e+00> : vector<80x128xf32>
    %3 = tpu.matmul %0, %2, %cst {dimension_numbers = #tpu.dot_dimension_numbers<[1], [0], [0], [1], [0, 0, 1, 1], [], []>} : vector<80x64xbf16>, vector<64x128xbf16>, vector<80x128xf32> -> vector<80x128xf32>
    %c0_4 = arith.constant 0 : index
    %c0_5 = arith.constant 0 : index
    %4 = vector.load %arg2[%c0_4, %c0_5] : memref<80x64xbf16, #tpu.memory_space<vmem>>, vector<80x64xbf16>
    %c1 = arith.constant 1 : index
    %c0_6 = arith.constant 0 : index
    %c0_7 = arith.constant 0 : index
    %5 = vector.load %arg8[%c1, %c0_6, %c0_7] : memref<7x64x128xbf16, #tpu.memory_space<vmem>>, vector<1x64x128xbf16>
    %6 = vector.shape_cast %5 : vector<1x64x128xbf16> to vector<64x128xbf16>
    %cst_8 = arith.constant dense<0.000000e+00> : vector<80x128xf32>
    %7 = tpu.matmul %4, %6, %cst_8 {dimension_numbers = #tpu.dot_dimension_numbers<[1], [0], [0], [1], [0, 0, 1, 1], [], []>} : vector<80x64xbf16>, vector<64x128xbf16>, vector<80x128xf32> -> vector<80x128xf32>
    %8 = arith.addf %3, %7 : vector<80x128xf32>
    %c0_9 = arith.constant 0 : index
    %c0_10 = arith.constant 0 : index
    %9 = vector.load %arg3[%c0_9, %c0_10] : memref<80x64xbf16, #tpu.memory_space<vmem>>, vector<80x64xbf16>
    %c2 = arith.constant 2 : index
    %c0_11 = arith.constant 0 : index
    %c0_12 = arith.constant 0 : index
    %10 = vector.load %arg8[%c2, %c0_11, %c0_12] : memref<7x64x128xbf16, #tpu.memory_space<vmem>>, vector<1x64x128xbf16>
    %11 = vector.shape_cast %10 : vector<1x64x128xbf16> to vector<64x128xbf16>
    %cst_13 = arith.constant dense<0.000000e+00> : vector<80x128xf32>
    %12 = tpu.matmul %9, %11, %cst_13 {dimension_numbers = #tpu.dot_dimension_numbers<[1], [0], [0], [1], [0, 0, 1, 1], [], []>} : vector<80x64xbf16>, vector<64x128xbf16>, vector<80x128xf32> -> vector<80x128xf32>
    %13 = arith.addf %8, %12 : vector<80x128xf32>
    %c0_14 = arith.constant 0 : index
    %c0_15 = arith.constant 0 : index
    %14 = vector.load %arg4[%c0_14, %c0_15] : memref<80x64xbf16, #tpu.memory_space<vmem>>, vector<80x64xbf16>
    %c3 = arith.constant 3 : index
    %c0_16 = arith.constant 0 : index
    %c0_17 = arith.constant 0 : index
    %15 = vector.load %arg8[%c3, %c0_16, %c0_17] : memref<7x64x128xbf16, #tpu.memory_space<vmem>>, vector<1x64x128xbf16>
    %16 = vector.shape_cast %15 : vector<1x64x128xbf16> to vector<64x128xbf16>
    %cst_18 = arith.constant dense<0.000000e+00> : vector<80x128xf32>
    %17 = tpu.matmul %14, %16, %cst_18 {dimension_numbers = #tpu.dot_dimension_numbers<[1], [0], [0], [1], [0, 0, 1, 1], [], []>} : vector<80x64xbf16>, vector<64x128xbf16>, vector<80x128xf32> -> vector<80x128xf32>
    %18 = arith.addf %13, %17 : vector<80x128xf32>
    %c0_19 = arith.constant 0 : index
    %c0_20 = arith.constant 0 : index
    %19 = vector.load %arg5[%c0_19, %c0_20] : memref<80x64xbf16, #tpu.memory_space<vmem>>, vector<80x64xbf16>
    %c4 = arith.constant 4 : index
    %c0_21 = arith.constant 0 : index
    %c0_22 = arith.constant 0 : index
    %20 = vector.load %arg8[%c4, %c0_21, %c0_22] : memref<7x64x128xbf16, #tpu.memory_space<vmem>>, vector<1x64x128xbf16>
    %21 = vector.shape_cast %20 : vector<1x64x128xbf16> to vector<64x128xbf16>
    %cst_23 = arith.constant dense<0.000000e+00> : vector<80x128xf32>
    %22 = tpu.matmul %19, %21, %cst_23 {dimension_numbers = #tpu.dot_dimension_numbers<[1], [0], [0], [1], [0, 0, 1, 1], [], []>} : vector<80x64xbf16>, vector<64x128xbf16>, vector<80x128xf32> -> vector<80x128xf32>
    %23 = arith.addf %18, %22 : vector<80x128xf32>
    %c0_24 = arith.constant 0 : index
    %c0_25 = arith.constant 0 : index
    %24 = vector.load %arg6[%c0_24, %c0_25] : memref<80x64xbf16, #tpu.memory_space<vmem>>, vector<80x64xbf16>
    %c5 = arith.constant 5 : index
    %c0_26 = arith.constant 0 : index
    %c0_27 = arith.constant 0 : index
    %25 = vector.load %arg8[%c5, %c0_26, %c0_27] : memref<7x64x128xbf16, #tpu.memory_space<vmem>>, vector<1x64x128xbf16>
    %26 = vector.shape_cast %25 : vector<1x64x128xbf16> to vector<64x128xbf16>
    %cst_28 = arith.constant dense<0.000000e+00> : vector<80x128xf32>
    %27 = tpu.matmul %24, %26, %cst_28 {dimension_numbers = #tpu.dot_dimension_numbers<[1], [0], [0], [1], [0, 0, 1, 1], [], []>} : vector<80x64xbf16>, vector<64x128xbf16>, vector<80x128xf32> -> vector<80x128xf32>
    %28 = arith.addf %23, %27 : vector<80x128xf32>
    %c0_29 = arith.constant 0 : index
    %c0_30 = arith.constant 0 : index
    %29 = vector.load %arg7[%c0_29, %c0_30] : memref<80x64xbf16, #tpu.memory_space<vmem>>, vector<80x64xbf16>
    %c6 = arith.constant 6 : index
    %c0_31 = arith.constant 0 : index
    %c0_32 = arith.constant 0 : index
    %30 = vector.load %arg8[%c6, %c0_31, %c0_32] : memref<7x64x128xbf16, #tpu.memory_space<vmem>>, vector<1x64x128xbf16>
    %31 = vector.shape_cast %30 : vector<1x64x128xbf16> to vector<64x128xbf16>
    %cst_33 = arith.constant dense<0.000000e+00> : vector<80x128xf32>
    %32 = tpu.matmul %29, %31, %cst_33 {dimension_numbers = #tpu.dot_dimension_numbers<[1], [0], [0], [1], [0, 0, 1, 1], [], []>} : vector<80x64xbf16>, vector<64x128xbf16>, vector<80x128xf32> -> vector<80x128xf32>
    %33 = arith.addf %28, %32 : vector<80x128xf32>
    %c0_34 = arith.constant 0 : index
    %c0_35 = arith.constant 0 : index
    %34 = vector.load %arg9[%c0_34, %c0_35] : memref<1x128xf32, #tpu.memory_space<vmem>>, vector<1x128xf32>
    %35 = vector.broadcast %34 : vector<1x128xf32> to vector<80x128xf32>
    %36 = arith.addf %33, %35 : vector<80x128xf32>
    %cst_36 = arith.constant 0.000000e+00 : f32
    %37 = vector.broadcast %cst_36 : f32 to vector<80x128xf32>
    %38 = arith.maximumf %36, %37 : vector<80x128xf32>
    %39 = arith.truncf %38 : vector<80x128xf32> to vector<80x128xbf16>
    %c0_37 = arith.constant 0 : index
    %c0_38 = arith.constant 0 : index
    %40 = vector.load %arg10[%c0_37, %c0_38] : memref<80x128xbf16, #tpu.memory_space<vmem>>, vector<80x128xbf16>
    tpu.vector_store %arg10[%c0_37, %c0_38], %39 {strides = array<i32>} : memref<80x128xbf16, #tpu.memory_space<vmem>>, vector<80x128xbf16>,
    return
  }
  func.func @transform_0(%arg0: i32) -> (i32, i32) {
    %c0_i32 = arith.constant 0 : i32
    %c0_i32_0 = arith.constant 0 : i32
    return %arg0, %c0_i32 : i32, i32
  }
  func.func @transform_1(%arg0: i32) -> (i32, i32) {
    %c0_i32 = arith.constant 0 : i32
    %c0_i32_0 = arith.constant 0 : i32
    return %arg0, %c0_i32 : i32, i32
  }
  func.func @transform_2(%arg0: i32) -> (i32, i32) {
    %c0_i32 = arith.constant 0 : i32
    %c0_i32_0 = arith.constant 0 : i32
    return %arg0, %c0_i32 : i32, i32
  }
  func.func @transform_3(%arg0: i32) -> (i32, i32) {
    %c0_i32 = arith.constant 0 : i32
    %c0_i32_0 = arith.constant 0 : i32
    return %arg0, %c0_i32 : i32, i32
  }
  func.func @transform_4(%arg0: i32) -> (i32, i32) {
    %c0_i32 = arith.constant 0 : i32
    %c0_i32_0 = arith.constant 0 : i32
    return %arg0, %c0_i32 : i32, i32
  }
  func.func @transform_5(%arg0: i32) -> (i32, i32) {
    %c0_i32 = arith.constant 0 : i32
    %c0_i32_0 = arith.constant 0 : i32
    return %arg0, %c0_i32 : i32, i32
  }
  func.func @transform_6(%arg0: i32) -> (i32, i32) {
    %c0_i32 = arith.constant 0 : i32
    %c0_i32_0 = arith.constant 0 : i32
    return %arg0, %c0_i32 : i32, i32
  }
  func.func @transform_7(%arg0: i32) -> (i32, i32, i32) {
    %c0_i32 = arith.constant 0 : i32
    %c0_i32_0 = arith.constant 0 : i32
    %c0_i32_1 = arith.constant 0 : i32
    %c0_i32_2 = arith.constant 0 : i32
    return %c0_i32, %c0_i32_0, %c0_i32_1 : i32, i32, i32
  }
  func.func @transform_8(%arg0: i32) -> (i32, i32) {
    %c0_i32 = arith.constant 0 : i32
    %c0_i32_0 = arith.constant 0 : i32
    %c0_i32_1 = arith.constant 0 : i32
    return %c0_i32, %c0_i32_0 : i32, i32
  }
  func.func @transform_9(%arg0: i32) -> (i32, i32) {
    %c0_i32 = arith.constant 0 : i32
    %c0_i32_0 = arith.constant 0 : i32
    return %arg0, %c0_i32 : i32, i32
  }
}

module attributes {stable_mosaic.version = 11 : i64} {
  func.func @kernel(%arg0: i32, %arg1: memref<32x64xbf16, #tpu.memory_space<vmem>>, %arg2: memref<32x64xbf16, #tpu.memory_space<vmem>>, %arg3: memref<32x64xbf16, #tpu.memory_space<vmem>>, %arg4: memref<32x64xbf16, #tpu.memory_space<vmem>>, %arg5: memref<32x64xbf16, #tpu.memory_space<vmem>>, %arg6: memref<32x64xbf16, #tpu.memory_space<vmem>>, %arg7: memref<32x64xbf16, #tpu.memory_space<vmem>>, %arg8: memref<32x64xbf16, #tpu.memory_space<vmem>>, %arg9: memref<32x64xbf16, #tpu.memory_space<vmem>>, %arg10: memref<32x64xbf16, #tpu.memory_space<vmem>>, %arg11: memref<32x64xbf16, #tpu.memory_space<vmem>>, %arg12: memref<32x64xbf16, #tpu.memory_space<vmem>>, %arg13: memref<32x64xbf16, #tpu.memory_space<vmem>>, %arg14: memref<32x64xbf16, #tpu.memory_space<vmem>>, %arg15: memref<32x64xbf16, #tpu.memory_space<vmem>>, %arg16: memref<32x64xbf16, #tpu.memory_space<vmem>>, %arg17: memref<32x64xbf16, #tpu.memory_space<vmem>>, %arg18: memref<32x64xbf16, #tpu.memory_space<vmem>>, %arg19: memref<18x64x256xbf16, #tpu.memory_space<vmem>>, %arg20: memref<1x256xf32, #tpu.memory_space<vmem>>, %arg21: memref<32x256xbf16, #tpu.memory_space<vmem>>) attributes {dimension_semantics = [#tpu.dimension_semantics<parallel>], iteration_bounds = array<i64: 1>, scalar_prefetch = 0 : i64, scratch_operands = 0 : i64, tpu.core_type = #tpu.core_type<tc>, window_params = [{transform_indices = @transform_0, window_bounds = array<i64: 32, 64>}, {transform_indices = @transform_1, window_bounds = array<i64: 32, 64>}, {transform_indices = @transform_2, window_bounds = array<i64: 32, 64>}, {transform_indices = @transform_3, window_bounds = array<i64: 32, 64>}, {transform_indices = @transform_4, window_bounds = array<i64: 32, 64>}, {transform_indices = @transform_5, window_bounds = array<i64: 32, 64>}, {transform_indices = @transform_6, window_bounds = array<i64: 32, 64>}, {transform_indices = @transform_7, window_bounds = array<i64: 32, 64>}, {transform_indices = @transform_8, window_bounds = array<i64: 32, 64>}, {transform_indices = @transform_9, window_bounds = array<i64: 32, 64>}, {transform_indices = @transform_10, window_bounds = array<i64: 32, 64>}, {transform_indices = @transform_11, window_bounds = array<i64: 32, 64>}, {transform_indices = @transform_12, window_bounds = array<i64: 32, 64>}, {transform_indices = @transform_13, window_bounds = array<i64: 32, 64>}, {transform_indices = @transform_14, window_bounds = array<i64: 32, 64>}, {transform_indices = @transform_15, window_bounds = array<i64: 32, 64>}, {transform_indices = @transform_16, window_bounds = array<i64: 32, 64>}, {transform_indices = @transform_17, window_bounds = array<i64: 32, 64>}, {pipeline_mode = #tpu.pipeline_mode<synchronous>, transform_indices = @transform_18, window_bounds = array<i64: 18, 64, 256>}, {pipeline_mode = #tpu.pipeline_mode<synchronous>, transform_indices = @transform_19, window_bounds = array<i64: 1, 256>}, {transform_indices = @transform_20, window_bounds = array<i64: 32, 256>}]} {
    %c0 = arith.constant 0 : index
    %c0_0 = arith.constant 0 : index
    %0 = vector.load %arg1[%c0, %c0_0] : memref<32x64xbf16, #tpu.memory_space<vmem>>, vector<32x64xbf16>
    %c0_1 = arith.constant 0 : index
    %c0_2 = arith.constant 0 : index
    %c0_3 = arith.constant 0 : index
    %1 = vector.load %arg19[%c0_1, %c0_2, %c0_3] : memref<18x64x256xbf16, #tpu.memory_space<vmem>>, vector<1x64x256xbf16>
    %2 = vector.shape_cast %1 : vector<1x64x256xbf16> to vector<64x256xbf16>
    %cst = arith.constant dense<0.000000e+00> : vector<32x256xf32>
    %3 = tpu.matmul %0, %2, %cst {dimension_numbers = #tpu.dot_dimension_numbers<[1], [0], [0], [1], [0, 0, 1, 1], [], []>} : vector<32x64xbf16>, vector<64x256xbf16>, vector<32x256xf32> -> vector<32x256xf32>
    %c0_4 = arith.constant 0 : index
    %c0_5 = arith.constant 0 : index
    %4 = vector.load %arg2[%c0_4, %c0_5] : memref<32x64xbf16, #tpu.memory_space<vmem>>, vector<32x64xbf16>
    %c1 = arith.constant 1 : index
    %c0_6 = arith.constant 0 : index
    %c0_7 = arith.constant 0 : index
    %5 = vector.load %arg19[%c1, %c0_6, %c0_7] : memref<18x64x256xbf16, #tpu.memory_space<vmem>>, vector<1x64x256xbf16>
    %6 = vector.shape_cast %5 : vector<1x64x256xbf16> to vector<64x256xbf16>
    %cst_8 = arith.constant dense<0.000000e+00> : vector<32x256xf32>
    %7 = tpu.matmul %4, %6, %cst_8 {dimension_numbers = #tpu.dot_dimension_numbers<[1], [0], [0], [1], [0, 0, 1, 1], [], []>} : vector<32x64xbf16>, vector<64x256xbf16>, vector<32x256xf32> -> vector<32x256xf32>
    %8 = arith.addf %3, %7 : vector<32x256xf32>
    %c0_9 = arith.constant 0 : index
    %c0_10 = arith.constant 0 : index
    %9 = vector.load %arg3[%c0_9, %c0_10] : memref<32x64xbf16, #tpu.memory_space<vmem>>, vector<32x64xbf16>
    %c2 = arith.constant 2 : index
    %c0_11 = arith.constant 0 : index
    %c0_12 = arith.constant 0 : index
    %10 = vector.load %arg19[%c2, %c0_11, %c0_12] : memref<18x64x256xbf16, #tpu.memory_space<vmem>>, vector<1x64x256xbf16>
    %11 = vector.shape_cast %10 : vector<1x64x256xbf16> to vector<64x256xbf16>
    %cst_13 = arith.constant dense<0.000000e+00> : vector<32x256xf32>
    %12 = tpu.matmul %9, %11, %cst_13 {dimension_numbers = #tpu.dot_dimension_numbers<[1], [0], [0], [1], [0, 0, 1, 1], [], []>} : vector<32x64xbf16>, vector<64x256xbf16>, vector<32x256xf32> -> vector<32x256xf32>
    %13 = arith.addf %8, %12 : vector<32x256xf32>
    %c0_14 = arith.constant 0 : index
    %c0_15 = arith.constant 0 : index
    %14 = vector.load %arg4[%c0_14, %c0_15] : memref<32x64xbf16, #tpu.memory_space<vmem>>, vector<32x64xbf16>
    %c3 = arith.constant 3 : index
    %c0_16 = arith.constant 0 : index
    %c0_17 = arith.constant 0 : index
    %15 = vector.load %arg19[%c3, %c0_16, %c0_17] : memref<18x64x256xbf16, #tpu.memory_space<vmem>>, vector<1x64x256xbf16>
    %16 = vector.shape_cast %15 : vector<1x64x256xbf16> to vector<64x256xbf16>
    %cst_18 = arith.constant dense<0.000000e+00> : vector<32x256xf32>
    %17 = tpu.matmul %14, %16, %cst_18 {dimension_numbers = #tpu.dot_dimension_numbers<[1], [0], [0], [1], [0, 0, 1, 1], [], []>} : vector<32x64xbf16>, vector<64x256xbf16>, vector<32x256xf32> -> vector<32x256xf32>
    %18 = arith.addf %13, %17 : vector<32x256xf32>
    %c0_19 = arith.constant 0 : index
    %c0_20 = arith.constant 0 : index
    %19 = vector.load %arg5[%c0_19, %c0_20] : memref<32x64xbf16, #tpu.memory_space<vmem>>, vector<32x64xbf16>
    %c4 = arith.constant 4 : index
    %c0_21 = arith.constant 0 : index
    %c0_22 = arith.constant 0 : index
    %20 = vector.load %arg19[%c4, %c0_21, %c0_22] : memref<18x64x256xbf16, #tpu.memory_space<vmem>>, vector<1x64x256xbf16>
    %21 = vector.shape_cast %20 : vector<1x64x256xbf16> to vector<64x256xbf16>
    %cst_23 = arith.constant dense<0.000000e+00> : vector<32x256xf32>
    %22 = tpu.matmul %19, %21, %cst_23 {dimension_numbers = #tpu.dot_dimension_numbers<[1], [0], [0], [1], [0, 0, 1, 1], [], []>} : vector<32x64xbf16>, vector<64x256xbf16>, vector<32x256xf32> -> vector<32x256xf32>
    %23 = arith.addf %18, %22 : vector<32x256xf32>
    %c0_24 = arith.constant 0 : index
    %c0_25 = arith.constant 0 : index
    %24 = vector.load %arg6[%c0_24, %c0_25] : memref<32x64xbf16, #tpu.memory_space<vmem>>, vector<32x64xbf16>
    %c5 = arith.constant 5 : index
    %c0_26 = arith.constant 0 : index
    %c0_27 = arith.constant 0 : index
    %25 = vector.load %arg19[%c5, %c0_26, %c0_27] : memref<18x64x256xbf16, #tpu.memory_space<vmem>>, vector<1x64x256xbf16>
    %26 = vector.shape_cast %25 : vector<1x64x256xbf16> to vector<64x256xbf16>
    %cst_28 = arith.constant dense<0.000000e+00> : vector<32x256xf32>
    %27 = tpu.matmul %24, %26, %cst_28 {dimension_numbers = #tpu.dot_dimension_numbers<[1], [0], [0], [1], [0, 0, 1, 1], [], []>} : vector<32x64xbf16>, vector<64x256xbf16>, vector<32x256xf32> -> vector<32x256xf32>
    %28 = arith.addf %23, %27 : vector<32x256xf32>
    %c0_29 = arith.constant 0 : index
    %c0_30 = arith.constant 0 : index
    %29 = vector.load %arg7[%c0_29, %c0_30] : memref<32x64xbf16, #tpu.memory_space<vmem>>, vector<32x64xbf16>
    %c6 = arith.constant 6 : index
    %c0_31 = arith.constant 0 : index
    %c0_32 = arith.constant 0 : index
    %30 = vector.load %arg19[%c6, %c0_31, %c0_32] : memref<18x64x256xbf16, #tpu.memory_space<vmem>>, vector<1x64x256xbf16>
    %31 = vector.shape_cast %30 : vector<1x64x256xbf16> to vector<64x256xbf16>
    %cst_33 = arith.constant dense<0.000000e+00> : vector<32x256xf32>
    %32 = tpu.matmul %29, %31, %cst_33 {dimension_numbers = #tpu.dot_dimension_numbers<[1], [0], [0], [1], [0, 0, 1, 1], [], []>} : vector<32x64xbf16>, vector<64x256xbf16>, vector<32x256xf32> -> vector<32x256xf32>
    %33 = arith.addf %28, %32 : vector<32x256xf32>
    %c0_34 = arith.constant 0 : index
    %c0_35 = arith.constant 0 : index
    %34 = vector.load %arg8[%c0_34, %c0_35] : memref<32x64xbf16, #tpu.memory_space<vmem>>, vector<32x64xbf16>
    %c7 = arith.constant 7 : index
    %c0_36 = arith.constant 0 : index
    %c0_37 = arith.constant 0 : index
    %35 = vector.load %arg19[%c7, %c0_36, %c0_37] : memref<18x64x256xbf16, #tpu.memory_space<vmem>>, vector<1x64x256xbf16>
    %36 = vector.shape_cast %35 : vector<1x64x256xbf16> to vector<64x256xbf16>
    %cst_38 = arith.constant dense<0.000000e+00> : vector<32x256xf32>
    %37 = tpu.matmul %34, %36, %cst_38 {dimension_numbers = #tpu.dot_dimension_numbers<[1], [0], [0], [1], [0, 0, 1, 1], [], []>} : vector<32x64xbf16>, vector<64x256xbf16>, vector<32x256xf32> -> vector<32x256xf32>
    %38 = arith.addf %33, %37 : vector<32x256xf32>
    %c0_39 = arith.constant 0 : index
    %c0_40 = arith.constant 0 : index
    %39 = vector.load %arg9[%c0_39, %c0_40] : memref<32x64xbf16, #tpu.memory_space<vmem>>, vector<32x64xbf16>
    %c8 = arith.constant 8 : index
    %c0_41 = arith.constant 0 : index
    %c0_42 = arith.constant 0 : index
    %40 = vector.load %arg19[%c8, %c0_41, %c0_42] : memref<18x64x256xbf16, #tpu.memory_space<vmem>>, vector<1x64x256xbf16>
    %41 = vector.shape_cast %40 : vector<1x64x256xbf16> to vector<64x256xbf16>
    %cst_43 = arith.constant dense<0.000000e+00> : vector<32x256xf32>
    %42 = tpu.matmul %39, %41, %cst_43 {dimension_numbers = #tpu.dot_dimension_numbers<[1], [0], [0], [1], [0, 0, 1, 1], [], []>} : vector<32x64xbf16>, vector<64x256xbf16>, vector<32x256xf32> -> vector<32x256xf32>
    %43 = arith.addf %38, %42 : vector<32x256xf32>
    %c0_44 = arith.constant 0 : index
    %c0_45 = arith.constant 0 : index
    %44 = vector.load %arg10[%c0_44, %c0_45] : memref<32x64xbf16, #tpu.memory_space<vmem>>, vector<32x64xbf16>
    %c9 = arith.constant 9 : index
    %c0_46 = arith.constant 0 : index
    %c0_47 = arith.constant 0 : index
    %45 = vector.load %arg19[%c9, %c0_46, %c0_47] : memref<18x64x256xbf16, #tpu.memory_space<vmem>>, vector<1x64x256xbf16>
    %46 = vector.shape_cast %45 : vector<1x64x256xbf16> to vector<64x256xbf16>
    %cst_48 = arith.constant dense<0.000000e+00> : vector<32x256xf32>
    %47 = tpu.matmul %44, %46, %cst_48 {dimension_numbers = #tpu.dot_dimension_numbers<[1], [0], [0], [1], [0, 0, 1, 1], [], []>} : vector<32x64xbf16>, vector<64x256xbf16>, vector<32x256xf32> -> vector<32x256xf32>
    %48 = arith.addf %43, %47 : vector<32x256xf32>
    %c0_49 = arith.constant 0 : index
    %c0_50 = arith.constant 0 : index
    %49 = vector.load %arg11[%c0_49, %c0_50] : memref<32x64xbf16, #tpu.memory_space<vmem>>, vector<32x64xbf16>
    %c10 = arith.constant 10 : index
    %c0_51 = arith.constant 0 : index
    %c0_52 = arith.constant 0 : index
    %50 = vector.load %arg19[%c10, %c0_51, %c0_52] : memref<18x64x256xbf16, #tpu.memory_space<vmem>>, vector<1x64x256xbf16>
    %51 = vector.shape_cast %50 : vector<1x64x256xbf16> to vector<64x256xbf16>
    %cst_53 = arith.constant dense<0.000000e+00> : vector<32x256xf32>
    %52 = tpu.matmul %49, %51, %cst_53 {dimension_numbers = #tpu.dot_dimension_numbers<[1], [0], [0], [1], [0, 0, 1, 1], [], []>} : vector<32x64xbf16>, vector<64x256xbf16>, vector<32x256xf32> -> vector<32x256xf32>
    %53 = arith.addf %48, %52 : vector<32x256xf32>
    %c0_54 = arith.constant 0 : index
    %c0_55 = arith.constant 0 : index
    %54 = vector.load %arg12[%c0_54, %c0_55] : memref<32x64xbf16, #tpu.memory_space<vmem>>, vector<32x64xbf16>
    %c11 = arith.constant 11 : index
    %c0_56 = arith.constant 0 : index
    %c0_57 = arith.constant 0 : index
    %55 = vector.load %arg19[%c11, %c0_56, %c0_57] : memref<18x64x256xbf16, #tpu.memory_space<vmem>>, vector<1x64x256xbf16>
    %56 = vector.shape_cast %55 : vector<1x64x256xbf16> to vector<64x256xbf16>
    %cst_58 = arith.constant dense<0.000000e+00> : vector<32x256xf32>
    %57 = tpu.matmul %54, %56, %cst_58 {dimension_numbers = #tpu.dot_dimension_numbers<[1], [0], [0], [1], [0, 0, 1, 1], [], []>} : vector<32x64xbf16>, vector<64x256xbf16>, vector<32x256xf32> -> vector<32x256xf32>
    %58 = arith.addf %53, %57 : vector<32x256xf32>
    %c0_59 = arith.constant 0 : index
    %c0_60 = arith.constant 0 : index
    %59 = vector.load %arg13[%c0_59, %c0_60] : memref<32x64xbf16, #tpu.memory_space<vmem>>, vector<32x64xbf16>
    %c12 = arith.constant 12 : index
    %c0_61 = arith.constant 0 : index
    %c0_62 = arith.constant 0 : index
    %60 = vector.load %arg19[%c12, %c0_61, %c0_62] : memref<18x64x256xbf16, #tpu.memory_space<vmem>>, vector<1x64x256xbf16>
    %61 = vector.shape_cast %60 : vector<1x64x256xbf16> to vector<64x256xbf16>
    %cst_63 = arith.constant dense<0.000000e+00> : vector<32x256xf32>
    %62 = tpu.matmul %59, %61, %cst_63 {dimension_numbers = #tpu.dot_dimension_numbers<[1], [0], [0], [1], [0, 0, 1, 1], [], []>} : vector<32x64xbf16>, vector<64x256xbf16>, vector<32x256xf32> -> vector<32x256xf32>
    %63 = arith.addf %58, %62 : vector<32x256xf32>
    %c0_64 = arith.constant 0 : index
    %c0_65 = arith.constant 0 : index
    %64 = vector.load %arg14[%c0_64, %c0_65] : memref<32x64xbf16, #tpu.memory_space<vmem>>, vector<32x64xbf16>
    %c13 = arith.constant 13 : index
    %c0_66 = arith.constant 0 : index
    %c0_67 = arith.constant 0 : index
    %65 = vector.load %arg19[%c13, %c0_66, %c0_67] : memref<18x64x256xbf16, #tpu.memory_space<vmem>>, vector<1x64x256xbf16>
    %66 = vector.shape_cast %65 : vector<1x64x256xbf16> to vector<64x256xbf16>
    %cst_68 = arith.constant dense<0.000000e+00> : vector<32x256xf32>
    %67 = tpu.matmul %64, %66, %cst_68 {dimension_numbers = #tpu.dot_dimension_numbers<[1], [0], [0], [1], [0, 0, 1, 1], [], []>} : vector<32x64xbf16>, vector<64x256xbf16>, vector<32x256xf32> -> vector<32x256xf32>
    %68 = arith.addf %63, %67 : vector<32x256xf32>
    %c0_69 = arith.constant 0 : index
    %c0_70 = arith.constant 0 : index
    %69 = vector.load %arg15[%c0_69, %c0_70] : memref<32x64xbf16, #tpu.memory_space<vmem>>, vector<32x64xbf16>
    %c14 = arith.constant 14 : index
    %c0_71 = arith.constant 0 : index
    %c0_72 = arith.constant 0 : index
    %70 = vector.load %arg19[%c14, %c0_71, %c0_72] : memref<18x64x256xbf16, #tpu.memory_space<vmem>>, vector<1x64x256xbf16>
    %71 = vector.shape_cast %70 : vector<1x64x256xbf16> to vector<64x256xbf16>
    %cst_73 = arith.constant dense<0.000000e+00> : vector<32x256xf32>
    %72 = tpu.matmul %69, %71, %cst_73 {dimension_numbers = #tpu.dot_dimension_numbers<[1], [0], [0], [1], [0, 0, 1, 1], [], []>} : vector<32x64xbf16>, vector<64x256xbf16>, vector<32x256xf32> -> vector<32x256xf32>
    %73 = arith.addf %68, %72 : vector<32x256xf32>
    %c0_74 = arith.constant 0 : index
    %c0_75 = arith.constant 0 : index
    %74 = vector.load %arg16[%c0_74, %c0_75] : memref<32x64xbf16, #tpu.memory_space<vmem>>, vector<32x64xbf16>
    %c15 = arith.constant 15 : index
    %c0_76 = arith.constant 0 : index
    %c0_77 = arith.constant 0 : index
    %75 = vector.load %arg19[%c15, %c0_76, %c0_77] : memref<18x64x256xbf16, #tpu.memory_space<vmem>>, vector<1x64x256xbf16>
    %76 = vector.shape_cast %75 : vector<1x64x256xbf16> to vector<64x256xbf16>
    %cst_78 = arith.constant dense<0.000000e+00> : vector<32x256xf32>
    %77 = tpu.matmul %74, %76, %cst_78 {dimension_numbers = #tpu.dot_dimension_numbers<[1], [0], [0], [1], [0, 0, 1, 1], [], []>} : vector<32x64xbf16>, vector<64x256xbf16>, vector<32x256xf32> -> vector<32x256xf32>
    %78 = arith.addf %73, %77 : vector<32x256xf32>
    %c0_79 = arith.constant 0 : index
    %c0_80 = arith.constant 0 : index
    %79 = vector.load %arg17[%c0_79, %c0_80] : memref<32x64xbf16, #tpu.memory_space<vmem>>, vector<32x64xbf16>
    %c16 = arith.constant 16 : index
    %c0_81 = arith.constant 0 : index
    %c0_82 = arith.constant 0 : index
    %80 = vector.load %arg19[%c16, %c0_81, %c0_82] : memref<18x64x256xbf16, #tpu.memory_space<vmem>>, vector<1x64x256xbf16>
    %81 = vector.shape_cast %80 : vector<1x64x256xbf16> to vector<64x256xbf16>
    %cst_83 = arith.constant dense<0.000000e+00> : vector<32x256xf32>
    %82 = tpu.matmul %79, %81, %cst_83 {dimension_numbers = #tpu.dot_dimension_numbers<[1], [0], [0], [1], [0, 0, 1, 1], [], []>} : vector<32x64xbf16>, vector<64x256xbf16>, vector<32x256xf32> -> vector<32x256xf32>
    %83 = arith.addf %78, %82 : vector<32x256xf32>
    %c0_84 = arith.constant 0 : index
    %c0_85 = arith.constant 0 : index
    %84 = vector.load %arg18[%c0_84, %c0_85] : memref<32x64xbf16, #tpu.memory_space<vmem>>, vector<32x64xbf16>
    %c17 = arith.constant 17 : index
    %c0_86 = arith.constant 0 : index
    %c0_87 = arith.constant 0 : index
    %85 = vector.load %arg19[%c17, %c0_86, %c0_87] : memref<18x64x256xbf16, #tpu.memory_space<vmem>>, vector<1x64x256xbf16>
    %86 = vector.shape_cast %85 : vector<1x64x256xbf16> to vector<64x256xbf16>
    %cst_88 = arith.constant dense<0.000000e+00> : vector<32x256xf32>
    %87 = tpu.matmul %84, %86, %cst_88 {dimension_numbers = #tpu.dot_dimension_numbers<[1], [0], [0], [1], [0, 0, 1, 1], [], []>} : vector<32x64xbf16>, vector<64x256xbf16>, vector<32x256xf32> -> vector<32x256xf32>
    %88 = arith.addf %83, %87 : vector<32x256xf32>
    %c0_89 = arith.constant 0 : index
    %c0_90 = arith.constant 0 : index
    %89 = vector.load %arg20[%c0_89, %c0_90] : memref<1x256xf32, #tpu.memory_space<vmem>>, vector<1x256xf32>
    %90 = vector.broadcast %89 : vector<1x256xf32> to vector<32x256xf32>
    %91 = arith.addf %88, %90 : vector<32x256xf32>
    %cst_91 = arith.constant 0.000000e+00 : f32
    %92 = vector.broadcast %cst_91 : f32 to vector<32x256xf32>
    %93 = arith.maximumf %91, %92 : vector<32x256xf32>
    %94 = arith.truncf %93 : vector<32x256xf32> to vector<32x256xbf16>
    %c0_92 = arith.constant 0 : index
    %c0_93 = arith.constant 0 : index
    %95 = vector.load %arg21[%c0_92, %c0_93] : memref<32x256xbf16, #tpu.memory_space<vmem>>, vector<32x256xbf16>
    tpu.vector_store %arg21[%c0_92, %c0_93], %94 {strides = array<i32>} : memref<32x256xbf16, #tpu.memory_space<vmem>>, vector<32x256xbf16>,
    return
  }
  func.func @transform_0(%arg0: i32) -> (i32, i32) {
    %c0_i32 = arith.constant 0 : i32
    %c0_i32_0 = arith.constant 0 : i32
    return %arg0, %c0_i32 : i32, i32
  }
  func.func @transform_1(%arg0: i32) -> (i32, i32) {
    %c0_i32 = arith.constant 0 : i32
    %c0_i32_0 = arith.constant 0 : i32
    return %arg0, %c0_i32 : i32, i32
  }
  func.func @transform_2(%arg0: i32) -> (i32, i32) {
    %c0_i32 = arith.constant 0 : i32
    %c0_i32_0 = arith.constant 0 : i32
    return %arg0, %c0_i32 : i32, i32
  }
  func.func @transform_3(%arg0: i32) -> (i32, i32) {
    %c0_i32 = arith.constant 0 : i32
    %c0_i32_0 = arith.constant 0 : i32
    return %arg0, %c0_i32 : i32, i32
  }
  func.func @transform_4(%arg0: i32) -> (i32, i32) {
    %c0_i32 = arith.constant 0 : i32
    %c0_i32_0 = arith.constant 0 : i32
    return %arg0, %c0_i32 : i32, i32
  }
  func.func @transform_5(%arg0: i32) -> (i32, i32) {
    %c0_i32 = arith.constant 0 : i32
    %c0_i32_0 = arith.constant 0 : i32
    return %arg0, %c0_i32 : i32, i32
  }
  func.func @transform_6(%arg0: i32) -> (i32, i32) {
    %c0_i32 = arith.constant 0 : i32
    %c0_i32_0 = arith.constant 0 : i32
    return %arg0, %c0_i32 : i32, i32
  }
  func.func @transform_7(%arg0: i32) -> (i32, i32) {
    %c0_i32 = arith.constant 0 : i32
    %c0_i32_0 = arith.constant 0 : i32
    return %arg0, %c0_i32 : i32, i32
  }
  func.func @transform_8(%arg0: i32) -> (i32, i32) {
    %c0_i32 = arith.constant 0 : i32
    %c0_i32_0 = arith.constant 0 : i32
    return %arg0, %c0_i32 : i32, i32
  }
  func.func @transform_9(%arg0: i32) -> (i32, i32) {
    %c0_i32 = arith.constant 0 : i32
    %c0_i32_0 = arith.constant 0 : i32
    return %arg0, %c0_i32 : i32, i32
  }
  func.func @transform_10(%arg0: i32) -> (i32, i32) {
    %c0_i32 = arith.constant 0 : i32
    %c0_i32_0 = arith.constant 0 : i32
    return %arg0, %c0_i32 : i32, i32
  }
  func.func @transform_11(%arg0: i32) -> (i32, i32) {
    %c0_i32 = arith.constant 0 : i32
    %c0_i32_0 = arith.constant 0 : i32
    return %arg0, %c0_i32 : i32, i32
  }
  func.func @transform_12(%arg0: i32) -> (i32, i32) {
    %c0_i32 = arith.constant 0 : i32
    %c0_i32_0 = arith.constant 0 : i32
    return %arg0, %c0_i32 : i32, i32
  }
  func.func @transform_13(%arg0: i32) -> (i32, i32) {
    %c0_i32 = arith.constant 0 : i32
    %c0_i32_0 = arith.constant 0 : i32
    return %arg0, %c0_i32 : i32, i32
  }
  func.func @transform_14(%arg0: i32) -> (i32, i32) {
    %c0_i32 = arith.constant 0 : i32
    %c0_i32_0 = arith.constant 0 : i32
    return %arg0, %c0_i32 : i32, i32
  }
  func.func @transform_15(%arg0: i32) -> (i32, i32) {
    %c0_i32 = arith.constant 0 : i32
    %c0_i32_0 = arith.constant 0 : i32
    return %arg0, %c0_i32 : i32, i32
  }
  func.func @transform_16(%arg0: i32) -> (i32, i32) {
    %c0_i32 = arith.constant 0 : i32
    %c0_i32_0 = arith.constant 0 : i32
    return %arg0, %c0_i32 : i32, i32
  }
  func.func @transform_17(%arg0: i32) -> (i32, i32) {
    %c0_i32 = arith.constant 0 : i32
    %c0_i32_0 = arith.constant 0 : i32
    return %arg0, %c0_i32 : i32, i32
  }
  func.func @transform_18(%arg0: i32) -> (i32, i32, i32) {
    %c0_i32 = arith.constant 0 : i32
    %c0_i32_0 = arith.constant 0 : i32
    %c0_i32_1 = arith.constant 0 : i32
    %c0_i32_2 = arith.constant 0 : i32
    return %c0_i32, %c0_i32_0, %c0_i32_1 : i32, i32, i32
  }
  func.func @transform_19(%arg0: i32) -> (i32, i32) {
    %c0_i32 = arith.constant 0 : i32
    %c0_i32_0 = arith.constant 0 : i32
    %c0_i32_1 = arith.constant 0 : i32
    return %c0_i32, %c0_i32_0 : i32, i32
  }
  func.func @transform_20(%arg0: i32) -> (i32, i32) {
    %c0_i32 = arith.constant 0 : i32
    %c0_i32_0 = arith.constant 0 : i32
    return %arg0, %c0_i32 : i32, i32
  }
}

module attributes {stable_mosaic.version = 11 : i64} {
  func.func @kernel(%arg0: i32, %arg1: memref<16x192xbf16, #tpu.memory_space<vmem>>, %arg2: memref<16x192xbf16, #tpu.memory_space<vmem>>, %arg3: memref<16x192xbf16, #tpu.memory_space<vmem>>, %arg4: memref<16x192xbf16, #tpu.memory_space<vmem>>, %arg5: memref<16x192xbf16, #tpu.memory_space<vmem>>, %arg6: memref<16x192xbf16, #tpu.memory_space<vmem>>, %arg7: memref<16x192xbf16, #tpu.memory_space<vmem>>, %arg8: memref<16x192xbf16, #tpu.memory_space<vmem>>, %arg9: memref<16x192xbf16, #tpu.memory_space<vmem>>, %arg10: memref<9x192x192xbf16, #tpu.memory_space<vmem>>, %arg11: memref<1x192xf32, #tpu.memory_space<vmem>>, %arg12: memref<16x384xbf16, #tpu.memory_space<vmem>>) attributes {dimension_semantics = [#tpu.dimension_semantics<parallel>], iteration_bounds = array<i64: 1>, scalar_prefetch = 0 : i64, scratch_operands = 0 : i64, tpu.core_type = #tpu.core_type<tc>, window_params = [{transform_indices = @transform_0, window_bounds = array<i64: 16, 192>}, {transform_indices = @transform_1, window_bounds = array<i64: 16, 192>}, {transform_indices = @transform_2, window_bounds = array<i64: 16, 192>}, {transform_indices = @transform_3, window_bounds = array<i64: 16, 192>}, {transform_indices = @transform_4, window_bounds = array<i64: 16, 192>}, {transform_indices = @transform_5, window_bounds = array<i64: 16, 192>}, {transform_indices = @transform_6, window_bounds = array<i64: 16, 192>}, {transform_indices = @transform_7, window_bounds = array<i64: 16, 192>}, {transform_indices = @transform_8, window_bounds = array<i64: 16, 192>}, {pipeline_mode = #tpu.pipeline_mode<synchronous>, transform_indices = @transform_9, window_bounds = array<i64: 9, 192, 192>}, {pipeline_mode = #tpu.pipeline_mode<synchronous>, transform_indices = @transform_10, window_bounds = array<i64: 1, 192>}, {transform_indices = @transform_11, window_bounds = array<i64: 16, 384>}]} {
    %c0 = arith.constant 0 : index
    %c0_0 = arith.constant 0 : index
    %0 = vector.load %arg1[%c0, %c0_0] : memref<16x192xbf16, #tpu.memory_space<vmem>>, vector<16x192xbf16>
    %c0_1 = arith.constant 0 : index
    %c0_2 = arith.constant 0 : index
    %c0_3 = arith.constant 0 : index
    %1 = vector.load %arg10[%c0_1, %c0_2, %c0_3] : memref<9x192x192xbf16, #tpu.memory_space<vmem>>, vector<1x192x192xbf16>
    %2 = vector.shape_cast %1 : vector<1x192x192xbf16> to vector<192x192xbf16>
    %cst = arith.constant dense<0.000000e+00> : vector<16x192xf32>
    %3 = tpu.matmul %0, %2, %cst {dimension_numbers = #tpu.dot_dimension_numbers<[1], [0], [0], [1], [0, 0, 1, 1], [], []>} : vector<16x192xbf16>, vector<192x192xbf16>, vector<16x192xf32> -> vector<16x192xf32>
    %c0_4 = arith.constant 0 : index
    %c0_5 = arith.constant 0 : index
    %4 = vector.load %arg2[%c0_4, %c0_5] : memref<16x192xbf16, #tpu.memory_space<vmem>>, vector<16x192xbf16>
    %c1 = arith.constant 1 : index
    %c0_6 = arith.constant 0 : index
    %c0_7 = arith.constant 0 : index
    %5 = vector.load %arg10[%c1, %c0_6, %c0_7] : memref<9x192x192xbf16, #tpu.memory_space<vmem>>, vector<1x192x192xbf16>
    %6 = vector.shape_cast %5 : vector<1x192x192xbf16> to vector<192x192xbf16>
    %cst_8 = arith.constant dense<0.000000e+00> : vector<16x192xf32>
    %7 = tpu.matmul %4, %6, %cst_8 {dimension_numbers = #tpu.dot_dimension_numbers<[1], [0], [0], [1], [0, 0, 1, 1], [], []>} : vector<16x192xbf16>, vector<192x192xbf16>, vector<16x192xf32> -> vector<16x192xf32>
    %8 = arith.addf %3, %7 : vector<16x192xf32>
    %c0_9 = arith.constant 0 : index
    %c0_10 = arith.constant 0 : index
    %9 = vector.load %arg3[%c0_9, %c0_10] : memref<16x192xbf16, #tpu.memory_space<vmem>>, vector<16x192xbf16>
    %c2 = arith.constant 2 : index
    %c0_11 = arith.constant 0 : index
    %c0_12 = arith.constant 0 : index
    %10 = vector.load %arg10[%c2, %c0_11, %c0_12] : memref<9x192x192xbf16, #tpu.memory_space<vmem>>, vector<1x192x192xbf16>
    %11 = vector.shape_cast %10 : vector<1x192x192xbf16> to vector<192x192xbf16>
    %cst_13 = arith.constant dense<0.000000e+00> : vector<16x192xf32>
    %12 = tpu.matmul %9, %11, %cst_13 {dimension_numbers = #tpu.dot_dimension_numbers<[1], [0], [0], [1], [0, 0, 1, 1], [], []>} : vector<16x192xbf16>, vector<192x192xbf16>, vector<16x192xf32> -> vector<16x192xf32>
    %13 = arith.addf %8, %12 : vector<16x192xf32>
    %c0_14 = arith.constant 0 : index
    %c0_15 = arith.constant 0 : index
    %14 = vector.load %arg4[%c0_14, %c0_15] : memref<16x192xbf16, #tpu.memory_space<vmem>>, vector<16x192xbf16>
    %c3 = arith.constant 3 : index
    %c0_16 = arith.constant 0 : index
    %c0_17 = arith.constant 0 : index
    %15 = vector.load %arg10[%c3, %c0_16, %c0_17] : memref<9x192x192xbf16, #tpu.memory_space<vmem>>, vector<1x192x192xbf16>
    %16 = vector.shape_cast %15 : vector<1x192x192xbf16> to vector<192x192xbf16>
    %cst_18 = arith.constant dense<0.000000e+00> : vector<16x192xf32>
    %17 = tpu.matmul %14, %16, %cst_18 {dimension_numbers = #tpu.dot_dimension_numbers<[1], [0], [0], [1], [0, 0, 1, 1], [], []>} : vector<16x192xbf16>, vector<192x192xbf16>, vector<16x192xf32> -> vector<16x192xf32>
    %18 = arith.addf %13, %17 : vector<16x192xf32>
    %c0_19 = arith.constant 0 : index
    %c0_20 = arith.constant 0 : index
    %19 = vector.load %arg5[%c0_19, %c0_20] : memref<16x192xbf16, #tpu.memory_space<vmem>>, vector<16x192xbf16>
    %c4 = arith.constant 4 : index
    %c0_21 = arith.constant 0 : index
    %c0_22 = arith.constant 0 : index
    %20 = vector.load %arg10[%c4, %c0_21, %c0_22] : memref<9x192x192xbf16, #tpu.memory_space<vmem>>, vector<1x192x192xbf16>
    %21 = vector.shape_cast %20 : vector<1x192x192xbf16> to vector<192x192xbf16>
    %cst_23 = arith.constant dense<0.000000e+00> : vector<16x192xf32>
    %22 = tpu.matmul %19, %21, %cst_23 {dimension_numbers = #tpu.dot_dimension_numbers<[1], [0], [0], [1], [0, 0, 1, 1], [], []>} : vector<16x192xbf16>, vector<192x192xbf16>, vector<16x192xf32> -> vector<16x192xf32>
    %23 = arith.addf %18, %22 : vector<16x192xf32>
    %c0_24 = arith.constant 0 : index
    %c0_25 = arith.constant 0 : index
    %24 = vector.load %arg6[%c0_24, %c0_25] : memref<16x192xbf16, #tpu.memory_space<vmem>>, vector<16x192xbf16>
    %c5 = arith.constant 5 : index
    %c0_26 = arith.constant 0 : index
    %c0_27 = arith.constant 0 : index
    %25 = vector.load %arg10[%c5, %c0_26, %c0_27] : memref<9x192x192xbf16, #tpu.memory_space<vmem>>, vector<1x192x192xbf16>
    %26 = vector.shape_cast %25 : vector<1x192x192xbf16> to vector<192x192xbf16>
    %cst_28 = arith.constant dense<0.000000e+00> : vector<16x192xf32>
    %27 = tpu.matmul %24, %26, %cst_28 {dimension_numbers = #tpu.dot_dimension_numbers<[1], [0], [0], [1], [0, 0, 1, 1], [], []>} : vector<16x192xbf16>, vector<192x192xbf16>, vector<16x192xf32> -> vector<16x192xf32>
    %28 = arith.addf %23, %27 : vector<16x192xf32>
    %c0_29 = arith.constant 0 : index
    %c0_30 = arith.constant 0 : index
    %29 = vector.load %arg7[%c0_29, %c0_30] : memref<16x192xbf16, #tpu.memory_space<vmem>>, vector<16x192xbf16>
    %c6 = arith.constant 6 : index
    %c0_31 = arith.constant 0 : index
    %c0_32 = arith.constant 0 : index
    %30 = vector.load %arg10[%c6, %c0_31, %c0_32] : memref<9x192x192xbf16, #tpu.memory_space<vmem>>, vector<1x192x192xbf16>
    %31 = vector.shape_cast %30 : vector<1x192x192xbf16> to vector<192x192xbf16>
    %cst_33 = arith.constant dense<0.000000e+00> : vector<16x192xf32>
    %32 = tpu.matmul %29, %31, %cst_33 {dimension_numbers = #tpu.dot_dimension_numbers<[1], [0], [0], [1], [0, 0, 1, 1], [], []>} : vector<16x192xbf16>, vector<192x192xbf16>, vector<16x192xf32> -> vector<16x192xf32>
    %33 = arith.addf %28, %32 : vector<16x192xf32>
    %c0_34 = arith.constant 0 : index
    %c0_35 = arith.constant 0 : index
    %34 = vector.load %arg8[%c0_34, %c0_35] : memref<16x192xbf16, #tpu.memory_space<vmem>>, vector<16x192xbf16>
    %c7 = arith.constant 7 : index
    %c0_36 = arith.constant 0 : index
    %c0_37 = arith.constant 0 : index
    %35 = vector.load %arg10[%c7, %c0_36, %c0_37] : memref<9x192x192xbf16, #tpu.memory_space<vmem>>, vector<1x192x192xbf16>
    %36 = vector.shape_cast %35 : vector<1x192x192xbf16> to vector<192x192xbf16>
    %cst_38 = arith.constant dense<0.000000e+00> : vector<16x192xf32>
    %37 = tpu.matmul %34, %36, %cst_38 {dimension_numbers = #tpu.dot_dimension_numbers<[1], [0], [0], [1], [0, 0, 1, 1], [], []>} : vector<16x192xbf16>, vector<192x192xbf16>, vector<16x192xf32> -> vector<16x192xf32>
    %38 = arith.addf %33, %37 : vector<16x192xf32>
    %c0_39 = arith.constant 0 : index
    %c0_40 = arith.constant 0 : index
    %39 = vector.load %arg9[%c0_39, %c0_40] : memref<16x192xbf16, #tpu.memory_space<vmem>>, vector<16x192xbf16>
    %c8 = arith.constant 8 : index
    %c0_41 = arith.constant 0 : index
    %c0_42 = arith.constant 0 : index
    %40 = vector.load %arg10[%c8, %c0_41, %c0_42] : memref<9x192x192xbf16, #tpu.memory_space<vmem>>, vector<1x192x192xbf16>
    %41 = vector.shape_cast %40 : vector<1x192x192xbf16> to vector<192x192xbf16>
    %cst_43 = arith.constant dense<0.000000e+00> : vector<16x192xf32>
    %42 = tpu.matmul %39, %41, %cst_43 {dimension_numbers = #tpu.dot_dimension_numbers<[1], [0], [0], [1], [0, 0, 1, 1], [], []>} : vector<16x192xbf16>, vector<192x192xbf16>, vector<16x192xf32> -> vector<16x192xf32>
    %43 = arith.addf %38, %42 : vector<16x192xf32>
    %c0_44 = arith.constant 0 : index
    %c0_45 = arith.constant 0 : index
    %44 = vector.load %arg11[%c0_44, %c0_45] : memref<1x192xf32, #tpu.memory_space<vmem>>, vector<1x192xf32>
    %45 = vector.broadcast %44 : vector<1x192xf32> to vector<16x192xf32>
    %46 = arith.addf %43, %45 : vector<16x192xf32>
    %cst_46 = arith.constant 0.000000e+00 : f32
    %47 = vector.broadcast %cst_46 : f32 to vector<16x192xf32>
    %48 = arith.maximumf %46, %47 : vector<16x192xf32>
    %49 = arith.truncf %48 : vector<16x192xf32> to vector<16x192xbf16>
    %c0_47 = arith.constant 0 : index
    %c0_48 = arith.constant 0 : index
    %50 = vector.load %arg1[%c0_47, %c0_48] : memref<16x192xbf16, #tpu.memory_space<vmem>>, vector<16x192xbf16>
    %c0_49 = arith.constant 0 : index
    %c0_50 = arith.constant 0 : index
    %51 = vector.load %arg2[%c0_49, %c0_50] : memref<16x192xbf16, #tpu.memory_space<vmem>>, vector<16x192xbf16>
    %52 = arith.maximumf %50, %51 : vector<16x192xbf16>
    %c0_51 = arith.constant 0 : index
    %c0_52 = arith.constant 0 : index
    %53 = vector.load %arg3[%c0_51, %c0_52] : memref<16x192xbf16, #tpu.memory_space<vmem>>, vector<16x192xbf16>
    %54 = arith.maximumf %52, %53 : vector<16x192xbf16>
    %c0_53 = arith.constant 0 : index
    %c0_54 = arith.constant 0 : index
    %55 = vector.load %arg4[%c0_53, %c0_54] : memref<16x192xbf16, #tpu.memory_space<vmem>>, vector<16x192xbf16>
    %56 = arith.maximumf %54, %55 : vector<16x192xbf16>
    %c0_55 = arith.constant 0 : index
    %c0_56 = arith.constant 0 : index
    %57 = vector.load %arg5[%c0_55, %c0_56] : memref<16x192xbf16, #tpu.memory_space<vmem>>, vector<16x192xbf16>
    %58 = arith.maximumf %56, %57 : vector<16x192xbf16>
    %c0_57 = arith.constant 0 : index
    %c0_58 = arith.constant 0 : index
    %59 = vector.load %arg6[%c0_57, %c0_58] : memref<16x192xbf16, #tpu.memory_space<vmem>>, vector<16x192xbf16>
    %60 = arith.maximumf %58, %59 : vector<16x192xbf16>
    %c0_59 = arith.constant 0 : index
    %c0_60 = arith.constant 0 : index
    %61 = vector.load %arg7[%c0_59, %c0_60] : memref<16x192xbf16, #tpu.memory_space<vmem>>, vector<16x192xbf16>
    %62 = arith.maximumf %60, %61 : vector<16x192xbf16>
    %c0_61 = arith.constant 0 : index
    %c0_62 = arith.constant 0 : index
    %63 = vector.load %arg8[%c0_61, %c0_62] : memref<16x192xbf16, #tpu.memory_space<vmem>>, vector<16x192xbf16>
    %64 = arith.maximumf %62, %63 : vector<16x192xbf16>
    %c0_63 = arith.constant 0 : index
    %c0_64 = arith.constant 0 : index
    %65 = vector.load %arg9[%c0_63, %c0_64] : memref<16x192xbf16, #tpu.memory_space<vmem>>, vector<16x192xbf16>
    %66 = arith.maximumf %64, %65 : vector<16x192xbf16>
    %67 = tpu.concatenate %49, %66 in 1 : vector<16x192xbf16>, vector<16x192xbf16> -> vector<16x384xbf16>
    %c0_65 = arith.constant 0 : index
    %c0_66 = arith.constant 0 : index
    %68 = vector.load %arg12[%c0_65, %c0_66] : memref<16x384xbf16, #tpu.memory_space<vmem>>, vector<16x384xbf16>
    tpu.vector_store %arg12[%c0_65, %c0_66], %67 {strides = array<i32>} : memref<16x384xbf16, #tpu.memory_space<vmem>>, vector<16x384xbf16>,
    return
  }
  func.func @transform_0(%arg0: i32) -> (i32, i32) {
    %c0_i32 = arith.constant 0 : i32
    %c0_i32_0 = arith.constant 0 : i32
    return %arg0, %c0_i32 : i32, i32
  }
  func.func @transform_1(%arg0: i32) -> (i32, i32) {
    %c0_i32 = arith.constant 0 : i32
    %c0_i32_0 = arith.constant 0 : i32
    return %arg0, %c0_i32 : i32, i32
  }
  func.func @transform_2(%arg0: i32) -> (i32, i32) {
    %c0_i32 = arith.constant 0 : i32
    %c0_i32_0 = arith.constant 0 : i32
    return %arg0, %c0_i32 : i32, i32
  }
  func.func @transform_3(%arg0: i32) -> (i32, i32) {
    %c0_i32 = arith.constant 0 : i32
    %c0_i32_0 = arith.constant 0 : i32
    return %arg0, %c0_i32 : i32, i32
  }
  func.func @transform_4(%arg0: i32) -> (i32, i32) {
    %c0_i32 = arith.constant 0 : i32
    %c0_i32_0 = arith.constant 0 : i32
    return %arg0, %c0_i32 : i32, i32
  }
  func.func @transform_5(%arg0: i32) -> (i32, i32) {
    %c0_i32 = arith.constant 0 : i32
    %c0_i32_0 = arith.constant 0 : i32
    return %arg0, %c0_i32 : i32, i32
  }
  func.func @transform_6(%arg0: i32) -> (i32, i32) {
    %c0_i32 = arith.constant 0 : i32
    %c0_i32_0 = arith.constant 0 : i32
    return %arg0, %c0_i32 : i32, i32
  }
  func.func @transform_7(%arg0: i32) -> (i32, i32) {
    %c0_i32 = arith.constant 0 : i32
    %c0_i32_0 = arith.constant 0 : i32
    return %arg0, %c0_i32 : i32, i32
  }
  func.func @transform_8(%arg0: i32) -> (i32, i32) {
    %c0_i32 = arith.constant 0 : i32
    %c0_i32_0 = arith.constant 0 : i32
    return %arg0, %c0_i32 : i32, i32
  }
  func.func @transform_9(%arg0: i32) -> (i32, i32, i32) {
    %c0_i32 = arith.constant 0 : i32
    %c0_i32_0 = arith.constant 0 : i32
    %c0_i32_1 = arith.constant 0 : i32
    %c0_i32_2 = arith.constant 0 : i32
    return %c0_i32, %c0_i32_0, %c0_i32_1 : i32, i32, i32
  }
  func.func @transform_10(%arg0: i32) -> (i32, i32) {
    %c0_i32 = arith.constant 0 : i32
    %c0_i32_0 = arith.constant 0 : i32
    %c0_i32_1 = arith.constant 0 : i32
    return %c0_i32, %c0_i32_0 : i32, i32
  }
  func.func @transform_11(%arg0: i32) -> (i32, i32) {
    %c0_i32 = arith.constant 0 : i32
    %c0_i32_0 = arith.constant 0 : i32
    return %arg0, %c0_i32 : i32, i32
  }
}

</mosaic_0001>

<bundles_post_ra>
// kernel: stem_forward.9
= control target key start
LH: loop header
LB: loop body
LE: loop exit
PB: predicated region body
PF: predicated region fallthrough
CT: control target
= control target key end

     0   :  { %s5283_s17 = smov 0   ;;  %s6352_s0 = inlined_call_operand.vmem [shape: bf16[480,8], index: 0, kind: input, shape index: {}]   ;;  %s6353_s1 = inlined_call_operand.vmem [shape: bf16[480,8], index: 1, kind: input, shape index: {}]   ;;  %s6354_s2 = inlined_call_operand.vmem [shape: bf16[480,8], index: 2, kind: input, shape index: {}]   ;;  %s6355_s3 = inlined_call_operand.vmem [shape: bf16[480,8], index: 3, kind: input, shape index: {}]   ;;  %s6356_s4 = inlined_call_operand.vmem [shape: bf16[480,8], index: 4, kind: input, shape index: {}]   ;;  %s6357_s5 = inlined_call_operand.vmem [shape: bf16[480,8], index: 5, kind: input, shape index: {}]   ;;  %s6358_s6 = inlined_call_operand.vmem [shape: bf16[480,8], index: 6, kind: input, shape index: {}]   ;;  %s6359_s7 = inlined_call_operand.vmem [shape: bf16[480,8], index: 7, kind: input, shape index: {}]   ;;  %s6360_s8 = inlined_call_operand.vmem [shape: bf16[480,8], index: 8, kind: input, shape index: {}]   ;;  %s6361_s9 = inlined_call_operand.vmem [shape: bf16[9,8,128], index: 9, kind: input, shape index: {}]   ;;  %s6362_s10 = inlined_call_operand.vmem [shape: f32[1,128], index: 10, kind: input, shape index: {}]   ;;  %s6363_s11 = inlined_call_operand.vmem [shape: bf16[480,128], index: 11, kind: output, shape index: {}]  }
   0x1 LB: > { %s3919_s18 = sadd.s32 4294967295, %s5219_s17   ;;  %p3923_p0 = scmp.ge.s32.totalorder %s5219_s17, 1  ;;  %s5219_s17 = sphi %s5283_s17, %s21_s17  }
   0x2   : > { %p426_p1 = scmp.lt.s32.totalorder %s5219_s17, 3 }
   0x4   : > { %p427_p2 = pnand %p3923_p0, %p426_p1 }
   0x5   : > { %v3934_v0 = vld [vmem:[%s6361_s9 + $0x4] sm:$0xf] (!%p427_p2)  ;;  %vm751_vm0 = vcmask (!%p427_p2), 1043456   ;;  %s506_s21 = smul.u32 (!%p427_p2), 30, %s3919_s18  ;;  %v5221_v1 = vmov (!%p427_p2), 0.0   ;;  %vm5222_vm1 = vmmov (!%p427_p2), 0  }
   0x6   : > { %430 = sbr.rel (%p427_p2) target bundleno = 776 (0x308), region = 64  ;;  %4508 = vmatprep.subr.bf16.mxu0 (!%p427_p2), %v5221_v1  ;;  %5066 = vmatprep.subr.bf16.mxu1 (!%p427_p2), %v5221_v1  ;;  %v753_v2 = vsel (!%p427_p2), %vm751_vm0, %v3934_v0, 0  ;;  %v3995_v3 = vld [vmem:[%s6361_s9 + $0x8] sm:$0xf] (!%p427_p2)  ;;  %v597_v4 = vld [vmem:[%s6361_s9] sm:$0xf] (!%p427_p2) }
   0x7   : > { %4509 = vmatpush3.bf16.msra.mxu0 (!%p427_p2), %v753_v2  ;;  %5067 = vmatpush3.bf16.msra.mxu1 (!%p427_p2), %v753_v2  ;;  %p507_p3 = scmp.lt.s32.totalorder (!%p427_p2), %s506_s21, 59  ;;  %vm705_vm2 = vcmask (!%p427_p2), 64512   ;;  %v1337_v6 = vsel (!%p427_p2), %vm751_vm0, %v3995_v3, 0  ;;  %v1029_v8 = vsel (!%p427_p2), %vm751_vm0, %v597_v4, 0  ;;  %v4026_v21 = vld [vmem:[%s6361_s9 + $0xc] sm:$0xf] (!%p427_p2) }
   0x8   : > { %4510 = vmatprep.mubr.msk.bf16.mxu0 (!%p427_p2), %vm5222_vm1, %v5221_v1  ;;  %4542 = vmatprep.mubr.msk.bf16.mxu1 (!%p427_p2), %vm5222_vm1, %v5221_v1  ;;  %v1675_v23 = vsel (!%p427_p2), %vm751_vm0, %v4026_v21, 0  ;;  %v4057_v25 = vld [vmem:[%s6361_s9 + $0x10] sm:$0xf] (!%p427_p2)  ;;  %v4088_v56 = vld [vmem:[%s6361_s9 + $0x14] sm:$0xf] (!%p427_p2) }
   0x9   : > { %4632 = vmatprep.subr.bf16.mxu0 (!%p427_p2), %v5221_v1  ;;  %4570 = vmatprep.subr.bf16.mxu1 (!%p427_p2), %v5221_v1  ;;  %v2013_v27 = vsel (!%p427_p2), %vm751_vm0, %v4057_v25, 0  ;;  %v2351_v58 = vsel (!%p427_p2), %vm751_vm0, %v4088_v56, 0  ;;  %v4119_v59 = vld [vmem:[%s6361_s9 + $0x18] sm:$0xf] (!%p427_p2) }
   0xa   : > { %v2689_v61 = vsel (!%p427_p2), %vm751_vm0, %v4119_v59, 0 }
   0xd   : > { %s6365_s21 = smov (!%p507_p3, %s506_s21), 59 }
   0xe   : > { %s5306_s24 = sshll.u32 %s6365_s21, 2 }
   0xf   : > { %s5315_s29 = scalar_lea.vmem %s6353_s1, %s5306_s24  ;;  %s5342_s13 = scalar_lea.vmem %s6352_s0, %s5306_s24 }
  0x10   : > { %v5078_v5 = vld [vmem:[%s5315_s29] sm:$0xff]   ;;  %v5080_v9 = vld [vmem:[%s5315_s29 + $0x8] sm:$0xff]   ;;  %v5082_v11 = vld [vmem:[%s5315_s29 + $0x10] sm:$0xff]   ;;  %s5349_s16 = scalar_lea.vmem %s6354_s2, %s5306_s24  ;;  %s5387_s20 = scalar_lea.vmem %s6355_s3, %s5306_s24 }
  0x11   : > { %v5079_v7 = vld [vmem:[%s5315_s29 + $0x40] sm:$0xff]   ;;  %4511 = vmatmul.mubr.msk.bf16.vlgmr.msra.gmra.mrb[0].mxu0 %vm705_vm2, %v5078_v5  ;;  %v5081_v10 = vld [vmem:[%s5315_s29 + $0x48] sm:$0xff]   ;;  %v5083_v12 = vld [vmem:[%s5315_s29 + $0x50] sm:$0xff]   ;;  %s5405_s26 = scalar_lea.vmem %s6356_s4, %s5306_s24  ;;  %s5529_s12 = scalar_lea.vmem %s6357_s5, %s5306_s24 }
  0x12   : > { %4543 = vmatmul.mubr.msk.bf16.vlgmr.msra.gmra.mrb[0].mxu1 %vm705_vm2, %v5079_v7  ;;  %4633 = vmatpush3.bf16.msra.mxu0 %v1337_v6  ;;  %v5084_v13 = vld [vmem:[%s5315_s29 + $0x18] sm:$0xff]   ;;  %v5086_v15 = vld [vmem:[%s5315_s29 + $0x20] sm:$0xff]   ;;  %v5088_v17 = vld [vmem:[%s5315_s29 + $0x28] sm:$0xff]   ;;  %s5546_s19 = scalar_lea.vmem %s6358_s6, %s5306_s24  ;;  %s5744_s25 = scalar_lea.vmem %s6359_s7, %s5306_s24 }
  0x13   : > { %4571 = vmatpush3.bf16.msra.mxu1 %v1029_v8  ;;  %4514 = vmatprep.mubr.msk.bf16.mxu0 %vm5222_vm1, %v5221_v1  ;;  %v5085_v14 = vld [vmem:[%s5315_s29 + $0x58] sm:$0xff]   ;;  %v5087_v16 = vld [vmem:[%s5315_s29 + $0x60] sm:$0xff]   ;;  %v5089_v18 = vld [vmem:[%s5315_s29 + $0x68] sm:$0xff]  }
  0x14   : > { %4546 = vmatprep.mubr.msk.bf16.mxu1 %vm5222_vm1, %v5221_v1  ;;  %4694 = vmatprep.subr.bf16.mxu1 %v5221_v1  ;;  %v5090_v19 = vld [vmem:[%s5315_s29 + $0x30] sm:$0xff]   ;;  %v5092_v22 = vld [vmem:[%s5315_s29 + $0x38] sm:$0xff]   ;;  %v5093_v24 = vld [vmem:[%s5342_s13] sm:$0xff]  }
  0x15   : > { %4756 = vmatprep.subr.bf16.mxu0 %v5221_v1  ;;  %v5091_v20 = vld [vmem:[%s5315_s29 + $0x70] sm:$0xff]   ;;  %v5095_v26 = vld [vmem:[%s5349_s16] sm:$0xff]   ;;  %v5094_v28 = vld [vmem:[%s5342_s13 + $0x8] sm:$0xff]   ;;  %s5767_s29 = scalar_lea.vmem %s6360_s8, %s5306_s24 }
  0x16   : > { %v5097_v29 = vld [vmem:[%s5349_s16 + $0x8] sm:$0xff]   ;;  %v5096_v30 = vld [vmem:[%s5342_s13 + $0x10] sm:$0xff]   ;;  %v5098_v32 = vld [vmem:[%s5342_s13 + $0x18] sm:$0xff]  }
  0x17   : > { %v5099_v31 = vld [vmem:[%s5349_s16 + $0x10] sm:$0xff]   ;;  %v5101_v33 = vld [vmem:[%s5349_s16 + $0x18] sm:$0xff]   ;;  %v5100_v34 = vld [vmem:[%s5342_s13 + $0x20] sm:$0xff]  }
  0x18   : > { %v5103_v35 = vld [vmem:[%s5349_s16 + $0x20] sm:$0xff]   ;;  %v5102_v36 = vld [vmem:[%s5342_s13 + $0x28] sm:$0xff]   ;;  %v5104_v38 = vld [vmem:[%s5342_s13 + $0x30] sm:$0xff]  }
  0x19   : > { %4515 = vmatmul.mubr.msk.bf16.gmra.mrb[4].mxu0 %vm705_vm2, %v5080_v9  ;;  %v5105_v37 = vld [vmem:[%s5349_s16 + $0x28] sm:$0xff]   ;;  %v5107_v39 = vld [vmem:[%s5349_s16 + $0x30] sm:$0xff]   ;;  %v5106_v40 = vld [vmem:[%s5342_s13 + $0x38] sm:$0xff]  }
  0x1a   : > { %4547 = vmatmul.mubr.msk.bf16.gmra.mrb[4].mxu1 %vm705_vm2, %v5081_v10  ;;  %4518 = vmatprep.mubr.msk.bf16.mxu0 %vm5222_vm1, %v5221_v1  ;;  %v5109_v41 = vld [vmem:[%s5349_s16 + $0x38] sm:$0xff]   ;;  %v5108_v42 = vld [vmem:[%s5342_s13 + $0x40] sm:$0xff]   ;;  %v5110_v44 = vld [vmem:[%s5342_s13 + $0x48] sm:$0xff]  }
  0x1b   : > { %4550 = vmatprep.mubr.msk.bf16.mxu1 %vm5222_vm1, %v5221_v1  ;;  %v5111_v43 = vld [vmem:[%s5349_s16 + $0x40] sm:$0xff]   ;;  %v5113_v45 = vld [vmem:[%s5349_s16 + $0x48] sm:$0xff]   ;;  %v5112_v46 = vld [vmem:[%s5342_s13 + $0x50] sm:$0xff]  }
  0x1c   : > { %v5115_v47 = vld [vmem:[%s5349_s16 + $0x50] sm:$0xff]   ;;  %v5114_v48 = vld [vmem:[%s5342_s13 + $0x58] sm:$0xff]   ;;  %v5116_v50 = vld [vmem:[%s5342_s13 + $0x60] sm:$0xff]  }
  0x1d   : > { %v5117_v49 = vld [vmem:[%s5349_s16 + $0x58] sm:$0xff]   ;;  %v5119_v51 = vld [vmem:[%s5349_s16 + $0x60] sm:$0xff]   ;;  %v5118_v52 = vld [vmem:[%s5342_s13 + $0x68] sm:$0xff]  }
  0x1e   : > { %v5121_v53 = vld [vmem:[%s5349_s16 + $0x68] sm:$0xff]   ;;  %v5120_v54 = vld [vmem:[%s5342_s13 + $0x70] sm:$0xff]   ;;  %v5123_v57 = vld [vmem:[%s5387_s20] sm:$0xff]  }
  0x1f   : > { %v5122_v55 = vld [vmem:[%s5349_s16 + $0x70] sm:$0xff]   ;;  %v5125_v60 = vld [vmem:[%s5405_s26] sm:$0xff]   ;;  %v5124_v62 = vld [vmem:[%s5387_s20 + $0x8] sm:$0xff]  }
  0x20   : > { %v5127_v63 = vld [vmem:[%s5405_s26 + $0x8] sm:$0xff]   ;;  %v5126_v0 = vld [vmem:[%s5387_s20 + $0x10] sm:$0xff]   ;;  %v5128_v3 = vld [vmem:[%s5387_s20 + $0x18] sm:$0xff]  }
  0x21   : > { %4519 = vmatmul.mubr.msk.bf16.gmra.mrb[8].mxu0 %vm705_vm2, %v5082_v11  ;;  %v5129_v2 = vld [vmem:[%s5405_s26 + $0x10] sm:$0xff]   ;;  %v5131_v4 = vld [vmem:[%s5405_s26 + $0x18] sm:$0xff]   ;;  %v5130_v5 = vld [vmem:[%s5387_s20 + $0x20] sm:$0xff]  }
  0x22   : > { %4551 = vmatmul.mubr.msk.bf16.gmra.mrb[8].mxu1 %vm705_vm2, %v5083_v12  ;;  %4522 = vmatprep.mubr.msk.bf16.mxu0 %vm5222_vm1, %v5221_v1  ;;  %v5133_v9 = vld [vmem:[%s5405_s26 + $0x20] sm:$0xff]   ;;  %v5132_v12 = vld [vmem:[%s5387_s20 + $0x28] sm:$0xff]  }
  0x23   : > { %4554 = vmatprep.mubr.msk.bf16.mxu1 %vm5222_vm1, %v5221_v1  ;;  %v5143_v59 = vld [vmem:[%s5405_s26 + $0x48] sm:$0xff]  }
  0x29   : > { %4523 = vmatmul.mubr.msk.bf16.gmra.mrb[12].mxu0 %vm705_vm2, %v5084_v13 }
  0x2a   : > { %4555 = vmatmul.mubr.msk.bf16.gmra.mrb[12].mxu1 %vm705_vm2, %v5085_v14  ;;  %4526 = vmatprep.mubr.msk.bf16.mxu0 %vm5222_vm1, %v5221_v1 }
  0x2b   : > { %4558 = vmatprep.mubr.msk.bf16.mxu1 %vm5222_vm1, %v5221_v1 }
  0x31   : > { %4527 = vmatmul.mubr.msk.bf16.gmra.mrb[16].mxu0 %vm705_vm2, %v5086_v15 }
  0x32   : > { %4559 = vmatmul.mubr.msk.bf16.gmra.mrb[16].mxu1 %vm705_vm2, %v5087_v16  ;;  %4530 = vmatprep.mubr.msk.bf16.mxu0 %vm5222_vm1, %v5221_v1 }
  0x33   : > { %4562 = vmatprep.mubr.msk.bf16.mxu1 %vm5222_vm1, %v5221_v1 }
  0x39   : > { %4531 = vmatmul.mubr.msk.bf16.gmra.mrb[20].mxu0 %vm705_vm2, %v5088_v17 }
  0x3a   : > { %4563 = vmatmul.mubr.msk.bf16.gmra.mrb[20].mxu1 %vm705_vm2, %v5089_v18  ;;  %4534 = vmatprep.mubr.msk.bf16.mxu0 %vm5222_vm1, %v5221_v1 }
  0x3b   : > { %4566 = vmatprep.mubr.msk.bf16.mxu1 %vm5222_vm1, %v5221_v1 }
  0x41   : > { %4535 = vmatmul.mubr.msk.bf16.gmra.mrb[24].mxu0 %vm705_vm2, %v5090_v19  ;;  %v5135_v19 = vld [vmem:[%s5405_s26 + $0x28] sm:$0xff]  }
  0x42   : > { %4567 = vmatmul.mubr.msk.bf16.gmra.mrb[24].mxu1 %vm705_vm2, %v5091_v20  ;;  %4538 = vmatprep.mubr.msk.bf16.mxu0 %vm5222_vm1, %v5221_v1 }
  0x43   : > { %4572 = vmatprep.mubr.msk.bf16.mxu1 %vm5222_vm1, %v5221_v1 }
  0x49   : > { %4539 = vmatmul.mubr.msk.bf16.gmra.mrb[28].mxu0 %vm705_vm2, %v5092_v22  ;;  %v5134_v22 = vld [vmem:[%s5387_s20 + $0x30] sm:$0xff]  }
  0x4a   : > { %4573 = vmatmul.mubr.msk.bf16.vlgmr.msra.gmra.mrb[28].mxu1 %vm705_vm2, %v5093_v24  ;;  %4634 = vmatprep.mubr.msk.bf16.mxu0 %vm5222_vm1, %v5221_v1 }
  0x4b   : > { %4695 = vmatpush3.bf16.msra.mxu1 %v1675_v23  ;;  %4576 = vmatprep.mubr.msk.bf16.mxu1 %vm5222_vm1, %v5221_v1 }
  0x4c   : > { %4818 = vmatprep.subr.bf16.mxu1 %v5221_v1 }
  0x51   : > { %4635 = vmatmul.mubr.msk.bf16.vlgmr.msra.gmra.mrb[32].mxu0 %vm705_vm2, %v5095_v26 }
  0x52   : > { %4577 = vmatmul.mubr.msk.bf16.gmra.mrb[32].mxu1 %vm705_vm2, %v5094_v28  ;;  %4757 = vmatpush3.bf16.msra.mxu0 %v2013_v27 }
  0x53   : > { %4580 = vmatprep.mubr.msk.bf16.mxu1 %vm5222_vm1, %v5221_v1  ;;  %4638 = vmatprep.mubr.msk.bf16.mxu0 %vm5222_vm1, %v5221_v1 }
  0x54   : > { %4880 = vmatprep.subr.bf16.mxu0 %v5221_v1 }
  0x59   : > { %4639 = vmatmul.mubr.msk.bf16.gmra.mrb[36].mxu0 %vm705_vm2, %v5097_v29  ;;  %v5137_v29 = vld [vmem:[%s5405_s26 + $0x30] sm:$0xff]  }
  0x5a   : > { %4581 = vmatmul.mubr.msk.bf16.gmra.mrb[36].mxu1 %vm705_vm2, %v5096_v30  ;;  %4642 = vmatprep.mubr.msk.bf16.mxu0 %vm5222_vm1, %v5221_v1 }
  0x5b   : > { %4584 = vmatprep.mubr.msk.bf16.mxu1 %vm5222_vm1, %v5221_v1 }
  0x61   : > { %4643 = vmatmul.mubr.msk.bf16.gmra.mrb[40].mxu0 %vm705_vm2, %v5099_v31 }
  0x62   : > { %4585 = vmatmul.mubr.msk.bf16.gmra.mrb[40].mxu1 %vm705_vm2, %v5098_v32  ;;  %4646 = vmatprep.mubr.msk.bf16.mxu0 %vm5222_vm1, %v5221_v1  ;;  %v5136_v32 = vld [vmem:[%s5387_s20 + $0x38] sm:$0xff]  }
  0x63   : > { %4588 = vmatprep.mubr.msk.bf16.mxu1 %vm5222_vm1, %v5221_v1 }
  0x69   : > { %4647 = vmatmul.mubr.msk.bf16.gmra.mrb[44].mxu0 %vm705_vm2, %v5101_v33 }
  0x6a   : > { %4589 = vmatmul.mubr.msk.bf16.gmra.mrb[44].mxu1 %vm705_vm2, %v5100_v34  ;;  %4650 = vmatprep.mubr.msk.bf16.mxu0 %vm5222_vm1, %v5221_v1 }
  0x6b   : > { %4592 = vmatprep.mubr.msk.bf16.mxu1 %vm5222_vm1, %v5221_v1 }
  0x71   : > { %4651 = vmatmul.mubr.msk.bf16.gmra.mrb[48].mxu0 %vm705_vm2, %v5103_v35 }
  0x72   : > { %4593 = vmatmul.mubr.msk.bf16.gmra.mrb[48].mxu1 %vm705_vm2, %v5102_v36  ;;  %4654 = vmatprep.mubr.msk.bf16.mxu0 %vm5222_vm1, %v5221_v1 }
  0x73   : > { %4596 = vmatprep.mubr.msk.bf16.mxu1 %vm5222_vm1, %v5221_v1 }
  0x79   : > { %4655 = vmatmul.mubr.msk.bf16.gmra.mrb[52].mxu0 %vm705_vm2, %v5105_v37 }
  0x7a   : > { %4597 = vmatmul.mubr.msk.bf16.gmra.mrb[52].mxu1 %vm705_vm2, %v5104_v38  ;;  %4658 = vmatprep.mubr.msk.bf16.mxu0 %vm5222_vm1, %v5221_v1 }
  0x7b   : > { %4600 = vmatprep.mubr.msk.bf16.mxu1 %vm5222_vm1, %v5221_v1 }
  0x81   : > { %4659 = vmatmul.mubr.msk.bf16.gmra.mrb[56].mxu0 %vm705_vm2, %v5107_v39  ;;  %v5139_v39 = vld [vmem:[%s5405_s26 + $0x38] sm:$0xff]  }
  0x82   : > { %4601 = vmatmul.mubr.msk.bf16.gmra.mrb[56].mxu1 %vm705_vm2, %v5106_v40  ;;  %4662 = vmatprep.mubr.msk.bf16.mxu0 %vm5222_vm1, %v5221_v1 }
  0x83   : > { %4604 = vmatprep.mubr.msk.bf16.mxu1 %vm5222_vm1, %v5221_v1 }
  0x89   : > { %4663 = vmatmul.mubr.msk.bf16.gmra.mrb[60].mxu0 %vm705_vm2, %v5109_v41 }
  0x8a   : > { %4605 = vmatmul.mubr.msk.bf16.gmra.mrb[60].mxu1 %vm705_vm2, %v5108_v42  ;;  %4666 = vmatprep.mubr.msk.bf16.mxu0 %vm5222_vm1, %v5221_v1  ;;  %v5138_v42 = vld [vmem:[%s5387_s20 + $0x40] sm:$0xff]  }
  0x8b   : > { %4608 = vmatprep.mubr.msk.bf16.mxu1 %vm5222_vm1, %v5221_v1 }
  0x91   : > { %4667 = vmatmul.mubr.msk.bf16.gmra.mrb[64].mxu0 %vm705_vm2, %v5111_v43 }
  0x92   : > { %4609 = vmatmul.mubr.msk.bf16.gmra.mrb[64].mxu1 %vm705_vm2, %v5110_v44  ;;  %4670 = vmatprep.mubr.msk.bf16.mxu0 %vm5222_vm1, %v5221_v1 }
  0x93   : > { %4612 = vmatprep.mubr.msk.bf16.mxu1 %vm5222_vm1, %v5221_v1 }
  0x99   : > { %4671 = vmatmul.mubr.msk.bf16.gmra.mrb[68].mxu0 %vm705_vm2, %v5113_v45 }
  0x9a   : > { %4613 = vmatmul.mubr.msk.bf16.gmra.mrb[68].mxu1 %vm705_vm2, %v5112_v46  ;;  %4674 = vmatprep.mubr.msk.bf16.mxu0 %vm5222_vm1, %v5221_v1 }
  0x9b   : > { %4616 = vmatprep.mubr.msk.bf16.mxu1 %vm5222_vm1, %v5221_v1 }
  0xa1   : > { %4675 = vmatmul.mubr.msk.bf16.gmra.mrb[72].mxu0 %vm705_vm2, %v5115_v47 }
  0xa2   : > { %4617 = vmatmul.mubr.msk.bf16.gmra.mrb[72].mxu1 %vm705_vm2, %v5114_v48  ;;  %4678 = vmatprep.mubr.msk.bf16.mxu0 %vm5222_vm1, %v5221_v1 }
  0xa3   : > { %4620 = vmatprep.mubr.msk.bf16.mxu1 %vm5222_vm1, %v5221_v1 }
  0xa9   : > { %4679 = vmatmul.mubr.msk.bf16.gmra.mrb[76].mxu0 %vm705_vm2, %v5117_v49  ;;  %v5141_v49 = vld [vmem:[%s5405_s26 + $0x40] sm:$0xff]  }
  0xaa   : > { %4621 = vmatmul.mubr.msk.bf16.gmra.mrb[76].mxu1 %vm705_vm2, %v5116_v50  ;;  %4682 = vmatprep.mubr.msk.bf16.mxu0 %vm5222_vm1, %v5221_v1 }
  0xab   : > { %4624 = vmatprep.mubr.msk.bf16.mxu1 %vm5222_vm1, %v5221_v1 }
  0xb1   : > { %4683 = vmatmul.mubr.msk.bf16.gmra.mrb[80].mxu0 %vm705_vm2, %v5119_v51 }
  0xb2   : > { %4625 = vmatmul.mubr.msk.bf16.gmra.mrb[80].mxu1 %vm705_vm2, %v5118_v52  ;;  %4686 = vmatprep.mubr.msk.bf16.mxu0 %vm5222_vm1, %v5221_v1  ;;  %v5140_v52 = vld [vmem:[%s5387_s20 + $0x48] sm:$0xff]  }
  0xb3   : > { %4628 = vmatprep.mubr.msk.bf16.mxu1 %vm5222_vm1, %v5221_v1 }
  0xb9   : > { %4687 = vmatmul.mubr.msk.bf16.gmra.mrb[84].mxu0 %vm705_vm2, %v5121_v53 }
  0xba   : > { %4629 = vmatmul.mubr.msk.bf16.gmra.mrb[84].mxu1 %vm705_vm2, %v5120_v54  ;;  %4690 = vmatprep.mubr.msk.bf16.mxu0 %vm5222_vm1, %v5221_v1 }
  0xbb   : > { %4696 = vmatprep.mubr.msk.bf16.mxu1 %vm5222_vm1, %v5221_v1 }
  0xc1   : > { %4691 = vmatmul.mubr.msk.bf16.gmra.mrb[88].mxu0 %vm705_vm2, %v5122_v55 }
  0xc2   : > { %4697 = vmatmul.mubr.msk.bf16.vlgmr.msra.gmra.mrb[88].mxu1 %vm705_vm2, %v5123_v57  ;;  %4758 = vmatprep.mubr.msk.bf16.mxu0 %vm5222_vm1, %v5221_v1 }
  0xc3   : > { %4819 = vmatpush3.bf16.msra.mxu1 %v2351_v58  ;;  %4700 = vmatprep.mubr.msk.bf16.mxu1 %vm5222_vm1, %v5221_v1 }
  0xc4   : > { %4942 = vmatprep.subr.bf16.mxu1 %v5221_v1 }
  0xc9   : > { %4759 = vmatmul.mubr.msk.bf16.vlgmr.msra.gmra.mrb[92].mxu0 %vm705_vm2, %v5125_v60 }
  0xca   : > { %4701 = vmatmul.mubr.msk.bf16.gmra.mrb[92].mxu1 %vm705_vm2, %v5124_v62  ;;  %4881 = vmatpush3.bf16.msra.mxu0 %v2689_v61  ;;  %v5142_v62 = vld [vmem:[%s5387_s20 + $0x50] sm:$0xff]  }
  0xcb   : > { %4704 = vmatprep.mubr.msk.bf16.mxu1 %vm5222_vm1, %v5221_v1  ;;  %4762 = vmatprep.mubr.msk.bf16.mxu0 %vm5222_vm1, %v5221_v1 }
  0xcc   : > { %5004 = vmatprep.subr.bf16.mxu0 %v5221_v1 }
  0xd1   : > { %4763 = vmatmul.mubr.msk.bf16.gmra.mrb[96].mxu0 %vm705_vm2, %v5127_v63 }
  0xd2   : > { %4705 = vmatmul.mubr.msk.bf16.gmra.mrb[96].mxu1 %vm705_vm2, %v5126_v0  ;;  %4766 = vmatprep.mubr.msk.bf16.mxu0 %vm5222_vm1, %v5221_v1 }
  0xd3   : > { %4708 = vmatprep.mubr.msk.bf16.mxu1 %vm5222_vm1, %v5221_v1 }
  0xd9   : > { %4767 = vmatmul.mubr.msk.bf16.gmra.mrb[100].mxu0 %vm705_vm2, %v5129_v2 }
  0xda   : > { %4709 = vmatmul.mubr.msk.bf16.gmra.mrb[100].mxu1 %vm705_vm2, %v5128_v3  ;;  %4770 = vmatprep.mubr.msk.bf16.mxu0 %vm5222_vm1, %v5221_v1 }
  0xdb   : > { %4712 = vmatprep.mubr.msk.bf16.mxu1 %vm5222_vm1, %v5221_v1 }
  0xe1   : > { %4771 = vmatmul.mubr.msk.bf16.gmra.mrb[104].mxu0 %vm705_vm2, %v5131_v4 }
  0xe2   : > { %4713 = vmatmul.mubr.msk.bf16.gmra.mrb[104].mxu1 %vm705_vm2, %v5130_v5  ;;  %4774 = vmatprep.mubr.msk.bf16.mxu0 %vm5222_vm1, %v5221_v1 }
  0xe3   : > { %4716 = vmatprep.mubr.msk.bf16.mxu1 %vm5222_vm1, %v5221_v1 }
  0xe4   : > { %v5593_v6 = vpop.f32.mrb[0].mxu0 }
  0xe5   : > { %v4512_v7 = vpop.f32.mrb[1].mxu0  ;;  %v5595_v8 = vpop.f32.mrb[0].mxu1 }
  0xe6   : > { %v5598_v10 = vpop.f32.mrb[2].mxu0  ;;  %v4544_v11 = vpop.f32.mrb[1].mxu1  ;;  %v5145_v7 = vld [vmem:[%s5405_s26 + $0x50] sm:$0xff]  }
  0xe7   : > { %v4513_v13 = vpop.f32.mrb[3].mxu0  ;;  %v5601_v14 = vpop.f32.mrb[2].mxu1 }
  0xe8   : > { %v4545_v15 = vpop.f32.mrb[3].mxu1 }
  0xe9   : > { %4775 = vmatmul.mubr.msk.bf16.gmra.mrb[108].mxu0 %vm705_vm2, %v5133_v9 }
  0xea   : > { %4717 = vmatmul.mubr.msk.bf16.gmra.mrb[108].mxu1 %vm705_vm2, %v5132_v12  ;;  %4778 = vmatprep.mubr.msk.bf16.mxu0 %vm5222_vm1, %v5221_v1  ;;  %v5144_v12 = vld [vmem:[%s5387_s20 + $0x58] sm:$0xff]  }
  0xeb   : > { %4720 = vmatprep.mubr.msk.bf16.mxu1 %vm5222_vm1, %v5221_v1 }
  0xec   : > { %v5609_v16 = vpop.f32.mrb[4].mxu0 }
  0xed   : > { %v4516_v17 = vpop.f32.mrb[5].mxu0  ;;  %v5611_v18 = vpop.f32.mrb[4].mxu1 }
  0xee   : > { %v5614_v20 = vpop.f32.mrb[6].mxu0  ;;  %v4548_v21 = vpop.f32.mrb[5].mxu1 }
  0xef   : > { %v4517_v23 = vpop.f32.mrb[7].mxu0  ;;  %v5617_v24 = vpop.f32.mrb[6].mxu1 }
  0xf0   : > { %v4549_v25 = vpop.f32.mrb[7].mxu1  ;;  %v5147_v23 = vld [vmem:[%s5405_s26 + $0x58] sm:$0xff]  }
  0xf1   : > { %4779 = vmatmul.mubr.msk.bf16.gmra.mrb[112].mxu0 %vm705_vm2, %v5135_v19 }
  0xf2   : > { %4721 = vmatmul.mubr.msk.bf16.gmra.mrb[112].mxu1 %vm705_vm2, %v5134_v22  ;;  %4782 = vmatprep.mubr.msk.bf16.mxu0 %vm5222_vm1, %v5221_v1 }
  0xf3   : > { %4724 = vmatprep.mubr.msk.bf16.mxu1 %vm5222_vm1, %v5221_v1 }
  0xf4   : > { %v5625_v26 = vpop.f32.mrb[8].mxu0 }
  0xf5   : > { %v4520_v27 = vpop.f32.mrb[9].mxu0  ;;  %v5627_v28 = vpop.f32.mrb[8].mxu1 }
  0xf6   : > { %v5630_v30 = vpop.f32.mrb[10].mxu0  ;;  %v4552_v31 = vpop.f32.mrb[9].mxu1 }
  0xf7   : > { %v4521_v33 = vpop.f32.mrb[11].mxu0  ;;  %v5633_v34 = vpop.f32.mrb[10].mxu1  ;;  %v5146_v31 = vld [vmem:[%s5387_s20 + $0x60] sm:$0xff]  }
  0xf8   : > { %v4553_v35 = vpop.f32.mrb[11].mxu1 }
  0xf9   : > { %4783 = vmatmul.mubr.msk.bf16.gmra.mrb[116].mxu0 %vm705_vm2, %v5137_v29 }
  0xfa   : > { %4725 = vmatmul.mubr.msk.bf16.gmra.mrb[116].mxu1 %vm705_vm2, %v5136_v32  ;;  %4786 = vmatprep.mubr.msk.bf16.mxu0 %vm5222_vm1, %v5221_v1 }
  0xfb   : > { %4728 = vmatprep.mubr.msk.bf16.mxu1 %vm5222_vm1, %v5221_v1 }
  0xfc   : > { %v5641_v36 = vpop.f32.mrb[12].mxu0 }
  0xfd   : > { %v4524_v37 = vpop.f32.mrb[13].mxu0  ;;  %v5643_v38 = vpop.f32.mrb[12].mxu1 }
  0xfe   : > { %v5646_v40 = vpop.f32.mrb[14].mxu0  ;;  %v4556_v41 = vpop.f32.mrb[13].mxu1 }
  0xff   : > { %v4525_v43 = vpop.f32.mrb[15].mxu0  ;;  %v5649_v44 = vpop.f32.mrb[14].mxu1 }
 0x100   : > { %v4557_v45 = vpop.f32.mrb[15].mxu1  ;;  %v5149_v43 = vld [vmem:[%s5405_s26 + $0x60] sm:$0xff]  }
 0x101   : > { %4787 = vmatmul.mubr.msk.bf16.gmra.mrb[120].mxu0 %vm705_vm2, %v5139_v39 }
 0x102   : > { %4729 = vmatmul.mubr.msk.bf16.gmra.mrb[120].mxu1 %vm705_vm2, %v5138_v42  ;;  %4790 = vmatprep.mubr.msk.bf16.mxu0 %vm5222_vm1, %v5221_v1 }
 0x103   : > { %4732 = vmatprep.mubr.msk.bf16.mxu1 %vm5222_vm1, %v5221_v1 }
 0x104   : > { %v5657_v46 = vpop.f32.mrb[16].mxu0 }
 0x105   : > { %v4528_v47 = vpop.f32.mrb[17].mxu0  ;;  %v5659_v48 = vpop.f32.mrb[16].mxu1 }
 0x106   : > { %v5662_v50 = vpop.f32.mrb[18].mxu0  ;;  %v4560_v51 = vpop.f32.mrb[17].mxu1 }
 0x107   : > { %v4529_v53 = vpop.f32.mrb[19].mxu0  ;;  %v5665_v54 = vpop.f32.mrb[18].mxu1 }
 0x108   : > { %v4561_v55 = vpop.f32.mrb[19].mxu1 }
 0x109   : > { %4791 = vmatmul.mubr.msk.bf16.gmra.mrb[124].mxu0 %vm705_vm2, %v5141_v49  ;;  %v5148_v49 = vld [vmem:[%s5387_s20 + $0x68] sm:$0xff]  }
 0x10a   : > { %4733 = vmatmul.mubr.msk.bf16.gmra.mrb[124].mxu1 %vm705_vm2, %v5140_v52  ;;  %4794 = vmatprep.mubr.msk.bf16.mxu0 %vm5222_vm1, %v5221_v1 }
 0x10b   : > { %4736 = vmatprep.mubr.msk.bf16.mxu1 %vm5222_vm1, %v5221_v1 }
 0x10c   : > { %v5673_v56 = vpop.f32.mrb[20].mxu0 }
 0x10d   : > { %v4532_v57 = vpop.f32.mrb[21].mxu0  ;;  %v5675_v58 = vpop.f32.mrb[20].mxu1 }
 0x10e   : > { %v5678_v60 = vpop.f32.mrb[22].mxu0  ;;  %v4564_v61 = vpop.f32.mrb[21].mxu1 }
 0x10f   : > { %v4533_v63 = vpop.f32.mrb[23].mxu0  ;;  %v5681_v0 = vpop.f32.mrb[22].mxu1 }
 0x110   : > { %v4565_v2 = vpop.f32.mrb[23].mxu1  ;;  %v5151_v63 = vld [vmem:[%s5405_s26 + $0x68] sm:$0xff]  }
 0x111   : > { %4795 = vmatmul.mubr.msk.bf16.gmra.mrb[128].mxu0 %vm705_vm2, %v5143_v59 }
 0x112   : > { %4737 = vmatmul.mubr.msk.bf16.gmra.mrb[128].mxu1 %vm705_vm2, %v5142_v62  ;;  %4798 = vmatprep.mubr.msk.bf16.mxu0 %vm5222_vm1, %v5221_v1 }
 0x113   : > { %4740 = vmatprep.mubr.msk.bf16.mxu1 %vm5222_vm1, %v5221_v1 }
 0x114   : > { %v5689_v3 = vpop.f32.mrb[24].mxu0 }
 0x115   : > { %v4536_v4 = vpop.f32.mrb[25].mxu0  ;;  %v5691_v5 = vpop.f32.mrb[24].mxu1 }
 0x116   : > { %v5694_v9 = vpop.f32.mrb[26].mxu0  ;;  %v4568_v11 = vpop.f32.mrb[25].mxu1 }
 0x117   : > { %v4537_v13 = vpop.f32.mrb[27].mxu0  ;;  %v5697_v15 = vpop.f32.mrb[26].mxu1 }
 0x118   : > { %v4569_v17 = vpop.f32.mrb[27].mxu1 }
 0x119   : > { %4799 = vmatmul.mubr.msk.bf16.gmra.mrb[132].mxu0 %vm705_vm2, %v5145_v7  ;;  %v5150_v7 = vld [vmem:[%s5387_s20 + $0x70] sm:$0xff]  }
 0x11a   : > { %4741 = vmatmul.mubr.msk.bf16.gmra.mrb[132].mxu1 %vm705_vm2, %v5144_v12  ;;  %4802 = vmatprep.mubr.msk.bf16.mxu0 %vm5222_vm1, %v5221_v1 }
 0x11b   : > { %4744 = vmatprep.mubr.msk.bf16.mxu1 %vm5222_vm1, %v5221_v1 }
 0x11c   : > { %v5705_v19 = vpop.f32.mrb[28].mxu0 }
 0x11d   : > { %v1065_v21 = vpop.f32.mrb[28].mxu1  ;;  %v4540_v22 = vpop.f32.mrb[29].mxu0 }
 0x11e   : > { %v1066_v25 = vadd.f32 %v1065_v21, %v5593_v6  ;;  %v4574_v27 = vpop.f32.mrb[29].mxu1  ;;  %v5709_v29 = vpop.f32.mrb[30].mxu0  ;;  %v4150_v22 = vld [vmem:[%s6361_s9 + $0x1c] sm:$0xf] }
 0x11f   : > { %v1068_v32 = vpop.f32.mrb[30].mxu1  ;;  %v4541_v33 = vpop.f32.mrb[31].mxu0 }
 0x120   : > { %v1069_v35 = vadd.f32 %v1068_v32, %v5598_v10  ;;  %v4575_v37 = vpop.f32.mrb[31].mxu1 }
 0x121   : > { %4803 = vmatmul.mubr.msk.bf16.gmra.mrb[136].mxu0 %vm705_vm2, %v5147_v23 }
 0x122   : > { %4745 = vmatmul.mubr.msk.bf16.gmra.mrb[136].mxu1 %vm705_vm2, %v5146_v31  ;;  %4806 = vmatprep.mubr.msk.bf16.mxu0 %vm5222_vm1, %v5221_v1 }
 0x123   : > { %4748 = vmatprep.mubr.msk.bf16.mxu1 %vm5222_vm1, %v5221_v1 }
 0x124   : > { %v1373_v6 = vpop.f32.mrb[32].mxu0 }
 0x125   : > { %v1073_v39 = vpop.f32.mrb[32].mxu1  ;;  %v5719_v41 = vadd.f32 %v1373_v6, %v1066_v25  ;;  %v4636_v42 = vpop.f32.mrb[33].mxu0  ;;  %v5153_v25 = vld [vmem:[%s5529_s12] sm:$0xff]  }
 0x126   : > { %v1074_v45 = vadd.f32 %v1073_v39, %v5609_v16  ;;  %v4578_v10 = vpop.f32.mrb[33].mxu1  ;;  %v1376_v47 = vpop.f32.mrb[34].mxu0 }
 0x127   : > { %v1076_v51 = vpop.f32.mrb[34].mxu1  ;;  %v5724_v52 = vadd.f32 %v1376_v47, %v1069_v35  ;;  %v4637_v53 = vpop.f32.mrb[35].mxu0  ;;  %v5155_v10 = vld [vmem:[%s5546_s19] sm:$0xff]   ;;  %v5154_v47 = vld [vmem:[%s5529_s12 + $0x8] sm:$0xff]  }
 0x128   : > { %v1077_v55 = vadd.f32 %v1076_v51, %v5614_v20  ;;  %v4579_v57 = vpop.f32.mrb[35].mxu1 }
 0x129   : > { %4807 = vmatmul.mubr.msk.bf16.gmra.mrb[140].mxu0 %vm705_vm2, %v5149_v43 }
 0x12a   : > { %4749 = vmatmul.mubr.msk.bf16.gmra.mrb[140].mxu1 %vm705_vm2, %v5148_v49  ;;  %4810 = vmatprep.mubr.msk.bf16.mxu0 %vm5222_vm1, %v5221_v1 }
 0x12b   : > { %4752 = vmatprep.mubr.msk.bf16.mxu1 %vm5222_vm1, %v5221_v1 }
 0x12c   : > { %v1381_v16 = vpop.f32.mrb[36].mxu0 }
 0x12d   : > { %v1081_v59 = vpop.f32.mrb[36].mxu1  ;;  %v5733_v61 = vadd.f32 %v1381_v16, %v1074_v45  ;;  %v4640_v62 = vpop.f32.mrb[37].mxu0  ;;  %v3027_v45 = vsel %vm751_vm0, %v4150_v22, 0 }
 0x12e   : > { %v1082_v20 = vadd.f32 %v1081_v59, %v5625_v26  ;;  %v4582_v2 = vpop.f32.mrb[37].mxu1  ;;  %v1384_v4 = vpop.f32.mrb[38].mxu0  ;;  %v5152_v26 = vld [vmem:[%s5405_s26 + $0x70] sm:$0xff]  }
 0x12f   : > { %v1084_v11 = vpop.f32.mrb[38].mxu1  ;;  %v5738_v12 = vadd.f32 %v1384_v4, %v1077_v55  ;;  %v4641_v13 = vpop.f32.mrb[39].mxu0 }
 0x130   : > { %v1085_v17 = vadd.f32 %v1084_v11, %v5630_v30  ;;  %v4583_v21 = vpop.f32.mrb[39].mxu1  ;;  %v5157_v11 = vld [vmem:[%s5546_s19 + $0x8] sm:$0xff]  }
 0x131   : > { %4811 = vmatmul.mubr.msk.bf16.gmra.mrb[144].mxu0 %vm705_vm2, %v5151_v63 }
 0x132   : > { %4753 = vmatmul.mubr.msk.bf16.gmra.mrb[144].mxu1 %vm705_vm2, %v5150_v7  ;;  %4814 = vmatprep.mubr.msk.bf16.mxu0 %vm5222_vm1, %v5221_v1  ;;  %v5156_v7 = vld [vmem:[%s5529_s12 + $0x10] sm:$0xff]  }
 0x133   : > { %4820 = vmatprep.mubr.msk.bf16.mxu1 %vm5222_vm1, %v5221_v1 }
 0x134   : > { %v1389_v23 = vpop.f32.mrb[40].mxu0 }
 0x135   : > { %v1089_v30 = vpop.f32.mrb[40].mxu1  ;;  %v5758_v27 = vadd.f32 %v1389_v23, %v1082_v20  ;;  %v4644_v31 = vpop.f32.mrb[41].mxu0 }
 0x136   : > { %v1090_v32 = vadd.f32 %v1089_v30, %v5641_v36  ;;  %v4586_v33 = vpop.f32.mrb[41].mxu1  ;;  %v1392_v35 = vpop.f32.mrb[42].mxu0  ;;  %v4181_v36 = vld [vmem:[%s6361_s9 + $0x20] sm:$0xf] }
 0x137   : > { %v1092_v37 = vpop.f32.mrb[42].mxu1  ;;  %v5761_v6 = vadd.f32 %v1392_v35, %v1085_v17  ;;  %v4645_v39 = vpop.f32.mrb[43].mxu0  ;;  %v3365_v49 = vsel %vm751_vm0, %v4181_v36, 0 }
 0x138   : > { %v1093_v42 = vadd.f32 %v1092_v37, %v5646_v40  ;;  %v4587_v43 = vpop.f32.mrb[43].mxu1  ;;  %v5159_v39 = vld [vmem:[%s5546_s19 + $0x10] sm:$0xff]  }
 0x139   : > { %4815 = vmatmul.mubr.msk.bf16.gmra.mrb[148].mxu0 %vm705_vm2, %v5152_v26 }
 0x13a   : > { %4821 = vmatmul.mubr.msk.bf16.vlgmr.msra.gmra.mrb[148].mxu1 %vm705_vm2, %v5153_v25  ;;  %4882 = vmatprep.mubr.msk.bf16.mxu0 %vm5222_vm1, %v5221_v1 }
 0x13b   : > { %4943 = vmatpush3.bf16.msra.mxu1 %v3027_v45  ;;  %4824 = vmatprep.mubr.msk.bf16.mxu1 %vm5222_vm1, %v5221_v1  ;;  %v5158_v45 = vld [vmem:[%s5529_s12 + $0x18] sm:$0xff]  }
 0x13c   : > { %v1397_v40 = vpop.f32.mrb[44].mxu0 }
 0x13d   : > { %v1097_v51 = vpop.f32.mrb[44].mxu1  ;;  %v5783_v53 = vadd.f32 %v1397_v40, %v1090_v32  ;;  %v4648_v55 = vpop.f32.mrb[45].mxu0 }
 0x13e   : > { %v1098_v57 = vadd.f32 %v1097_v51, %v5657_v46  ;;  %v4590_v16 = vpop.f32.mrb[45].mxu1  ;;  %v1400_v59 = vpop.f32.mrb[46].mxu0 }
 0x13f   : > { %v1100_v62 = vpop.f32.mrb[46].mxu1  ;;  %v5786_v63 = vadd.f32 %v1400_v59, %v1093_v42  ;;  %v4649_v20 = vpop.f32.mrb[47].mxu0  ;;  %v5161_v16 = vld [vmem:[%s5546_s19 + $0x18] sm:$0xff]  }
 0x140   : > { %v1101_v2 = vadd.f32 %v1100_v62, %v5662_v50  ;;  %v4591_v4 = vpop.f32.mrb[47].mxu1  ;;  %v5160_v20 = vld [vmem:[%s5529_s12 + $0x20] sm:$0xff]  }
 0x141   : > { %4883 = vmatmul.mubr.msk.bf16.vlgmr.msra.gmra.mrb[152].mxu0 %vm705_vm2, %v5155_v10 }
 0x142   : > { %4825 = vmatmul.mubr.msk.bf16.gmra.mrb[152].mxu1 %vm705_vm2, %v5154_v47  ;;  %5005 = vmatpush3.bf16.msra.mxu0 %v3365_v49 }
 0x143   : > { %4828 = vmatprep.mubr.msk.bf16.mxu1 %vm5222_vm1, %v5221_v1  ;;  %4886 = vmatprep.mubr.msk.bf16.mxu0 %vm5222_vm1, %v5221_v1 }
 0x144   : > { %v1405_v46 = vpop.f32.mrb[48].mxu0 }
 0x145   : > { %v1105_v13 = vpop.f32.mrb[48].mxu1  ;;  %v5797_v17 = vadd.f32 %v1405_v46, %v1098_v57  ;;  %v4652_v21 = vpop.f32.mrb[49].mxu0 }
 0x146   : > { %v1106_v50 = vadd.f32 %v1105_v13, %v5673_v56  ;;  %v4594_v26 = vpop.f32.mrb[49].mxu1  ;;  %v1408_v22 = vpop.f32.mrb[50].mxu0 }
 0x147   : > { %v1108_v23 = vpop.f32.mrb[50].mxu1  ;;  %v5800_v25 = vadd.f32 %v1408_v22, %v1101_v2  ;;  %v4653_v30 = vpop.f32.mrb[51].mxu0  ;;  %v5163_v26 = vld [vmem:[%s5546_s19 + $0x20] sm:$0xff]  }
 0x148   : > { %v1109_v31 = vadd.f32 %v1108_v23, %v5678_v60  ;;  %v4595_v32 = vpop.f32.mrb[51].mxu1  ;;  %v5162_v30 = vld [vmem:[%s5529_s12 + $0x28] sm:$0xff]  }
 0x149   : > { %4887 = vmatmul.mubr.msk.bf16.gmra.mrb[156].mxu0 %vm705_vm2, %v5157_v11 }
 0x14a   : > { %4829 = vmatmul.mubr.msk.bf16.gmra.mrb[156].mxu1 %vm705_vm2, %v5156_v7  ;;  %4890 = vmatprep.mubr.msk.bf16.mxu0 %vm5222_vm1, %v5221_v1 }
 0x14b   : > { %4832 = vmatprep.mubr.msk.bf16.mxu1 %vm5222_vm1, %v5221_v1 }
 0x14c   : > { %v1413_v56 = vpop.f32.mrb[52].mxu0 }
 0x14d   : > { %v1113_v33 = vpop.f32.mrb[52].mxu1  ;;  %v5809_v35 = vadd.f32 %v1413_v56, %v1106_v50  ;;  %v4656_v37 = vpop.f32.mrb[53].mxu0 }
 0x14e   : > { %v1114_v42 = vadd.f32 %v1113_v33, %v5689_v3  ;;  %v4598_v60 = vpop.f32.mrb[53].mxu1  ;;  %v1416_v43 = vpop.f32.mrb[54].mxu0 }
 0x14f   : > { %v1116_v36 = vpop.f32.mrb[54].mxu1  ;;  %v5814_v10 = vadd.f32 %v1416_v43, %v1109_v31  ;;  %v4657_v40 = vpop.f32.mrb[55].mxu0  ;;  %v5165_v43 = vld [vmem:[%s5546_s19 + $0x28] sm:$0xff]  }
 0x150   : > { %v1117_v47 = vadd.f32 %v1116_v36, %v5694_v9  ;;  %v4599_v49 = vpop.f32.mrb[55].mxu1  ;;  %v5164_v40 = vld [vmem:[%s5529_s12 + $0x30] sm:$0xff]  }
 0x151   : > { %4891 = vmatmul.mubr.msk.bf16.gmra.mrb[160].mxu0 %vm705_vm2, %v5159_v39 }
 0x152   : > { %4833 = vmatmul.mubr.msk.bf16.gmra.mrb[160].mxu1 %vm705_vm2, %v5158_v45  ;;  %4894 = vmatprep.mubr.msk.bf16.mxu0 %vm5222_vm1, %v5221_v1 }
 0x153   : > { %4836 = vmatprep.mubr.msk.bf16.mxu1 %vm5222_vm1, %v5221_v1 }
 0x154   : > { %v1421_v3 = vpop.f32.mrb[56].mxu0 }
 0x155   : > { %v1121_v51 = vpop.f32.mrb[56].mxu1  ;;  %v5823_v55 = vadd.f32 %v1421_v3, %v1114_v42  ;;  %v4660_v57 = vpop.f32.mrb[57].mxu0 }
 0x156   : > { %v1122_v59 = vadd.f32 %v1121_v51, %v5705_v19  ;;  %v4602_v9 = vpop.f32.mrb[57].mxu1  ;;  %v1424_v62 = vpop.f32.mrb[58].mxu0 }
 0x157   : > { %v1124_v2 = vpop.f32.mrb[58].mxu1  ;;  %v5828_v4 = vadd.f32 %v1424_v62, %v1117_v47  ;;  %v4661_v46 = vpop.f32.mrb[59].mxu0  ;;  %v5167_v62 = vld [vmem:[%s5546_s19 + $0x30] sm:$0xff]  }
 0x158   : > { %v1125_v7 = vadd.f32 %v1124_v2, %v5709_v29  ;;  %v4603_v11 = vpop.f32.mrb[59].mxu1  ;;  %v5166_v46 = vld [vmem:[%s5529_s12 + $0x38] sm:$0xff]  }
 0x159   : > { %4895 = vmatmul.mubr.msk.bf16.gmra.mrb[164].mxu0 %vm705_vm2, %v5161_v16 }
 0x15a   : > { %4837 = vmatmul.mubr.msk.bf16.gmra.mrb[164].mxu1 %vm705_vm2, %v5160_v20  ;;  %4898 = vmatprep.mubr.msk.bf16.mxu0 %vm5222_vm1, %v5221_v1 }
 0x15b   : > { %4840 = vmatprep.mubr.msk.bf16.mxu1 %vm5222_vm1, %v5221_v1 }
 0x15c   : > { %v1429_v19 = vpop.f32.mrb[60].mxu0 }
 0x15d   : > { %v1129_v13 = vpop.f32.mrb[60].mxu1  ;;  %v5837_v21 = vadd.f32 %v1429_v19, %v1122_v59  ;;  %v4664_v50 = vpop.f32.mrb[61].mxu0 }
 0x15e   : > { %v1130_v22 = vadd.f32 %v1129_v13, %v5595_v8  ;;  %v4606_v29 = vpop.f32.mrb[61].mxu1  ;;  %v1432_v23 = vpop.f32.mrb[62].mxu0 }
 0x15f   : > { %v1132_v31 = vpop.f32.mrb[62].mxu1  ;;  %v5842_v32 = vadd.f32 %v1432_v23, %v1125_v7  ;;  %v4665_v56 = vpop.f32.mrb[63].mxu0  ;;  %v5169_v23 = vld [vmem:[%s5546_s19 + $0x38] sm:$0xff]  }
 0x160   : > { %v1133_v33 = vadd.f32 %v1132_v31, %v5601_v14  ;;  %v4607_v37 = vpop.f32.mrb[63].mxu1  ;;  %v5168_v56 = vld [vmem:[%s5529_s12 + $0x40] sm:$0xff]  }
 0x161   : > { %4899 = vmatmul.mubr.msk.bf16.gmra.mrb[168].mxu0 %vm705_vm2, %v5163_v26 }
 0x162   : > { %4841 = vmatmul.mubr.msk.bf16.gmra.mrb[168].mxu1 %vm705_vm2, %v5162_v30  ;;  %4902 = vmatprep.mubr.msk.bf16.mxu0 %vm5222_vm1, %v5221_v1 }
 0x163   : > { %4844 = vmatprep.mubr.msk.bf16.mxu1 %vm5222_vm1, %v5221_v1 }
 0x164   : > { %v1437_v8 = vpop.f32.mrb[64].mxu0 }
 0x165   : > { %v1137_v39 = vpop.f32.mrb[64].mxu1  ;;  %v5851_v42 = vadd.f32 %v1437_v8, %v1130_v22  ;;  %v4668_v60 = vpop.f32.mrb[65].mxu0 }
 0x166   : > { %v1138_v45 = vadd.f32 %v1137_v39, %v5611_v18  ;;  %v4610_v14 = vpop.f32.mrb[65].mxu1  ;;  %v1440_v36 = vpop.f32.mrb[66].mxu0 }
 0x167   : > { %v1140_v47 = vpop.f32.mrb[66].mxu1  ;;  %v5856_v49 = vadd.f32 %v1440_v36, %v1133_v33  ;;  %v4669_v3 = vpop.f32.mrb[67].mxu0  ;;  %v5171_v36 = vld [vmem:[%s5546_s19 + $0x40] sm:$0xff]  }
 0x168   : > { %v1141_v51 = vadd.f32 %v1140_v47, %v5617_v24  ;;  %v4611_v57 = vpop.f32.mrb[67].mxu1  ;;  %v5170_v3 = vld [vmem:[%s5529_s12 + $0x48] sm:$0xff]  }
 0x169   : > { %4903 = vmatmul.mubr.msk.bf16.gmra.mrb[172].mxu0 %vm705_vm2, %v5165_v43 }
 0x16a   : > { %4845 = vmatmul.mubr.msk.bf16.gmra.mrb[172].mxu1 %vm705_vm2, %v5164_v40  ;;  %4906 = vmatprep.mubr.msk.bf16.mxu0 %vm5222_vm1, %v5221_v1 }
 0x16b   : > { %4848 = vmatprep.mubr.msk.bf16.mxu1 %vm5222_vm1, %v5221_v1 }
 0x16c   : > { %v1445_v18 = vpop.f32.mrb[68].mxu0 }
 0x16d   : > { %v1145_v16 = vpop.f32.mrb[68].mxu1  ;;  %v5865_v59 = vadd.f32 %v1445_v18, %v1138_v45  ;;  %v4672_v9 = vpop.f32.mrb[69].mxu0 }
 0x16e   : > { %v1146_v20 = vadd.f32 %v1145_v16, %v5627_v28  ;;  %v4614_v24 = vpop.f32.mrb[69].mxu1  ;;  %v1448_v2 = vpop.f32.mrb[70].mxu0 }
 0x16f   : > { %v1148_v7 = vpop.f32.mrb[70].mxu1  ;;  %v5870_v11 = vadd.f32 %v1448_v2, %v1141_v51  ;;  %v4673_v19 = vpop.f32.mrb[71].mxu0  ;;  %v5173_v2 = vld [vmem:[%s5546_s19 + $0x48] sm:$0xff]  }
 0x170   : > { %v1149_v13 = vadd.f32 %v1148_v7, %v5633_v34  ;;  %v4615_v50 = vpop.f32.mrb[71].mxu1  ;;  %v5172_v19 = vld [vmem:[%s5529_s12 + $0x50] sm:$0xff]  }
 0x171   : > { %4907 = vmatmul.mubr.msk.bf16.gmra.mrb[176].mxu0 %vm705_vm2, %v5167_v62 }
 0x172   : > { %4849 = vmatmul.mubr.msk.bf16.gmra.mrb[176].mxu1 %vm705_vm2, %v5166_v46  ;;  %4910 = vmatprep.mubr.msk.bf16.mxu0 %vm5222_vm1, %v5221_v1 }
 0x173   : > { %4852 = vmatprep.mubr.msk.bf16.mxu1 %vm5222_vm1, %v5221_v1 }
 0x174   : > { %v1453_v28 = vpop.f32.mrb[72].mxu0 }
 0x175   : > { %v1153_v26 = vpop.f32.mrb[72].mxu1  ;;  %v5879_v22 = vadd.f32 %v1453_v28, %v1146_v20  ;;  %v4676_v29 = vpop.f32.mrb[73].mxu0 }
 0x176   : > { %v1154_v30 = vadd.f32 %v1153_v26, %v5643_v38  ;;  %v4618_v34 = vpop.f32.mrb[73].mxu1  ;;  %v1456_v31 = vpop.f32.mrb[74].mxu0 }
 0x177   : > { %v1156_v33 = vpop.f32.mrb[74].mxu1  ;;  %v5884_v37 = vadd.f32 %v1456_v31, %v1149_v13  ;;  %v4677_v8 = vpop.f32.mrb[75].mxu0  ;;  %v5175_v31 = vld [vmem:[%s5546_s19 + $0x50] sm:$0xff]  }
 0x178   : > { %v1157_v39 = vadd.f32 %v1156_v33, %v5649_v44  ;;  %v4619_v60 = vpop.f32.mrb[75].mxu1  ;;  %v5174_v8 = vld [vmem:[%s5529_s12 + $0x58] sm:$0xff]  }
 0x179   : > { %4911 = vmatmul.mubr.msk.bf16.gmra.mrb[180].mxu0 %vm705_vm2, %v5169_v23 }
 0x17a   : > { %4853 = vmatmul.mubr.msk.bf16.gmra.mrb[180].mxu1 %vm705_vm2, %v5168_v56  ;;  %4914 = vmatprep.mubr.msk.bf16.mxu0 %vm5222_vm1, %v5221_v1 }
 0x17b   : > { %4856 = vmatprep.mubr.msk.bf16.mxu1 %vm5222_vm1, %v5221_v1 }
 0x17c   : > { %v1461_v38 = vpop.f32.mrb[76].mxu0 }
 0x17d   : > { %v1161_v43 = vpop.f32.mrb[76].mxu1  ;;  %v5893_v45 = vadd.f32 %v1461_v38, %v1154_v30  ;;  %v4680_v14 = vpop.f32.mrb[77].mxu0 }
 0x17e   : > { %v1162_v40 = vadd.f32 %v1161_v43, %v5659_v48  ;;  %v4622_v44 = vpop.f32.mrb[77].mxu1  ;;  %v1464_v47 = vpop.f32.mrb[78].mxu0 }
 0x17f   : > { %v1164_v51 = vpop.f32.mrb[78].mxu1  ;;  %v5898_v57 = vadd.f32 %v1464_v47, %v1157_v39  ;;  %v4681_v18 = vpop.f32.mrb[79].mxu0  ;;  %v5177_v47 = vld [vmem:[%s5546_s19 + $0x58] sm:$0xff]  }
 0x180   : > { %v1165_v16 = vadd.f32 %v1164_v51, %v5665_v54  ;;  %v4623_v9 = vpop.f32.mrb[79].mxu1  ;;  %v5176_v18 = vld [vmem:[%s5529_s12 + $0x60] sm:$0xff]  }
 0x181   : > { %4915 = vmatmul.mubr.msk.bf16.gmra.mrb[184].mxu0 %vm705_vm2, %v5171_v36 }
 0x182   : > { %4857 = vmatmul.mubr.msk.bf16.gmra.mrb[184].mxu1 %vm705_vm2, %v5170_v3  ;;  %4918 = vmatprep.mubr.msk.bf16.mxu0 %vm5222_vm1, %v5221_v1 }
 0x183   : > { %4860 = vmatprep.mubr.msk.bf16.mxu1 %vm5222_vm1, %v5221_v1 }
 0x184   : > { %v1469_v48 = vpop.f32.mrb[80].mxu0 }
 0x185   : > { %v1169_v62 = vpop.f32.mrb[80].mxu1  ;;  %v5907_v20 = vadd.f32 %v1469_v48, %v1162_v40  ;;  %v4684_v24 = vpop.f32.mrb[81].mxu0 }
 0x186   : > { %v1170_v46 = vadd.f32 %v1169_v62, %v5675_v58  ;;  %v4626_v54 = vpop.f32.mrb[81].mxu1  ;;  %v1472_v7 = vpop.f32.mrb[82].mxu0 }
 0x187   : > { %v1172_v13 = vpop.f32.mrb[82].mxu1  ;;  %v5912_v50 = vadd.f32 %v1472_v7, %v1165_v16  ;;  %v4685_v28 = vpop.f32.mrb[83].mxu0  ;;  %v5179_v7 = vld [vmem:[%s5546_s19 + $0x60] sm:$0xff]  }
 0x188   : > { %v1173_v26 = vadd.f32 %v1172_v13, %v5681_v0  ;;  %v4627_v29 = vpop.f32.mrb[83].mxu1  ;;  %v5178_v28 = vld [vmem:[%s5529_s12 + $0x68] sm:$0xff]  }
 0x189   : > { %4919 = vmatmul.mubr.msk.bf16.gmra.mrb[188].mxu0 %vm705_vm2, %v5173_v2 }
 0x18a   : > { %4861 = vmatmul.mubr.msk.bf16.gmra.mrb[188].mxu1 %vm705_vm2, %v5172_v19  ;;  %4922 = vmatprep.mubr.msk.bf16.mxu0 %vm5222_vm1, %v5221_v1 }
 0x18b   : > { %4864 = vmatprep.mubr.msk.bf16.mxu1 %vm5222_vm1, %v5221_v1 }
 0x18c   : > { %v1477_v58 = vpop.f32.mrb[84].mxu0 }
 0x18d   : > { %v1177_v23 = vpop.f32.mrb[84].mxu1  ;;  %v5921_v30 = vadd.f32 %v1477_v58, %v1170_v46  ;;  %v4688_v34 = vpop.f32.mrb[85].mxu0 }
 0x18e   : > { %v1178_v56 = vadd.f32 %v1177_v23, %v5691_v5  ;;  %v4630_v0 = vpop.f32.mrb[85].mxu1  ;;  %v1480_v33 = vpop.f32.mrb[86].mxu0 }
 0x18f   : > { %v1180_v39 = vpop.f32.mrb[86].mxu1  ;;  %v5926_v60 = vadd.f32 %v1480_v33, %v1173_v26  ;;  %v4689_v38 = vpop.f32.mrb[87].mxu0  ;;  %v5181_v33 = vld [vmem:[%s5546_s19 + $0x68] sm:$0xff]  }
 0x190   : > { %v1181_v43 = vadd.f32 %v1180_v39, %v5697_v15  ;;  %v4631_v14 = vpop.f32.mrb[87].mxu1  ;;  %v5180_v38 = vld [vmem:[%s5529_s12 + $0x70] sm:$0xff]  }
 0x191   : > { %4923 = vmatmul.mubr.msk.bf16.gmra.mrb[192].mxu0 %vm705_vm2, %v5175_v31 }
 0x192   : > { %4865 = vmatmul.mubr.msk.bf16.gmra.mrb[192].mxu1 %vm705_vm2, %v5174_v8  ;;  %4926 = vmatprep.mubr.msk.bf16.mxu0 %vm5222_vm1, %v5221_v1 }
 0x193   : > { %4868 = vmatprep.mubr.msk.bf16.mxu1 %vm5222_vm1, %v5221_v1 }
 0x194   : > { %v1485_v5 = vpop.f32.mrb[88].mxu0 }
 0x195   : > { %v5935_v36 = vadd.f32 %v1485_v5, %v1178_v56  ;;  %v1711_v40 = vpop.f32.mrb[88].mxu1  ;;  %v4692_v44 = vpop.f32.mrb[89].mxu0 }
 0x196   : > { %v1830_v3 = vadd.f32 %v1711_v40, %v5719_v41  ;;  %v4698_v15 = vpop.f32.mrb[89].mxu1  ;;  %v1488_v51 = vpop.f32.mrb[90].mxu0 }
 0x197   : > { %v5940_v16 = vadd.f32 %v1488_v51, %v1181_v43  ;;  %v1714_v9 = vpop.f32.mrb[90].mxu1  ;;  %v4693_v48 = vpop.f32.mrb[91].mxu0  ;;  %v5182_v51 = vld [vmem:[%s5546_s19 + $0x70] sm:$0xff]   ;;  %s6278_s19 = scalar_lea.vmem %s6363_s11, %s5306_s24 }
 0x198   : > { %v1831_v62 = vadd.f32 %v1714_v9, %v5724_v52  ;;  %v4699_v24 = vpop.f32.mrb[91].mxu1  ;;  %v5183_v48 = vld [vmem:[%s5744_s25] sm:$0xff]  }
 0x199   : > { %4927 = vmatmul.mubr.msk.bf16.gmra.mrb[196].mxu0 %vm705_vm2, %v5177_v47 }
 0x19a   : > { %4869 = vmatmul.mubr.msk.bf16.gmra.mrb[196].mxu1 %vm705_vm2, %v5176_v18  ;;  %4930 = vmatprep.mubr.msk.bf16.mxu0 %vm5222_vm1, %v5221_v1 }
 0x19b   : > { %4872 = vmatprep.mubr.msk.bf16.mxu1 %vm5222_vm1, %v5221_v1 }
 0x19c   : > { %v2049_v41 = vpop.f32.mrb[92].mxu0 }
 0x19d   : > { %v1719_v2 = vpop.f32.mrb[92].mxu1  ;;  %v5949_v46 = vadd.f32 %v2049_v41, %v1830_v3  ;;  %v4760_v54 = vpop.f32.mrb[93].mxu0 }
 0x19e   : > { %v1832_v19 = vadd.f32 %v1719_v2, %v5733_v61  ;;  %v4702_v52 = vpop.f32.mrb[93].mxu1  ;;  %v2052_v13 = vpop.f32.mrb[94].mxu0 }
 0x19f   : > { %v1722_v26 = vpop.f32.mrb[94].mxu1  ;;  %v5954_v29 = vadd.f32 %v2052_v13, %v1831_v62  ;;  %v4761_v58 = vpop.f32.mrb[95].mxu0  ;;  %v5185_v13 = vld [vmem:[%s5767_s29] sm:$0xff]  }
 0x1a0   : > { %v1833_v23 = vadd.f32 %v1722_v26, %v5738_v12  ;;  %v4703_v34 = vpop.f32.mrb[95].mxu1  ;;  %v5184_v58 = vld [vmem:[%s5744_s25 + $0x8] sm:$0xff]  }
 0x1a1   : > { %4931 = vmatmul.mubr.msk.bf16.gmra.mrb[200].mxu0 %vm705_vm2, %v5179_v7 }
 0x1a2   : > { %4873 = vmatmul.mubr.msk.bf16.gmra.mrb[200].mxu1 %vm705_vm2, %v5178_v28  ;;  %4934 = vmatprep.mubr.msk.bf16.mxu0 %vm5222_vm1, %v5221_v1 }
 0x1a3   : > { %4876 = vmatprep.mubr.msk.bf16.mxu1 %vm5222_vm1, %v5221_v1 }
 0x1a4   : > { %v2057_v61 = vpop.f32.mrb[96].mxu0 }
 0x1a5   : > { %v1727_v31 = vpop.f32.mrb[96].mxu1  ;;  %v5963_v56 = vadd.f32 %v2057_v61, %v1832_v19  ;;  %v4764_v0 = vpop.f32.mrb[97].mxu0 }
 0x1a6   : > { %v1834_v8 = vadd.f32 %v1727_v31, %v5758_v27  ;;  %v4706_v12 = vpop.f32.mrb[97].mxu1  ;;  %v2060_v39 = vpop.f32.mrb[98].mxu0 }
 0x1a7   : > { %v1730_v43 = vpop.f32.mrb[98].mxu1  ;;  %v5968_v14 = vadd.f32 %v2060_v39, %v1833_v23  ;;  %v4765_v5 = vpop.f32.mrb[99].mxu0  ;;  %v5187_v39 = vld [vmem:[%s5767_s29 + $0x8] sm:$0xff]  }
 0x1a8   : > { %v1835_v40 = vadd.f32 %v1730_v43, %v5761_v6  ;;  %v4707_v44 = vpop.f32.mrb[99].mxu1  ;;  %v5186_v5 = vld [vmem:[%s5744_s25 + $0x10] sm:$0xff]  }
 0x1a9   : > { %4935 = vmatmul.mubr.msk.bf16.gmra.mrb[204].mxu0 %vm705_vm2, %v5181_v33 }
 0x1aa   : > { %4877 = vmatmul.mubr.msk.bf16.gmra.mrb[204].mxu1 %vm705_vm2, %v5180_v38  ;;  %4938 = vmatprep.mubr.msk.bf16.mxu0 %vm5222_vm1, %v5221_v1 }
 0x1ab   : > { %4944 = vmatprep.mubr.msk.bf16.mxu1 %vm5222_vm1, %v5221_v1 }
 0x1ac   : > { %v2065_v27 = vpop.f32.mrb[100].mxu0 }
 0x1ad   : > { %v1735_v47 = vpop.f32.mrb[100].mxu1  ;;  %v5977_v3 = vadd.f32 %v2065_v27, %v1834_v8  ;;  %v4768_v15 = vpop.f32.mrb[101].mxu0 }
 0x1ae   : > { %v1836_v18 = vadd.f32 %v1735_v47, %v5783_v53  ;;  %v4710_v6 = vpop.f32.mrb[101].mxu1  ;;  %v2068_v9 = vpop.f32.mrb[102].mxu0 }
 0x1af   : > { %v1738_v62 = vpop.f32.mrb[102].mxu1  ;;  %v5982_v24 = vadd.f32 %v2068_v9, %v1835_v40  ;;  %v4769_v41 = vpop.f32.mrb[103].mxu0  ;;  %v5189_v9 = vld [vmem:[%s5767_s29 + $0x10] sm:$0xff]  }
 0x1b0   : > { %v1837_v2 = vadd.f32 %v1738_v62, %v5786_v63  ;;  %v4711_v54 = vpop.f32.mrb[103].mxu1  ;;  %v5188_v41 = vld [vmem:[%s5744_s25 + $0x18] sm:$0xff]  }
 0x1b1   : > { %4939 = vmatmul.mubr.msk.bf16.gmra.mrb[208].mxu0 %vm705_vm2, %v5182_v51 }
 0x1b2   : > { %4945 = vmatmul.mubr.msk.bf16.vlgmr.msra.gmra.mrb[208].mxu1 %vm705_vm2, %v5183_v48  ;;  %5006 = vmatprep.mubr.msk.bf16.mxu0 %vm5222_vm1, %v5221_v1 }
 0x1b3   : > { %4948 = vmatprep.mubr.msk.bf16.mxu1 %vm5222_vm1, %v5221_v1 }
 0x1b4   : > { %v2073_v53 = vpop.f32.mrb[104].mxu0 }
 0x1b5   : > { %v1743_v7 = vpop.f32.mrb[104].mxu1  ;;  %v5991_v19 = vadd.f32 %v2073_v53, %v1836_v18  ;;  %v4772_v52 = vpop.f32.mrb[105].mxu0 }
 0x1b6   : > { %v1838_v28 = vadd.f32 %v1743_v7, %v5797_v17  ;;  %v4714_v63 = vpop.f32.mrb[105].mxu1  ;;  %v2076_v26 = vpop.f32.mrb[106].mxu0 }
 0x1b7   : > { %v1746_v23 = vpop.f32.mrb[106].mxu1  ;;  %v5996_v34 = vadd.f32 %v2076_v26, %v1837_v2  ;;  %v4773_v61 = vpop.f32.mrb[107].mxu0  ;;  %v5191_v26 = vld [vmem:[%s5767_s29 + $0x18] sm:$0xff]  }
 0x1b8   : > { %v1839_v31 = vadd.f32 %v1746_v23, %v5800_v25  ;;  %v4715_v0 = vpop.f32.mrb[107].mxu1  ;;  %v5190_v61 = vld [vmem:[%s5744_s25 + $0x20] sm:$0xff]  }
 0x1b9   : > { %5007 = vmatmul.mubr.msk.bf16.vlgmr.msra.gmra.mrb[212].mxu0 %vm705_vm2, %v5185_v13 }
 0x1ba   : > { %4949 = vmatmul.mubr.msk.bf16.gmra.mrb[212].mxu1 %vm705_vm2, %v5184_v58  ;;  %5010 = vmatprep.mubr.msk.bf16.mxu0 %vm5222_vm1, %v5221_v1 }
 0x1bb   : > { %4952 = vmatprep.mubr.msk.bf16.mxu1 %vm5222_vm1, %v5221_v1 }
 0x1bc   : > { %v2081_v17 = vpop.f32.mrb[108].mxu0 }
 0x1bd   : > { %v1751_v33 = vpop.f32.mrb[108].mxu1  ;;  %v6005_v8 = vadd.f32 %v2081_v17, %v1838_v28  ;;  %v4776_v12 = vpop.f32.mrb[109].mxu0 }
 0x1be   : > { %v1840_v38 = vadd.f32 %v1751_v33, %v5809_v35  ;;  %v4718_v25 = vpop.f32.mrb[109].mxu1  ;;  %v2084_v43 = vpop.f32.mrb[110].mxu0 }
 0x1bf   : > { %v1754_v40 = vpop.f32.mrb[110].mxu1  ;;  %v6010_v44 = vadd.f32 %v2084_v43, %v1839_v31  ;;  %v4777_v27 = vpop.f32.mrb[111].mxu0  ;;  %v5193_v43 = vld [vmem:[%s5767_s29 + $0x20] sm:$0xff]  }
 0x1c0   : > { %v1841_v47 = vadd.f32 %v1754_v40, %v5814_v10  ;;  %v4719_v15 = vpop.f32.mrb[111].mxu1  ;;  %v5192_v27 = vld [vmem:[%s5744_s25 + $0x28] sm:$0xff]  }
 0x1c1   : > { %5011 = vmatmul.mubr.msk.bf16.gmra.mrb[216].mxu0 %vm705_vm2, %v5187_v39 }
 0x1c2   : > { %4953 = vmatmul.mubr.msk.bf16.gmra.mrb[216].mxu1 %vm705_vm2, %v5186_v5  ;;  %5014 = vmatprep.mubr.msk.bf16.mxu0 %vm5222_vm1, %v5221_v1 }
 0x1c3   : > { %4956 = vmatprep.mubr.msk.bf16.mxu1 %vm5222_vm1, %v5221_v1 }
 0x1c4   : > { %v2089_v35 = vpop.f32.mrb[112].mxu0 }
 0x1c5   : > { %v1759_v51 = vpop.f32.mrb[112].mxu1  ;;  %v6019_v18 = vadd.f32 %v2089_v35, %v1840_v38  ;;  %v4780_v6 = vpop.f32.mrb[113].mxu0 }
 0x1c6   : > { %v1842_v48 = vadd.f32 %v1759_v51, %v5823_v55  ;;  %v4722_v10 = vpop.f32.mrb[113].mxu1  ;;  %v2092_v62 = vpop.f32.mrb[114].mxu0 }
 0x1c7   : > { %v1762_v2 = vpop.f32.mrb[114].mxu1  ;;  %v6024_v54 = vadd.f32 %v2092_v62, %v1841_v47  ;;  %v4781_v53 = vpop.f32.mrb[115].mxu0  ;;  %v5195_v62 = vld [vmem:[%s5767_s29 + $0x28] sm:$0xff]  }
 0x1c8   : > { %v1843_v7 = vadd.f32 %v1762_v2, %v5828_v4  ;;  %v4723_v52 = vpop.f32.mrb[115].mxu1  ;;  %v5194_v53 = vld [vmem:[%s5744_s25 + $0x30] sm:$0xff]  }
 0x1c9   : > { %5015 = vmatmul.mubr.msk.bf16.gmra.mrb[220].mxu0 %vm705_vm2, %v5189_v9 }
 0x1ca   : > { %4957 = vmatmul.mubr.msk.bf16.gmra.mrb[220].mxu1 %vm705_vm2, %v5188_v41  ;;  %5018 = vmatprep.mubr.msk.bf16.mxu0 %vm5222_vm1, %v5221_v1 }
 0x1cb   : > { %4960 = vmatprep.mubr.msk.bf16.mxu1 %vm5222_vm1, %v5221_v1 }
 0x1cc   : > { %v2097_v55 = vpop.f32.mrb[116].mxu0 }
 0x1cd   : > { %v1767_v13 = vpop.f32.mrb[116].mxu1  ;;  %v6033_v28 = vadd.f32 %v2097_v55, %v1842_v48  ;;  %v4784_v63 = vpop.f32.mrb[117].mxu0 }
 0x1ce   : > { %v1844_v58 = vadd.f32 %v1767_v13, %v5837_v21  ;;  %v4726_v4 = vpop.f32.mrb[117].mxu1  ;;  %v2100_v23 = vpop.f32.mrb[118].mxu0 }
 0x1cf   : > { %v1770_v31 = vpop.f32.mrb[118].mxu1  ;;  %v6038_v0 = vadd.f32 %v2100_v23, %v1843_v7  ;;  %v4785_v17 = vpop.f32.mrb[119].mxu0  ;;  %v5197_v23 = vld [vmem:[%s5767_s29 + $0x30] sm:$0xff]  }
 0x1d0   : > { %v1845_v33 = vadd.f32 %v1770_v31, %v5842_v32  ;;  %v4727_v12 = vpop.f32.mrb[119].mxu1  ;;  %v5196_v17 = vld [vmem:[%s5744_s25 + $0x38] sm:$0xff]  }
 0x1d1   : > { %5019 = vmatmul.mubr.msk.bf16.gmra.mrb[224].mxu0 %vm705_vm2, %v5191_v26 }
 0x1d2   : > { %4961 = vmatmul.mubr.msk.bf16.gmra.mrb[224].mxu1 %vm705_vm2, %v5190_v61  ;;  %5022 = vmatprep.mubr.msk.bf16.mxu0 %vm5222_vm1, %v5221_v1 }
 0x1d3   : > { %4964 = vmatprep.mubr.msk.bf16.mxu1 %vm5222_vm1, %v5221_v1 }
 0x1d4   : > { %v2105_v21 = vpop.f32.mrb[120].mxu0 }
 0x1d5   : > { %v1775_v39 = vpop.f32.mrb[120].mxu1  ;;  %v6047_v38 = vadd.f32 %v2105_v21, %v1844_v58  ;;  %v4788_v25 = vpop.f32.mrb[121].mxu0 }
 0x1d6   : > { %v1846_v5 = vadd.f32 %v1775_v39, %v5851_v42  ;;  %v4730_v32 = vpop.f32.mrb[121].mxu1  ;;  %v2108_v40 = vpop.f32.mrb[122].mxu0 }
 0x1d7   : > { %v1778_v47 = vpop.f32.mrb[122].mxu1  ;;  %v6052_v15 = vadd.f32 %v2108_v40, %v1845_v33  ;;  %v4789_v35 = vpop.f32.mrb[123].mxu0  ;;  %v5199_v40 = vld [vmem:[%s5767_s29 + $0x38] sm:$0xff]  }
 0x1d8   : > { %v1847_v51 = vadd.f32 %v1778_v47, %v5856_v49  ;;  %v4731_v6 = vpop.f32.mrb[123].mxu1  ;;  %v5198_v35 = vld [vmem:[%s5744_s25 + $0x40] sm:$0xff]  }
 0x1d9   : > { %5023 = vmatmul.mubr.msk.bf16.gmra.mrb[228].mxu0 %vm705_vm2, %v5193_v43 }
 0x1da   : > { %4965 = vmatmul.mubr.msk.bf16.gmra.mrb[228].mxu1 %vm705_vm2, %v5192_v27  ;;  %5026 = vmatprep.mubr.msk.bf16.mxu0 %vm5222_vm1, %v5221_v1 }
 0x1db   : > { %4968 = vmatprep.mubr.msk.bf16.mxu1 %vm5222_vm1, %v5221_v1 }
 0x1dc   : > { %v2113_v42 = vpop.f32.mrb[124].mxu0 }
 0x1dd   : > { %v1783_v9 = vpop.f32.mrb[124].mxu1  ;;  %v6061_v48 = vadd.f32 %v2113_v42, %v1846_v5  ;;  %v4792_v10 = vpop.f32.mrb[125].mxu0 }
 0x1de   : > { %v1848_v41 = vadd.f32 %v1783_v9, %v5865_v59  ;;  %v4734_v49 = vpop.f32.mrb[125].mxu1  ;;  %v2116_v2 = vpop.f32.mrb[126].mxu0 }
 0x1df   : > { %v1786_v7 = vpop.f32.mrb[126].mxu1  ;;  %v6066_v52 = vadd.f32 %v2116_v2, %v1847_v51  ;;  %v4793_v55 = vpop.f32.mrb[127].mxu0  ;;  %v5201_v2 = vld [vmem:[%s5767_s29 + $0x40] sm:$0xff]  }
 0x1e0   : > { %v1849_v13 = vadd.f32 %v1786_v7, %v5870_v11  ;;  %v4735_v63 = vpop.f32.mrb[127].mxu1  ;;  %v5200_v55 = vld [vmem:[%s5744_s25 + $0x48] sm:$0xff]  }
 0x1e1   : > { %5027 = vmatmul.mubr.msk.bf16.gmra.mrb[232].mxu0 %vm705_vm2, %v5195_v62 }
 0x1e2   : > { %4969 = vmatmul.mubr.msk.bf16.gmra.mrb[232].mxu1 %vm705_vm2, %v5194_v53  ;;  %5030 = vmatprep.mubr.msk.bf16.mxu0 %vm5222_vm1, %v5221_v1 }
 0x1e3   : > { %4972 = vmatprep.mubr.msk.bf16.mxu1 %vm5222_vm1, %v5221_v1 }
 0x1e4   : > { %v2121_v59 = vpop.f32.mrb[128].mxu0 }
 0x1e5   : > { %v1791_v26 = vpop.f32.mrb[128].mxu1  ;;  %v6075_v58 = vadd.f32 %v2121_v59, %v1848_v41  ;;  %v4796_v4 = vpop.f32.mrb[129].mxu0 }
 0x1e6   : > { %v1850_v61 = vadd.f32 %v1791_v26, %v5879_v22  ;;  %v4738_v11 = vpop.f32.mrb[129].mxu1  ;;  %v2124_v31 = vpop.f32.mrb[130].mxu0 }
 0x1e7   : > { %v1794_v33 = vpop.f32.mrb[130].mxu1  ;;  %v6080_v12 = vadd.f32 %v2124_v31, %v1849_v13  ;;  %v4797_v21 = vpop.f32.mrb[131].mxu0  ;;  %v5203_v31 = vld [vmem:[%s5767_s29 + $0x48] sm:$0xff]  }
 0x1e8   : > { %v1851_v39 = vadd.f32 %v1794_v33, %v5884_v37  ;;  %v4739_v25 = vpop.f32.mrb[131].mxu1  ;;  %v5202_v21 = vld [vmem:[%s5744_s25 + $0x50] sm:$0xff]  }
 0x1e9   : > { %5031 = vmatmul.mubr.msk.bf16.gmra.mrb[236].mxu0 %vm705_vm2, %v5197_v23 }
 0x1ea   : > { %4973 = vmatmul.mubr.msk.bf16.gmra.mrb[236].mxu1 %vm705_vm2, %v5196_v17  ;;  %5034 = vmatprep.mubr.msk.bf16.mxu0 %vm5222_vm1, %v5221_v1 }
 0x1eb   : > { %4976 = vmatprep.mubr.msk.bf16.mxu1 %vm5222_vm1, %v5221_v1 }
 0x1ec   : > { %v2129_v22 = vpop.f32.mrb[132].mxu0 }
 0x1ed   : > { %v1799_v43 = vpop.f32.mrb[132].mxu1  ;;  %v6089_v5 = vadd.f32 %v2129_v22, %v1850_v61  ;;  %v4800_v32 = vpop.f32.mrb[133].mxu0 }
 0x1ee   : > { %v1852_v27 = vadd.f32 %v1799_v43, %v5893_v45  ;;  %v4742_v37 = vpop.f32.mrb[133].mxu1  ;;  %v2132_v47 = vpop.f32.mrb[134].mxu0 }
 0x1ef   : > { %v1802_v51 = vpop.f32.mrb[134].mxu1  ;;  %v6094_v6 = vadd.f32 %v2132_v47, %v1851_v39  ;;  %v4801_v42 = vpop.f32.mrb[135].mxu0  ;;  %v5205_v47 = vld [vmem:[%s5767_s29 + $0x50] sm:$0xff]  }
 0x1f0   : > { %v1853_v9 = vadd.f32 %v1802_v51, %v5898_v57  ;;  %v4743_v10 = vpop.f32.mrb[135].mxu1  ;;  %v5204_v42 = vld [vmem:[%s5744_s25 + $0x58] sm:$0xff]  }
 0x1f1   : > { %5035 = vmatmul.mubr.msk.bf16.gmra.mrb[240].mxu0 %vm705_vm2, %v5199_v40 }
 0x1f2   : > { %4977 = vmatmul.mubr.msk.bf16.gmra.mrb[240].mxu1 %vm705_vm2, %v5198_v35  ;;  %5038 = vmatprep.mubr.msk.bf16.mxu0 %vm5222_vm1, %v5221_v1 }
 0x1f3   : > { %4980 = vmatprep.mubr.msk.bf16.mxu1 %vm5222_vm1, %v5221_v1 }
 0x1f4   : > { %v2137_v45 = vpop.f32.mrb[136].mxu0 }
 0x1f5   : > { %v1807_v62 = vpop.f32.mrb[136].mxu1  ;;  %v6103_v41 = vadd.f32 %v2137_v45, %v1852_v27  ;;  %v4804_v49 = vpop.f32.mrb[137].mxu0 }
 0x1f6   : > { %v1854_v53 = vadd.f32 %v1807_v62, %v5907_v20  ;;  %v4746_v57 = vpop.f32.mrb[137].mxu1  ;;  %v2140_v7 = vpop.f32.mrb[138].mxu0 }
 0x1f7   : > { %v1810_v13 = vpop.f32.mrb[138].mxu1  ;;  %v6108_v63 = vadd.f32 %v2140_v7, %v1853_v9  ;;  %v4805_v59 = vpop.f32.mrb[139].mxu0  ;;  %v5207_v7 = vld [vmem:[%s5767_s29 + $0x58] sm:$0xff]  }
 0x1f8   : > { %v1855_v26 = vadd.f32 %v1810_v13, %v5912_v50  ;;  %v4747_v4 = vpop.f32.mrb[139].mxu1  ;;  %v5206_v59 = vld [vmem:[%s5744_s25 + $0x60] sm:$0xff]  }
 0x1f9   : > { %5039 = vmatmul.mubr.msk.bf16.gmra.mrb[244].mxu0 %vm705_vm2, %v5201_v2 }
 0x1fa   : > { %4981 = vmatmul.mubr.msk.bf16.gmra.mrb[244].mxu1 %vm705_vm2, %v5200_v55  ;;  %5042 = vmatprep.mubr.msk.bf16.mxu0 %vm5222_vm1, %v5221_v1 }
 0x1fb   : > { %4984 = vmatprep.mubr.msk.bf16.mxu1 %vm5222_vm1, %v5221_v1 }
 0x1fc   : > { %v2145_v20 = vpop.f32.mrb[140].mxu0 }
 0x1fd   : > { %v1815_v23 = vpop.f32.mrb[140].mxu1  ;;  %v6117_v61 = vadd.f32 %v2145_v20, %v1854_v53  ;;  %v4808_v11 = vpop.f32.mrb[141].mxu0 }
 0x1fe   : > { %v1856_v17 = vadd.f32 %v1815_v23, %v5921_v30  ;;  %v4750_v50 = vpop.f32.mrb[141].mxu1  ;;  %v2148_v33 = vpop.f32.mrb[142].mxu0 }
 0x1ff   : > { %v1818_v39 = vpop.f32.mrb[142].mxu1  ;;  %v6122_v25 = vadd.f32 %v2148_v33, %v1855_v26  ;;  %v4809_v22 = vpop.f32.mrb[143].mxu0  ;;  %v5209_v33 = vld [vmem:[%s5767_s29 + $0x60] sm:$0xff]  }
 0x200   : > { %v1857_v43 = vadd.f32 %v1818_v39, %v5926_v60  ;;  %v4751_v32 = vpop.f32.mrb[143].mxu1  ;;  %v5208_v22 = vld [vmem:[%s5744_s25 + $0x68] sm:$0xff]  }
 0x201   : > { %5043 = vmatmul.mubr.msk.bf16.gmra.mrb[248].mxu0 %vm705_vm2, %v5203_v31 }
 0x202   : > { %4985 = vmatmul.mubr.msk.bf16.gmra.mrb[248].mxu1 %vm705_vm2, %v5202_v21  ;;  %5046 = vmatprep.mubr.msk.bf16.mxu0 %vm5222_vm1, %v5221_v1 }
 0x203   : > { %4988 = vmatprep.mubr.msk.bf16.mxu1 %vm5222_vm1, %v5221_v1 }
 0x204   : > { %v2153_v30 = vpop.f32.mrb[144].mxu0 }
 0x205   : > { %v1823_v40 = vpop.f32.mrb[144].mxu1  ;;  %v6131_v27 = vadd.f32 %v2153_v30, %v1856_v17  ;;  %v4812_v37 = vpop.f32.mrb[145].mxu0 }
 0x206   : > { %v1858_v35 = vadd.f32 %v1823_v40, %v5935_v36  ;;  %v4754_v60 = vpop.f32.mrb[145].mxu1  ;;  %v2156_v51 = vpop.f32.mrb[146].mxu0 }
 0x207   : > { %v1826_v9 = vpop.f32.mrb[146].mxu1  ;;  %v6136_v10 = vadd.f32 %v2156_v51, %v1857_v43  ;;  %v4813_v45 = vpop.f32.mrb[147].mxu0  ;;  %v5211_v51 = vld [vmem:[%s5767_s29 + $0x68] sm:$0xff]  }
 0x208   : > { %v1859_v62 = vadd.f32 %v1826_v9, %v5940_v16  ;;  %v4755_v49 = vpop.f32.mrb[147].mxu1  ;;  %v5210_v45 = vld [vmem:[%s5744_s25 + $0x70] sm:$0xff]  }
 0x209   : > { %5047 = vmatmul.mubr.msk.bf16.gmra.mrb[252].mxu0 %vm705_vm2, %v5205_v47 }
 0x20a   : > { %4989 = vmatmul.mubr.msk.bf16.gmra.mrb[252].mxu1 %vm705_vm2, %v5204_v42  ;;  %5050 = vmatprep.mubr.msk.bf16.mxu0 %vm5222_vm1, %v5221_v1 }
 0x20b   : > { %4992 = vmatprep.mubr.msk.bf16.mxu1 %vm5222_vm1, %v5221_v1 }
 0x20c   : > { %v2161_v36 = vpop.f32.mrb[148].mxu0 }
 0x20d   : > { %v6145_v2 = vadd.f32 %v2161_v36, %v1858_v35  ;;  %v2387_v53 = vpop.f32.mrb[148].mxu1  ;;  %v4816_v57 = vpop.f32.mrb[149].mxu0 }
 0x20e   : > { %v2506_v55 = vadd.f32 %v2387_v53, %v5949_v46  ;;  %v4822_v16 = vpop.f32.mrb[149].mxu1  ;;  %v2164_v13 = vpop.f32.mrb[150].mxu0 }
 0x20f   : > { %v6150_v26 = vadd.f32 %v2164_v13, %v1859_v62  ;;  %v2390_v4 = vpop.f32.mrb[150].mxu1  ;;  %v4817_v20 = vpop.f32.mrb[151].mxu0  ;;  %v5212_v13 = vld [vmem:[%s5767_s29 + $0x70] sm:$0xff]  }
 0x210   : > { %v2507_v23 = vadd.f32 %v2390_v4, %v5954_v29  ;;  %v4823_v11 = vpop.f32.mrb[151].mxu1 }
 0x211   : > { %5051 = vmatmul.mubr.msk.bf16.gmra.mrb[0].mxu0 %vm705_vm2, %v5207_v7 }
 0x212   : > { %4993 = vmatmul.mubr.msk.bf16.gmra.mrb[0].mxu1 %vm705_vm2, %v5206_v59  ;;  %5054 = vmatprep.mubr.msk.bf16.mxu0 %vm5222_vm1, %v5221_v1 }
 0x213   : > { %4996 = vmatprep.mubr.msk.bf16.mxu1 %vm5222_vm1, %v5221_v1 }
 0x214   : > { %v2725_v46 = vpop.f32.mrb[152].mxu0 }
 0x215   : > { %v2395_v31 = vpop.f32.mrb[152].mxu1  ;;  %v6159_v17 = vadd.f32 %v2725_v46, %v2506_v55  ;;  %v4884_v50 = vpop.f32.mrb[153].mxu0 }
 0x216   : > { %v2508_v21 = vadd.f32 %v2395_v31, %v5963_v56  ;;  %v4826_v29 = vpop.f32.mrb[153].mxu1  ;;  %v2728_v39 = vpop.f32.mrb[154].mxu0 }
 0x217   : > { %v2398_v43 = vpop.f32.mrb[154].mxu1  ;;  %v6164_v32 = vadd.f32 %v2728_v39, %v2507_v23  ;;  %v4885_v30 = vpop.f32.mrb[155].mxu0 }
 0x218   : > { %v2509_v40 = vadd.f32 %v2398_v43, %v5968_v14  ;;  %v4827_v37 = vpop.f32.mrb[155].mxu1 }
 0x219   : > { %5055 = vmatmul.mubr.msk.bf16.gmra.mrb[4].mxu0 %vm705_vm2, %v5209_v33 }
 0x21a   : > { %4997 = vmatmul.mubr.msk.bf16.gmra.mrb[4].mxu1 %vm705_vm2, %v5208_v22  ;;  %5058 = vmatprep.mubr.msk.bf16.mxu0 %vm5222_vm1, %v5221_v1 }
 0x21b   : > { %5000 = vmatprep.mubr.msk.bf16.mxu1 %vm5222_vm1, %v5221_v1 }
 0x21c   : > { %v2733_v56 = vpop.f32.mrb[156].mxu0 }
 0x21d   : > { %v2403_v47 = vpop.f32.mrb[156].mxu1  ;;  %v6173_v35 = vadd.f32 %v2733_v56, %v2508_v21  ;;  %v4888_v60 = vpop.f32.mrb[157].mxu0 }
 0x21e   : > { %v2510_v42 = vadd.f32 %v2403_v47, %v5977_v3  ;;  %v4830_v14 = vpop.f32.mrb[157].mxu1  ;;  %v2736_v9 = vpop.f32.mrb[158].mxu0 }
 0x21f   : > { %v2406_v62 = vpop.f32.mrb[158].mxu1  ;;  %v6178_v49 = vadd.f32 %v2736_v9, %v2509_v40  ;;  %v4889_v36 = vpop.f32.mrb[159].mxu0 }
 0x220   : > { %v2511_v53 = vadd.f32 %v2406_v62, %v5982_v24  ;;  %v4831_v57 = vpop.f32.mrb[159].mxu1 }
 0x221   : > { %5059 = vmatmul.mubr.msk.bf16.gmra.mrb[8].mxu0 %vm705_vm2, %v5211_v51 }
 0x222   : > { %5001 = vmatmul.mubr.msk.bf16.gmra.mrb[8].mxu1 %vm705_vm2, %v5210_v45  ;;  %5062 = vmatprep.mubr.msk.bf16.mxu0 %vm5222_vm1, %v5221_v1 }
 0x224   : > { %v2741_v7 = vpop.f32.mrb[160].mxu0 }
 0x225   : > { %v2411_v3 = vpop.f32.mrb[160].mxu1  ;;  %v6185_v55 = vadd.f32 %v2741_v7, %v2510_v42  ;;  %v4892_v16 = vpop.f32.mrb[161].mxu0 }
 0x226   : > { %v2512_v59 = vadd.f32 %v2411_v3, %v5991_v19  ;;  %v4834_v4 = vpop.f32.mrb[161].mxu1  ;;  %v2744_v20 = vpop.f32.mrb[162].mxu0 }
 0x227   : > { %v2414_v23 = vpop.f32.mrb[162].mxu1  ;;  %v6189_v24 = vadd.f32 %v2744_v20, %v2511_v53  ;;  %v4893_v11 = vpop.f32.mrb[163].mxu0 }
 0x228   : > { %v2513_v46 = vadd.f32 %v2414_v23, %v5996_v34  ;;  %v4835_v31 = vpop.f32.mrb[163].mxu1 }
 0x229   : > { %5063 = vmatmul.mubr.msk.bf16.gmra.mrb[12].mxu0 %vm705_vm2, %v5212_v13 }
 0x22c   : > { %v2749_v1 = vpop.f32.mrb[164].mxu0 }
 0x22d   : > { %v2419_v50 = vpop.f32.mrb[164].mxu1  ;;  %v6193_v33 = vadd.f32 %v2749_v1, %v2512_v59  ;;  %v4896_v21 = vpop.f32.mrb[165].mxu0 }
 0x22e   : > { %v2514_v29 = vadd.f32 %v2419_v50, %v6005_v8  ;;  %v4838_v39 = vpop.f32.mrb[165].mxu1  ;;  %v2752_v19 = vpop.f32.mrb[166].mxu0 }
 0x22f   : > { %v2422_v22 = vpop.f32.mrb[166].mxu1  ;;  %v6196_v43 = vadd.f32 %v2752_v19, %v2513_v46  ;;  %v4897_v30 = vpop.f32.mrb[167].mxu0 }
 0x230   : > { %v2515_v40 = vadd.f32 %v2422_v22, %v6010_v44  ;;  %v4839_v37 = vpop.f32.mrb[167].mxu1 }
 0x234   : > { %v2757_v34 = vpop.f32.mrb[168].mxu0 }
 0x235   : > { %v2427_v56 = vpop.f32.mrb[168].mxu1  ;;  %v6199_v47 = vadd.f32 %v2757_v34, %v2514_v29  ;;  %v4900_v60 = vpop.f32.mrb[169].mxu0 }
 0x236   : > { %v2516_v51 = vadd.f32 %v2427_v56, %v6019_v18  ;;  %v4842_v42 = vpop.f32.mrb[169].mxu1  ;;  %v2760_v14 = vpop.f32.mrb[170].mxu0 }
 0x237   : > { %v2430_v9 = vpop.f32.mrb[170].mxu1  ;;  %v6202_v8 = vadd.f32 %v2760_v14, %v2515_v40  ;;  %v4901_v45 = vpop.f32.mrb[171].mxu0 }
 0x238   : > { %v2517_v62 = vadd.f32 %v2430_v9, %v6024_v54  ;;  %v4843_v36 = vpop.f32.mrb[171].mxu1 }
 0x23c   : > { %v2765_v53 = vpop.f32.mrb[172].mxu0 }
 0x23d   : > { %v2435_v57 = vpop.f32.mrb[172].mxu1  ;;  %v6205_v44 = vadd.f32 %v2765_v53, %v2516_v51  ;;  %v4904_v7 = vpop.f32.mrb[173].mxu0 }
 0x23e   : > { %v2518_v3 = vadd.f32 %v2435_v57, %v6033_v28  ;;  %v4846_v16 = vpop.f32.mrb[173].mxu1  ;;  %v2768_v13 = vpop.f32.mrb[174].mxu0 }
 0x23f   : > { %v2438_v59 = vpop.f32.mrb[174].mxu1  ;;  %v6208_v18 = vadd.f32 %v2768_v13, %v2517_v62  ;;  %v4905_v4 = vpop.f32.mrb[175].mxu0 }
 0x240   : > { %v2519_v20 = vadd.f32 %v2438_v59, %v6038_v0  ;;  %v4847_v23 = vpop.f32.mrb[175].mxu1 }
 0x244   : > { %v2773_v11 = vpop.f32.mrb[176].mxu0 }
 0x245   : > { %v2443_v46 = vpop.f32.mrb[176].mxu1  ;;  %v6211_v54 = vadd.f32 %v2773_v11, %v2518_v3  ;;  %v4908_v31 = vpop.f32.mrb[177].mxu0 }
 0x246   : > { %v2520_v1 = vadd.f32 %v2443_v46, %v6047_v38  ;;  %v4850_v50 = vpop.f32.mrb[177].mxu1  ;;  %v2776_v21 = vpop.f32.mrb[178].mxu0 }
 0x247   : > { %v2446_v29 = vpop.f32.mrb[178].mxu1  ;;  %v6214_v28 = vadd.f32 %v2776_v21, %v2519_v20  ;;  %v4909_v39 = vpop.f32.mrb[179].mxu0 }
 0x248   : > { %v2521_v19 = vadd.f32 %v2446_v29, %v6052_v15  ;;  %v4851_v22 = vpop.f32.mrb[179].mxu1 }
 0x24c   : > { %v2781_v30 = vpop.f32.mrb[180].mxu0 }
 0x24d   : > { %v2451_v40 = vpop.f32.mrb[180].mxu1  ;;  %v6217_v0 = vadd.f32 %v2781_v30, %v2520_v1  ;;  %v4912_v37 = vpop.f32.mrb[181].mxu0 }
 0x24e   : > { %v2522_v34 = vadd.f32 %v2451_v40, %v6061_v48  ;;  %v4854_v56 = vpop.f32.mrb[181].mxu1  ;;  %v2784_v60 = vpop.f32.mrb[182].mxu0 }
 0x24f   : > { %v2454_v51 = vpop.f32.mrb[182].mxu1  ;;  %v6220_v38 = vadd.f32 %v2784_v60, %v2521_v19  ;;  %v4913_v42 = vpop.f32.mrb[183].mxu0 }
 0x250   : > { %v2523_v14 = vadd.f32 %v2454_v51, %v6066_v52  ;;  %v4855_v9 = vpop.f32.mrb[183].mxu1 }
 0x254   : > { %v2789_v45 = vpop.f32.mrb[184].mxu0 }
 0x255   : > { %v2459_v62 = vpop.f32.mrb[184].mxu1  ;;  %v6223_v15 = vadd.f32 %v2789_v45, %v2522_v34  ;;  %v4916_v36 = vpop.f32.mrb[185].mxu0 }
 0x256   : > { %v2524_v53 = vadd.f32 %v2459_v62, %v6075_v58  ;;  %v4858_v57 = vpop.f32.mrb[185].mxu1  ;;  %v2792_v7 = vpop.f32.mrb[186].mxu0 }
 0x257   : > { %v2462_v3 = vpop.f32.mrb[186].mxu1  ;;  %v6226_v48 = vadd.f32 %v2792_v7, %v2523_v14  ;;  %v4917_v16 = vpop.f32.mrb[187].mxu0 }
 0x258   : > { %v2525_v13 = vadd.f32 %v2462_v3, %v6080_v12  ;;  %v4859_v59 = vpop.f32.mrb[187].mxu1 }
 0x25c   : > { %v2797_v4 = vpop.f32.mrb[188].mxu0 }
 0x25d   : > { %v2467_v20 = vpop.f32.mrb[188].mxu1  ;;  %v6229_v52 = vadd.f32 %v2797_v4, %v2524_v53  ;;  %v4920_v23 = vpop.f32.mrb[189].mxu0 }
 0x25e   : > { %v2526_v11 = vadd.f32 %v2467_v20, %v6089_v5  ;;  %v4862_v46 = vpop.f32.mrb[189].mxu1  ;;  %v2800_v31 = vpop.f32.mrb[190].mxu0 }
 0x25f   : > { %v2470_v1 = vpop.f32.mrb[190].mxu1  ;;  %v6232_v58 = vadd.f32 %v2800_v31, %v2525_v13  ;;  %v4921_v50 = vpop.f32.mrb[191].mxu0 }
 0x260   : > { %v2527_v21 = vadd.f32 %v2470_v1, %v6094_v6  ;;  %v4863_v29 = vpop.f32.mrb[191].mxu1 }
 0x264   : > { %v2805_v39 = vpop.f32.mrb[192].mxu0 }
 0x265   : > { %v2475_v19 = vpop.f32.mrb[192].mxu1  ;;  %v6235_v12 = vadd.f32 %v2805_v39, %v2526_v11  ;;  %v4924_v22 = vpop.f32.mrb[193].mxu0 }
 0x266   : > { %v2528_v30 = vadd.f32 %v2475_v19, %v6103_v41  ;;  %v4866_v40 = vpop.f32.mrb[193].mxu1  ;;  %v2808_v37 = vpop.f32.mrb[194].mxu0 }
 0x267   : > { %v2478_v34 = vpop.f32.mrb[194].mxu1  ;;  %v6238_v5 = vadd.f32 %v2808_v37, %v2527_v21  ;;  %v4925_v56 = vpop.f32.mrb[195].mxu0 }
 0x268   : > { %v2529_v60 = vadd.f32 %v2478_v34, %v6108_v63  ;;  %v4867_v51 = vpop.f32.mrb[195].mxu1 }
 0x26c   : > { %v2813_v42 = vpop.f32.mrb[196].mxu0 }
 0x26d   : > { %v2483_v14 = vpop.f32.mrb[196].mxu1  ;;  %v6241_v6 = vadd.f32 %v2813_v42, %v2528_v30  ;;  %v4928_v9 = vpop.f32.mrb[197].mxu0 }
 0x26e   : > { %v2530_v45 = vadd.f32 %v2483_v14, %v6117_v61  ;;  %v4870_v62 = vpop.f32.mrb[197].mxu1  ;;  %v2816_v36 = vpop.f32.mrb[198].mxu0 }
 0x26f   : > { %v2486_v53 = vpop.f32.mrb[198].mxu1  ;;  %v6244_v41 = vadd.f32 %v2816_v36, %v2529_v60  ;;  %v4929_v57 = vpop.f32.mrb[199].mxu0 }
 0x270   : > { %v2531_v7 = vadd.f32 %v2486_v53, %v6122_v25  ;;  %v4871_v3 = vpop.f32.mrb[199].mxu1 }
 0x274   : > { %v2821_v16 = vpop.f32.mrb[200].mxu0 }
 0x275   : > { %v2491_v13 = vpop.f32.mrb[200].mxu1  ;;  %v6247_v63 = vadd.f32 %v2821_v16, %v2530_v45  ;;  %v4932_v59 = vpop.f32.mrb[201].mxu0 }
 0x276   : > { %v2532_v4 = vadd.f32 %v2491_v13, %v6131_v27  ;;  %v4874_v20 = vpop.f32.mrb[201].mxu1  ;;  %v2824_v23 = vpop.f32.mrb[202].mxu0 }
 0x277   : > { %v2494_v11 = vpop.f32.mrb[202].mxu1  ;;  %v6250_v61 = vadd.f32 %v2824_v23, %v2531_v7  ;;  %v4933_v46 = vpop.f32.mrb[203].mxu0 }
 0x278   : > { %v2533_v31 = vadd.f32 %v2494_v11, %v6136_v10  ;;  %v4875_v1 = vpop.f32.mrb[203].mxu1 }
 0x27c   : > { %v2829_v50 = vpop.f32.mrb[204].mxu0 }
 0x27d   : > { %v2499_v21 = vpop.f32.mrb[204].mxu1  ;;  %v6253_v25 = vadd.f32 %v2829_v50, %v2532_v4  ;;  %v4936_v29 = vpop.f32.mrb[205].mxu0 }
 0x27e   : > { %v2534_v39 = vadd.f32 %v2499_v21, %v6145_v2  ;;  %v4878_v19 = vpop.f32.mrb[205].mxu1  ;;  %v2832_v22 = vpop.f32.mrb[206].mxu0 }
 0x27f   : > { %v2502_v30 = vpop.f32.mrb[206].mxu1  ;;  %v6256_v27 = vadd.f32 %v2832_v22, %v2533_v31  ;;  %v4937_v40 = vpop.f32.mrb[207].mxu0 }
 0x280   : > { %v2535_v37 = vadd.f32 %v2502_v30, %v6150_v26  ;;  %v4879_v34 = vpop.f32.mrb[207].mxu1  ;;  %v6268_v26 = vld [vmem:[%s6362_s10] ss:$0 sm:$0xff] }
 0x284   : > { %v2837_v56 = vpop.f32.mrb[208].mxu0 }
 0x285   : > { %v6259_v60 = vadd.f32 %v2837_v56, %v2534_v39  ;;  %v3063_v10 = vpop.f32.mrb[208].mxu1  ;;  %v4940_v51 = vpop.f32.mrb[209].mxu0 }
 0x286   : > { %v3182_v42 = vadd.f32 %v3063_v10, %v6159_v17  ;;  %v4946_v14 = vpop.f32.mrb[209].mxu1  ;;  %v2840_v9 = vpop.f32.mrb[210].mxu0 }
 0x287   : > { %v6262_v45 = vadd.f32 %v2840_v9, %v2535_v37  ;;  %v3066_v2 = vpop.f32.mrb[210].mxu1  ;;  %v4941_v62 = vpop.f32.mrb[211].mxu0 }
 0x288   : > { %v3183_v36 = vadd.f32 %v3066_v2, %v6164_v32  ;;  %v4947_v53 = vpop.f32.mrb[211].mxu1 }
 0x28c   : > { %v3401_v57 = vpop.f32.mrb[212].mxu0 }
 0x28d   : > { %v3071_v7 = vpop.f32.mrb[212].mxu1  ;;  %v3520_v3 = vadd.f32 %v3401_v57, %v3182_v42  ;;  %v5008_v16 = vpop.f32.mrb[213].mxu0 }
 0x28e   : > { %v3184_v17 = vadd.f32 %v3071_v7, %v6173_v35  ;;  %v4950_v13 = vpop.f32.mrb[213].mxu1  ;;  %v3404_v59 = vpop.f32.mrb[214].mxu0 }
 0x28f   : > { %v3557_v4 = vadd.f32 %v6268_v26, %v3520_v3  ;;  %v3074_v20 = vpop.f32.mrb[214].mxu1  ;;  %v3521_v23 = vadd.f32 %v3404_v59, %v3183_v36  ;;  %v5009_v32 = vpop.f32.mrb[215].mxu0 }
 0x290   : > { %v3185_v11 = vadd.f32 %v3074_v20, %v6178_v49  ;;  %v4951_v46 = vpop.f32.mrb[215].mxu1 }
 0x291   : > { %v3558_v31 = vadd.f32 %v6268_v26, %v3521_v23  ;;  %v3587_v1 = vmax.f32 %v3557_v4, 0.0 }
 0x293   : > { %v3588_v50 = vmax.f32 %v3558_v31, 0.0 }
 0x294   : > { %v3409_v35 = vpop.f32.mrb[216].mxu0 }
 0x295   : > { %v4278_v21 = vpack.c.bf16 %v3588_v50, %v3587_v1  ;;  %v3079_v29 = vpop.f32.mrb[216].mxu1  ;;  %v3522_v39 = vadd.f32 %v3409_v35, %v3184_v17  ;;  %v5012_v19 = vpop.f32.mrb[217].mxu0 }
 0x296   : > { %v3186_v22 = vadd.f32 %v3079_v29, %v6185_v55  ;;  %v4954_v30 = vpop.f32.mrb[217].mxu1  ;;  %v3412_v49 = vpop.f32.mrb[218].mxu0 }
 0x297   : > { %4279 = vst [vmem:[%s6278_s19] sm:$0xff] %v4278_v21   ;;  %v3559_v40 = vadd.f32 %v6268_v26, %v3522_v39  ;;  %v3082_v37 = vpop.f32.mrb[218].mxu1  ;;  %v3523_v34 = vadd.f32 %v3412_v49, %v3185_v11  ;;  %v5013_v56 = vpop.f32.mrb[219].mxu0 }
 0x298   : > { %v3187_v10 = vadd.f32 %v3082_v37, %v6189_v24  ;;  %v4955_v51 = vpop.f32.mrb[219].mxu1 }
 0x299   : > { %v3560_v42 = vadd.f32 %v6268_v26, %v3523_v34  ;;  %v3589_v14 = vmax.f32 %v3559_v40, 0.0 }
 0x29b   : > { %v3590_v9 = vmax.f32 %v3560_v42, 0.0 }
 0x29c   : > { %v3417_v2 = vpop.f32.mrb[220].mxu0 }
 0x29d   : > { %v4283_v62 = vpack.c.bf16 %v3590_v9, %v3589_v14  ;;  %v3087_v36 = vpop.f32.mrb[220].mxu1  ;;  %v3524_v55 = vadd.f32 %v3417_v2, %v3186_v22  ;;  %v5016_v53 = vpop.f32.mrb[221].mxu0 }
 0x29e   : > { %v3188_v57 = vadd.f32 %v3087_v36, %v6193_v33  ;;  %v4958_v7 = vpop.f32.mrb[221].mxu1  ;;  %v3420_v3 = vpop.f32.mrb[222].mxu0 }
 0x29f   : > { %4350 = vst [vmem:[%s6278_s19 + $0x8] sm:$0xff] %v4283_v62   ;;  %v3561_v16 = vadd.f32 %v6268_v26, %v3524_v55  ;;  %v3090_v17 = vpop.f32.mrb[222].mxu1  ;;  %v3525_v24 = vadd.f32 %v3420_v3, %v3187_v10  ;;  %v5017_v13 = vpop.f32.mrb[223].mxu0 }
 0x2a0   : > { %v3189_v59 = vadd.f32 %v3090_v17, %v6196_v43  ;;  %v4959_v4 = vpop.f32.mrb[223].mxu1 }
 0x2a1   : > { %v3562_v20 = vadd.f32 %v6268_v26, %v3525_v24  ;;  %v3591_v23 = vmax.f32 %v3561_v16, 0.0 }
 0x2a3   : > { %v3592_v32 = vmax.f32 %v3562_v20, 0.0 }
 0x2a4   : > { %v3425_v11 = vpop.f32.mrb[224].mxu0 }
 0x2a5   : > { %v4288_v46 = vpack.c.bf16 %v3592_v32, %v3591_v23  ;;  %v3095_v31 = vpop.f32.mrb[224].mxu1  ;;  %v3526_v33 = vadd.f32 %v3425_v11, %v3188_v57  ;;  %v5020_v1 = vpop.f32.mrb[225].mxu0 }
 0x2a6   : > { %v3190_v50 = vadd.f32 %v3095_v31, %v6199_v47  ;;  %v4962_v35 = vpop.f32.mrb[225].mxu1  ;;  %v3428_v21 = vpop.f32.mrb[226].mxu0 }
 0x2a7   : > { %4351 = vst [vmem:[%s6278_s19 + $0x10] sm:$0xff] %v4288_v46   ;;  %v3563_v29 = vadd.f32 %v6268_v26, %v3526_v33  ;;  %v3098_v39 = vpop.f32.mrb[226].mxu1  ;;  %v3527_v43 = vadd.f32 %v3428_v21, %v3189_v59  ;;  %v5021_v19 = vpop.f32.mrb[227].mxu0 }
 0x2a8   : > { %v3191_v22 = vadd.f32 %v3098_v39, %v6202_v8  ;;  %v4963_v30 = vpop.f32.mrb[227].mxu1 }
 0x2a9   : > { %v3564_v49 = vadd.f32 %v6268_v26, %v3527_v43  ;;  %v3593_v40 = vmax.f32 %v3563_v29, 0.0 }
 0x2ab   : > { %v3594_v37 = vmax.f32 %v3564_v49, 0.0 }
 0x2ac   : > { %v3433_v34 = vpop.f32.mrb[228].mxu0 }
 0x2ad   : > { %v4293_v56 = vpack.c.bf16 %v3594_v37, %v3593_v40  ;;  %v3103_v10 = vpop.f32.mrb[228].mxu1  ;;  %v3528_v47 = vadd.f32 %v3433_v34, %v3190_v50  ;;  %v5024_v51 = vpop.f32.mrb[229].mxu0 }
 0x2ae   : > { %v3192_v42 = vadd.f32 %v3103_v10, %v6205_v44  ;;  %v4966_v14 = vpop.f32.mrb[229].mxu1  ;;  %v3436_v9 = vpop.f32.mrb[230].mxu0 }
 0x2af   : > { %4352 = vst [vmem:[%s6278_s19 + $0x18] sm:$0xff] %v4293_v56   ;;  %v3565_v2 = vadd.f32 %v6268_v26, %v3528_v47  ;;  %v3106_v62 = vpop.f32.mrb[230].mxu1  ;;  %v3529_v8 = vadd.f32 %v3436_v9, %v3191_v22  ;;  %v5025_v36 = vpop.f32.mrb[231].mxu0 }
 0x2b0   : > { %v3193_v55 = vadd.f32 %v3106_v62, %v6208_v18  ;;  %v4967_v53 = vpop.f32.mrb[231].mxu1 }
 0x2b1   : > { %v3566_v57 = vadd.f32 %v6268_v26, %v3529_v8  ;;  %v3595_v7 = vmax.f32 %v3565_v2, 0.0 }
 0x2b3   : > { %v3596_v3 = vmax.f32 %v3566_v57, 0.0 }
 0x2b4   : > { %v3441_v16 = vpop.f32.mrb[232].mxu0 }
 0x2b5   : > { %v4298_v17 = vpack.c.bf16 %v3596_v3, %v3595_v7  ;;  %v3111_v24 = vpop.f32.mrb[232].mxu1  ;;  %v3530_v44 = vadd.f32 %v3441_v16, %v3192_v42  ;;  %v5028_v13 = vpop.f32.mrb[233].mxu0 }
 0x2b6   : > { %v3194_v59 = vadd.f32 %v3111_v24, %v6211_v54  ;;  %v4970_v4 = vpop.f32.mrb[233].mxu1  ;;  %v3444_v20 = vpop.f32.mrb[234].mxu0 }
 0x2b7   : > { %4353 = vst [vmem:[%s6278_s19 + $0x20] sm:$0xff] %v4298_v17   ;;  %v3567_v23 = vadd.f32 %v6268_v26, %v3530_v44  ;;  %v3114_v32 = vpop.f32.mrb[234].mxu1  ;;  %v3531_v18 = vadd.f32 %v3444_v20, %v3193_v55  ;;  %v5029_v11 = vpop.f32.mrb[235].mxu0 }
 0x2b8   : > { %v3195_v46 = vadd.f32 %v3114_v32, %v6214_v28  ;;  %v4971_v31 = vpop.f32.mrb[235].mxu1 }
 0x2b9   : > { %v3568_v33 = vadd.f32 %v6268_v26, %v3531_v18  ;;  %v3597_v1 = vmax.f32 %v3567_v23, 0.0 }
 0x2bb   : > { %v3598_v50 = vmax.f32 %v3568_v33, 0.0 }
 0x2bc   : > { %v3449_v35 = vpop.f32.mrb[236].mxu0 }
 0x2bd   : > { %v4303_v21 = vpack.c.bf16 %v3598_v50, %v3597_v1  ;;  %v3119_v29 = vpop.f32.mrb[236].mxu1  ;;  %v3532_v54 = vadd.f32 %v3449_v35, %v3194_v59  ;;  %v5032_v39 = vpop.f32.mrb[237].mxu0 }
 0x2be   : > { %v3196_v43 = vadd.f32 %v3119_v29, %v6217_v0  ;;  %v4974_v19 = vpop.f32.mrb[237].mxu1  ;;  %v3452_v22 = vpop.f32.mrb[238].mxu0 }
 0x2bf   : > { %4354 = vst [vmem:[%s6278_s19 + $0x28] sm:$0xff] %v4303_v21   ;;  %v3569_v30 = vadd.f32 %v6268_v26, %v3532_v54  ;;  %v3122_v49 = vpop.f32.mrb[238].mxu1  ;;  %v3533_v28 = vadd.f32 %v3452_v22, %v3195_v46  ;;  %v5033_v40 = vpop.f32.mrb[239].mxu0 }
 0x2c0   : > { %v3197_v37 = vadd.f32 %v3122_v49, %v6220_v38  ;;  %v4975_v34 = vpop.f32.mrb[239].mxu1 }
 0x2c1   : > { %v3570_v56 = vadd.f32 %v6268_v26, %v3533_v28  ;;  %v3599_v10 = vmax.f32 %v3569_v30, 0.0 }
 0x2c3   : > { %v3600_v47 = vmax.f32 %v3570_v56, 0.0 }
 0x2c4   : > { %v3457_v51 = vpop.f32.mrb[240].mxu0 }
 0x2c5   : > { %v4308_v42 = vpack.c.bf16 %v3600_v47, %v3599_v10  ;;  %v3127_v14 = vpop.f32.mrb[240].mxu1  ;;  %v3534_v0 = vadd.f32 %v3457_v51, %v3196_v43  ;;  %v5036_v9 = vpop.f32.mrb[241].mxu0 }
 0x2c6   : > { %v3198_v2 = vadd.f32 %v3127_v14, %v6223_v15  ;;  %v4978_v62 = vpop.f32.mrb[241].mxu1  ;;  %v3460_v8 = vpop.f32.mrb[242].mxu0 }
 0x2c7   : > { %4355 = vst [vmem:[%s6278_s19 + $0x30] sm:$0xff] %v4308_v42   ;;  %v3571_v36 = vadd.f32 %v6268_v26, %v3534_v0  ;;  %v3130_v55 = vpop.f32.mrb[242].mxu1  ;;  %v3535_v38 = vadd.f32 %v3460_v8, %v3197_v37  ;;  %v5037_v53 = vpop.f32.mrb[243].mxu0 }
 0x2c8   : > { %v3199_v57 = vadd.f32 %v3130_v55, %v6226_v48  ;;  %v4979_v7 = vpop.f32.mrb[243].mxu1 }
 0x2c9   : > { %v3572_v3 = vadd.f32 %v6268_v26, %v3535_v38  ;;  %v3601_v16 = vmax.f32 %v3571_v36, 0.0 }
 0x2cb   : > { %v3602_v17 = vmax.f32 %v3572_v3, 0.0 }
 0x2cc   : > { %v3465_v24 = vpop.f32.mrb[244].mxu0 }
 0x2cd   : > { %v4313_v44 = vpack.c.bf16 %v3602_v17, %v3601_v16  ;;  %v3135_v13 = vpop.f32.mrb[244].mxu1  ;;  %v3536_v15 = vadd.f32 %v3465_v24, %v3198_v2  ;;  %v5040_v59 = vpop.f32.mrb[245].mxu0 }
 0x2ce   : > { %v3200_v4 = vadd.f32 %v3135_v13, %v6229_v52  ;;  %v4982_v20 = vpop.f32.mrb[245].mxu1  ;;  %v3468_v23 = vpop.f32.mrb[246].mxu0 }
 0x2cf   : > { %4356 = vst [vmem:[%s6278_s19 + $0x38] sm:$0xff] %v4313_v44   ;;  %v3573_v32 = vadd.f32 %v6268_v26, %v3536_v15  ;;  %v3138_v18 = vpop.f32.mrb[246].mxu1  ;;  %v3537_v48 = vadd.f32 %v3468_v23, %v3199_v57  ;;  %v5041_v11 = vpop.f32.mrb[247].mxu0 }
 0x2d0   : > { %v3201_v46 = vadd.f32 %v3138_v18, %v6232_v58  ;;  %v4983_v31 = vpop.f32.mrb[247].mxu1 }
 0x2d1   : > { %v3574_v33 = vadd.f32 %v6268_v26, %v3537_v48  ;;  %v3603_v1 = vmax.f32 %v3573_v32, 0.0 }
 0x2d3   : > { %v3604_v50 = vmax.f32 %v3574_v33, 0.0 }
 0x2d4   : > { %v3473_v35 = vpop.f32.mrb[248].mxu0 }
 0x2d5   : > { %v4318_v21 = vpack.c.bf16 %v3604_v50, %v3603_v1  ;;  %v3143_v29 = vpop.f32.mrb[248].mxu1  ;;  %v3538_v52 = vadd.f32 %v3473_v35, %v3200_v4  ;;  %v5044_v54 = vpop.f32.mrb[249].mxu0 }
 0x2d6   : > { %v3202_v39 = vadd.f32 %v3143_v29, %v6235_v12  ;;  %v4986_v43 = vpop.f32.mrb[249].mxu1  ;;  %v3476_v19 = vpop.f32.mrb[250].mxu0 }
 0x2d7   : > { %4357 = vst [vmem:[%s6278_s19 + $0x40] sm:$0xff] %v4318_v21   ;;  %v3575_v22 = vadd.f32 %v6268_v26, %v3538_v52  ;;  %v3146_v30 = vpop.f32.mrb[250].mxu1  ;;  %v3539_v58 = vadd.f32 %v3476_v19, %v3201_v46  ;;  %v5045_v49 = vpop.f32.mrb[251].mxu0 }
 0x2d8   : > { %v3203_v28 = vadd.f32 %v3146_v30, %v6238_v5  ;;  %v4987_v40 = vpop.f32.mrb[251].mxu1 }
 0x2d9   : > { %v3576_v37 = vadd.f32 %v6268_v26, %v3539_v58  ;;  %v3605_v34 = vmax.f32 %v3575_v22, 0.0 }
 0x2db   : > { %v3606_v56 = vmax.f32 %v3576_v37, 0.0 }
 0x2dc   : > { %v3481_v10 = vpop.f32.mrb[252].mxu0 }
 0x2dd   : > { %v4323_v47 = vpack.c.bf16 %v3606_v56, %v3605_v34  ;;  %v3151_v51 = vpop.f32.mrb[252].mxu1  ;;  %v3540_v12 = vadd.f32 %v3481_v10, %v3202_v39  ;;  %v5048_v42 = vpop.f32.mrb[253].mxu0 }
 0x2de   : > { %v3204_v14 = vadd.f32 %v3151_v51, %v6241_v6  ;;  %v4990_v0 = vpop.f32.mrb[253].mxu1  ;;  %v3484_v9 = vpop.f32.mrb[254].mxu0 }
 0x2df   : > { %4358 = vst [vmem:[%s6278_s19 + $0x48] sm:$0xff] %v4323_v47   ;;  %v3577_v2 = vadd.f32 %v6268_v26, %v3540_v12  ;;  %v3154_v62 = vpop.f32.mrb[254].mxu1  ;;  %v3541_v5 = vadd.f32 %v3484_v9, %v3203_v28  ;;  %v5049_v8 = vpop.f32.mrb[255].mxu0 }
 0x2e0   : > { %v3205_v36 = vadd.f32 %v3154_v62, %v6244_v41  ;;  %v4991_v55 = vpop.f32.mrb[255].mxu1 }
 0x2e1   : > { %v3578_v38 = vadd.f32 %v6268_v26, %v3541_v5  ;;  %v3607_v53 = vmax.f32 %v3577_v2, 0.0 }
 0x2e3   : > { %v3608_v57 = vmax.f32 %v3578_v38, 0.0 }
 0x2e4   : > { %v3489_v7 = vpop.f32.mrb[0].mxu0 }
 0x2e5   : > { %v4328_v3 = vpack.c.bf16 %v3608_v57, %v3607_v53  ;;  %v3159_v16 = vpop.f32.mrb[0].mxu1  ;;  %v3542_v6 = vadd.f32 %v3489_v7, %v3204_v14  ;;  %v5052_v17 = vpop.f32.mrb[1].mxu0 }
 0x2e6   : > { %v3206_v24 = vadd.f32 %v3159_v16, %v6247_v63  ;;  %v4994_v44 = vpop.f32.mrb[1].mxu1  ;;  %v3492_v13 = vpop.f32.mrb[2].mxu0 }
 0x2e7   : > { %4359 = vst [vmem:[%s6278_s19 + $0x50] sm:$0xff] %v4328_v3   ;;  %v3579_v15 = vadd.f32 %v6268_v26, %v3542_v6  ;;  %v3162_v59 = vpop.f32.mrb[2].mxu1  ;;  %v3543_v41 = vadd.f32 %v3492_v13, %v3205_v36  ;;  %v5053_v4 = vpop.f32.mrb[3].mxu0 }
 0x2e8   : > { %v3207_v20 = vadd.f32 %v3162_v59, %v6250_v61  ;;  %v4995_v23 = vpop.f32.mrb[3].mxu1 }
 0x2e9   : > { %v3580_v32 = vadd.f32 %v6268_v26, %v3543_v41  ;;  %v3609_v18 = vmax.f32 %v3579_v15, 0.0 }
 0x2eb   : > { %v3610_v48 = vmax.f32 %v3580_v32, 0.0 }
 0x2ec   : > { %v3497_v11 = vpop.f32.mrb[4].mxu0 }
 0x2ed   : > { %v4333_v46 = vpack.c.bf16 %v3610_v48, %v3609_v18  ;;  %v3167_v31 = vpop.f32.mrb[4].mxu1  ;;  %v3544_v63 = vadd.f32 %v3497_v11, %v3206_v24  ;;  %v5056_v33 = vpop.f32.mrb[5].mxu0 }
 0x2ee   : > { %v3208_v1 = vadd.f32 %v3167_v31, %v6253_v25  ;;  %v4998_v50 = vpop.f32.mrb[5].mxu1  ;;  %v3500_v35 = vpop.f32.mrb[6].mxu0 }
 0x2ef   : > { %4360 = vst [vmem:[%s6278_s19 + $0x58] sm:$0xff] %v4333_v46   ;;  %v3581_v21 = vadd.f32 %v6268_v26, %v3544_v63  ;;  %v3170_v29 = vpop.f32.mrb[6].mxu1  ;;  %v3545_v61 = vadd.f32 %v3500_v35, %v3207_v20  ;;  %v5057_v52 = vpop.f32.mrb[7].mxu0 }
 0x2f0   : > { %v3209_v54 = vadd.f32 %v3170_v29, %v6256_v27  ;;  %v4999_v39 = vpop.f32.mrb[7].mxu1 }
 0x2f1   : > { %v3582_v43 = vadd.f32 %v6268_v26, %v3545_v61  ;;  %v3611_v19 = vmax.f32 %v3581_v21, 0.0 }
 0x2f3   : > { %v3612_v22 = vmax.f32 %v3582_v43, 0.0 }
 0x2f4   : > { %v3505_v30 = vpop.f32.mrb[8].mxu0 }
 0x2f5   : > { %v4338_v58 = vpack.c.bf16 %v3612_v22, %v3611_v19  ;;  %v3175_v49 = vpop.f32.mrb[8].mxu1  ;;  %v3546_v25 = vadd.f32 %v3505_v30, %v3208_v1  ;;  %v5060_v28 = vpop.f32.mrb[9].mxu0 }
 0x2f6   : > { %v3210_v40 = vadd.f32 %v3175_v49, %v6259_v60  ;;  %v5002_v37 = vpop.f32.mrb[9].mxu1  ;;  %v3508_v34 = vpop.f32.mrb[10].mxu0 }
 0x2f7   : > { %4361 = vst [vmem:[%s6278_s19 + $0x60] sm:$0xff] %v4338_v58   ;;  %v3583_v56 = vadd.f32 %v6268_v26, %v3546_v25  ;;  %v3178_v10 = vpop.f32.mrb[10].mxu1  ;;  %v3547_v27 = vadd.f32 %v3508_v34, %v3209_v54  ;;  %v5061_v47 = vpop.f32.mrb[11].mxu0 }
 0x2f8   : > { %v3211_v51 = vadd.f32 %v3178_v10, %v6262_v45  ;;  %v5003_v12 = vpop.f32.mrb[11].mxu1 }
 0x2f9   : > { %v3584_v42 = vadd.f32 %v6268_v26, %v3547_v27  ;;  %v3613_v14 = vmax.f32 %v3583_v56, 0.0 }
 0x2fb   : > { %v3614_v0 = vmax.f32 %v3584_v42, 0.0 }
 0x2fc   : > { %v3513_v9 = vpop.f32.mrb[12].mxu0 }
 0x2fd   : > { %v4343_v2 = vpack.c.bf16 %v3614_v0, %v3613_v14  ;;  %v3548_v60 = vadd.f32 %v3513_v9, %v3210_v40  ;;  %v5064_v62 = vpop.f32.mrb[13].mxu0 }
 0x2fe   : > { %v3516_v5 = vpop.f32.mrb[14].mxu0 }
 0x2ff   : > { %4362 = vst [vmem:[%s6278_s19 + $0x68] sm:$0xff] %v4343_v2   ;;  %v3585_v8 = vadd.f32 %v6268_v26, %v3548_v60  ;;  %v3549_v36 = vadd.f32 %v3516_v5, %v3211_v51  ;;  %v5065_v55 = vpop.f32.mrb[15].mxu0 }
 0x301   : > { %v3586_v38 = vadd.f32 %v6268_v26, %v3549_v36  ;;  %v3615_v53 = vmax.f32 %v3585_v8, 0.0 }
 0x303   : > { %v3616_v45 = vmax.f32 %v3586_v38, 0.0 }
 0x305   : > { %v4348_v57 = vpack.c.bf16 %v3616_v45, %v3615_v53 }
 0x307   : > { %4363 = vst [vmem:[%s6278_s19 + $0x70] sm:$0xff] %v4348_v57  }
 0x308 PF: > { %s21_s17 = sadd.s32 1, %s5219_s17  }
 0x309   : > { %p18_p4 = scmp.ge.s32.totalorder %s21_s17, 4  }
 0x30b   :  { %20 = sbr.rel (!%p18_p4) target bundleno = 1 (0x1), region = 126 }

// kernel: stem_forward.10
= control target key start
LH: loop header
LB: loop body
LE: loop exit
PB: predicated region body
PF: predicated region fallthrough
CT: control target
= control target key end

     0   :  { %s4391_s17 = smov 0   ;;  %s5236_s0 = inlined_call_operand.vmem [shape: bf16[352,32], index: 0, kind: input, shape index: {}]   ;;  %s5237_s1 = inlined_call_operand.vmem [shape: bf16[352,32], index: 1, kind: input, shape index: {}]   ;;  %s5238_s2 = inlined_call_operand.vmem [shape: bf16[352,32], index: 2, kind: input, shape index: {}]   ;;  %s5239_s3 = inlined_call_operand.vmem [shape: bf16[352,32], index: 3, kind: input, shape index: {}]   ;;  %s5240_s4 = inlined_call_operand.vmem [shape: bf16[352,32], index: 4, kind: input, shape index: {}]   ;;  %s5241_s5 = inlined_call_operand.vmem [shape: bf16[352,32], index: 5, kind: input, shape index: {}]   ;;  %s5242_s6 = inlined_call_operand.vmem [shape: bf16[352,32], index: 6, kind: input, shape index: {}]   ;;  %s5243_s7 = inlined_call_operand.vmem [shape: bf16[352,32], index: 7, kind: input, shape index: {}]   ;;  %s5244_s8 = inlined_call_operand.vmem [shape: bf16[352,32], index: 8, kind: input, shape index: {}]   ;;  %s5245_s9 = inlined_call_operand.vmem [shape: bf16[9,32,128], index: 9, kind: input, shape index: {}]   ;;  %s5246_s10 = inlined_call_operand.vmem [shape: f32[1,128], index: 10, kind: input, shape index: {}]   ;;  %s5247_s11 = inlined_call_operand.vmem [shape: bf16[352,128], index: 11, kind: output, shape index: {}]  }
   0x1 LB: > { %s3266_s18 = sadd.s32 4294967295, %s4327_s17   ;;  %p3270_p0 = scmp.ge.s32.totalorder %s4327_s17, 1  ;;  %s4327_s17 = sphi %s4391_s17, %s21_s17  }
   0x2   : > { %p426_p1 = scmp.lt.s32.totalorder %s4327_s17, 3 }
   0x4   : > { %p427_p2 = pnand %p3270_p0, %p426_p1 }
   0x5   : > { %v4204_v0 = vld [vmem:[%s5245_s9 + $0x10] sm:$0xff] (!%p427_p2)   ;;  %v4329_v1 = vmov (!%p427_p2), 0.0   ;;  %v4205_v2 = vld [vmem:[%s5245_s9 + $0x18] sm:$0xff] (!%p427_p2)   ;;  %s506_s23 = smul.u32 (!%p427_p2), 22, %s3266_s18  ;;  %vm4330_vm0 = vmmov (!%p427_p2), 0   ;;  %v4208_v3 = vld [vmem:[%s5245_s9 + $0x20] sm:$0xff] (!%p427_p2)  }
   0x6   : > { %430 = sbr.rel (%p427_p2) target bundleno = 632 (0x278), region = 64  ;;  %3758 = vmatprep.subr.bf16.mxu0 (!%p427_p2), %v4329_v1  ;;  %4190 = vmatprep.subr.bf16.mxu1 (!%p427_p2), %v4329_v1  ;;  %vm687_vm1 = vcmask (!%p427_p2), 261120   ;;  %v4209_v4 = vld [vmem:[%s5245_s9] sm:$0xff] (!%p427_p2)   ;;  %v4216_v7 = vld [vmem:[%s5245_s9 + $0x28] sm:$0xff] (!%p427_p2)   ;;  %v4222_v19 = vld [vmem:[%s5245_s9 + $0x30] sm:$0xff] (!%p427_p2)  }
   0x7   : > { %3759 = vmatpush3.bf16.msra.mxu0 (!%p427_p2), %v4204_v0  ;;  %4192 = vmatpush3.bf16.msra.mxu1 (!%p427_p2), %v4204_v0  ;;  %p507_p3 = scmp.lt.s32.totalorder (!%p427_p2), %s506_s23, 43  ;;  %v4217_v8 = vld [vmem:[%s5245_s9 + $0x8] sm:$0xff] (!%p427_p2)   ;;  %v4236_v20 = vld [vmem:[%s5245_s9 + $0x38] sm:$0xff] (!%p427_p2)   ;;  %v4225_v21 = vld [vmem:[%s5245_s9 + $0x40] sm:$0xff] (!%p427_p2)  }
   0x8   : > { %3760 = vmatprep.subr.bf16.mxu0 (!%p427_p2), %v4329_v1  ;;  %4191 = vmatprep.subr.bf16.mxu1 (!%p427_p2), %v4329_v1  ;;  %v4237_v24 = vld [vmem:[%s5245_s9 + $0x48] sm:$0xff] (!%p427_p2)   ;;  %v4248_v45 = vld [vmem:[%s5245_s9 + $0x50] sm:$0xff] (!%p427_p2)   ;;  %v4262_v46 = vld [vmem:[%s5245_s9 + $0x58] sm:$0xff] (!%p427_p2)  }
   0x9   : > { %3762 = vmatprep.mubr.msk.bf16.mxu0 (!%p427_p2), %vm4330_vm0, %v4329_v1  ;;  %3786 = vmatprep.mubr.msk.bf16.mxu1 (!%p427_p2), %vm4330_vm0, %v4329_v1  ;;  %v4251_v49 = vld [vmem:[%s5245_s9 + $0x60] sm:$0xff] (!%p427_p2)   ;;  %v4263_v50 = vld [vmem:[%s5245_s9 + $0x68] sm:$0xff] (!%p427_p2)  }
   0xb   : > { %3761 = vmatpush3.bf16.msra.mxu0 (!%p427_p2), %v4205_v2  ;;  %4193 = vmatpush3.bf16.msra.mxu1 (!%p427_p2), %v4205_v2 }
   0xc   : > { %3854 = vmatprep.subr.bf16.mxu0 (!%p427_p2), %v4329_v1  ;;  %3806 = vmatprep.subr.bf16.mxu1 (!%p427_p2), %v4329_v1 }
   0xd   : > { %s5249_s23 = smov (!%p507_p3, %s506_s23), 43 }
   0xe   : > { %s4415_s24 = sshll.u32 %s5249_s23, 2 }
   0xf   : > { %s4424_s29 = scalar_lea.vmem %s5237_s1, %s4415_s24  ;;  %s4454_s20 = scalar_lea.vmem %s5236_s0, %s4415_s24 }
  0x10   : > { %v4206_v5 = vld [vmem:[%s4424_s29] sm:$0xff]   ;;  %v4207_v6 = vld [vmem:[%s4424_s29 + $0x30] sm:$0xff]   ;;  %v4210_v9 = vld [vmem:[%s4424_s29 + $0x8] sm:$0xff]   ;;  %s4465_s23 = scalar_lea.vmem %s5238_s2, %s4415_s24  ;;  %s4489_s27 = scalar_lea.vmem %s5239_s3, %s4415_s24 }
  0x11   : > { %3763 = vmatmul.mubr.msk.bf16.vlgmr.msra.gmra.mrb[0].mxu0 %vm687_vm1, %v4206_v5  ;;  %3787 = vmatmul.mubr.msk.bf16.vlgmr.msra.gmra.mrb[0].mxu1 %vm687_vm1, %v4207_v6  ;;  %v4211_v10 = vld [vmem:[%s4424_s29 + $0x38] sm:$0xff]   ;;  %v4212_v11 = vld [vmem:[%s4424_s29 + $0x10] sm:$0xff]   ;;  %v4213_v12 = vld [vmem:[%s4424_s29 + $0x40] sm:$0xff]   ;;  %s4499_s12 = scalar_lea.vmem %s5240_s4, %s4415_s24  ;;  %s4573_s26 = scalar_lea.vmem %s5241_s5, %s4415_s24 }
  0x12   : > { %3855 = vmatpush3.bf16.msra.mxu0 %v4208_v3  ;;  %3807 = vmatpush3.bf16.msra.mxu1 %v4209_v4  ;;  %v4214_v13 = vld [vmem:[%s4424_s29 + $0x18] sm:$0xff]   ;;  %v4215_v14 = vld [vmem:[%s4424_s29 + $0x48] sm:$0xff]   ;;  %v4218_v15 = vld [vmem:[%s4424_s29 + $0x20] sm:$0xff]   ;;  %s4587_s13 = scalar_lea.vmem %s5242_s6, %s4415_s24  ;;  %s4689_s25 = scalar_lea.vmem %s5243_s7, %s4415_s24 }
  0x13   : > { %3766 = vmatprep.mubr.msk.bf16.mxu0 %vm4330_vm0, %v4329_v1  ;;  %3790 = vmatprep.mubr.msk.bf16.mxu1 %vm4330_vm0, %v4329_v1  ;;  %v4219_v16 = vld [vmem:[%s4424_s29 + $0x50] sm:$0xff]   ;;  %v4220_v17 = vld [vmem:[%s4424_s29 + $0x28] sm:$0xff]   ;;  %v4221_v18 = vld [vmem:[%s4454_s20] sm:$0xff]   ;;  %s4703_s14 = scalar_lea.vmem %s5244_s8, %s4415_s24  ;;  %s5182_s22 = scalar_lea.vmem %s5247_s11, %s4415_s24 }
  0x14   : > { %3856 = vmatprep.subr.bf16.mxu0 %v4329_v1  ;;  %3808 = vmatprep.subr.bf16.mxu1 %v4329_v1  ;;  %v4224_v22 = vld [vmem:[%s4465_s23] sm:$0xff]   ;;  %v4223_v23 = vld [vmem:[%s4454_s20 + $0x8] sm:$0xff]   ;;  %v4226_v26 = vld [vmem:[%s4454_s20 + $0x10] sm:$0xff]  }
  0x15   : > { %v4227_v25 = vld [vmem:[%s4465_s23 + $0x8] sm:$0xff]   ;;  %v4229_v27 = vld [vmem:[%s4465_s23 + $0x10] sm:$0xff]   ;;  %v4228_v28 = vld [vmem:[%s4454_s20 + $0x18] sm:$0xff]  }
  0x16   : > { %3857 = vmatpush3.bf16.msra.mxu0 %v4216_v7  ;;  %3809 = vmatpush3.bf16.msra.mxu1 %v4217_v8  ;;  %v4231_v29 = vld [vmem:[%s4465_s23 + $0x18] sm:$0xff]   ;;  %v4230_v30 = vld [vmem:[%s4454_s20 + $0x20] sm:$0xff]   ;;  %v4232_v32 = vld [vmem:[%s4454_s20 + $0x28] sm:$0xff]  }
  0x17   : > { %3950 = vmatprep.subr.bf16.mxu0 %v4329_v1  ;;  %3902 = vmatprep.subr.bf16.mxu1 %v4329_v1  ;;  %v4233_v31 = vld [vmem:[%s4465_s23 + $0x20] sm:$0xff]   ;;  %v4235_v33 = vld [vmem:[%s4465_s23 + $0x28] sm:$0xff]   ;;  %v4234_v34 = vld [vmem:[%s4454_s20 + $0x30] sm:$0xff]  }
  0x18   : > { %v4239_v35 = vld [vmem:[%s4465_s23 + $0x30] sm:$0xff]   ;;  %v4238_v36 = vld [vmem:[%s4454_s20 + $0x38] sm:$0xff]   ;;  %v4240_v38 = vld [vmem:[%s4454_s20 + $0x40] sm:$0xff]  }
  0x19   : > { %3767 = vmatmul.mubr.msk.bf16.gmra.mrb[4].mxu0 %vm687_vm1, %v4210_v9  ;;  %3791 = vmatmul.mubr.msk.bf16.gmra.mrb[4].mxu1 %vm687_vm1, %v4211_v10  ;;  %v4241_v37 = vld [vmem:[%s4465_s23 + $0x38] sm:$0xff]   ;;  %v4243_v39 = vld [vmem:[%s4465_s23 + $0x40] sm:$0xff]   ;;  %v4242_v40 = vld [vmem:[%s4454_s20 + $0x48] sm:$0xff]  }
  0x1a   : > { %3770 = vmatprep.mubr.msk.bf16.mxu0 %vm4330_vm0, %v4329_v1  ;;  %3794 = vmatprep.mubr.msk.bf16.mxu1 %vm4330_vm0, %v4329_v1  ;;  %v4245_v41 = vld [vmem:[%s4465_s23 + $0x48] sm:$0xff]   ;;  %v4244_v42 = vld [vmem:[%s4454_s20 + $0x50] sm:$0xff]   ;;  %v4247_v44 = vld [vmem:[%s4489_s27] sm:$0xff]  }
  0x1b   : > { %v4246_v43 = vld [vmem:[%s4465_s23 + $0x50] sm:$0xff]   ;;  %v4250_v47 = vld [vmem:[%s4499_s12] sm:$0xff]   ;;  %v4249_v48 = vld [vmem:[%s4489_s27 + $0x8] sm:$0xff]  }
  0x1c   : > { %v4253_v51 = vld [vmem:[%s4499_s12 + $0x8] sm:$0xff]   ;;  %v4252_v52 = vld [vmem:[%s4489_s27 + $0x10] sm:$0xff]   ;;  %v4254_v54 = vld [vmem:[%s4489_s27 + $0x18] sm:$0xff]  }
  0x1d   : > { %v4255_v53 = vld [vmem:[%s4499_s12 + $0x10] sm:$0xff]   ;;  %v4257_v55 = vld [vmem:[%s4499_s12 + $0x18] sm:$0xff]   ;;  %v4256_v56 = vld [vmem:[%s4489_s27 + $0x20] sm:$0xff]  }
  0x1e   : > { %v4259_v57 = vld [vmem:[%s4499_s12 + $0x20] sm:$0xff]   ;;  %v4258_v58 = vld [vmem:[%s4489_s27 + $0x28] sm:$0xff]   ;;  %v4260_v60 = vld [vmem:[%s4489_s27 + $0x30] sm:$0xff]  }
  0x1f   : > { %v4261_v59 = vld [vmem:[%s4499_s12 + $0x28] sm:$0xff]   ;;  %v4265_v61 = vld [vmem:[%s4499_s12 + $0x30] sm:$0xff]   ;;  %v4264_v62 = vld [vmem:[%s4489_s27 + $0x38] sm:$0xff]  }
  0x20   : > { %v4267_v63 = vld [vmem:[%s4499_s12 + $0x38] sm:$0xff]   ;;  %v4266_v0 = vld [vmem:[%s4489_s27 + $0x40] sm:$0xff]   ;;  %v4268_v3 = vld [vmem:[%s4489_s27 + $0x48] sm:$0xff]  }
  0x21   : > { %3771 = vmatmul.mubr.msk.bf16.gmra.mrb[8].mxu0 %vm687_vm1, %v4212_v11  ;;  %3795 = vmatmul.mubr.msk.bf16.gmra.mrb[8].mxu1 %vm687_vm1, %v4213_v12  ;;  %v4269_v2 = vld [vmem:[%s4499_s12 + $0x40] sm:$0xff]   ;;  %v4271_v4 = vld [vmem:[%s4499_s12 + $0x48] sm:$0xff]   ;;  %v4270_v5 = vld [vmem:[%s4489_s27 + $0x50] sm:$0xff]  }
  0x22   : > { %3774 = vmatprep.mubr.msk.bf16.mxu0 %vm4330_vm0, %v4329_v1  ;;  %3798 = vmatprep.mubr.msk.bf16.mxu1 %vm4330_vm0, %v4329_v1  ;;  %v4272_v9 = vld [vmem:[%s4499_s12 + $0x50] sm:$0xff]   ;;  %v4273_v12 = vld [vmem:[%s4573_s26] sm:$0xff]  }
  0x29   : > { %3775 = vmatmul.mubr.msk.bf16.gmra.mrb[12].mxu0 %vm687_vm1, %v4214_v13  ;;  %3799 = vmatmul.mubr.msk.bf16.gmra.mrb[12].mxu1 %vm687_vm1, %v4215_v14 }
  0x2a   : > { %3778 = vmatprep.mubr.msk.bf16.mxu0 %vm4330_vm0, %v4329_v1  ;;  %3802 = vmatprep.mubr.msk.bf16.mxu1 %vm4330_vm0, %v4329_v1 }
  0x31   : > { %3779 = vmatmul.mubr.msk.bf16.gmra.mrb[16].mxu0 %vm687_vm1, %v4218_v15  ;;  %3803 = vmatmul.mubr.msk.bf16.gmra.mrb[16].mxu1 %vm687_vm1, %v4219_v16  ;;  %v4274_v15 = vld [vmem:[%s5245_s9 + $0x70] sm:$0xff]  }
  0x32   : > { %3782 = vmatprep.mubr.msk.bf16.mxu0 %vm4330_vm0, %v4329_v1  ;;  %3810 = vmatprep.mubr.msk.bf16.mxu1 %vm4330_vm0, %v4329_v1 }
  0x39   : > { %3783 = vmatmul.mubr.msk.bf16.gmra.mrb[20].mxu0 %vm687_vm1, %v4220_v17  ;;  %3811 = vmatmul.mubr.msk.bf16.vlgmr.msra.gmra.mrb[20].mxu1 %vm687_vm1, %v4221_v18  ;;  %v4288_v17 = vld [vmem:[%s5245_s9 + $0x78] sm:$0xff]  }
  0x3a   : > { %3858 = vmatprep.mubr.msk.bf16.mxu0 %vm4330_vm0, %v4329_v1  ;;  %3903 = vmatpush3.bf16.msra.mxu1 %v4222_v19 }
  0x3b   : > { %3814 = vmatprep.mubr.msk.bf16.mxu1 %vm4330_vm0, %v4329_v1  ;;  %3904 = vmatprep.subr.bf16.mxu1 %v4329_v1 }
  0x3e   : > { %3905 = vmatpush3.bf16.msra.mxu1 %v4236_v20 }
  0x3f   : > { %3998 = vmatprep.subr.bf16.mxu1 %v4329_v1 }
  0x41   : > { %3859 = vmatmul.mubr.msk.bf16.vlgmr.msra.gmra.mrb[24].mxu0 %vm687_vm1, %v4224_v22  ;;  %3815 = vmatmul.mubr.msk.bf16.gmra.mrb[24].mxu1 %vm687_vm1, %v4223_v23 }
  0x42   : > { %3951 = vmatpush3.bf16.msra.mxu0 %v4225_v21  ;;  %3818 = vmatprep.mubr.msk.bf16.mxu1 %vm4330_vm0, %v4329_v1  ;;  %v4276_v21 = vld [vmem:[%s4587_s13] sm:$0xff]  }
  0x43   : > { %3862 = vmatprep.mubr.msk.bf16.mxu0 %vm4330_vm0, %v4329_v1  ;;  %3952 = vmatprep.subr.bf16.mxu0 %v4329_v1 }
  0x46   : > { %3953 = vmatpush3.bf16.msra.mxu0 %v4237_v24  ;;  %v4275_v24 = vld [vmem:[%s4573_s26 + $0x8] sm:$0xff]  }
  0x47   : > { %4046 = vmatprep.subr.bf16.mxu0 %v4329_v1 }
  0x49   : > { %3863 = vmatmul.mubr.msk.bf16.gmra.mrb[28].mxu0 %vm687_vm1, %v4227_v25  ;;  %3819 = vmatmul.mubr.msk.bf16.gmra.mrb[28].mxu1 %vm687_vm1, %v4226_v26  ;;  %v4277_v25 = vld [vmem:[%s5245_s9 + $0x80] sm:$0xff]  }
  0x4a   : > { %3866 = vmatprep.mubr.msk.bf16.mxu0 %vm4330_vm0, %v4329_v1  ;;  %3822 = vmatprep.mubr.msk.bf16.mxu1 %vm4330_vm0, %v4329_v1 }
  0x51   : > { %3867 = vmatmul.mubr.msk.bf16.gmra.mrb[32].mxu0 %vm687_vm1, %v4229_v27  ;;  %3823 = vmatmul.mubr.msk.bf16.gmra.mrb[32].mxu1 %vm687_vm1, %v4228_v28 }
  0x52   : > { %3870 = vmatprep.mubr.msk.bf16.mxu0 %vm4330_vm0, %v4329_v1  ;;  %3826 = vmatprep.mubr.msk.bf16.mxu1 %vm4330_vm0, %v4329_v1 }
  0x59   : > { %3871 = vmatmul.mubr.msk.bf16.gmra.mrb[36].mxu0 %vm687_vm1, %v4231_v29  ;;  %3827 = vmatmul.mubr.msk.bf16.gmra.mrb[36].mxu1 %vm687_vm1, %v4230_v30  ;;  %v4289_v29 = vld [vmem:[%s5245_s9 + $0x88] sm:$0xff]  }
  0x5a   : > { %3874 = vmatprep.mubr.msk.bf16.mxu0 %vm4330_vm0, %v4329_v1  ;;  %3830 = vmatprep.mubr.msk.bf16.mxu1 %vm4330_vm0, %v4329_v1 }
  0x61   : > { %3875 = vmatmul.mubr.msk.bf16.gmra.mrb[40].mxu0 %vm687_vm1, %v4233_v31  ;;  %3831 = vmatmul.mubr.msk.bf16.gmra.mrb[40].mxu1 %vm687_vm1, %v4232_v32 }
  0x62   : > { %3878 = vmatprep.mubr.msk.bf16.mxu0 %vm4330_vm0, %v4329_v1  ;;  %3834 = vmatprep.mubr.msk.bf16.mxu1 %vm4330_vm0, %v4329_v1 }
  0x69   : > { %3879 = vmatmul.mubr.msk.bf16.gmra.mrb[44].mxu0 %vm687_vm1, %v4235_v33  ;;  %3835 = vmatmul.mubr.msk.bf16.gmra.mrb[44].mxu1 %vm687_vm1, %v4234_v34  ;;  %v4279_v33 = vld [vmem:[%s4587_s13 + $0x8] sm:$0xff]  }
  0x6a   : > { %3882 = vmatprep.mubr.msk.bf16.mxu0 %vm4330_vm0, %v4329_v1  ;;  %3838 = vmatprep.mubr.msk.bf16.mxu1 %vm4330_vm0, %v4329_v1 }
  0x71   : > { %3883 = vmatmul.mubr.msk.bf16.gmra.mrb[48].mxu0 %vm687_vm1, %v4239_v35  ;;  %3839 = vmatmul.mubr.msk.bf16.gmra.mrb[48].mxu1 %vm687_vm1, %v4238_v36  ;;  %v4278_v36 = vld [vmem:[%s4573_s26 + $0x10] sm:$0xff]  }
  0x72   : > { %3886 = vmatprep.mubr.msk.bf16.mxu0 %vm4330_vm0, %v4329_v1  ;;  %3842 = vmatprep.mubr.msk.bf16.mxu1 %vm4330_vm0, %v4329_v1 }
  0x79   : > { %3887 = vmatmul.mubr.msk.bf16.gmra.mrb[52].mxu0 %vm687_vm1, %v4241_v37  ;;  %3843 = vmatmul.mubr.msk.bf16.gmra.mrb[52].mxu1 %vm687_vm1, %v4240_v38 }
  0x7a   : > { %3890 = vmatprep.mubr.msk.bf16.mxu0 %vm4330_vm0, %v4329_v1  ;;  %3846 = vmatprep.mubr.msk.bf16.mxu1 %vm4330_vm0, %v4329_v1 }
  0x81   : > { %3891 = vmatmul.mubr.msk.bf16.gmra.mrb[56].mxu0 %vm687_vm1, %v4243_v39  ;;  %3847 = vmatmul.mubr.msk.bf16.gmra.mrb[56].mxu1 %vm687_vm1, %v4242_v40 }
  0x82   : > { %3894 = vmatprep.mubr.msk.bf16.mxu0 %vm4330_vm0, %v4329_v1  ;;  %3850 = vmatprep.mubr.msk.bf16.mxu1 %vm4330_vm0, %v4329_v1 }
  0x89   : > { %3895 = vmatmul.mubr.msk.bf16.gmra.mrb[60].mxu0 %vm687_vm1, %v4245_v41  ;;  %3851 = vmatmul.mubr.msk.bf16.gmra.mrb[60].mxu1 %vm687_vm1, %v4244_v42 }
  0x8a   : > { %3898 = vmatprep.mubr.msk.bf16.mxu0 %vm4330_vm0, %v4329_v1  ;;  %3906 = vmatprep.mubr.msk.bf16.mxu1 %vm4330_vm0, %v4329_v1 }
  0x91   : > { %3899 = vmatmul.mubr.msk.bf16.gmra.mrb[64].mxu0 %vm687_vm1, %v4246_v43  ;;  %3907 = vmatmul.mubr.msk.bf16.vlgmr.msra.gmra.mrb[64].mxu1 %vm687_vm1, %v4247_v44  ;;  %v4281_v43 = vld [vmem:[%s4587_s13 + $0x10] sm:$0xff]  }
  0x92   : > { %3954 = vmatprep.mubr.msk.bf16.mxu0 %vm4330_vm0, %v4329_v1  ;;  %3999 = vmatpush3.bf16.msra.mxu1 %v4248_v45 }
  0x93   : > { %3910 = vmatprep.mubr.msk.bf16.mxu1 %vm4330_vm0, %v4329_v1  ;;  %4000 = vmatprep.subr.bf16.mxu1 %v4329_v1 }
  0x96   : > { %4001 = vmatpush3.bf16.msra.mxu1 %v4262_v46  ;;  %v4280_v46 = vld [vmem:[%s4573_s26 + $0x18] sm:$0xff]  }
  0x97   : > { %4094 = vmatprep.subr.bf16.mxu1 %v4329_v1 }
  0x99   : > { %3955 = vmatmul.mubr.msk.bf16.vlgmr.msra.gmra.mrb[68].mxu0 %vm687_vm1, %v4250_v47  ;;  %3911 = vmatmul.mubr.msk.bf16.gmra.mrb[68].mxu1 %vm687_vm1, %v4249_v48 }
  0x9a   : > { %4047 = vmatpush3.bf16.msra.mxu0 %v4251_v49  ;;  %3914 = vmatprep.mubr.msk.bf16.mxu1 %vm4330_vm0, %v4329_v1 }
  0x9b   : > { %3958 = vmatprep.mubr.msk.bf16.mxu0 %vm4330_vm0, %v4329_v1  ;;  %4048 = vmatprep.subr.bf16.mxu0 %v4329_v1 }
  0x9e   : > { %4049 = vmatpush3.bf16.msra.mxu0 %v4263_v50 }
  0x9f   : > { %4142 = vmatprep.subr.bf16.mxu0 %v4329_v1 }
  0xa1   : > { %3959 = vmatmul.mubr.msk.bf16.gmra.mrb[72].mxu0 %vm687_vm1, %v4253_v51  ;;  %3915 = vmatmul.mubr.msk.bf16.gmra.mrb[72].mxu1 %vm687_vm1, %v4252_v52 }
  0xa2   : > { %3962 = vmatprep.mubr.msk.bf16.mxu0 %vm4330_vm0, %v4329_v1  ;;  %3918 = vmatprep.mubr.msk.bf16.mxu1 %vm4330_vm0, %v4329_v1 }
  0xa9   : > { %3963 = vmatmul.mubr.msk.bf16.gmra.mrb[76].mxu0 %vm687_vm1, %v4255_v53  ;;  %3919 = vmatmul.mubr.msk.bf16.gmra.mrb[76].mxu1 %vm687_vm1, %v4254_v54  ;;  %v4283_v53 = vld [vmem:[%s4587_s13 + $0x18] sm:$0xff]  }
  0xaa   : > { %3966 = vmatprep.mubr.msk.bf16.mxu0 %vm4330_vm0, %v4329_v1  ;;  %3922 = vmatprep.mubr.msk.bf16.mxu1 %vm4330_vm0, %v4329_v1 }
  0xb1   : > { %3967 = vmatmul.mubr.msk.bf16.gmra.mrb[80].mxu0 %vm687_vm1, %v4257_v55  ;;  %3923 = vmatmul.mubr.msk.bf16.gmra.mrb[80].mxu1 %vm687_vm1, %v4256_v56  ;;  %v4282_v56 = vld [vmem:[%s4573_s26 + $0x20] sm:$0xff]  }
  0xb2   : > { %3970 = vmatprep.mubr.msk.bf16.mxu0 %vm4330_vm0, %v4329_v1  ;;  %3926 = vmatprep.mubr.msk.bf16.mxu1 %vm4330_vm0, %v4329_v1 }
  0xb9   : > { %3971 = vmatmul.mubr.msk.bf16.gmra.mrb[84].mxu0 %vm687_vm1, %v4259_v57  ;;  %3927 = vmatmul.mubr.msk.bf16.gmra.mrb[84].mxu1 %vm687_vm1, %v4258_v58 }
  0xba   : > { %3974 = vmatprep.mubr.msk.bf16.mxu0 %vm4330_vm0, %v4329_v1  ;;  %3930 = vmatprep.mubr.msk.bf16.mxu1 %vm4330_vm0, %v4329_v1 }
  0xc1   : > { %3975 = vmatmul.mubr.msk.bf16.gmra.mrb[88].mxu0 %vm687_vm1, %v4261_v59  ;;  %3931 = vmatmul.mubr.msk.bf16.gmra.mrb[88].mxu1 %vm687_vm1, %v4260_v60 }
  0xc2   : > { %3978 = vmatprep.mubr.msk.bf16.mxu0 %vm4330_vm0, %v4329_v1  ;;  %3934 = vmatprep.mubr.msk.bf16.mxu1 %vm4330_vm0, %v4329_v1 }
  0xc9   : > { %3979 = vmatmul.mubr.msk.bf16.gmra.mrb[92].mxu0 %vm687_vm1, %v4265_v61  ;;  %3935 = vmatmul.mubr.msk.bf16.gmra.mrb[92].mxu1 %vm687_vm1, %v4264_v62 }
  0xca   : > { %3982 = vmatprep.mubr.msk.bf16.mxu0 %vm4330_vm0, %v4329_v1  ;;  %3938 = vmatprep.mubr.msk.bf16.mxu1 %vm4330_vm0, %v4329_v1 }
  0xd1   : > { %3983 = vmatmul.mubr.msk.bf16.gmra.mrb[96].mxu0 %vm687_vm1, %v4267_v63  ;;  %3939 = vmatmul.mubr.msk.bf16.gmra.mrb[96].mxu1 %vm687_vm1, %v4266_v0  ;;  %v4285_v63 = vld [vmem:[%s4587_s13 + $0x20] sm:$0xff]  }
  0xd2   : > { %3986 = vmatprep.mubr.msk.bf16.mxu0 %vm4330_vm0, %v4329_v1  ;;  %3942 = vmatprep.mubr.msk.bf16.mxu1 %vm4330_vm0, %v4329_v1 }
  0xd9   : > { %3987 = vmatmul.mubr.msk.bf16.gmra.mrb[100].mxu0 %vm687_vm1, %v4269_v2  ;;  %3943 = vmatmul.mubr.msk.bf16.gmra.mrb[100].mxu1 %vm687_vm1, %v4268_v3 }
  0xda   : > { %3990 = vmatprep.mubr.msk.bf16.mxu0 %vm4330_vm0, %v4329_v1  ;;  %3946 = vmatprep.mubr.msk.bf16.mxu1 %vm4330_vm0, %v4329_v1 }
  0xe1   : > { %3991 = vmatmul.mubr.msk.bf16.gmra.mrb[104].mxu0 %vm687_vm1, %v4271_v4  ;;  %3947 = vmatmul.mubr.msk.bf16.gmra.mrb[104].mxu1 %vm687_vm1, %v4270_v5  ;;  %v4284_v4 = vld [vmem:[%s4573_s26 + $0x28] sm:$0xff]  }
  0xe2   : > { %3994 = vmatprep.mubr.msk.bf16.mxu0 %vm4330_vm0, %v4329_v1  ;;  %4002 = vmatprep.mubr.msk.bf16.mxu1 %vm4330_vm0, %v4329_v1 }
  0xe4   : > { %v4735_v6 = vpop.f32.mrb[0].mxu0  ;;  %v4737_v8 = vpop.f32.mrb[0].mxu1 }
  0xe5   : > { %v3764_v7 = vpop.f32.mrb[1].mxu0  ;;  %v3788_v11 = vpop.f32.mrb[1].mxu1 }
  0xe6   : > { %v4740_v10 = vpop.f32.mrb[2].mxu0  ;;  %v4743_v14 = vpop.f32.mrb[2].mxu1 }
  0xe7   : > { %v3765_v13 = vpop.f32.mrb[3].mxu0  ;;  %v3789_v16 = vpop.f32.mrb[3].mxu1 }
  0xe8   : > { %v4287_v16 = vld [vmem:[%s4587_s13 + $0x28] sm:$0xff]  }
  0xe9   : > { %3995 = vmatmul.mubr.msk.bf16.gmra.mrb[108].mxu0 %vm687_vm1, %v4272_v9  ;;  %4003 = vmatmul.mubr.msk.bf16.vlgmr.msra.gmra.mrb[108].mxu1 %vm687_vm1, %v4273_v12 }
  0xea   : > { %4050 = vmatprep.mubr.msk.bf16.mxu0 %vm4330_vm0, %v4329_v1  ;;  %4095 = vmatpush3.bf16.msra.mxu1 %v4274_v15 }
  0xeb   : > { %4006 = vmatprep.mubr.msk.bf16.mxu1 %vm4330_vm0, %v4329_v1  ;;  %4096 = vmatprep.subr.bf16.mxu1 %v4329_v1 }
  0xec   : > { %v4757_v18 = vpop.f32.mrb[4].mxu0  ;;  %v4760_v20 = vpop.f32.mrb[4].mxu1 }
  0xed   : > { %v3768_v19 = vpop.f32.mrb[5].mxu0  ;;  %v3792_v23 = vpop.f32.mrb[5].mxu1 }
  0xee   : > { %v4763_v22 = vpop.f32.mrb[6].mxu0  ;;  %v4769_v27 = vpop.f32.mrb[6].mxu1  ;;  %4097 = vmatpush3.bf16.msra.mxu1 %v4288_v17 }
  0xef   : > { %v3769_v26 = vpop.f32.mrb[7].mxu0  ;;  %v3793_v28 = vpop.f32.mrb[7].mxu1 }
  0xf1   : > { %4051 = vmatmul.mubr.msk.bf16.vlgmr.msra.gmra.mrb[112].mxu0 %vm687_vm1, %v4276_v21  ;;  %4007 = vmatmul.mubr.msk.bf16.gmra.mrb[112].mxu1 %vm687_vm1, %v4275_v24  ;;  %v4286_v21 = vld [vmem:[%s4573_s26 + $0x30] sm:$0xff]  }
  0xf2   : > { %4143 = vmatpush3.bf16.msra.mxu0 %v4277_v25  ;;  %4010 = vmatprep.mubr.msk.bf16.mxu1 %vm4330_vm0, %v4329_v1 }
  0xf3   : > { %4054 = vmatprep.mubr.msk.bf16.mxu0 %vm4330_vm0, %v4329_v1  ;;  %4144 = vmatprep.subr.bf16.mxu0 %v4329_v1 }
  0xf4   : > { %v4780_v30 = vpop.f32.mrb[8].mxu0  ;;  %v4783_v32 = vpop.f32.mrb[8].mxu1 }
  0xf5   : > { %v3772_v31 = vpop.f32.mrb[9].mxu0  ;;  %v3796_v35 = vpop.f32.mrb[9].mxu1 }
  0xf6   : > { %v4786_v34 = vpop.f32.mrb[10].mxu0  ;;  %4145 = vmatpush3.bf16.msra.mxu0 %v4289_v29  ;;  %v4789_v38 = vpop.f32.mrb[10].mxu1  ;;  %v4291_v35 = vld [vmem:[%s4587_s13 + $0x30] sm:$0xff]  }
  0xf7   : > { %v3773_v37 = vpop.f32.mrb[11].mxu0  ;;  %v3797_v39 = vpop.f32.mrb[11].mxu1 }
  0xf8   : > { %v4290_v39 = vld [vmem:[%s4573_s26 + $0x38] sm:$0xff]  }
  0xf9   : > { %4055 = vmatmul.mubr.msk.bf16.gmra.mrb[116].mxu0 %vm687_vm1, %v4279_v33  ;;  %4011 = vmatmul.mubr.msk.bf16.gmra.mrb[116].mxu1 %vm687_vm1, %v4278_v36 }
  0xfa   : > { %4058 = vmatprep.mubr.msk.bf16.mxu0 %vm4330_vm0, %v4329_v1  ;;  %4014 = vmatprep.mubr.msk.bf16.mxu1 %vm4330_vm0, %v4329_v1 }
  0xfc   : > { %v4797_v40 = vpop.f32.mrb[12].mxu0  ;;  %v4799_v42 = vpop.f32.mrb[12].mxu1 }
  0xfd   : > { %v3776_v41 = vpop.f32.mrb[13].mxu0  ;;  %v3800_v45 = vpop.f32.mrb[13].mxu1 }
  0xfe   : > { %v4802_v44 = vpop.f32.mrb[14].mxu0  ;;  %v4805_v48 = vpop.f32.mrb[14].mxu1 }
  0xff   : > { %v3777_v47 = vpop.f32.mrb[15].mxu0  ;;  %v3801_v49 = vpop.f32.mrb[15].mxu1 }
 0x101   : > { %4059 = vmatmul.mubr.msk.bf16.gmra.mrb[120].mxu0 %vm687_vm1, %v4281_v43  ;;  %4015 = vmatmul.mubr.msk.bf16.gmra.mrb[120].mxu1 %vm687_vm1, %v4280_v46 }
 0x102   : > { %4062 = vmatprep.mubr.msk.bf16.mxu0 %vm4330_vm0, %v4329_v1  ;;  %4018 = vmatprep.mubr.msk.bf16.mxu1 %vm4330_vm0, %v4329_v1 }
 0x104   : > { %v4813_v50 = vpop.f32.mrb[16].mxu0  ;;  %v4815_v52 = vpop.f32.mrb[16].mxu1 }
 0x105   : > { %v3780_v51 = vpop.f32.mrb[17].mxu0  ;;  %v3804_v55 = vpop.f32.mrb[17].mxu1 }
 0x106   : > { %v4818_v54 = vpop.f32.mrb[18].mxu0  ;;  %v4821_v58 = vpop.f32.mrb[18].mxu1  ;;  %v4293_v55 = vld [vmem:[%s4587_s13 + $0x38] sm:$0xff]  }
 0x107   : > { %v3781_v57 = vpop.f32.mrb[19].mxu0  ;;  %v3805_v59 = vpop.f32.mrb[19].mxu1 }
 0x108   : > { %v4292_v59 = vld [vmem:[%s4573_s26 + $0x40] sm:$0xff]  }
 0x109   : > { %4063 = vmatmul.mubr.msk.bf16.gmra.mrb[124].mxu0 %vm687_vm1, %v4283_v53  ;;  %4019 = vmatmul.mubr.msk.bf16.gmra.mrb[124].mxu1 %vm687_vm1, %v4282_v56 }
 0x10a   : > { %4066 = vmatprep.mubr.msk.bf16.mxu0 %vm4330_vm0, %v4329_v1  ;;  %4022 = vmatprep.mubr.msk.bf16.mxu1 %vm4330_vm0, %v4329_v1 }
 0x10c   : > { %v4829_v60 = vpop.f32.mrb[20].mxu0  ;;  %v976_v61 = vpop.f32.mrb[20].mxu1 }
 0x10d   : > { %v3784_v62 = vpop.f32.mrb[21].mxu0  ;;  %v977_v0 = vadd.f32 %v976_v61, %v4735_v6  ;;  %v3812_v2 = vpop.f32.mrb[21].mxu1 }
 0x10e   : > { %v4833_v3 = vpop.f32.mrb[22].mxu0  ;;  %v979_v5 = vpop.f32.mrb[22].mxu1 }
 0x10f   : > { %v3785_v7 = vpop.f32.mrb[23].mxu0  ;;  %v980_v9 = vadd.f32 %v979_v5, %v4740_v10  ;;  %v3813_v11 = vpop.f32.mrb[23].mxu1 }
 0x111   : > { %4067 = vmatmul.mubr.msk.bf16.gmra.mrb[128].mxu0 %vm687_vm1, %v4285_v63  ;;  %4023 = vmatmul.mubr.msk.bf16.gmra.mrb[128].mxu1 %vm687_vm1, %v4284_v4 }
 0x112   : > { %4070 = vmatprep.mubr.msk.bf16.mxu0 %vm4330_vm0, %v4329_v1  ;;  %4026 = vmatprep.mubr.msk.bf16.mxu1 %vm4330_vm0, %v4329_v1 }
 0x114   : > { %v1224_v6 = vpop.f32.mrb[24].mxu0  ;;  %v984_v12 = vpop.f32.mrb[24].mxu1 }
 0x115   : > { %v4843_v13 = vadd.f32 %v1224_v6, %v977_v0  ;;  %v3860_v15 = vpop.f32.mrb[25].mxu0  ;;  %v985_v17 = vadd.f32 %v984_v12, %v4757_v18  ;;  %v3816_v10 = vpop.f32.mrb[25].mxu1  ;;  %v4294_v12 = vld [vmem:[%s4573_s26 + $0x48] sm:$0xff]  }
 0x116   : > { %v1227_v19 = vpop.f32.mrb[26].mxu0  ;;  %v987_v23 = vpop.f32.mrb[26].mxu1 }
 0x117   : > { %v4848_v24 = vadd.f32 %v1227_v19, %v980_v9  ;;  %v3861_v25 = vpop.f32.mrb[27].mxu0  ;;  %v988_v26 = vadd.f32 %v987_v23, %v4763_v22  ;;  %v3817_v28 = vpop.f32.mrb[27].mxu1  ;;  %v4295_v9 = vld [vmem:[%s4587_s13 + $0x40] sm:$0xff]  }
 0x119   : > { %4071 = vmatmul.mubr.msk.bf16.gmra.mrb[132].mxu0 %vm687_vm1, %v4287_v16  ;;  %4027 = vmatmul.mubr.msk.bf16.gmra.mrb[132].mxu1 %vm687_vm1, %v4286_v21 }
 0x11a   : > { %4074 = vmatprep.mubr.msk.bf16.mxu0 %vm4330_vm0, %v4329_v1  ;;  %4030 = vmatprep.mubr.msk.bf16.mxu1 %vm4330_vm0, %v4329_v1 }
 0x11c   : > { %v1232_v18 = vpop.f32.mrb[28].mxu0  ;;  %v992_v29 = vpop.f32.mrb[28].mxu1 }
 0x11d   : > { %v4857_v31 = vadd.f32 %v1232_v18, %v985_v17  ;;  %v3864_v33 = vpop.f32.mrb[29].mxu0  ;;  %v993_v36 = vadd.f32 %v992_v29, %v4780_v30  ;;  %v3820_v22 = vpop.f32.mrb[29].mxu1  ;;  %v4296_v29 = vld [vmem:[%s4573_s26 + $0x50] sm:$0xff]  }
 0x11e   : > { %v1235_v37 = vpop.f32.mrb[30].mxu0  ;;  %v995_v41 = vpop.f32.mrb[30].mxu1 }
 0x11f   : > { %v4862_v43 = vadd.f32 %v1235_v37, %v988_v26  ;;  %v3865_v45 = vpop.f32.mrb[31].mxu0  ;;  %v996_v46 = vadd.f32 %v995_v41, %v4786_v34  ;;  %v3821_v47 = vpop.f32.mrb[31].mxu1  ;;  %v4297_v26 = vld [vmem:[%s4587_s13 + $0x48] sm:$0xff]  }
 0x121   : > { %4075 = vmatmul.mubr.msk.bf16.gmra.mrb[136].mxu0 %vm687_vm1, %v4291_v35  ;;  %4031 = vmatmul.mubr.msk.bf16.gmra.mrb[136].mxu1 %vm687_vm1, %v4290_v39 }
 0x122   : > { %4078 = vmatprep.mubr.msk.bf16.mxu0 %vm4330_vm0, %v4329_v1  ;;  %4034 = vmatprep.mubr.msk.bf16.mxu1 %vm4330_vm0, %v4329_v1 }
 0x124   : > { %v1240_v30 = vpop.f32.mrb[32].mxu0  ;;  %v1000_v49 = vpop.f32.mrb[32].mxu1 }
 0x125   : > { %v4871_v51 = vadd.f32 %v1240_v30, %v993_v36  ;;  %v3868_v53 = vpop.f32.mrb[33].mxu0  ;;  %v1001_v56 = vadd.f32 %v1000_v49, %v4797_v40  ;;  %v3824_v34 = vpop.f32.mrb[33].mxu1  ;;  %v4299_v49 = vld [vmem:[%s4689_s25] sm:$0xff]  }
 0x126   : > { %v1243_v57 = vpop.f32.mrb[34].mxu0  ;;  %v1003_v61 = vpop.f32.mrb[34].mxu1 }
 0x127   : > { %v4876_v62 = vadd.f32 %v1243_v57, %v996_v46  ;;  %v3869_v63 = vpop.f32.mrb[35].mxu0  ;;  %v1004_v0 = vadd.f32 %v1003_v61, %v4802_v44  ;;  %v3825_v2 = vpop.f32.mrb[35].mxu1  ;;  %v4298_v46 = vld [vmem:[%s4587_s13 + $0x50] sm:$0xff]  }
 0x129   : > { %4079 = vmatmul.mubr.msk.bf16.gmra.mrb[140].mxu0 %vm687_vm1, %v4293_v55  ;;  %4035 = vmatmul.mubr.msk.bf16.gmra.mrb[140].mxu1 %vm687_vm1, %v4292_v59 }
 0x12a   : > { %4082 = vmatprep.mubr.msk.bf16.mxu0 %vm4330_vm0, %v4329_v1  ;;  %4038 = vmatprep.mubr.msk.bf16.mxu1 %vm4330_vm0, %v4329_v1 }
 0x12c   : > { %v1248_v40 = vpop.f32.mrb[36].mxu0  ;;  %v1008_v4 = vpop.f32.mrb[36].mxu1 }
 0x12d   : > { %v4885_v5 = vadd.f32 %v1248_v40, %v1001_v56  ;;  %v3872_v7 = vpop.f32.mrb[37].mxu0  ;;  %v1009_v11 = vadd.f32 %v1008_v4, %v4813_v50  ;;  %v3828_v44 = vpop.f32.mrb[37].mxu1  ;;  %v4300_v4 = vld [vmem:[%s4689_s25 + $0x8] sm:$0xff]  }
 0x12e   : > { %v1251_v6 = vpop.f32.mrb[38].mxu0  ;;  %v1011_v15 = vpop.f32.mrb[38].mxu1 }
 0x12f   : > { %v4890_v16 = vadd.f32 %v1251_v6, %v1004_v0  ;;  %v3873_v17 = vpop.f32.mrb[39].mxu0  ;;  %v1012_v10 = vadd.f32 %v1011_v15, %v4818_v54  ;;  %v3829_v19 = vpop.f32.mrb[39].mxu1  ;;  %v4301_v0 = vld [vmem:[%s4703_s14] sm:$0xff]  }
 0x131   : > { %4083 = vmatmul.mubr.msk.bf16.gmra.mrb[144].mxu0 %vm687_vm1, %v4295_v9  ;;  %4039 = vmatmul.mubr.msk.bf16.gmra.mrb[144].mxu1 %vm687_vm1, %v4294_v12 }
 0x132   : > { %4086 = vmatprep.mubr.msk.bf16.mxu0 %vm4330_vm0, %v4329_v1  ;;  %4042 = vmatprep.mubr.msk.bf16.mxu1 %vm4330_vm0, %v4329_v1 }
 0x134   : > { %v1256_v50 = vpop.f32.mrb[40].mxu0  ;;  %v1016_v21 = vpop.f32.mrb[40].mxu1 }
 0x135   : > { %v4899_v23 = vadd.f32 %v1256_v50, %v1009_v11  ;;  %v3876_v25 = vpop.f32.mrb[41].mxu0  ;;  %v1017_v28 = vadd.f32 %v1016_v21, %v4829_v60  ;;  %v3832_v54 = vpop.f32.mrb[41].mxu1  ;;  %v4302_v21 = vld [vmem:[%s4689_s25 + $0x10] sm:$0xff]  }
 0x136   : > { %v1259_v18 = vpop.f32.mrb[42].mxu0  ;;  %v1019_v33 = vpop.f32.mrb[42].mxu1 }
 0x137   : > { %v4904_v35 = vadd.f32 %v1259_v18, %v1012_v10  ;;  %v3877_v36 = vpop.f32.mrb[43].mxu0  ;;  %v1020_v22 = vadd.f32 %v1019_v33, %v4833_v3  ;;  %v3833_v37 = vpop.f32.mrb[43].mxu1  ;;  %v4303_v10 = vld [vmem:[%s4703_s14 + $0x8] sm:$0xff]  }
 0x139   : > { %4087 = vmatmul.mubr.msk.bf16.gmra.mrb[148].mxu0 %vm687_vm1, %v4297_v26  ;;  %4043 = vmatmul.mubr.msk.bf16.gmra.mrb[148].mxu1 %vm687_vm1, %v4296_v29 }
 0x13a   : > { %4090 = vmatprep.mubr.msk.bf16.mxu0 %vm4330_vm0, %v4329_v1  ;;  %4098 = vmatprep.mubr.msk.bf16.mxu1 %vm4330_vm0, %v4329_v1 }
 0x13c   : > { %v1264_v60 = vpop.f32.mrb[44].mxu0  ;;  %v1024_v39 = vpop.f32.mrb[44].mxu1 }
 0x13d   : > { %v4913_v41 = vadd.f32 %v1264_v60, %v1017_v28  ;;  %v3880_v45 = vpop.f32.mrb[45].mxu0  ;;  %v1025_v47 = vadd.f32 %v1024_v39, %v4737_v8  ;;  %v3836_v3 = vpop.f32.mrb[45].mxu1  ;;  %v4304_v39 = vld [vmem:[%s4689_s25 + $0x18] sm:$0xff]  }
 0x13e   : > { %v1267_v30 = vpop.f32.mrb[46].mxu0  ;;  %v1027_v53 = vpop.f32.mrb[46].mxu1 }
 0x13f   : > { %v4918_v55 = vadd.f32 %v1267_v30, %v1020_v22  ;;  %v3881_v56 = vpop.f32.mrb[47].mxu0  ;;  %v1028_v34 = vadd.f32 %v1027_v53, %v4743_v14  ;;  %v3837_v57 = vpop.f32.mrb[47].mxu1  ;;  %v4305_v22 = vld [vmem:[%s4703_s14 + $0x10] sm:$0xff]  }
 0x141   : > { %4091 = vmatmul.mubr.msk.bf16.gmra.mrb[152].mxu0 %vm687_vm1, %v4298_v46  ;;  %4099 = vmatmul.mubr.msk.bf16.vlgmr.msra.gmra.mrb[152].mxu1 %vm687_vm1, %v4299_v49 }
 0x142   : > { %4146 = vmatprep.mubr.msk.bf16.mxu0 %vm4330_vm0, %v4329_v1  ;;  %4102 = vmatprep.mubr.msk.bf16.mxu1 %vm4330_vm0, %v4329_v1 }
 0x144   : > { %v1272_v8 = vpop.f32.mrb[48].mxu0  ;;  %v1032_v59 = vpop.f32.mrb[48].mxu1 }
 0x145   : > { %v4927_v61 = vadd.f32 %v1272_v8, %v1025_v47  ;;  %v3884_v63 = vpop.f32.mrb[49].mxu0  ;;  %v1033_v2 = vadd.f32 %v1032_v59, %v4760_v20  ;;  %v3840_v14 = vpop.f32.mrb[49].mxu1  ;;  %v4306_v59 = vld [vmem:[%s4689_s25 + $0x20] sm:$0xff]  }
 0x146   : > { %v1275_v40 = vpop.f32.mrb[50].mxu0  ;;  %v1035_v7 = vpop.f32.mrb[50].mxu1 }
 0x147   : > { %v4932_v9 = vadd.f32 %v1275_v40, %v1028_v34  ;;  %v3885_v11 = vpop.f32.mrb[51].mxu0  ;;  %v1036_v44 = vadd.f32 %v1035_v7, %v4769_v27  ;;  %v3841_v6 = vpop.f32.mrb[51].mxu1  ;;  %v4307_v34 = vld [vmem:[%s4703_s14 + $0x18] sm:$0xff]  }
 0x149   : > { %4147 = vmatmul.mubr.msk.bf16.vlgmr.msra.gmra.mrb[156].mxu0 %vm687_vm1, %v4301_v0  ;;  %4103 = vmatmul.mubr.msk.bf16.gmra.mrb[156].mxu1 %vm687_vm1, %v4300_v4 }
 0x14a   : > { %4150 = vmatprep.mubr.msk.bf16.mxu0 %vm4330_vm0, %v4329_v1  ;;  %4106 = vmatprep.mubr.msk.bf16.mxu1 %vm4330_vm0, %v4329_v1 }
 0x14c   : > { %v1280_v20 = vpop.f32.mrb[52].mxu0  ;;  %v1040_v12 = vpop.f32.mrb[52].mxu1 }
 0x14d   : > { %v4941_v15 = vadd.f32 %v1280_v20, %v1033_v2  ;;  %v3888_v17 = vpop.f32.mrb[53].mxu0  ;;  %v1041_v19 = vadd.f32 %v1040_v12, %v4783_v32  ;;  %v3844_v27 = vpop.f32.mrb[53].mxu1  ;;  %v4308_v12 = vld [vmem:[%s4689_s25 + $0x28] sm:$0xff]  }
 0x14e   : > { %v1283_v50 = vpop.f32.mrb[54].mxu0  ;;  %v1043_v25 = vpop.f32.mrb[54].mxu1 }
 0x14f   : > { %v4946_v26 = vadd.f32 %v1283_v50, %v1036_v44  ;;  %v3889_v28 = vpop.f32.mrb[55].mxu0  ;;  %v1044_v54 = vadd.f32 %v1043_v25, %v4789_v38  ;;  %v3845_v18 = vpop.f32.mrb[55].mxu1  ;;  %v4309_v44 = vld [vmem:[%s4703_s14 + $0x20] sm:$0xff]  }
 0x151   : > { %4151 = vmatmul.mubr.msk.bf16.gmra.mrb[160].mxu0 %vm687_vm1, %v4303_v10  ;;  %4107 = vmatmul.mubr.msk.bf16.gmra.mrb[160].mxu1 %vm687_vm1, %v4302_v21 }
 0x152   : > { %4154 = vmatprep.mubr.msk.bf16.mxu0 %vm4330_vm0, %v4329_v1  ;;  %4110 = vmatprep.mubr.msk.bf16.mxu1 %vm4330_vm0, %v4329_v1 }
 0x154   : > { %v1288_v32 = vpop.f32.mrb[56].mxu0  ;;  %v1048_v29 = vpop.f32.mrb[56].mxu1 }
 0x155   : > { %v4955_v33 = vadd.f32 %v1288_v32, %v1041_v19  ;;  %v3892_v36 = vpop.f32.mrb[57].mxu0  ;;  %v1049_v37 = vadd.f32 %v1048_v29, %v4799_v42  ;;  %v3848_v38 = vpop.f32.mrb[57].mxu1  ;;  %v4310_v29 = vld [vmem:[%s4689_s25 + $0x30] sm:$0xff]  }
 0x156   : > { %v1291_v60 = vpop.f32.mrb[58].mxu0  ;;  %v1051_v45 = vpop.f32.mrb[58].mxu1 }
 0x157   : > { %v4960_v46 = vadd.f32 %v1291_v60, %v1044_v54  ;;  %v3893_v47 = vpop.f32.mrb[59].mxu0  ;;  %v1052_v3 = vadd.f32 %v1051_v45, %v4805_v48  ;;  %v3849_v30 = vpop.f32.mrb[59].mxu1  ;;  %v4311_v54 = vld [vmem:[%s4703_s14 + $0x28] sm:$0xff]  }
 0x159   : > { %4155 = vmatmul.mubr.msk.bf16.gmra.mrb[164].mxu0 %vm687_vm1, %v4305_v22  ;;  %4111 = vmatmul.mubr.msk.bf16.gmra.mrb[164].mxu1 %vm687_vm1, %v4304_v39 }
 0x15a   : > { %4158 = vmatprep.mubr.msk.bf16.mxu0 %vm4330_vm0, %v4329_v1  ;;  %4114 = vmatprep.mubr.msk.bf16.mxu1 %vm4330_vm0, %v4329_v1 }
 0x15c   : > { %v1296_v42 = vpop.f32.mrb[60].mxu0  ;;  %v1056_v49 = vpop.f32.mrb[60].mxu1 }
 0x15d   : > { %v4969_v53 = vadd.f32 %v1296_v42, %v1049_v37  ;;  %v3896_v56 = vpop.f32.mrb[61].mxu0  ;;  %v1057_v57 = vadd.f32 %v1056_v49, %v4815_v52  ;;  %v3852_v48 = vpop.f32.mrb[61].mxu1  ;;  %v4312_v49 = vld [vmem:[%s4689_s25 + $0x38] sm:$0xff]  }
 0x15e   : > { %v1299_v8 = vpop.f32.mrb[62].mxu0  ;;  %v1059_v63 = vpop.f32.mrb[62].mxu1 }
 0x15f   : > { %v4974_v0 = vadd.f32 %v1299_v8, %v1052_v3  ;;  %v3897_v2 = vpop.f32.mrb[63].mxu0  ;;  %v1060_v14 = vadd.f32 %v1059_v63, %v4821_v58  ;;  %v3853_v40 = vpop.f32.mrb[63].mxu1  ;;  %v4313_v3 = vld [vmem:[%s4703_s14 + $0x30] sm:$0xff]  }
 0x161   : > { %4159 = vmatmul.mubr.msk.bf16.gmra.mrb[168].mxu0 %vm687_vm1, %v4307_v34  ;;  %4115 = vmatmul.mubr.msk.bf16.gmra.mrb[168].mxu1 %vm687_vm1, %v4306_v59 }
 0x162   : > { %4162 = vmatprep.mubr.msk.bf16.mxu0 %vm4330_vm0, %v4329_v1  ;;  %4118 = vmatprep.mubr.msk.bf16.mxu1 %vm4330_vm0, %v4329_v1 }
 0x164   : > { %v1304_v52 = vpop.f32.mrb[64].mxu0  ;;  %v1494_v7 = vpop.f32.mrb[64].mxu1 }
 0x165   : > { %v4983_v4 = vadd.f32 %v1304_v52, %v1057_v57  ;;  %v3900_v11 = vpop.f32.mrb[65].mxu0  ;;  %v1581_v6 = vadd.f32 %v1494_v7, %v4843_v13  ;;  %v3908_v58 = vpop.f32.mrb[65].mxu1  ;;  %v4314_v7 = vld [vmem:[%s4689_s25 + $0x40] sm:$0xff]  }
 0x166   : > { %v1307_v20 = vpop.f32.mrb[66].mxu0  ;;  %v1497_v10 = vpop.f32.mrb[66].mxu1 }
 0x167   : > { %v4988_v17 = vadd.f32 %v1307_v20, %v1060_v14  ;;  %v3901_v19 = vpop.f32.mrb[67].mxu0  ;;  %v1582_v27 = vadd.f32 %v1497_v10, %v4848_v24  ;;  %v3909_v50 = vpop.f32.mrb[67].mxu1  ;;  %v4315_v14 = vld [vmem:[%s4703_s14 + $0x38] sm:$0xff]  }
 0x169   : > { %4163 = vmatmul.mubr.msk.bf16.gmra.mrb[172].mxu0 %vm687_vm1, %v4309_v44  ;;  %4119 = vmatmul.mubr.msk.bf16.gmra.mrb[172].mxu1 %vm687_vm1, %v4308_v12 }
 0x16a   : > { %4166 = vmatprep.mubr.msk.bf16.mxu0 %vm4330_vm0, %v4329_v1  ;;  %4122 = vmatprep.mubr.msk.bf16.mxu1 %vm4330_vm0, %v4329_v1 }
 0x16c   : > { %v1764_v13 = vpop.f32.mrb[68].mxu0  ;;  %v1502_v21 = vpop.f32.mrb[68].mxu1 }
 0x16d   : > { %v4997_v25 = vadd.f32 %v1764_v13, %v1581_v6  ;;  %v3956_v28 = vpop.f32.mrb[69].mxu0  ;;  %v1583_v18 = vadd.f32 %v1502_v21, %v4857_v31  ;;  %v3912_v24 = vpop.f32.mrb[69].mxu1  ;;  %v4316_v21 = vld [vmem:[%s4689_s25 + $0x48] sm:$0xff]  }
 0x16e   : > { %v1767_v32 = vpop.f32.mrb[70].mxu0  ;;  %v1505_v36 = vpop.f32.mrb[70].mxu1 }
 0x16f   : > { %v5002_v22 = vadd.f32 %v1767_v32, %v1582_v27  ;;  %v3957_v37 = vpop.f32.mrb[71].mxu0  ;;  %v1584_v38 = vadd.f32 %v1505_v36, %v4862_v43  ;;  %v3913_v60 = vpop.f32.mrb[71].mxu1  ;;  %v4317_v27 = vld [vmem:[%s4703_s14 + $0x40] sm:$0xff]  }
 0x171   : > { %4167 = vmatmul.mubr.msk.bf16.gmra.mrb[176].mxu0 %vm687_vm1, %v4311_v54  ;;  %4123 = vmatmul.mubr.msk.bf16.gmra.mrb[176].mxu1 %vm687_vm1, %v4310_v29 }
 0x172   : > { %4170 = vmatprep.mubr.msk.bf16.mxu0 %vm4330_vm0, %v4329_v1  ;;  %4126 = vmatprep.mubr.msk.bf16.mxu1 %vm4330_vm0, %v4329_v1 }
 0x174   : > { %v1772_v31 = vpop.f32.mrb[72].mxu0  ;;  %v1510_v39 = vpop.f32.mrb[72].mxu1 }
 0x175   : > { %v5011_v45 = vadd.f32 %v1772_v31, %v1583_v18  ;;  %v3960_v47 = vpop.f32.mrb[73].mxu0  ;;  %v1585_v30 = vadd.f32 %v1510_v39, %v4871_v51  ;;  %v3916_v43 = vpop.f32.mrb[73].mxu1  ;;  %v4318_v39 = vld [vmem:[%s4689_s25 + $0x50] sm:$0xff]  }
 0x176   : > { %v1775_v42 = vpop.f32.mrb[74].mxu0  ;;  %v1513_v56 = vpop.f32.mrb[74].mxu1 }
 0x177   : > { %v5016_v34 = vadd.f32 %v1775_v42, %v1584_v38  ;;  %v3961_v57 = vpop.f32.mrb[75].mxu0  ;;  %v1586_v48 = vadd.f32 %v1513_v56, %v4876_v62  ;;  %v3917_v8 = vpop.f32.mrb[75].mxu1  ;;  %v4319_v38 = vld [vmem:[%s4703_s14 + $0x48] sm:$0xff]  }
 0x179   : > { %4171 = vmatmul.mubr.msk.bf16.gmra.mrb[180].mxu0 %vm687_vm1, %v4313_v3  ;;  %4127 = vmatmul.mubr.msk.bf16.gmra.mrb[180].mxu1 %vm687_vm1, %v4312_v49 }
 0x17a   : > { %4174 = vmatprep.mubr.msk.bf16.mxu0 %vm4330_vm0, %v4329_v1  ;;  %4130 = vmatprep.mubr.msk.bf16.mxu1 %vm4330_vm0, %v4329_v1 }
 0x17c   : > { %v1780_v51 = vpop.f32.mrb[76].mxu0  ;;  %v1518_v59 = vpop.f32.mrb[76].mxu1 }
 0x17d   : > { %v5025_v63 = vadd.f32 %v1780_v51, %v1585_v30  ;;  %v3964_v2 = vpop.f32.mrb[77].mxu0  ;;  %v1587_v40 = vadd.f32 %v1518_v59, %v4885_v5  ;;  %v3920_v62 = vpop.f32.mrb[77].mxu1 }
 0x17e   : > { %v1783_v52 = vpop.f32.mrb[78].mxu0  ;;  %v1521_v11 = vpop.f32.mrb[78].mxu1 }
 0x17f   : > { %v5030_v44 = vadd.f32 %v1783_v52, %v1586_v48  ;;  %v3965_v6 = vpop.f32.mrb[79].mxu0  ;;  %v1588_v58 = vadd.f32 %v1521_v11, %v4890_v16  ;;  %v3921_v20 = vpop.f32.mrb[79].mxu1  ;;  %v4320_v48 = vld [vmem:[%s4703_s14 + $0x50] sm:$0xff]  }
 0x181   : > { %4175 = vmatmul.mubr.msk.bf16.gmra.mrb[184].mxu0 %vm687_vm1, %v4315_v14  ;;  %4131 = vmatmul.mubr.msk.bf16.gmra.mrb[184].mxu1 %vm687_vm1, %v4314_v7 }
 0x182   : > { %4178 = vmatprep.mubr.msk.bf16.mxu0 %vm4330_vm0, %v4329_v1  ;;  %4134 = vmatprep.mubr.msk.bf16.mxu1 %vm4330_vm0, %v4329_v1 }
 0x184   : > { %v1788_v5 = vpop.f32.mrb[80].mxu0  ;;  %v1526_v12 = vpop.f32.mrb[80].mxu1 }
 0x185   : > { %v5039_v10 = vadd.f32 %v1788_v5, %v1587_v40  ;;  %v3968_v19 = vpop.f32.mrb[81].mxu0  ;;  %v1589_v50 = vadd.f32 %v1526_v12, %v4899_v23  ;;  %v3924_v16 = vpop.f32.mrb[81].mxu1 }
 0x186   : > { %v1791_v13 = vpop.f32.mrb[82].mxu0  ;;  %v1529_v28 = vpop.f32.mrb[82].mxu1 }
 0x187   : > { %v5044_v54 = vadd.f32 %v1791_v13, %v1588_v58  ;;  %v3969_v18 = vpop.f32.mrb[83].mxu0  ;;  %v1590_v24 = vadd.f32 %v1529_v28, %v4904_v35  ;;  %v3925_v32 = vpop.f32.mrb[83].mxu1 }
 0x189   : > { %4179 = vmatmul.mubr.msk.bf16.gmra.mrb[188].mxu0 %vm687_vm1, %v4317_v27  ;;  %4135 = vmatmul.mubr.msk.bf16.gmra.mrb[188].mxu1 %vm687_vm1, %v4316_v21 }
 0x18a   : > { %4182 = vmatprep.mubr.msk.bf16.mxu0 %vm4330_vm0, %v4329_v1  ;;  %4138 = vmatprep.mubr.msk.bf16.mxu1 %vm4330_vm0, %v4329_v1 }
 0x18c   : > { %v1796_v23 = vpop.f32.mrb[84].mxu0  ;;  %v1534_v29 = vpop.f32.mrb[84].mxu1 }
 0x18d   : > { %v5053_v36 = vadd.f32 %v1796_v23, %v1589_v50  ;;  %v3972_v37 = vpop.f32.mrb[85].mxu0  ;;  %v1591_v60 = vadd.f32 %v1534_v29, %v4913_v41  ;;  %v3928_v35 = vpop.f32.mrb[85].mxu1 }
 0x18e   : > { %v1799_v31 = vpop.f32.mrb[86].mxu0  ;;  %v1537_v47 = vpop.f32.mrb[86].mxu1 }
 0x18f   : > { %v5058_v3 = vadd.f32 %v1799_v31, %v1590_v24  ;;  %v3973_v30 = vpop.f32.mrb[87].mxu0  ;;  %v1592_v43 = vadd.f32 %v1537_v47, %v4918_v55  ;;  %v3929_v42 = vpop.f32.mrb[87].mxu1 }
 0x191   : > { %4183 = vmatmul.mubr.msk.bf16.gmra.mrb[192].mxu0 %vm687_vm1, %v4319_v38  ;;  %4139 = vmatmul.mubr.msk.bf16.gmra.mrb[192].mxu1 %vm687_vm1, %v4318_v39 }
 0x192   : > { %4186 = vmatprep.mubr.msk.bf16.mxu0 %vm4330_vm0, %v4329_v1 }
 0x194   : > { %v1804_v49 = vpop.f32.mrb[88].mxu0  ;;  %v1542_v41 = vpop.f32.mrb[88].mxu1 }
 0x195   : > { %v5065_v56 = vadd.f32 %v1804_v49, %v1591_v60  ;;  %v3976_v57 = vpop.f32.mrb[89].mxu0  ;;  %v1593_v8 = vadd.f32 %v1542_v41, %v4927_v61  ;;  %v3932_v51 = vpop.f32.mrb[89].mxu1 }
 0x196   : > { %v1807_v59 = vpop.f32.mrb[90].mxu0  ;;  %v1545_v2 = vpop.f32.mrb[90].mxu1 }
 0x197   : > { %v5069_v55 = vadd.f32 %v1807_v59, %v1592_v43  ;;  %v3977_v14 = vpop.f32.mrb[91].mxu0  ;;  %v1594_v40 = vadd.f32 %v1545_v2, %v4932_v9  ;;  %v3933_v62 = vpop.f32.mrb[91].mxu1 }
 0x199   : > { %4187 = vmatmul.mubr.msk.bf16.gmra.mrb[196].mxu0 %vm687_vm1, %v4320_v48 }
 0x19c   : > { %v1812_v1 = vpop.f32.mrb[92].mxu0  ;;  %v1550_v52 = vpop.f32.mrb[92].mxu1 }
 0x19d   : > { %v5073_v7 = vadd.f32 %v1812_v1, %v1593_v8  ;;  %v3980_v11 = vpop.f32.mrb[93].mxu0  ;;  %v1595_v6 = vadd.f32 %v1550_v52, %v4941_v15  ;;  %v3936_v58 = vpop.f32.mrb[93].mxu1 }
 0x19e   : > { %v1815_v61 = vpop.f32.mrb[94].mxu0  ;;  %v1553_v20 = vpop.f32.mrb[94].mxu1 }
 0x19f   : > { %v5076_v5 = vadd.f32 %v1815_v61, %v1594_v40  ;;  %v3981_v12 = vpop.f32.mrb[95].mxu0  ;;  %v1596_v19 = vadd.f32 %v1553_v20, %v4946_v26  ;;  %v3937_v27 = vpop.f32.mrb[95].mxu1 }
 0x1a4   : > { %v1820_v9 = vpop.f32.mrb[96].mxu0  ;;  %v1558_v50 = vpop.f32.mrb[96].mxu1 }
 0x1a5   : > { %v5079_v16 = vadd.f32 %v1820_v9, %v1595_v6  ;;  %v3984_v13 = vpop.f32.mrb[97].mxu0  ;;  %v1597_v21 = vadd.f32 %v1558_v50, %v4955_v33  ;;  %v3940_v28 = vpop.f32.mrb[97].mxu1 }
 0x1a6   : > { %v1823_v18 = vpop.f32.mrb[98].mxu0  ;;  %v1561_v24 = vpop.f32.mrb[98].mxu1 }
 0x1a7   : > { %v5082_v15 = vadd.f32 %v1823_v18, %v1596_v19  ;;  %v3985_v32 = vpop.f32.mrb[99].mxu0  ;;  %v1598_v23 = vadd.f32 %v1561_v24, %v4960_v46  ;;  %v3941_v29 = vpop.f32.mrb[99].mxu1 }
 0x1ac   : > { %v1828_v37 = vpop.f32.mrb[100].mxu0  ;;  %v1566_v38 = vpop.f32.mrb[100].mxu1 }
 0x1ad   : > { %v5085_v26 = vadd.f32 %v1828_v37, %v1597_v21  ;;  %v3988_v60 = vpop.f32.mrb[101].mxu0  ;;  %v1599_v35 = vadd.f32 %v1566_v38, %v4969_v53  ;;  %v3944_v31 = vpop.f32.mrb[101].mxu1 }
 0x1ae   : > { %v1831_v39 = vpop.f32.mrb[102].mxu0  ;;  %v1569_v47 = vpop.f32.mrb[102].mxu1 }
 0x1af   : > { %v5088_v33 = vadd.f32 %v1831_v39, %v1598_v23  ;;  %v3989_v30 = vpop.f32.mrb[103].mxu0  ;;  %v1600_v43 = vadd.f32 %v1569_v47, %v4974_v0  ;;  %v3945_v42 = vpop.f32.mrb[103].mxu1 }
 0x1b4   : > { %v1836_v49 = vpop.f32.mrb[104].mxu0  ;;  %v1574_v41 = vpop.f32.mrb[104].mxu1 }
 0x1b5   : > { %v5091_v46 = vadd.f32 %v1836_v49, %v1599_v35  ;;  %v3992_v57 = vpop.f32.mrb[105].mxu0  ;;  %v1601_v48 = vadd.f32 %v1574_v41, %v4983_v4  ;;  %v3948_v8 = vpop.f32.mrb[105].mxu1 }
 0x1b6   : > { %v1839_v51 = vpop.f32.mrb[106].mxu0  ;;  %v1577_v59 = vpop.f32.mrb[106].mxu1 }
 0x1b7   : > { %v5094_v53 = vadd.f32 %v1839_v51, %v1600_v43  ;;  %v3993_v2 = vpop.f32.mrb[107].mxu0  ;;  %v1602_v14 = vadd.f32 %v1577_v59, %v4988_v17  ;;  %v3949_v40 = vpop.f32.mrb[107].mxu1 }
 0x1bc   : > { %v1844_v62 = vpop.f32.mrb[108].mxu0  ;;  %v2034_v0 = vpop.f32.mrb[108].mxu1 }
 0x1bd   : > { %v5097_v1 = vadd.f32 %v1844_v62, %v1601_v48  ;;  %v3996_v52 = vpop.f32.mrb[109].mxu0  ;;  %v2121_v11 = vadd.f32 %v2034_v0, %v4997_v25  ;;  %v4004_v6 = vpop.f32.mrb[109].mxu1 }
 0x1be   : > { %v1847_v58 = vpop.f32.mrb[110].mxu0  ;;  %v2037_v4 = vpop.f32.mrb[110].mxu1 }
 0x1bf   : > { %v5100_v61 = vadd.f32 %v1847_v58, %v1602_v14  ;;  %v3997_v20 = vpop.f32.mrb[111].mxu0  ;;  %v2122_v12 = vadd.f32 %v2037_v4, %v5002_v22  ;;  %v4005_v19 = vpop.f32.mrb[111].mxu1 }
 0x1c4   : > { %v2304_v27 = vpop.f32.mrb[112].mxu0  ;;  %v2042_v9 = vpop.f32.mrb[112].mxu1 }
 0x1c5   : > { %v5103_v17 = vadd.f32 %v2304_v27, %v2121_v11  ;;  %v4052_v50 = vpop.f32.mrb[113].mxu0  ;;  %v2123_v13 = vadd.f32 %v2042_v9, %v5011_v45  ;;  %v4008_v21 = vpop.f32.mrb[113].mxu1 }
 0x1c6   : > { %v2307_v28 = vpop.f32.mrb[114].mxu0  ;;  %v2045_v18 = vpop.f32.mrb[114].mxu1 }
 0x1c7   : > { %v5106_v25 = vadd.f32 %v2307_v28, %v2122_v12  ;;  %v4053_v24 = vpop.f32.mrb[115].mxu0  ;;  %v2124_v32 = vadd.f32 %v2045_v18, %v5016_v34  ;;  %v4009_v23 = vpop.f32.mrb[115].mxu1 }
 0x1cc   : > { %v2312_v29 = vpop.f32.mrb[116].mxu0  ;;  %v2050_v37 = vpop.f32.mrb[116].mxu1 }
 0x1cd   : > { %v5109_v22 = vadd.f32 %v2312_v29, %v2123_v13  ;;  %v4056_v38 = vpop.f32.mrb[117].mxu0  ;;  %v2125_v60 = vadd.f32 %v2050_v37, %v5025_v63  ;;  %v4012_v35 = vpop.f32.mrb[117].mxu1 }
 0x1ce   : > { %v2315_v31 = vpop.f32.mrb[118].mxu0  ;;  %v2053_v39 = vpop.f32.mrb[118].mxu1 }
 0x1cf   : > { %v5112_v45 = vadd.f32 %v2315_v31, %v2124_v32  ;;  %v4057_v47 = vpop.f32.mrb[119].mxu0  ;;  %v2126_v30 = vadd.f32 %v2053_v39, %v5030_v44  ;;  %v4013_v43 = vpop.f32.mrb[119].mxu1 }
 0x1d4   : > { %v2320_v42 = vpop.f32.mrb[120].mxu0  ;;  %v2058_v49 = vpop.f32.mrb[120].mxu1 }
 0x1d5   : > { %v5115_v34 = vadd.f32 %v2320_v42, %v2125_v60  ;;  %v4060_v41 = vpop.f32.mrb[121].mxu0  ;;  %v2127_v57 = vadd.f32 %v2058_v49, %v5039_v10  ;;  %v4016_v48 = vpop.f32.mrb[121].mxu1 }
 0x1d6   : > { %v2323_v8 = vpop.f32.mrb[122].mxu0  ;;  %v2061_v51 = vpop.f32.mrb[122].mxu1 }
 0x1d7   : > { %v5118_v63 = vadd.f32 %v2323_v8, %v2126_v30  ;;  %v4061_v59 = vpop.f32.mrb[123].mxu0  ;;  %v2128_v2 = vadd.f32 %v2061_v51, %v5044_v54  ;;  %v4017_v14 = vpop.f32.mrb[123].mxu1 }
 0x1dc   : > { %v2328_v40 = vpop.f32.mrb[124].mxu0  ;;  %v2066_v62 = vpop.f32.mrb[124].mxu1 }
 0x1dd   : > { %v5121_v44 = vadd.f32 %v2328_v40, %v2127_v57  ;;  %v4064_v0 = vpop.f32.mrb[125].mxu0  ;;  %v2129_v52 = vadd.f32 %v2066_v62, %v5053_v36  ;;  %v4020_v11 = vpop.f32.mrb[125].mxu1 }
 0x1de   : > { %v2331_v6 = vpop.f32.mrb[126].mxu0  ;;  %v2069_v58 = vpop.f32.mrb[126].mxu1 }
 0x1df   : > { %v5124_v10 = vadd.f32 %v2331_v6, %v2128_v2  ;;  %v4065_v4 = vpop.f32.mrb[127].mxu0  ;;  %v2130_v20 = vadd.f32 %v2069_v58, %v5058_v3  ;;  %v4021_v12 = vpop.f32.mrb[127].mxu1 }
 0x1e4   : > { %v2336_v19 = vpop.f32.mrb[128].mxu0  ;;  %v2074_v27 = vpop.f32.mrb[128].mxu1 }
 0x1e5   : > { %v5127_v54 = vadd.f32 %v2336_v19, %v2129_v52  ;;  %v4068_v9 = vpop.f32.mrb[129].mxu0  ;;  %v2131_v50 = vadd.f32 %v2074_v27, %v5065_v56  ;;  %v4024_v13 = vpop.f32.mrb[129].mxu1 }
 0x1e6   : > { %v2339_v21 = vpop.f32.mrb[130].mxu0  ;;  %v2077_v28 = vpop.f32.mrb[130].mxu1 }
 0x1e7   : > { %v5130_v36 = vadd.f32 %v2339_v21, %v2130_v20  ;;  %v4069_v18 = vpop.f32.mrb[131].mxu0  ;;  %v2132_v24 = vadd.f32 %v2077_v28, %v5069_v55  ;;  %v4025_v32 = vpop.f32.mrb[131].mxu1 }
 0x1ec   : > { %v2344_v23 = vpop.f32.mrb[132].mxu0  ;;  %v2082_v29 = vpop.f32.mrb[132].mxu1 }
 0x1ed   : > { %v5133_v3 = vadd.f32 %v2344_v23, %v2131_v50  ;;  %v4072_v37 = vpop.f32.mrb[133].mxu0  ;;  %v2133_v38 = vadd.f32 %v2082_v29, %v5073_v7  ;;  %v4028_v60 = vpop.f32.mrb[133].mxu1 }
 0x1ee   : > { %v2347_v35 = vpop.f32.mrb[134].mxu0  ;;  %v2085_v31 = vpop.f32.mrb[134].mxu1 }
 0x1ef   : > { %v5136_v56 = vadd.f32 %v2347_v35, %v2132_v24  ;;  %v4073_v39 = vpop.f32.mrb[135].mxu0  ;;  %v2134_v47 = vadd.f32 %v2085_v31, %v5076_v5  ;;  %v4029_v30 = vpop.f32.mrb[135].mxu1 }
 0x1f4   : > { %v2352_v43 = vpop.f32.mrb[136].mxu0  ;;  %v2090_v42 = vpop.f32.mrb[136].mxu1 }
 0x1f5   : > { %v5139_v55 = vadd.f32 %v2352_v43, %v2133_v38  ;;  %v4076_v49 = vpop.f32.mrb[137].mxu0  ;;  %v2135_v41 = vadd.f32 %v2090_v42, %v5079_v16  ;;  %v4032_v57 = vpop.f32.mrb[137].mxu1 }
 0x1f6   : > { %v2355_v48 = vpop.f32.mrb[138].mxu0  ;;  %v2093_v8 = vpop.f32.mrb[138].mxu1 }
 0x1f7   : > { %v5142_v7 = vadd.f32 %v2355_v48, %v2134_v47  ;;  %v4077_v51 = vpop.f32.mrb[139].mxu0  ;;  %v2136_v59 = vadd.f32 %v2093_v8, %v5082_v15  ;;  %v4033_v2 = vpop.f32.mrb[139].mxu1 }
 0x1fc   : > { %v2360_v14 = vpop.f32.mrb[140].mxu0  ;;  %v2098_v40 = vpop.f32.mrb[140].mxu1 }
 0x1fd   : > { %v5145_v5 = vadd.f32 %v2360_v14, %v2135_v41  ;;  %v4080_v62 = vpop.f32.mrb[141].mxu0  ;;  %v2137_v0 = vadd.f32 %v2098_v40, %v5085_v26  ;;  %v4036_v52 = vpop.f32.mrb[141].mxu1 }
 0x1fe   : > { %v2363_v11 = vpop.f32.mrb[142].mxu0  ;;  %v2101_v6 = vpop.f32.mrb[142].mxu1 }
 0x1ff   : > { %v5148_v16 = vadd.f32 %v2363_v11, %v2136_v59  ;;  %v4081_v58 = vpop.f32.mrb[143].mxu0  ;;  %v2138_v4 = vadd.f32 %v2101_v6, %v5088_v33  ;;  %v4037_v20 = vpop.f32.mrb[143].mxu1 }
 0x204   : > { %v2368_v12 = vpop.f32.mrb[144].mxu0  ;;  %v2106_v19 = vpop.f32.mrb[144].mxu1 }
 0x205   : > { %v5151_v15 = vadd.f32 %v2368_v12, %v2137_v0  ;;  %v4084_v27 = vpop.f32.mrb[145].mxu0  ;;  %v2139_v9 = vadd.f32 %v2106_v19, %v5091_v46  ;;  %v4040_v50 = vpop.f32.mrb[145].mxu1 }
 0x206   : > { %v2371_v13 = vpop.f32.mrb[146].mxu0  ;;  %v2109_v21 = vpop.f32.mrb[146].mxu1 }
 0x207   : > { %v5154_v26 = vadd.f32 %v2371_v13, %v2138_v4  ;;  %v4085_v28 = vpop.f32.mrb[147].mxu0  ;;  %v2140_v18 = vadd.f32 %v2109_v21, %v5094_v53  ;;  %v4041_v24 = vpop.f32.mrb[147].mxu1 }
 0x20c   : > { %v2376_v32 = vpop.f32.mrb[148].mxu0  ;;  %v2114_v23 = vpop.f32.mrb[148].mxu1 }
 0x20d   : > { %v5157_v33 = vadd.f32 %v2376_v32, %v2139_v9  ;;  %v4088_v29 = vpop.f32.mrb[149].mxu0  ;;  %v2141_v37 = vadd.f32 %v2114_v23, %v5097_v1  ;;  %v4044_v38 = vpop.f32.mrb[149].mxu1 }
 0x20e   : > { %v2379_v60 = vpop.f32.mrb[150].mxu0  ;;  %v2117_v35 = vpop.f32.mrb[150].mxu1 }
 0x20f   : > { %v5160_v46 = vadd.f32 %v2379_v60, %v2140_v18  ;;  %v4089_v31 = vpop.f32.mrb[151].mxu0  ;;  %v2142_v39 = vadd.f32 %v2117_v35, %v5100_v61  ;;  %v4045_v47 = vpop.f32.mrb[151].mxu1  ;;  %v5172_v61 = vld [vmem:[%s5246_s10] ss:$0 sm:$0xff] }
 0x214   : > { %v2384_v30 = vpop.f32.mrb[152].mxu0  ;;  %v2574_v53 = vpop.f32.mrb[152].mxu1 }
 0x215   : > { %v5163_v43 = vadd.f32 %v2384_v30, %v2141_v37  ;;  %v4092_v42 = vpop.f32.mrb[153].mxu0  ;;  %v2661_v49 = vadd.f32 %v2574_v53, %v5103_v17  ;;  %v4100_v41 = vpop.f32.mrb[153].mxu1 }
 0x216   : > { %v2387_v57 = vpop.f32.mrb[154].mxu0  ;;  %v2577_v1 = vpop.f32.mrb[154].mxu1 }
 0x217   : > { %v5166_v48 = vadd.f32 %v2387_v57, %v2142_v39  ;;  %v4093_v8 = vpop.f32.mrb[155].mxu0  ;;  %v2662_v51 = vadd.f32 %v2577_v1, %v5106_v25  ;;  %v4101_v59 = vpop.f32.mrb[155].mxu1 }
 0x21c   : > { %v2844_v2 = vpop.f32.mrb[156].mxu0  ;;  %v2582_v14 = vpop.f32.mrb[156].mxu1 }
 0x21d   : > { %v2931_v40 = vadd.f32 %v2844_v2, %v2661_v49  ;;  %v4148_v62 = vpop.f32.mrb[157].mxu0  ;;  %v2663_v17 = vadd.f32 %v2582_v14, %v5109_v22  ;;  %v4104_v0 = vpop.f32.mrb[157].mxu1 }
 0x21e   : > { %v2847_v52 = vpop.f32.mrb[158].mxu0  ;;  %v2585_v6 = vpop.f32.mrb[158].mxu1 }
 0x21f   : > { %v2960_v11 = vadd.f32 %v5172_v61, %v2931_v40  ;;  %v2932_v58 = vadd.f32 %v2847_v52, %v2662_v51  ;;  %v4149_v25 = vpop.f32.mrb[159].mxu0  ;;  %v2664_v4 = vadd.f32 %v2585_v6, %v5112_v45  ;;  %v4105_v20 = vpop.f32.mrb[159].mxu1 }
 0x221   : > { %v2961_v12 = vadd.f32 %v5172_v61, %v2932_v58  ;;  %v2982_v19 = vmax.f32 %v2960_v11, 0.0 }
 0x223   : > { %v2983_v27 = vmax.f32 %v2961_v12, 0.0 }
 0x224   : > { %v2852_v22 = vpop.f32.mrb[160].mxu0  ;;  %v2590_v50 = vpop.f32.mrb[160].mxu1 }
 0x225   : > { %v3579_v9 = vpack.c.bf16 %v2983_v27, %v2982_v19  ;;  %v2933_v13 = vadd.f32 %v2852_v22, %v2663_v17  ;;  %v4152_v21 = vpop.f32.mrb[161].mxu0  ;;  %v2665_v28 = vadd.f32 %v2590_v50, %v5115_v34  ;;  %v4108_v18 = vpop.f32.mrb[161].mxu1 }
 0x226   : > { %v2855_v45 = vpop.f32.mrb[162].mxu0  ;;  %v2593_v32 = vpop.f32.mrb[162].mxu1 }
 0x227   : > { %3580 = vst [vmem:[%s5182_s22] sm:$0xff] %v3579_v9   ;;  %v2962_v24 = vadd.f32 %v5172_v61, %v2933_v13  ;;  %v2934_v23 = vadd.f32 %v2855_v45, %v2664_v4  ;;  %v4153_v29 = vpop.f32.mrb[163].mxu0  ;;  %v2666_v37 = vadd.f32 %v2593_v32, %v5118_v63  ;;  %v4109_v38 = vpop.f32.mrb[163].mxu1 }
 0x229   : > { %v2963_v60 = vadd.f32 %v5172_v61, %v2934_v23  ;;  %v2984_v35 = vmax.f32 %v2962_v24, 0.0 }
 0x22b   : > { %v2985_v31 = vmax.f32 %v2963_v60, 0.0 }
 0x22c   : > { %v2860_v39 = vpop.f32.mrb[164].mxu0  ;;  %v2598_v30 = vpop.f32.mrb[164].mxu1 }
 0x22d   : > { %v3584_v47 = vpack.c.bf16 %v2985_v31, %v2984_v35  ;;  %v2935_v34 = vadd.f32 %v2860_v39, %v2665_v28  ;;  %v4156_v53 = vpop.f32.mrb[165].mxu0  ;;  %v2667_v42 = vadd.f32 %v2598_v30, %v5121_v44  ;;  %v4112_v49 = vpop.f32.mrb[165].mxu1 }
 0x22e   : > { %v2863_v41 = vpop.f32.mrb[166].mxu0  ;;  %v2601_v1 = vpop.f32.mrb[166].mxu1 }
 0x22f   : > { %3631 = vst [vmem:[%s5182_s22 + $0x8] sm:$0xff] %v3584_v47   ;;  %v2964_v57 = vadd.f32 %v5172_v61, %v2935_v34  ;;  %v2936_v63 = vadd.f32 %v2863_v41, %v2666_v37  ;;  %v4157_v8 = vpop.f32.mrb[167].mxu0  ;;  %v2668_v51 = vadd.f32 %v2601_v1, %v5124_v10  ;;  %v4113_v59 = vpop.f32.mrb[167].mxu1 }
 0x231   : > { %v2965_v2 = vadd.f32 %v5172_v61, %v2936_v63  ;;  %v2986_v14 = vmax.f32 %v2964_v57, 0.0 }
 0x233   : > { %v2987_v40 = vmax.f32 %v2965_v2, 0.0 }
 0x234   : > { %v2868_v62 = vpop.f32.mrb[168].mxu0  ;;  %v2606_v0 = vpop.f32.mrb[168].mxu1 }
 0x235   : > { %v3589_v17 = vpack.c.bf16 %v2987_v40, %v2986_v14  ;;  %v2937_v44 = vadd.f32 %v2868_v62, %v2667_v42  ;;  %v4160_v52 = vpop.f32.mrb[169].mxu0  ;;  %v2669_v11 = vadd.f32 %v2606_v0, %v5127_v54  ;;  %v4116_v6 = vpop.f32.mrb[169].mxu1 }
 0x236   : > { %v2871_v58 = vpop.f32.mrb[170].mxu0  ;;  %v2609_v4 = vpop.f32.mrb[170].mxu1 }
 0x237   : > { %3632 = vst [vmem:[%s5182_s22 + $0x10] sm:$0xff] %v3589_v17   ;;  %v2966_v25 = vadd.f32 %v5172_v61, %v2937_v44  ;;  %v2938_v10 = vadd.f32 %v2871_v58, %v2668_v51  ;;  %v4161_v20 = vpop.f32.mrb[171].mxu0  ;;  %v2670_v12 = vadd.f32 %v2609_v4, %v5130_v36  ;;  %v4117_v19 = vpop.f32.mrb[171].mxu1 }
 0x239   : > { %v2967_v27 = vadd.f32 %v5172_v61, %v2938_v10  ;;  %v2988_v22 = vmax.f32 %v2966_v25, 0.0 }
 0x23b   : > { %v2989_v9 = vmax.f32 %v2967_v27, 0.0 }
 0x23c   : > { %v2876_v50 = vpop.f32.mrb[172].mxu0  ;;  %v2614_v21 = vpop.f32.mrb[172].mxu1 }
 0x23d   : > { %v3594_v13 = vpack.c.bf16 %v2989_v9, %v2988_v22  ;;  %v2939_v54 = vadd.f32 %v2876_v50, %v2669_v11  ;;  %v4164_v28 = vpop.f32.mrb[173].mxu0  ;;  %v2671_v18 = vadd.f32 %v2614_v21, %v5133_v3  ;;  %v4120_v45 = vpop.f32.mrb[173].mxu1 }
 0x23e   : > { %v2879_v24 = vpop.f32.mrb[174].mxu0  ;;  %v2617_v23 = vpop.f32.mrb[174].mxu1 }
 0x23f   : > { %3633 = vst [vmem:[%s5182_s22 + $0x18] sm:$0xff] %v3594_v13   ;;  %v2968_v32 = vadd.f32 %v5172_v61, %v2939_v54  ;;  %v2940_v36 = vadd.f32 %v2879_v24, %v2670_v12  ;;  %v4165_v29 = vpop.f32.mrb[175].mxu0  ;;  %v2672_v37 = vadd.f32 %v2617_v23, %v5136_v56  ;;  %v4121_v38 = vpop.f32.mrb[175].mxu1 }
 0x241   : > { %v2969_v60 = vadd.f32 %v5172_v61, %v2940_v36  ;;  %v2990_v35 = vmax.f32 %v2968_v32, 0.0 }
 0x243   : > { %v2991_v31 = vmax.f32 %v2969_v60, 0.0 }
 0x244   : > { %v2884_v39 = vpop.f32.mrb[176].mxu0  ;;  %v2622_v30 = vpop.f32.mrb[176].mxu1 }
 0x245   : > { %v3599_v47 = vpack.c.bf16 %v2991_v31, %v2990_v35  ;;  %v2941_v3 = vadd.f32 %v2884_v39, %v2671_v18  ;;  %v4168_v34 = vpop.f32.mrb[177].mxu0  ;;  %v2673_v53 = vadd.f32 %v2622_v30, %v5139_v55  ;;  %v4124_v42 = vpop.f32.mrb[177].mxu1 }
 0x246   : > { %v2887_v49 = vpop.f32.mrb[178].mxu0  ;;  %v2625_v57 = vpop.f32.mrb[178].mxu1 }
 0x247   : > { %3634 = vst [vmem:[%s5182_s22 + $0x20] sm:$0xff] %v3599_v47   ;;  %v2970_v41 = vadd.f32 %v5172_v61, %v2941_v3  ;;  %v2942_v56 = vadd.f32 %v2887_v49, %v2672_v37  ;;  %v4169_v1 = vpop.f32.mrb[179].mxu0  ;;  %v2674_v63 = vadd.f32 %v2625_v57, %v5142_v7  ;;  %v4125_v8 = vpop.f32.mrb[179].mxu1 }
 0x249   : > { %v2971_v51 = vadd.f32 %v5172_v61, %v2942_v56  ;;  %v2992_v59 = vmax.f32 %v2970_v41, 0.0 }
 0x24b   : > { %v2993_v2 = vmax.f32 %v2971_v51, 0.0 }
 0x24c   : > { %v2892_v14 = vpop.f32.mrb[180].mxu0  ;;  %v2630_v62 = vpop.f32.mrb[180].mxu1 }
 0x24d   : > { %v3604_v40 = vpack.c.bf16 %v2993_v2, %v2992_v59  ;;  %v2943_v55 = vadd.f32 %v2892_v14, %v2673_v53  ;;  %v4172_v17 = vpop.f32.mrb[181].mxu0  ;;  %v2675_v0 = vadd.f32 %v2630_v62, %v5145_v5  ;;  %v4128_v44 = vpop.f32.mrb[181].mxu1 }
 0x24e   : > { %v2895_v52 = vpop.f32.mrb[182].mxu0  ;;  %v2633_v6 = vpop.f32.mrb[182].mxu1 }
 0x24f   : > { %3635 = vst [vmem:[%s5182_s22 + $0x28] sm:$0xff] %v3604_v40   ;;  %v2972_v11 = vadd.f32 %v5172_v61, %v2943_v55  ;;  %v2944_v7 = vadd.f32 %v2895_v52, %v2674_v63  ;;  %v4173_v58 = vpop.f32.mrb[183].mxu0  ;;  %v2676_v25 = vadd.f32 %v2633_v6, %v5148_v16  ;;  %v4129_v4 = vpop.f32.mrb[183].mxu1 }
 0x251   : > { %v2973_v10 = vadd.f32 %v5172_v61, %v2944_v7  ;;  %v2994_v20 = vmax.f32 %v2972_v11, 0.0 }
 0x253   : > { %v2995_v12 = vmax.f32 %v2973_v10, 0.0 }
 0x254   : > { %v2900_v19 = vpop.f32.mrb[184].mxu0  ;;  %v2638_v22 = vpop.f32.mrb[184].mxu1 }
 0x255   : > { %v3609_v27 = vpack.c.bf16 %v2995_v12, %v2994_v20  ;;  %v2945_v5 = vadd.f32 %v2900_v19, %v2675_v0  ;;  %v4176_v9 = vpop.f32.mrb[185].mxu0  ;;  %v2677_v50 = vadd.f32 %v2638_v22, %v5151_v15  ;;  %v4132_v13 = vpop.f32.mrb[185].mxu1 }
 0x256   : > { %v2903_v21 = vpop.f32.mrb[186].mxu0  ;;  %v2641_v28 = vpop.f32.mrb[186].mxu1 }
 0x257   : > { %3636 = vst [vmem:[%s5182_s22 + $0x30] sm:$0xff] %v3609_v27   ;;  %v2974_v54 = vadd.f32 %v5172_v61, %v2945_v5  ;;  %v2946_v16 = vadd.f32 %v2903_v21, %v2676_v25  ;;  %v4177_v18 = vpop.f32.mrb[187].mxu0  ;;  %v2678_v45 = vadd.f32 %v2641_v28, %v5154_v26  ;;  %v4133_v24 = vpop.f32.mrb[187].mxu1 }
 0x259   : > { %v2975_v32 = vadd.f32 %v5172_v61, %v2946_v16  ;;  %v2996_v23 = vmax.f32 %v2974_v54, 0.0 }
 0x25b   : > { %v2997_v36 = vmax.f32 %v2975_v32, 0.0 }
 0x25c   : > { %v2908_v29 = vpop.f32.mrb[188].mxu0  ;;  %v2646_v38 = vpop.f32.mrb[188].mxu1 }
 0x25d   : > { %v3614_v37 = vpack.c.bf16 %v2997_v36, %v2996_v23  ;;  %v2947_v15 = vadd.f32 %v2908_v29, %v2677_v50  ;;  %v4180_v60 = vpop.f32.mrb[189].mxu0  ;;  %v2679_v35 = vadd.f32 %v2646_v38, %v5157_v33  ;;  %v4136_v31 = vpop.f32.mrb[189].mxu1 }
 0x25e   : > { %v2911_v39 = vpop.f32.mrb[190].mxu0  ;;  %v2649_v30 = vpop.f32.mrb[190].mxu1 }
 0x25f   : > { %3637 = vst [vmem:[%s5182_s22 + $0x38] sm:$0xff] %v3614_v37   ;;  %v2976_v47 = vadd.f32 %v5172_v61, %v2947_v15  ;;  %v2948_v26 = vadd.f32 %v2911_v39, %v2678_v45  ;;  %v4181_v3 = vpop.f32.mrb[191].mxu0  ;;  %v2680_v34 = vadd.f32 %v2649_v30, %v5160_v46  ;;  %v4137_v53 = vpop.f32.mrb[191].mxu1 }
 0x261   : > { %v2977_v42 = vadd.f32 %v5172_v61, %v2948_v26  ;;  %v2998_v49 = vmax.f32 %v2976_v47, 0.0 }
 0x263   : > { %v2999_v41 = vmax.f32 %v2977_v42, 0.0 }
 0x264   : > { %v2916_v57 = vpop.f32.mrb[192].mxu0  ;;  %v2654_v1 = vpop.f32.mrb[192].mxu1 }
 0x265   : > { %v3619_v56 = vpack.c.bf16 %v2999_v41, %v2998_v49  ;;  %v2949_v33 = vadd.f32 %v2916_v57, %v2679_v35  ;;  %v4184_v63 = vpop.f32.mrb[193].mxu0  ;;  %v2681_v8 = vadd.f32 %v2654_v1, %v5163_v43  ;;  %v4140_v51 = vpop.f32.mrb[193].mxu1 }
 0x266   : > { %v2919_v59 = vpop.f32.mrb[194].mxu0  ;;  %v2657_v14 = vpop.f32.mrb[194].mxu1 }
 0x267   : > { %3638 = vst [vmem:[%s5182_s22 + $0x40] sm:$0xff] %v3619_v56   ;;  %v2978_v2 = vadd.f32 %v5172_v61, %v2949_v33  ;;  %v2950_v46 = vadd.f32 %v2919_v59, %v2680_v34  ;;  %v4185_v40 = vpop.f32.mrb[195].mxu0  ;;  %v2682_v62 = vadd.f32 %v2657_v14, %v5166_v48  ;;  %v4141_v55 = vpop.f32.mrb[195].mxu1 }
 0x269   : > { %v2979_v17 = vadd.f32 %v5172_v61, %v2950_v46  ;;  %v3000_v0 = vmax.f32 %v2978_v2, 0.0 }
 0x26b   : > { %v3001_v44 = vmax.f32 %v2979_v17, 0.0 }
 0x26c   : > { %v2924_v52 = vpop.f32.mrb[196].mxu0 }
 0x26d   : > { %v3624_v11 = vpack.c.bf16 %v3001_v44, %v3000_v0  ;;  %v2951_v43 = vadd.f32 %v2924_v52, %v2681_v8  ;;  %v4188_v6 = vpop.f32.mrb[197].mxu0 }
 0x26e   : > { %v2927_v7 = vpop.f32.mrb[198].mxu0 }
 0x26f   : > { %3639 = vst [vmem:[%s5182_s22 + $0x48] sm:$0xff] %v3624_v11   ;;  %v2980_v58 = vadd.f32 %v5172_v61, %v2951_v43  ;;  %v2952_v25 = vadd.f32 %v2927_v7, %v2682_v62  ;;  %v4189_v4 = vpop.f32.mrb[199].mxu0 }
 0x271   : > { %v2981_v10 = vadd.f32 %v5172_v61, %v2952_v25  ;;  %v3002_v20 = vmax.f32 %v2980_v58, 0.0 }
 0x273   : > { %v3003_v48 = vmax.f32 %v2981_v10, 0.0 }
 0x275   : > { %v3629_v12 = vpack.c.bf16 %v3003_v48, %v3002_v20 }
 0x277   : > { %3640 = vst [vmem:[%s5182_s22 + $0x50] sm:$0xff] %v3629_v12  }
 0x278 PF: > { %s21_s17 = sadd.s32 1, %s4327_s17  }
 0x279   : > { %p18_p4 = scmp.ge.s32.totalorder %s21_s17, 4  }
 0x27b   :  { %20 = sbr.rel (!%p18_p4) target bundleno = 1 (0x1), region = 126 }

// kernel: stem_forward.13
= control target key start
LH: loop header
LB: loop body
LE: loop exit
PB: predicated region body
PF: predicated region fallthrough
CT: control target
= control target key end

     0   :  { %v431_v0 = vmov 0   ;;  %vm157_vm0 = vcmask 261120   ;;  %s535_s1 = inlined_call_operand.vmem [shape: bf16[1,160,128], index: 1, kind: input, shape index: {}]   ;;  %s536_s0 = inlined_call_operand.vmem [shape: bf16[80,160], index: 0, kind: input, shape index: {}]   ;;  %s537_s2 = inlined_call_operand.vmem [shape: f32[1,128], index: 2, kind: input, shape index: {}]   ;;  %s538_s3 = inlined_call_operand.vmem [shape: bf16[80,128], index: 3, kind: output, shape index: {}]  }
   0x1   :  { %173 = vmatprep.subr.bf16.mxu0 %v431_v0  ;;  %v406_v1 = vld [vmem:[%s535_s1] sm:$0xff]   ;;  %385 = vmatprep.subr.bf16.mxu1 %v431_v0  ;;  %v407_v2 = vld [vmem:[%s535_s1 + $0x8] sm:$0xff]   ;;  %v408_v3 = vld [vmem:[%s535_s1 + $0x10] sm:$0xff]  }
   0x2   :  { %174 = vmatpush1.bf16.msra.mxu0 %v406_v1  ;;  %395 = vmatpush1.bf16.msra.mxu1 %v406_v1  ;;  %v409_v4 = vld [vmem:[%s535_s1 + $0x18] sm:$0xff]   ;;  %v418_v5 = vld [vmem:[%s536_s0 + $0x4] ss:$8 sps:$4 sm:$0xff]   ;;  %v412_v9 = vld [vmem:[%s535_s1 + $0x30] sm:$0xff]  }
   0x3   :  { %175 = vmatprep.subr.bf16.mxu0 %v431_v0  ;;  %386 = vmatprep.subr.bf16.mxu1 %v431_v0  ;;  %v421_v6 = vld [vmem:[%s536_s0 + $0x34] ss:$8 sps:$4 sm:$0xff]   ;;  %v410_v7 = vld [vmem:[%s535_s1 + $0x20] sm:$0xff]   ;;  %v411_v8 = vld [vmem:[%s535_s1 + $0x28] sm:$0xff]  }
   0x4   :  { %331 = vmatprep.mubr.msk.bf16.mxu0 %vm157_vm0, %v418_v5  ;;  %334 = vmatprep.mubr.msk.bf16.mxu1 %vm157_vm0, %v421_v6  ;;  %v413_v10 = vld [vmem:[%s535_s1 + $0x38] sm:$0xff]   ;;  %v414_v11 = vld [vmem:[%s535_s1 + $0x40] sm:$0xff]   ;;  %v415_v12 = vld [vmem:[%s535_s1 + $0x48] sm:$0xff]  }
   0x5   :  { %v416_v13 = vld [vmem:[%s536_s0] ss:$8 sps:$4 sm:$0xff]   ;;  %v419_v14 = vld [vmem:[%s536_s0 + $0x30] ss:$8 sps:$4 sm:$0xff]   ;;  %v422_v15 = vld [vmem:[%s536_s0 + $0x14] ss:$8 sps:$4 sm:$0xff]  }
   0x6   :  { %176 = vmatpush1.bf16.msra.mxu0 %v407_v2  ;;  %396 = vmatpush1.bf16.msra.mxu1 %v407_v2  ;;  %v425_v16 = vld [vmem:[%s536_s0 + $0x44] ss:$8 sps:$4 sm:$0xff]   ;;  %v424_v17 = vld [vmem:[%s536_s0 + $0x10] ss:$8 sps:$4 sm:$0xff]   ;;  %v427_v18 = vld [vmem:[%s536_s0 + $0x40] ss:$8 sps:$4 sm:$0xff]  }
   0x7   :  { %177 = vmatprep.subr.bf16.mxu0 %v431_v0  ;;  %387 = vmatprep.subr.bf16.mxu1 %v431_v0  ;;  %v428_v19 = vld [vmem:[%s536_s0 + $0x24] ss:$8 sps:$4 sm:$0xff]   ;;  %v430_v20 = vld [vmem:[%s536_s0 + $0x20] ss:$8 sps:$4 sm:$0xff]  }
   0x8   :  { %v310_v21 = vld [vmem:[%s537_s2] ss:$0 sm:$0xff] }
   0xa   :  { %178 = vmatpush1.bf16.msra.mxu0 %v408_v3  ;;  %397 = vmatpush1.bf16.msra.mxu1 %v408_v3 }
   0xb   :  { %179 = vmatprep.subr.bf16.mxu0 %v431_v0  ;;  %388 = vmatprep.subr.bf16.mxu1 %v431_v0 }
   0xe   :  { %180 = vmatpush1.bf16.msra.mxu0 %v409_v4  ;;  %398 = vmatpush1.bf16.msra.mxu1 %v409_v4 }
   0xf   :  { %181 = vmatprep.subr.bf16.mxu0 %v431_v0  ;;  %389 = vmatprep.subr.bf16.mxu1 %v431_v0 }
  0x12   :  { %182 = vmatpush1.bf16.msra.mxu0 %v410_v7  ;;  %399 = vmatpush1.bf16.msra.mxu1 %v410_v7 }
  0x13   :  { %183 = vmatprep.subr.bf16.mxu0 %v431_v0  ;;  %390 = vmatprep.subr.bf16.mxu1 %v431_v0 }
  0x16   :  { %184 = vmatpush1.bf16.msra.mxu0 %v411_v8  ;;  %400 = vmatpush1.bf16.msra.mxu1 %v411_v8 }
  0x17   :  { %185 = vmatprep.subr.bf16.mxu0 %v431_v0  ;;  %391 = vmatprep.subr.bf16.mxu1 %v431_v0 }
  0x1a   :  { %186 = vmatpush1.bf16.msra.mxu0 %v412_v9  ;;  %401 = vmatpush1.bf16.msra.mxu1 %v412_v9 }
  0x1b   :  { %187 = vmatprep.subr.bf16.mxu0 %v431_v0  ;;  %392 = vmatprep.subr.bf16.mxu1 %v431_v0 }
  0x1e   :  { %188 = vmatpush1.bf16.msra.mxu0 %v413_v10  ;;  %402 = vmatpush1.bf16.msra.mxu1 %v413_v10 }
  0x1f   :  { %189 = vmatprep.subr.bf16.mxu0 %v431_v0  ;;  %393 = vmatprep.subr.bf16.mxu1 %v431_v0 }
  0x22   :  { %190 = vmatpush1.bf16.msra.mxu0 %v414_v11  ;;  %403 = vmatpush1.bf16.msra.mxu1 %v414_v11 }
  0x23   :  { %191 = vmatprep.subr.bf16.mxu0 %v431_v0  ;;  %394 = vmatprep.subr.bf16.mxu1 %v431_v0 }
  0x26   :  { %192 = vmatpush1.bf16.msra.mxu0 %v415_v12  ;;  %404 = vmatpush1.bf16.msra.mxu1 %v415_v12 }
  0x29   :  { %206 = vmatmul.mubr.bf16.vlgmr.msra.gmra.mrb[0].mxu0 %v416_v13  ;;  %230 = vmatmul.mubr.bf16.vlgmr.msra.gmra.mrb[0].mxu1 %v419_v14 }
  0x2a   :  { %332 = vmatprep.mubr.msk.bf16.mxu0 %vm157_vm0, %v422_v15  ;;  %335 = vmatprep.mubr.msk.bf16.mxu1 %vm157_vm0, %v425_v16 }
  0x31   :  { %214 = vmatmul.mubr.bf16.gmra.mrb[4].mxu0 %v424_v17  ;;  %238 = vmatmul.mubr.bf16.gmra.mrb[4].mxu1 %v427_v18 }
  0x32   :  { %333 = vmatprep.mubr.msk.bf16.mxu0 %vm157_vm0, %v428_v19 }
  0x39   :  { %222 = vmatmul.mubr.bf16.gmra.mrb[8].mxu0 %v430_v20 }
  0xfc   :  { %v207_v22 = vpop.f32.mrb[0].mxu0  ;;  %v231_v23 = vpop.f32.mrb[0].mxu1 }
  0xfd   :  { %v208_v24 = vadd.f32 %v310_v21, %v207_v22  ;;  %v209_v25 = vpop.f32.mrb[1].mxu0  ;;  %v232_v26 = vadd.f32 %v310_v21, %v231_v23  ;;  %v233_v27 = vpop.f32.mrb[1].mxu1 }
  0xfe   :  { %v210_v28 = vpop.f32.mrb[2].mxu0  ;;  %v234_v29 = vpop.f32.mrb[2].mxu1 }
  0xff   :  { %v211_v30 = vadd.f32 %v310_v21, %v210_v28  ;;  %v212_v31 = vpop.f32.mrb[3].mxu0  ;;  %v252_v32 = vmax.f32 %v232_v26, 0.0  ;;  %v235_v33 = vadd.f32 %v310_v21, %v234_v29  ;;  %v236_v34 = vpop.f32.mrb[3].mxu1  ;;  %v246_v35 = vmax.f32 %v208_v24, 0.0 }
 0x101   :  { %v247_v36 = vmax.f32 %v211_v30, 0.0  ;;  %v253_v37 = vmax.f32 %v235_v33, 0.0 }
 0x103   :  { %v359_v38 = vpack.c.bf16 %v247_v36, %v246_v35  ;;  %v374_v39 = vpack.c.bf16 %v253_v37, %v252_v32 }
 0x104   :  { %v215_v40 = vpop.f32.mrb[4].mxu0  ;;  %v239_v41 = vpop.f32.mrb[4].mxu1 }
 0x105   :  { %360 = vst [vmem:[%s538_s3] sm:$0xff] %v359_v38   ;;  %383 = vst [vmem:[%s538_s3 + $0x18] sm:$0xff] %v374_v39   ;;  %v216_v42 = vadd.f32 %v310_v21, %v215_v40  ;;  %v217_v43 = vpop.f32.mrb[5].mxu0  ;;  %v240_v44 = vadd.f32 %v310_v21, %v239_v41  ;;  %v241_v45 = vpop.f32.mrb[5].mxu1 }
 0x106   :  { %v218_v46 = vpop.f32.mrb[6].mxu0  ;;  %v242_v47 = vpop.f32.mrb[6].mxu1 }
 0x107   :  { %v219_v48 = vadd.f32 %v310_v21, %v218_v46  ;;  %v220_v49 = vpop.f32.mrb[7].mxu0  ;;  %v254_v50 = vmax.f32 %v240_v44, 0.0  ;;  %v243_v51 = vadd.f32 %v310_v21, %v242_v47  ;;  %v244_v52 = vpop.f32.mrb[7].mxu1  ;;  %v248_v53 = vmax.f32 %v216_v42, 0.0 }
 0x109   :  { %v249_v54 = vmax.f32 %v219_v48, 0.0  ;;  %v255_v55 = vmax.f32 %v243_v51, 0.0 }
 0x10b   :  { %v364_v56 = vpack.c.bf16 %v249_v54, %v248_v53  ;;  %v379_v57 = vpack.c.bf16 %v255_v55, %v254_v50 }
 0x10c   :  { %v223_v58 = vpop.f32.mrb[8].mxu0 }
 0x10d   :  { %381 = vst [vmem:[%s538_s3 + $0x8] sm:$0xff] %v364_v56   ;;  %384 = vst [vmem:[%s538_s3 + $0x20] sm:$0xff] %v379_v57   ;;  %v224_v59 = vadd.f32 %v310_v21, %v223_v58  ;;  %v225_v60 = vpop.f32.mrb[9].mxu0 }
 0x10e   :  { %v226_v61 = vpop.f32.mrb[10].mxu0 }
 0x10f   :  { %v227_v62 = vadd.f32 %v310_v21, %v226_v61  ;;  %v228_v63 = vpop.f32.mrb[11].mxu0  ;;  %v250_v0 = vmax.f32 %v224_v59, 0.0 }
 0x111   :  { %v251_v1 = vmax.f32 %v227_v62, 0.0 }
 0x113   :  { %v369_v2 = vpack.c.bf16 %v251_v1, %v250_v0 }
 0x115   :  { %382 = vst [vmem:[%s538_s3 + $0x10] sm:$0xff] %v369_v2  }

// kernel: stem_forward.12
= control target key start
LH: loop header
LB: loop body
LE: loop exit
PB: predicated region body
PF: predicated region fallthrough
CT: control target
= control target key end

     0   :  { %v3844_v1 = vmov 0   ;;  %vm141_vm0 = vcmask 523264   ;;  %s3832_s9 = inlined_call_operand.vmem [shape: bf16[9,64,192], index: 9, kind: input, shape index: {}]   ;;  %s3833_s0 = inlined_call_operand.vmem [shape: bf16[80,64], index: 0, kind: input, shape index: {}]   ;;  %s3834_s1 = inlined_call_operand.vmem [shape: bf16[80,64], index: 1, kind: input, shape index: {}]   ;;  %s3835_s2 = inlined_call_operand.vmem [shape: bf16[80,64], index: 2, kind: input, shape index: {}]   ;;  %s3836_s4 = inlined_call_operand.vmem [shape: bf16[80,64], index: 4, kind: input, shape index: {}]   ;;  %s3837_s3 = inlined_call_operand.vmem [shape: bf16[80,64], index: 3, kind: input, shape index: {}]   ;;  %s3838_s5 = inlined_call_operand.vmem [shape: bf16[80,64], index: 5, kind: input, shape index: {}]   ;;  %s3839_s6 = inlined_call_operand.vmem [shape: bf16[80,64], index: 6, kind: input, shape index: {}]   ;;  %s3840_s7 = inlined_call_operand.vmem [shape: bf16[80,64], index: 7, kind: input, shape index: {}]   ;;  %s3841_s8 = inlined_call_operand.vmem [shape: bf16[80,64], index: 8, kind: input, shape index: {}]   ;;  %s3842_s10 = inlined_call_operand.vmem [shape: f32[1,192], index: 10, kind: input, shape index: {}]   ;;  %s3843_s11 = inlined_call_operand.vmem [shape: bf16[80,256], index: 11, kind: output, shape index: {}]  }
   0x1   :  { %v2505_v0 = vld [vmem:[%s3832_s9 + $0x44] ss:$8 sps:$4 sm:$0xff]   ;;  %189 = vmatprep.mubr.bf16.mxu1 %v3844_v1  ;;  %938 = vmatprep.mubr.bf16.mxu0 %v3844_v1  ;;  %v2509_v3 = vld [vmem:[%s3832_s9 + $0x40] ss:$8 sps:$4 sm:$0xff]   ;;  %v2511_v5 = vld [vmem:[%s3832_s9 + $0x54] ss:$8 sps:$4 sm:$0xff]  }
   0x2   :  { %v2728_v2 = vld [vmem:[%s3832_s9 + $0x104] ss:$8 sps:$4 sm:$0xff]   ;;  %157 = vmatprep.subr.bf16.mxu1 %v2505_v0  ;;  %v2736_v4 = vld [vmem:[%s3832_s9 + $0x100] ss:$8 sps:$4 sm:$0xff]   ;;  %v2746_v6 = vld [vmem:[%s3832_s9 + $0x114] ss:$8 sps:$4 sm:$0xff]  }
   0x3   :  { %906 = vmatprep.subr.bf16.mxu0 %v2728_v2  ;;  %158 = vmatpush1.bf16.msra.mxu1 %v2509_v3  ;;  %v2515_v7 = vld [vmem:[%s3832_s9 + $0x50] ss:$8 sps:$4 sm:$0xff]   ;;  %v2517_v9 = vld [vmem:[%s3832_s9 + $0x64] ss:$8 sps:$4 sm:$0xff]   ;;  %v2521_v11 = vld [vmem:[%s3832_s9 + $0x60] ss:$8 sps:$4 sm:$0xff]  }
   0x4   :  { %907 = vmatpush1.bf16.msra.mxu0 %v2736_v4  ;;  %159 = vmatprep.subr.bf16.mxu1 %v2511_v5  ;;  %v2754_v8 = vld [vmem:[%s3832_s9 + $0x110] ss:$8 sps:$4 sm:$0xff]   ;;  %v2763_v10 = vld [vmem:[%s3832_s9 + $0x124] ss:$8 sps:$4 sm:$0xff]   ;;  %v2771_v12 = vld [vmem:[%s3832_s9 + $0x120] ss:$8 sps:$4 sm:$0xff]  }
   0x5   :  { %908 = vmatprep.subr.bf16.mxu0 %v2746_v6  ;;  %v2523_v13 = vld [vmem:[%s3832_s9 + $0x74] ss:$8 sps:$4 sm:$0xff]   ;;  %v2527_v15 = vld [vmem:[%s3832_s9 + $0x70] ss:$8 sps:$4 sm:$0xff]   ;;  %v2794_v17 = vld [vmem:[%s3833_s0] sm:$0xf] }
   0x6   :  { %v2781_v14 = vld [vmem:[%s3832_s9 + $0x134] ss:$8 sps:$4 sm:$0xff]   ;;  %v2789_v16 = vld [vmem:[%s3832_s9 + $0x130] ss:$8 sps:$4 sm:$0xff]   ;;  %v57_v18 = vld [vmem:[%s3834_s1] sm:$0xf] }
   0x7   :  { %160 = vmatpush1.bf16.msra.mxu1 %v2515_v7  ;;  %v2803_v19 = vld [vmem:[%s3833_s0 + $0x4] sm:$0xf]  ;;  %v1879_v21 = vmax.bf16 %v57_v18, %v2794_v17  ;;  %v2813_v22 = vld [vmem:[%s3835_s2] sm:$0xf]  ;;  %v2543_v42 = vld [vmem:[%s3832_s9 + $0x154] ss:$8 sps:$4 sm:$0xff]  }
   0x8   :  { %909 = vmatpush1.bf16.msra.mxu0 %v2754_v8  ;;  %161 = vmatprep.subr.bf16.mxu1 %v2517_v9  ;;  %v58_v20 = vld [vmem:[%s3834_s1 + $0x4] sm:$0xf]  ;;  %v2532_v27 = vld [vmem:[%s3832_s9] ss:$8 sps:$4 sm:$0xff]   ;;  %v2541_v44 = vld [vmem:[%s3832_s9 + $0x150] ss:$8 sps:$4 sm:$0xff]  }
   0x9   :  { %910 = vmatprep.subr.bf16.mxu0 %v2763_v10  ;;  %v1880_v23 = vmax.bf16 %v58_v20, %v2803_v19  ;;  %v2534_v24 = vld [vmem:[%s3832_s9 + $0x4] ss:$8 sps:$4 sm:$0xff]   ;;  %v1889_v26 = vmax.bf16 %v1879_v21, %v2813_v22  ;;  %v807_v28 = vld [vmem:[%s3836_s4] sm:$0xf]  ;;  %v2102_v29 = vcombine.low %v57_v18, %v58_v20  ;;  %v59_v45 = vld [vmem:[%s3834_s1 + $0x8] sm:$0xf] }
   0xa   :  { %v2822_v25 = vld [vmem:[%s3835_s2 + $0x4] sm:$0xf]  ;;  %v2835_v31 = vld [vmem:[%s3837_s3] sm:$0xf]  ;;  %v60_v46 = vld [vmem:[%s3834_s1 + $0xc] sm:$0xf] }
   0xb   :  { %162 = vmatpush1.bf16.msra.mxu1 %v2521_v11  ;;  %v1890_v30 = vmax.bf16 %v1880_v23, %v2822_v25  ;;  %v2840_v32 = vld [vmem:[%s3837_s3 + $0x4] sm:$0xf]  ;;  %v1899_v35 = vmax.bf16 %v1889_v26, %v2835_v31  ;;  %v2538_v36 = vld [vmem:[%s3832_s9 + $0x140] ss:$8 sps:$4 sm:$0xff]   ;;  %v810_v50 = vld [vmem:[%s3836_s4 + $0xc] sm:$0xf]  ;;  %v2103_v56 = vcombine.low %v59_v45, %v60_v46 }
   0xc   :  { %911 = vmatpush1.bf16.msra.mxu0 %v2771_v12  ;;  %163 = vmatprep.subr.bf16.mxu1 %v2523_v13  ;;  %v808_v33 = vld [vmem:[%s3836_s4 + $0x4] sm:$0xf]  ;;  %v2857_v39 = vld [vmem:[%s3838_s5] sm:$0xf]  ;;  %v809_v47 = vld [vmem:[%s3836_s4 + $0x8] sm:$0xf]  ;;  %v1882_v52 = vmax.bf16 %v810_v50, %v60_v46 }
   0xd   :  { %912 = vmatprep.subr.bf16.mxu0 %v2781_v14  ;;  %v2198_v34 = vcombine.low %v807_v28, %v808_v33  ;;  %v1900_v37 = vmax.bf16 %v1890_v30, %v2840_v32  ;;  %v2540_v38 = vld [vmem:[%s3832_s9 + $0x144] ss:$8 sps:$4 sm:$0xff]   ;;  %v2864_v41 = vmax.bf16 %v1899_v35, %v807_v28  ;;  %v1881_v49 = vmax.bf16 %v809_v47, %v59_v45  ;;  %v2549_v54 = vld [vmem:[%s3832_s9 + $0x10] ss:$8 sps:$4 sm:$0xff]   ;;  %v2551_v55 = vld [vmem:[%s3832_s9 + $0x14] ss:$8 sps:$4 sm:$0xff]  }
   0xe   :  { %v2862_v40 = vld [vmem:[%s3838_s5 + $0x4] sm:$0xf]  ;;  %v2199_v57 = vcombine.low %v809_v47, %v810_v50  ;;  %v2546_v58 = vld [vmem:[%s3832_s9 + $0x160] ss:$8 sps:$4 sm:$0xff]   ;;  %v2554_v60 = vld [vmem:[%s3832_s9 + $0x174] ss:$8 sps:$4 sm:$0xff]  }
   0xf   :  { %164 = vmatpush1.bf16.msra.mxu1 %v2527_v15  ;;  %3855 = vst [vmem:[#allocation2_spill] sm:$0xff] %v2862_v40  ;;  %v2871_v43 = vmax.bf16 %v1900_v37, %v808_v33  ;;  %v2548_v53 = vld [vmem:[%s3832_s9 + $0x164] ss:$8 sps:$4 sm:$0xff]   ;;  %v2556_v61 = vld [vmem:[%s3832_s9 + $0x20] ss:$8 sps:$4 sm:$0xff]   ;;  %v2224_v20 = vcombine.low %v2857_v39, %v2862_v40 }
  0x10   :  { %913 = vmatpush1.bf16.msra.mxu0 %v2789_v16  ;;  %320 = vmatprep.subr.bf16.mxu1 %v2534_v24  ;;  %v2558_v59 = vld [vmem:[%s3832_s9 + $0x24] ss:$8 sps:$4 sm:$0xff]   ;;  %v2918_v62 = vld [vmem:[%s3838_s5 + $0x8] sm:$0xf]  ;;  %v2933_v3 = vld [vmem:[%s3834_s1 + $0x10] sm:$0xf] }
  0x11   :  { %3856 = vst [vmem:[#allocation3_spill] sm:$0xff] %v2871_v43  ;;  %1108 = vmatprep.subr.bf16.mxu0 %v2540_v38  ;;  %v2923_v63 = vmax.bf16 %v1881_v49, %v2918_v62  ;;  %v1012_v0 = vld [vmem:[%s3838_s5 + $0xc] sm:$0xf]  ;;  %v2938_v5 = vld [vmem:[%s3834_s1 + $0x14] sm:$0xf] }
  0x12   :  { %2115 = vmatmul.mubr.msk.bf16.vlgmr.msra.gmra.mrb[0].mxu1 %vm141_vm0, %v2102_v29  ;;  %v1892_v7 = vmax.bf16 %v1882_v52, %v1012_v0  ;;  %v2552_v9 = vld [vmem:[%s3832_s9 + $0x170] ss:$8 sps:$4 sm:$0xff]   ;;  %v2566_v11 = vld [vmem:[%s3832_s9 + $0x34] ss:$8 sps:$4 sm:$0xff]   ;;  %v2563_v13 = vld [vmem:[%s3832_s9 + $0x184] ss:$8 sps:$4 sm:$0xff]   ;;  %v2104_v18 = vcombine.low %v2933_v3, %v2938_v5  ;;  %v2225_v37 = vcombine.low %v2918_v62, %v1012_v0 }
  0x13   :  { %2211 = vmatmul.mubr.msk.bf16.vlgmr.msra.gmra.mrb[0].mxu0 %vm141_vm0, %v2198_v34  ;;  %321 = vmatpush1.bf16.msra.mxu1 %v2532_v27  ;;  %v2564_v15 = vld [vmem:[%s3832_s9 + $0x30] ss:$8 sps:$4 sm:$0xff]   ;;  %v2561_v21 = vld [vmem:[%s3832_s9 + $0x180] ss:$8 sps:$4 sm:$0xff]   ;;  %v2574_v23 = vld [vmem:[%s3832_s9 + $0x84] ss:$8 sps:$4 sm:$0xff]  }
  0x14   :  { %1109 = vmatpush1.bf16.msra.mxu0 %v2538_v36  ;;  %199 = vmatprep.mubr.bf16.mxu1 %v3844_v1  ;;  %v2571_v24 = vld [vmem:[%s3832_s9 + $0x194] ss:$8 sps:$4 sm:$0xff]   ;;  %v2969_v26 = vld [vmem:[%s3834_s1 + $0x18] sm:$0xf]  ;;  %v2981_v28 = vld [vmem:[%s3833_s0 + $0x8] sm:$0xf] }
  0x15   :  { %1110 = vmatprep.subr.bf16.mxu0 %v2543_v42  ;;  %948 = vmatprep.mubr.bf16.mxu0 %v3844_v1  ;;  %v2976_v27 = vld [vmem:[%s3834_s1 + $0x1c] sm:$0xf]  ;;  %v2986_v29 = vld [vmem:[%s3833_s0 + $0xc] sm:$0xf]  ;;  %v2569_v30 = vld [vmem:[%s3832_s9 + $0x190] ss:$8 sps:$4 sm:$0xff]   ;;  %v1901_v33 = vmax.bf16 %v2923_v63, %v2981_v28 }
  0x16   :  { %322 = vmatprep.subr.bf16.mxu1 %v2551_v55  ;;  %v1902_v34 = vmax.bf16 %v1892_v7, %v2986_v29  ;;  %v2578_v35 = vld [vmem:[%s3832_s9 + $0x1a4] ss:$8 sps:$4 sm:$0xff]   ;;  %v2105_v36 = vcombine.low %v2969_v26, %v2976_v27  ;;  %v3004_v38 = vld [vmem:[%s3833_s0 + $0x10] sm:$0xf]  ;;  %v3009_v42 = vld [vmem:[%s3833_s0 + $0x14] sm:$0xf] }
  0x17   :  { %323 = vmatpush1.bf16.msra.mxu1 %v2549_v54  ;;  %v1883_v45 = vmax.bf16 %v2933_v3, %v3004_v38  ;;  %v1884_v46 = vmax.bf16 %v2938_v5, %v3009_v42  ;;  %v3021_v47 = vld [vmem:[%s3834_s1 + $0x20] sm:$0xf]  ;;  %v3026_v49 = vld [vmem:[%s3834_s1 + $0x24] sm:$0xf]  ;;  %v2586_v50 = vld [vmem:[%s3832_s9 + $0x1b4] ss:$8 sps:$4 sm:$0xff]  }
  0x18   :  { %1111 = vmatpush1.bf16.msra.mxu0 %v2541_v44  ;;  %324 = vmatprep.subr.bf16.mxu1 %v2558_v59  ;;  %v2576_v44 = vld [vmem:[%s3832_s9 + $0x1a0] ss:$8 sps:$4 sm:$0xff]   ;;  %v3034_v52 = vld [vmem:[%s3833_s0 + $0x18] sm:$0xf]  ;;  %v3045_v54 = vld [vmem:[%s3838_s5 + $0x14] sm:$0xf]  ;;  %v2106_v3 = vcombine.low %v3021_v47, %v3026_v49 }
  0x19   :  { %1112 = vmatprep.subr.bf16.mxu0 %v2548_v53  ;;  %v3040_v53 = vld [vmem:[%s3838_s5 + $0x10] sm:$0xf]  ;;  %3858 = vst [vmem:[#allocation5_spill] sm:$0xff] %v3045_v54  ;;  %v3050_v55 = vld [vmem:[%s3833_s0 + $0x1c] sm:$0xf] }
  0x1a   :  { %2116 = vmatmul.mubr.msk.bf16.gmra.mrb[4].mxu1 %vm141_vm0, %v2103_v56  ;;  %3857 = vst [vmem:[#allocation4_spill] sm:$0xff] %v3040_v53  ;;  %v1885_v56 = vmax.bf16 %v2969_v26, %v3034_v52  ;;  %v2596_v63 = vld [vmem:[%s3832_s9 + $0x1c4] ss:$8 sps:$4 sm:$0xff]   ;;  %v3080_v0 = vld [vmem:[%s3833_s0 + $0x20] sm:$0xf] }
  0x1b   :  { %2212 = vmatmul.mubr.msk.bf16.gmra.mrb[4].mxu0 %vm141_vm0, %v2199_v57  ;;  %209 = vmatprep.mubr.bf16.mxu1 %v3844_v1  ;;  %v3057_v57 = vld [vmem:[%s3839_s6 + $0x8] sm:$0xf]  ;;  %v3087_v5 = vld [vmem:[%s3833_s0 + $0x24] sm:$0xf]  ;;  %v1887_v7 = vmax.bf16 %v3021_v47, %v3080_v0  ;;  %v3292_v48 = vld [vmem:[%s3837_s3 + $0x1c] sm:$0xf] }
  0x1c   :  { %1140 = vmatprep.mubr.bf16.mxu0 %v3844_v1  ;;  %1113 = vmatpush1.bf16.msra.mxu0 %v2546_v58  ;;  %v1886_v58 = vmax.bf16 %v2976_v27, %v3050_v55  ;;  %v1911_v59 = vmax.bf16 %v1901_v33, %v3057_v57  ;;  %v2572_v26 = vld [vmem:[%s3832_s9 + $0x80] ss:$8 sps:$4 sm:$0xff]   ;;  %v3136_v33 = vld [vmem:[%s3835_s2 + $0x14] sm:$0xf] }
  0x1d   :  { %1114 = vmatprep.subr.bf16.mxu0 %v2554_v60  ;;  %325 = vmatpush1.bf16.msra.mxu1 %v2556_v61  ;;  %v3067_v60 = vld [vmem:[%s3839_s6 + $0xc] sm:$0xf]  ;;  %v2584_v61 = vld [vmem:[%s3832_s9 + $0x1b0] ss:$8 sps:$4 sm:$0xff]   ;;  %v3174_v47 = vld [vmem:[%s3840_s7 + $0x8] sm:$0xf] }
  0x1e   :  { %326 = vmatprep.subr.bf16.mxu1 %v2566_v11  ;;  %v1912_v62 = vmax.bf16 %v1902_v34, %v3067_v60  ;;  %v1888_v11 = vmax.bf16 %v3026_v49, %v3087_v5  ;;  %v3179_v49 = vld [vmem:[%s3840_s7 + $0xc] sm:$0xf] }
  0x20   :  { %1115 = vmatpush1.bf16.msra.mxu0 %v2552_v9  ;;  %v2226_v9 = vcombine.low %v3040_v53, %v3045_v54  ;;  %v2602_v53 = vld [vmem:[%s3832_s9 + $0x1d0] ss:$8 sps:$4 sm:$0xff]   ;;  %v3367_v54 = vld [vmem:[%s3836_s4 + $0x20] sm:$0xf] }
  0x21   :  { %1310 = vmatprep.subr.bf16.mxu0 %v2563_v13  ;;  %327 = vmatpush1.bf16.msra.mxu1 %v2564_v15  ;;  %v3101_v13 = vld [vmem:[%s3835_s2 + $0x8] sm:$0xf]  ;;  %v3107_v15 = vld [vmem:[%s3838_s5 + $0x18] sm:$0xf] }
  0x22   :  { %2117 = vmatmul.mubr.msk.bf16.gmra.mrb[8].mxu1 %vm141_vm0, %v2104_v18  ;;  %502 = vmatprep.subr.bf16.mxu1 %v2574_v23  ;;  %v3112_v18 = vld [vmem:[%s3838_s5 + $0x1c] sm:$0xf] }
  0x23   :  { %2237 = vmatmul.mubr.msk.bf16.vlgmr.msra.gmra.mrb[0].mxu0 %vm141_vm0, %v2224_v20  ;;  %219 = vmatprep.mubr.bf16.mxu1 %v3844_v1  ;;  %v1921_v20 = vmax.bf16 %v1911_v59, %v3101_v13  ;;  %v2227_v27 = vcombine.low %v3107_v15, %v3112_v18 }
  0x24   :  { %1150 = vmatprep.mubr.bf16.mxu0 %v3844_v1  ;;  %1311 = vmatpush1.bf16.msra.mxu0 %v2561_v21  ;;  %v3118_v21 = vld [vmem:[%s3835_s2 + $0xc] sm:$0xf] }
  0x25   :  { %1312 = vmatprep.subr.bf16.mxu0 %v2571_v24  ;;  %v1922_v23 = vmax.bf16 %v1912_v62, %v3118_v21  ;;  %v2120_v24 = vcombine.low %v2794_v17, %v2803_v19  ;;  %v2583_v17 = vld [vmem:[%s3832_s9 + $0x94] ss:$8 sps:$4 sm:$0xff]   ;;  %v3143_v19 = vmax.bf16 %v1884_v46, %v3136_v33  ;;  %v3198_v62 = vld [vmem:[%s3835_s2 + $0x20] sm:$0xf] }
  0x27   :  { %v1932_v59 = vmax.bf16 %v1922_v23, %v3179_v49  ;;  %v3223_v23 = vld [vmem:[%s3839_s6] sm:$0xf] }
  0x28   :  { %1313 = vmatpush1.bf16.msra.mxu0 %v2569_v30  ;;  %v3131_v30 = vld [vmem:[%s3835_s2 + $0x10] sm:$0xf] }
  0x29   :  { %1314 = vmatprep.subr.bf16.mxu0 %v2578_v35  ;;  %v1893_v34 = vmax.bf16 %v1883_v45, %v3131_v30  ;;  %v3149_v35 = vld [vmem:[%s3838_s5 + $0x20] sm:$0xf] }
  0x2a   :  { %2118 = vmatmul.mubr.msk.bf16.gmra.mrb[12].mxu1 %vm141_vm0, %v2105_v36  ;;  %v2581_v36 = vld [vmem:[%s3832_s9 + $0x90] ss:$8 sps:$4 sm:$0xff]  }
  0x2b   :  { %2238 = vmatmul.mubr.msk.bf16.gmra.mrb[4].mxu0 %vm141_vm0, %v2225_v37  ;;  %229 = vmatprep.mubr.bf16.mxu1 %v3844_v1  ;;  %v3157_v37 = vld [vmem:[%s3835_s2 + $0x18] sm:$0xf] }
  0x2c   :  { %1160 = vmatprep.mubr.bf16.mxu0 %v3844_v1  ;;  %1315 = vmatpush1.bf16.msra.mxu0 %v2576_v44  ;;  %v3162_v44 = vld [vmem:[%s3835_s2 + $0x1c] sm:$0xf]  ;;  %v3166_v45 = vmax.bf16 %v1885_v56, %v3157_v37  ;;  %v2591_v56 = vld [vmem:[%s3832_s9 + $0xa4] ss:$8 sps:$4 sm:$0xff]  }
  0x2d   :  { %1316 = vmatprep.subr.bf16.mxu0 %v2586_v50  ;;  %v3169_v46 = vmax.bf16 %v1886_v58, %v3162_v44  ;;  %v3186_v50 = vld [vmem:[%s3838_s5 + $0x24] sm:$0xf]  ;;  %v1931_v58 = vmax.bf16 %v1921_v20, %v3174_v47 }
  0x2f   :  { %v1906_v40 = vmax.bf16 %v3169_v46, %v3292_v48  ;;  %v3326_v46 = vld [vmem:[%s3837_s3 + $0x20] sm:$0xf] }
  0x30   :  { %1317 = vmatpush1.bf16.msra.mxu0 %v2584_v61  ;;  %v2121_v61 = vcombine.low %v2981_v28, %v2986_v29  ;;  %v2589_v28 = vld [vmem:[%s3832_s9 + $0xa0] ss:$8 sps:$4 sm:$0xff]   ;;  %v2599_v29 = vld [vmem:[%s3832_s9 + $0xb4] ss:$8 sps:$4 sm:$0xff]  }
  0x31   :  { %1512 = vmatprep.subr.bf16.mxu0 %v2596_v63  ;;  %v3203_v63 = vld [vmem:[%s3835_s2 + $0x24] sm:$0xf] }
  0x32   :  { %2119 = vmatmul.mubr.msk.bf16.gmra.mrb[16].mxu1 %vm141_vm0, %v2106_v3  ;;  %v2228_v3 = vcombine.low %v3149_v35, %v3186_v50  ;;  %v3211_v20 = vmax.bf16 %v1888_v11, %v3203_v63  ;;  %v3235_v11 = vld [vmem:[%s3837_s3 + $0x8] sm:$0xf] }
  0x33   :  { %2239 = vmatmul.mubr.msk.bf16.gmra.mrb[8].mxu0 %vm141_vm0, %v2226_v9  ;;  %352 = vmatprep.mubr.bf16.mxu1 %v3844_v1  ;;  %v3208_v9 = vmax.bf16 %v1887_v7, %v3198_v62  ;;  %v3230_v7 = vld [vmem:[%s3839_s6 + $0x4] sm:$0xf] }
  0x34   :  { %1170 = vmatprep.mubr.bf16.mxu0 %v3844_v1  ;;  %3859 = vst [vmem:[#allocation6_spill] sm:$0xff] %v3230_v7 }
  0x3a   :  { %2133 = vmatmul.mubr.msk.bf16.vlgmr.msra.gmra.mrb[0].mxu1 %vm141_vm0, %v2120_v24  ;;  %v3240_v24 = vld [vmem:[%s3837_s3 + $0xc] sm:$0xf] }
  0x3b   :  { %2240 = vmatmul.mubr.msk.bf16.gmra.mrb[12].mxu0 %vm141_vm0, %v2227_v27  ;;  %503 = vmatpush1.bf16.msra.mxu1 %v2572_v26  ;;  %v2597_v26 = vld [vmem:[%s3832_s9 + $0xb0] ss:$8 sps:$4 sm:$0xff]   ;;  %v1941_v27 = vmax.bf16 %v1931_v58, %v3235_v11 }
  0x3c   :  { %362 = vmatprep.mubr.bf16.mxu1 %v3844_v1  ;;  %1180 = vmatprep.mubr.bf16.mxu0 %v3844_v1 }
  0x3d   :  { %504 = vmatprep.subr.bf16.mxu1 %v2583_v17  ;;  %v1942_v17 = vmax.bf16 %v1932_v59, %v3240_v24  ;;  %v2250_v59 = vcombine.low %v3223_v23, %v3230_v7 }
  0x3f   :  { %505 = vmatpush1.bf16.msra.mxu1 %v2581_v36  ;;  %v2607_v36 = vld [vmem:[%s3832_s9 + $0xc4] ss:$8 sps:$4 sm:$0xff]  }
  0x40   :  { %506 = vmatprep.subr.bf16.mxu1 %v2591_v56  ;;  %v3254_v56 = vld [vmem:[%s3837_s3 + $0x10] sm:$0xf] }
  0x41   :  { %v1903_v58 = vmax.bf16 %v1893_v34, %v3254_v56  ;;  %v3284_v34 = vld [vmem:[%s3836_s4 + $0x14] sm:$0xf] }
  0x42   :  { %2134 = vmatmul.mubr.msk.bf16.gmra.mrb[4].mxu1 %vm141_vm0, %v2121_v61  ;;  %v2122_v61 = vcombine.low %v3004_v38, %v3009_v42  ;;  %v3279_v42 = vld [vmem:[%s3837_s3 + $0x18] sm:$0xf] }
  0x43   :  { %2241 = vmatmul.mubr.msk.bf16.gmra.mrb[16].mxu0 %vm141_vm0, %v2228_v3  ;;  %372 = vmatprep.mubr.bf16.mxu1 %v3844_v1  ;;  %v3261_v3 = vld [vmem:[%s3837_s3 + $0x14] sm:$0xf] }
  0x44   :  { %1342 = vmatprep.mubr.bf16.mxu0 %v3844_v1  ;;  %507 = vmatpush1.bf16.msra.mxu1 %v2589_v28  ;;  %v2594_v28 = vld [vmem:[%s3832_s9 + $0x1c0] ss:$8 sps:$4 sm:$0xff]   ;;  %v1904_v38 = vmax.bf16 %v3143_v19, %v3261_v3  ;;  %v1905_v19 = vmax.bf16 %v3166_v45, %v3279_v42  ;;  %v2604_v1 = vld [vmem:[%s3832_s9 + $0x1d4] ss:$8 sps:$4 sm:$0xff]   ;;  %v3315_v45 = vld [vmem:[%s3841_s8 + $0xc] sm:$0xf] }
  0x45   :  { %508 = vmatprep.subr.bf16.mxu1 %v2599_v29  ;;  %v3272_v29 = vld [vmem:[%s3836_s4 + $0x10] sm:$0xf] }
  0x46   :  { %v3287_v51 = vmax.bf16 %v1903_v58, %v3272_v29  ;;  %v3305_v58 = vmax.bf16 %v1904_v38, %v3284_v34  ;;  %v3864_v38 = vmov 0  }
  0x48   :  { %509 = vmatpush1.bf16.msra.mxu1 %v2597_v26  ;;  %3860 = vst [vmem:[#allocation7_spill] sm:$0xff] %v3287_v51  ;;  %v3299_v26 = vld [vmem:[%s3841_s8 + $0x8] sm:$0xf]  ;;  %3861 = vst [vmem:[#allocation8_spill] sm:$0xff] %v3305_v58  ;;  %v3372_v58 = vld [vmem:[%s3836_s4 + $0x24] sm:$0xf] }
  0x49   :  { %704 = vmatprep.subr.bf16.mxu1 %v2607_v36  ;;  %v3310_v43 = vmax.bf16 %v1941_v27, %v3299_v26  ;;  %v3321_v36 = vmax.bf16 %v1942_v17, %v3315_v45  ;;  %v3331_v27 = vld [vmem:[%s3837_s3 + $0x24] sm:$0xf]  ;;  %v1907_v17 = vmax.bf16 %v3208_v9, %v3326_v46 }
  0x4a   :  { %2135 = vmatmul.mubr.msk.bf16.gmra.mrb[8].mxu1 %vm141_vm0, %v2122_v61  ;;  %v1908_v7 = vmax.bf16 %v3211_v20, %v3331_v27  ;;  %v3353_v61 = vld [vmem:[%s3836_s4 + $0x1c] sm:$0xf]  ;;  %v2611_v9 = vld [vmem:[%s3832_s9 + $0x1e4] ss:$8 sps:$4 sm:$0xff]  }
  0x4b   :  { %3862 = vst [vmem:[#allocation9_spill] sm:$0xff] %v3310_v43  ;;  %3863 = vst [vmem:[#allocation10_spill] sm:$0xff] %v3321_v36  ;;  %2263 = vmatmul.mubr.msk.bf16.vlgmr.msra.gmra.mrb[0].mxu0 %vm141_vm0, %v2250_v59  ;;  %382 = vmatprep.mubr.bf16.mxu1 %v3864_v38  ;;  %v3348_v59 = vld [vmem:[%s3836_s4 + $0x18] sm:$0xf]  ;;  %v3377_v51 = vmax.bf16 %v1907_v17, %v3367_v54 }
  0x4c   :  { %1352 = vmatprep.mubr.bf16.mxu0 %v3864_v38  ;;  %1513 = vmatpush1.bf16.msra.mxu0 %v2594_v28  ;;  %v3359_v20 = vmax.bf16 %v1905_v19, %v3348_v59  ;;  %v3362_v28 = vmax.bf16 %v1906_v40, %v3353_v61  ;;  %v3380_v19 = vmax.bf16 %v1908_v7, %v3372_v58  ;;  %v2617_v17 = vld [vmem:[%s3832_s9 + $0x1f0] ss:$8 sps:$4 sm:$0xff]   ;;  %v2632_v7 = vld [vmem:[%s3832_s9 + $0xf4] ss:$8 sps:$4 sm:$0xff]  }
  0x4d   :  { %1514 = vmatprep.subr.bf16.mxu0 %v2604_v1  ;;  %v2123_v1 = vcombine.low %v3034_v52, %v3050_v55  ;;  %v2251_v40 = vcombine.low %v3057_v57, %v3067_v60  ;;  %v2609_v52 = vld [vmem:[%s3832_s9 + $0x1e0] ss:$8 sps:$4 sm:$0xff]   ;;  %v1927_v55 = vmax.bf16 %v3377_v51, %v3149_v35  ;;  %v2619_v57 = vld [vmem:[%s3832_s9 + $0x1f4] ss:$8 sps:$4 sm:$0xff]  }
  0x4e   :  { %v1925_v43 = vmax.bf16 %v3359_v20, %v3107_v15  ;;  %v1926_v36 = vmax.bf16 %v3362_v28, %v3112_v18  ;;  %v3410_v60 = vld [vmem:[%s3839_s6 + $0x14] sm:$0xf] }
  0x50   :  { %1515 = vmatpush1.bf16.msra.mxu0 %v2602_v53  ;;  %v3405_v53 = vld [vmem:[%s3839_s6 + $0x10] sm:$0xf] }
  0x51   :  { %1516 = vmatprep.subr.bf16.mxu0 %v2611_v9  ;;  %v2629_v9 = vld [vmem:[%s3832_s9 + $0x204] ss:$8 sps:$4 sm:$0xff]  }
  0x52   :  { %2136 = vmatmul.mubr.msk.bf16.gmra.mrb[12].mxu1 %vm141_vm0, %v2123_v1  ;;  %v2124_v1 = vcombine.low %v3080_v0, %v3087_v5  ;;  %v3434_v0 = vld [vmem:[%s3839_s6 + $0x1c] sm:$0xf]  ;;  %v2146_v5 = vcombine.low %v2813_v22, %v2822_v25  ;;  %v2614_v22 = vld [vmem:[%s3832_s9 + $0xd0] ss:$8 sps:$4 sm:$0xff]   ;;  %v3456_v25 = vld [vmem:[%s3839_s6 + $0x20] sm:$0xf] }
  0x53   :  { %2264 = vmatmul.mubr.msk.bf16.gmra.mrb[4].mxu0 %vm141_vm0, %v2251_v40  ;;  %392 = vmatprep.mubr.bf16.mxu1 %v3864_v38  ;;  %v2252_v40 = vcombine.low %v3405_v53, %v3410_v60 }
  0x54   :  { %1362 = vmatprep.mubr.bf16.mxu0 %v3864_v38  ;;  %1517 = vmatpush1.bf16.msra.mxu0 %v2609_v52  ;;  %v3429_v52 = vld [vmem:[%s3839_s6 + $0x18] sm:$0xf] }
  0x55   :  { %1518 = vmatprep.subr.bf16.mxu0 %v2619_v57  ;;  %v2605_v57 = vld [vmem:[%s3832_s9 + $0xc0] ss:$8 sps:$4 sm:$0xff]  }
  0x58   :  { %1519 = vmatpush1.bf16.msra.mxu0 %v2617_v17  ;;  %v2253_v17 = vcombine.low %v3429_v52, %v3434_v0 }
  0x59   :  { %1714 = vmatprep.subr.bf16.mxu0 %v2629_v9  ;;  %v2616_v9 = vld [vmem:[%s3832_s9 + $0xd4] ss:$8 sps:$4 sm:$0xff]  }
  0x5a   :  { %2137 = vmatmul.mubr.msk.bf16.gmra.mrb[16].mxu1 %vm141_vm0, %v2124_v1  ;;  %v3461_v1 = vld [vmem:[%s3839_s6 + $0x24] sm:$0xf] }
  0x5b   :  { %2265 = vmatmul.mubr.msk.bf16.gmra.mrb[8].mxu0 %vm141_vm0, %v2252_v40  ;;  %534 = vmatprep.mubr.bf16.mxu1 %v3864_v38  ;;  %v2624_v40 = vld [vmem:[%s3832_s9 + $0xe4] ss:$8 sps:$4 sm:$0xff]  }
  0x5c   :  { %1372 = vmatprep.mubr.bf16.mxu0 %v3864_v38 }
  0x62   :  { %2159 = vmatmul.mubr.msk.bf16.vlgmr.msra.gmra.mrb[0].mxu1 %vm141_vm0, %v2146_v5  ;;  %v2147_v5 = vcombine.low %v3101_v13, %v3118_v21  ;;  %v3483_v13 = vld [vmem:[%s3840_s7] sm:$0xf]  ;;  %v3488_v21 = vld [vmem:[%s3840_s7 + $0x4] sm:$0xf] }
  0x63   :  { %2266 = vmatmul.mubr.msk.bf16.gmra.mrb[12].mxu0 %vm141_vm0, %v2253_v17  ;;  %705 = vmatpush1.bf16.msra.mxu1 %v2605_v57  ;;  %v2254_v57 = vcombine.low %v3456_v25, %v3461_v1  ;;  %v2622_v17 = vld [vmem:[%s3832_s9 + $0xe0] ss:$8 sps:$4 sm:$0xff]  }
  0x64   :  { %544 = vmatprep.mubr.bf16.mxu1 %v3864_v38  ;;  %1382 = vmatprep.mubr.bf16.mxu0 %v3864_v38 }
  0x65   :  { %706 = vmatprep.subr.bf16.mxu1 %v2616_v9  ;;  %v2630_v9 = vld [vmem:[%s3832_s9 + $0xf0] ss:$8 sps:$4 sm:$0xff]  }
  0x67   :  { %707 = vmatpush1.bf16.msra.mxu1 %v2614_v22  ;;  %v2148_v22 = vcombine.low %v3131_v30, %v3136_v33  ;;  %v2635_v30 = vld [vmem:[%s3832_s9 + $0x210] ss:$8 sps:$4 sm:$0xff]   ;;  %v2641_v33 = vld [vmem:[%s3832_s9 + $0x224] ss:$8 sps:$4 sm:$0xff]  }
  0x68   :  { %708 = vmatprep.subr.bf16.mxu1 %v2624_v40  ;;  %v2276_v40 = vcombine.low %v3483_v13, %v3488_v21 }
  0x6a   :  { %2160 = vmatmul.mubr.msk.bf16.gmra.mrb[4].mxu1 %vm141_vm0, %v2147_v5  ;;  %v2627_v5 = vld [vmem:[%s3832_s9 + $0x200] ss:$8 sps:$4 sm:$0xff]  }
  0x6b   :  { %2267 = vmatmul.mubr.msk.bf16.gmra.mrb[16].mxu0 %vm141_vm0, %v2254_v57  ;;  %554 = vmatprep.mubr.bf16.mxu1 %v3864_v38  ;;  %v2637_v57 = vld [vmem:[%s3832_s9 + $0x214] ss:$8 sps:$4 sm:$0xff]  }
  0x6c   :  { %1544 = vmatprep.mubr.bf16.mxu0 %v3864_v38  ;;  %709 = vmatpush1.bf16.msra.mxu1 %v2622_v17  ;;  %v2639_v17 = vld [vmem:[%s3832_s9 + $0x220] ss:$8 sps:$4 sm:$0xff]  }
  0x6d   :  { %710 = vmatprep.subr.bf16.mxu1 %v2632_v7  ;;  %v2277_v7 = vcombine.low %v3174_v47, %v3179_v49  ;;  %v2644_v47 = vld [vmem:[%s3832_s9 + $0x230] ss:$8 sps:$4 sm:$0xff]   ;;  %v2150_v49 = vcombine.low %v3198_v62, %v3203_v63  ;;  %v3557_v62 = vld [vmem:[%s3840_s7 + $0x1c] sm:$0xf]  ;;  %v2172_v63 = vcombine.low %v2835_v31, %v2840_v32  ;;  %v3576_v31 = vld [vmem:[%s3840_s7 + $0x24] sm:$0xf]  ;;  %v2173_v32 = vcombine.low %v3235_v11, %v3240_v24 }
  0x6e   :  { %v1616_v11 = vld [vmem:[%s3841_s8 + $0x4] sm:$0xf]  ;;  %v2175_v24 = vcombine.low %v3279_v42, %v3292_v48  ;;  %v2176_v48 = vcombine.low %v3326_v46, %v3331_v27  ;;  %v3638_v42 = vld [vmem:[%s3841_s8 + $0x1c] sm:$0xf]  ;;  %v3651_v46 = vld [vmem:[%s3841_s8 + $0x20] sm:$0xf] }
  0x70   :  { %711 = vmatpush1.bf16.msra.mxu1 %v2630_v9  ;;  %v2646_v9 = vld [vmem:[%s3832_s9 + $0x234] ss:$8 sps:$4 sm:$0xff]  }
  0x71   :  { %2335 = vmatprep.subr.bf16.mxu1 %v2728_v2  ;;  %v2149_v2 = vcombine.low %v3157_v37, %v3162_v44  ;;  %v3531_v37 = vld [vmem:[%s3840_s7 + $0x10] sm:$0xf]  ;;  %v3536_v44 = vld [vmem:[%s3840_s7 + $0x14] sm:$0xf] }
  0x72   :  { %2161 = vmatmul.mubr.msk.bf16.gmra.mrb[8].mxu1 %vm141_vm0, %v2148_v22  ;;  %v2278_v22 = vcombine.low %v3531_v37, %v3536_v44 }
  0x73   :  { %2289 = vmatmul.mubr.msk.bf16.vlgmr.msra.gmra.mrb[0].mxu0 %vm141_vm0, %v2276_v40  ;;  %564 = vmatprep.mubr.bf16.mxu1 %v3864_v38  ;;  %v3552_v40 = vld [vmem:[%s3840_s7 + $0x18] sm:$0xf] }
  0x74   :  { %1554 = vmatprep.mubr.bf16.mxu0 %v3864_v38  ;;  %1715 = vmatpush1.bf16.msra.mxu0 %v2627_v5  ;;  %v2279_v5 = vcombine.low %v3552_v40, %v3557_v62 }
  0x75   :  { %1716 = vmatprep.subr.bf16.mxu0 %v2637_v57  ;;  %v3571_v57 = vld [vmem:[%s3840_s7 + $0x20] sm:$0xf] }
  0x78   :  { %1717 = vmatpush1.bf16.msra.mxu0 %v2635_v30  ;;  %v2202_v30 = vcombine.low %v3367_v54, %v3372_v58 }
  0x79   :  { %1718 = vmatprep.subr.bf16.mxu0 %v2641_v33  ;;  %v3865_v33 = vmax.bf16 %v2864_v41, %v2857_v39 }
  0x7a   :  { %2162 = vmatmul.mubr.msk.bf16.gmra.mrb[12].mxu1 %vm141_vm0, %v2149_v2 }
  0x7b   :  { %2290 = vmatmul.mubr.msk.bf16.gmra.mrb[4].mxu0 %vm141_vm0, %v2277_v7  ;;  %574 = vmatprep.mubr.bf16.mxu1 %v3864_v38  ;;  %v1929_v2 = vmax.bf16 %v3865_v33, %v3223_v23  ;;  %v3868_v7 = vld [vmem:[#allocation2_spill] sm:$0xff]  ;;  %v1819_v23 = vlaneseq }
  0x7c   :  { %1564 = vmatprep.mubr.bf16.mxu0 %v3864_v38  ;;  %1719 = vmatpush1.bf16.msra.mxu0 %v2639_v17 }
  0x7d   :  { %1720 = vmatprep.subr.bf16.mxu0 %v2646_v9 }
  0x80   :  { %1721 = vmatpush1.bf16.msra.mxu0 %v2644_v47  ;;  %v1939_v47 = vmax.bf16 %v1929_v2, %v3483_v13 }
  0x82   :  { %2163 = vmatmul.mubr.msk.bf16.gmra.mrb[16].mxu1 %vm141_vm0, %v2150_v49 }
  0x83   :  { %2291 = vmatmul.mubr.msk.bf16.gmra.mrb[8].mxu0 %vm141_vm0, %v2278_v22  ;;  %736 = vmatprep.mubr.bf16.mxu1 %v3864_v38 }
  0x84   :  { %1574 = vmatprep.mubr.bf16.mxu0 %v3864_v38 }
  0x8a   :  { %2185 = vmatmul.mubr.msk.bf16.vlgmr.msra.gmra.mrb[0].mxu1 %vm141_vm0, %v2172_v63 }
  0x8b   :  { %2292 = vmatmul.mubr.msk.bf16.gmra.mrb[12].mxu0 %vm141_vm0, %v2279_v5  ;;  %2339 = vmatpush1.bf16.msra.mxu1 %v2736_v4  ;;  %v2280_v4 = vcombine.low %v3571_v57, %v3576_v31 }
  0x8c   :  { %746 = vmatprep.mubr.bf16.mxu1 %v3864_v38  ;;  %1584 = vmatprep.mubr.bf16.mxu0 %v3864_v38 }
  0x8d   :  { %2336 = vmatprep.subr.bf16.mxu1 %v2746_v6  ;;  %v1615_v6 = vld [vmem:[%s3841_s8] sm:$0xf] }
  0x8f   :  { %2340 = vmatpush1.bf16.msra.mxu1 %v2754_v8  ;;  %v2174_v8 = vcombine.low %v3254_v56, %v3261_v3  ;;  %v3633_v3 = vld [vmem:[%s3841_s8 + $0x18] sm:$0xf] }
  0x90   :  { %2337 = vmatprep.subr.bf16.mxu1 %v2763_v10  ;;  %v2302_v10 = vcombine.low %v1615_v6, %v1616_v11 }
  0x92   :  { %2186 = vmatmul.mubr.msk.bf16.gmra.mrb[4].mxu1 %vm141_vm0, %v2173_v32  ;;  %v1820_v32 = vshrl.u32 %v1819_v23, 7 }
  0x93   :  { %2293 = vmatmul.mubr.msk.bf16.gmra.mrb[16].mxu0 %vm141_vm0, %v2280_v4  ;;  %756 = vmatprep.mubr.bf16.mxu1 %v3864_v38 }
  0x94   :  { %1746 = vmatprep.mubr.bf16.mxu0 %v3864_v38  ;;  %2341 = vmatpush1.bf16.msra.mxu1 %v2771_v12  ;;  %v2303_v12 = vcombine.low %v3299_v26, %v3315_v45  ;;  %v2200_v26 = vcombine.low %v3272_v29, %v3284_v34  ;;  %v2305_v45 = vcombine.low %v3633_v3, %v3638_v42  ;;  %v3656_v29 = vld [vmem:[%s3841_s8 + $0x24] sm:$0xf]  ;;  %v1821_v13 = vsub.s32 0, %v1820_v32 }
  0x95   :  { %2338 = vmatprep.subr.bf16.mxu1 %v2781_v14  ;;  %v3615_v14 = vld [vmem:[%s3841_s8 + $0x10] sm:$0xf]  ;;  %v2201_v34 = vcombine.low %v3348_v59, %v3353_v61  ;;  %v2306_v27 = vcombine.low %v3651_v46, %v3656_v29  ;;  %v3866_v61 = vld [vmem:[#allocation6_spill] sm:$0xff]  ;;  %v3867_v59 = vld [vmem:[#allocation3_spill] sm:$0xff] }
  0x96   :  { %v3869_v17 = vmax.bf16 %v3867_v59, %v3868_v7  ;;  %v3871_v59 = vld [vmem:[#allocation9_spill] sm:$0xff] }
  0x98   :  { %2342 = vmatpush1.bf16.msra.mxu1 %v2789_v16  ;;  %v3620_v16 = vld [vmem:[%s3841_s8 + $0x14] sm:$0xf]  ;;  %v1930_v9 = vmax.bf16 %v3869_v17, %v3866_v61  ;;  %v3870_v61 = vld [vmem:[#allocation10_spill] sm:$0xff] }
  0x99   :  { %v2304_v56 = vcombine.low %v3615_v14, %v3620_v16  ;;  %v2321_v7 = vcombine.low %v3871_v59, %v3870_v61 }
  0x9a   :  { %2187 = vmatmul.mubr.msk.bf16.gmra.mrb[8].mxu1 %vm141_vm0, %v2174_v8  ;;  %v1940_v49 = vmax.bf16 %v1930_v9, %v3488_v21  ;;  %v1817_v21 = vld [vmem:[%s3842_s10] sm:$0x3]  ;;  %s2659_s10 = smov 64  }
  0x9b   :  { %2315 = vmatmul.mubr.msk.bf16.vlgmr.msra.gmra.mrb[0].mxu0 %vm141_vm0, %v2302_v10  ;;  %766 = vmatprep.mubr.bf16.mxu1 %v3864_v38 }
  0x9c   :  { %1756 = vmatprep.mubr.bf16.mxu0 %v3864_v38  ;;  %v3680_v22 = vmax.bf16 %v1940_v49, %v1616_v11  ;;  %v3687_v11 = vrot.slane %v1817_v21, %v1821_v13 }
  0xa2   :  { %2188 = vmatmul.mubr.msk.bf16.gmra.mrb[12].mxu1 %vm141_vm0, %v2175_v24 }
  0xa3   :  { %2316 = vmatmul.mubr.msk.bf16.gmra.mrb[4].mxu0 %vm141_vm0, %v2303_v12  ;;  %776 = vmatprep.mubr.bf16.mxu1 %v3864_v38 }
  0xa4   :  { %1766 = vmatprep.mubr.bf16.mxu0 %v3864_v38 }
  0xaa   :  { %2189 = vmatmul.mubr.msk.bf16.gmra.mrb[16].mxu1 %vm141_vm0, %v2176_v48 }
  0xab   :  { %2317 = vmatmul.mubr.msk.bf16.gmra.mrb[8].mxu0 %vm141_vm0, %v2304_v56  ;;  %958 = vmatprep.mubr.bf16.mxu1 %v3864_v38 }
  0xac   :  { %1776 = vmatprep.mubr.bf16.mxu0 %v3864_v38 }
  0xb2   :  { %2213 = vmatmul.mubr.msk.bf16.vlgmr.msra.gmra.mrb[8].mxu1 %vm141_vm0, %v2200_v26 }
  0xb3   :  { %2318 = vmatmul.mubr.msk.bf16.gmra.mrb[12].mxu0 %vm141_vm0, %v2305_v45  ;;  %968 = vmatprep.mubr.bf16.mxu1 %v3864_v38 }
  0xb4   :  { %1786 = vmatprep.mubr.bf16.mxu0 %v3864_v38 }
  0xba   :  { %2214 = vmatmul.mubr.msk.bf16.gmra.mrb[12].mxu1 %vm141_vm0, %v2201_v34 }
  0xbb   :  { %2319 = vmatmul.mubr.msk.bf16.gmra.mrb[16].mxu0 %vm141_vm0, %v2306_v27  ;;  %978 = vmatprep.mubr.bf16.mxu1 %v3864_v38  ;;  %v3678_v38 = vmax.bf16 %v1939_v47, %v1615_v6  ;;  %v1825_v6 = vsub.s32 1, %v1820_v32 }
  0xbd   :  { %v2320_v54 = vcombine.low %v3678_v38, %v3680_v22  ;;  %v3689_v12 = vrot.slane %v1817_v21, %v1825_v6 }
  0xc2   :  { %2215 = vmatmul.mubr.msk.bf16.gmra.mrb[16].mxu1 %vm141_vm0, %v2202_v30 }
 0x15d   :  { %v738_v58 = vpop.f32.mrb[0].mxu1 }
 0x15e   :  { %v740_v63 = vpop.f32.mrb[1].mxu1 }
 0x15f   :  { %v742_v39 = vpop.f32.mrb[2].mxu1 }
 0x160   :  { %v744_v41 = vpop.f32.mrb[3].mxu1 }
 0x165   :  { %v748_v5 = vpop.f32.mrb[4].mxu1 }
 0x166   :  { %v750_v4 = vpop.f32.mrb[5].mxu1 }
 0x167   :  { %v752_v8 = vpop.f32.mrb[6].mxu1 }
 0x168   :  { %v754_v10 = vpop.f32.mrb[7].mxu1 }
 0x16e   :  { %v1748_v24 = vpop.f32.mrb[0].mxu0 }
 0x16f   :  { %v2343_v48 = vadd.f32 %v1748_v24, %v738_v58  ;;  %v1750_v56 = vpop.f32.mrb[1].mxu0 }
 0x170   :  { %v2344_v26 = vadd.f32 %v1750_v56, %v740_v63  ;;  %v1752_v45 = vpop.f32.mrb[2].mxu0 }
 0x171   :  { %v1829_v34 = vadd.f32 %v2343_v48, %v3687_v11  ;;  %v2345_v27 = vadd.f32 %v1752_v45, %v742_v39  ;;  %v1754_v30 = vpop.f32.mrb[3].mxu0 }
 0x172   :  { %v1830_v33 = vadd.f32 %v2344_v26, %v3689_v12  ;;  %v2346_v2 = vadd.f32 %v1754_v30, %v744_v41 }
 0x173   :  { %v1831_v17 = vadd.f32 %v2345_v27, %v3687_v11  ;;  %v1849_v47 = vmax.f32 %v1829_v34, 0.0  ;;  %v3872_v27 = vld [vmem:[#allocation7_spill] sm:$0xff] }
 0x174   :  { %v1832_v9 = vadd.f32 %v2346_v2, %v3689_v12  ;;  %v1850_v58 = vmax.f32 %v1830_v33, 0.0  ;;  %v3876_v2 = vld [vmem:[#allocation5_spill] sm:$0xff] }
 0x175   :  { %v1851_v49 = vmax.f32 %v1831_v17, 0.0 }
 0x176   :  { %v1852_v23 = vmax.f32 %v1832_v9, 0.0  ;;  %v1758_v63 = vpop.f32.mrb[4].mxu0 }
 0x177   :  { %v2347_v32 = vadd.f32 %v1758_v63, %v748_v5  ;;  %v1760_v13 = vpop.f32.mrb[5].mxu0  ;;  %v1869_v21 = vpack.c.bf16 %v1851_v49, %v1849_v47  ;;  %v3873_v5 = vld [vmem:[#allocation4_spill] sm:$0xff] }
 0x178   :  { %v2348_v39 = vadd.f32 %v1760_v13, %v750_v4  ;;  %v1762_v6 = vpop.f32.mrb[6].mxu0  ;;  %v1870_v24 = vpack.c.bf16 %v1852_v23, %v1850_v58  ;;  %v3874_v30 = vmax.bf16 %v3872_v27, %v3873_v5  ;;  %v3875_v4 = vld [vmem:[#allocation8_spill] sm:$0xff] }
 0x179   :  { %v1833_v41 = vadd.f32 %v2347_v32, %v3687_v11  ;;  %v2349_v48 = vadd.f32 %v1762_v6, %v752_v8  ;;  %v1764_v56 = vpop.f32.mrb[7].mxu0  ;;  %1994 = vrot.lane.b32.xlu0 %v1869_v21, %s2659_s10  ;;  %v3877_v17 = vmax.bf16 %v3875_v4, %v3876_v2 }
 0x17a   :  { %v1834_v26 = vadd.f32 %v2348_v39, %v3689_v12  ;;  %v2350_v45 = vadd.f32 %v1764_v56, %v754_v10  ;;  %v1933_v33 = vmax.bf16 %v3874_v30, %v3405_v53 }
 0x17b   :  { %v1835_v34 = vadd.f32 %v2349_v48, %v3687_v11  ;;  %v1934_v9 = vmax.bf16 %v3877_v17, %v3410_v60  ;;  %v1853_v47 = vmax.f32 %v1833_v41, 0.0 }
 0x17c   :  { %v1836_v8 = vadd.f32 %v2350_v45, %v3689_v12  ;;  %v1943_v10 = vmax.bf16 %v1933_v33, %v3531_v37  ;;  %v1854_v23 = vmax.f32 %v1834_v26, 0.0 }
 0x17d   :  { %v1855_v49 = vmax.f32 %v1835_v34, 0.0  ;;  %1996 = vrot.lane.b32.xlu0 %v1870_v24, %s2659_s10  ;;  %v1944_v58 = vmax.bf16 %v1934_v9, %v3536_v44  ;;  %v1935_v44 = vmax.bf16 %v1925_v43, %v3429_v52 }
 0x17e   :  { %v1856_v63 = vmax.f32 %v1836_v8, 0.0  ;;  %v1768_v32 = vpop.f32.mrb[8].mxu0  ;;  %v3714_v21 = vmax.bf16 %v1943_v10, %v3615_v14  ;;  %v1936_v14 = vmax.bf16 %v1926_v36, %v3434_v0 }
 0x17f   :  { %v1770_v13 = vpop.f32.mrb[9].mxu0  ;;  %v1871_v53 = vpack.c.bf16 %v1855_v49, %v1853_v47  ;;  %v3717_v60 = vmax.bf16 %v1944_v58, %v3620_v16  ;;  %v1945_v26 = vmax.bf16 %v1935_v44, %v3552_v40 }
 0x180   :  { %v1772_v39 = vpop.f32.mrb[10].mxu0  ;;  %v1872_v6 = vpack.c.bf16 %v1856_v63, %v1854_v23  ;;  %v1946_v45 = vmax.bf16 %v1936_v14, %v3557_v62 }
 0x181   :  { %v1774_v41 = vpop.f32.mrb[11].mxu0  ;;  %1998 = vrot.lane.b32.xlu1 %v1871_v53, %s2659_s10  ;;  %v2322_v37 = vcombine.low %v3714_v21, %v3717_v60  ;;  %v3735_v18 = vmax.bf16 %v1945_v26, %v3633_v3  ;;  %v1937_v3 = vmax.bf16 %v1927_v55, %v3456_v25 }
 0x182   :  { %v3738_v36 = vmax.bf16 %v1946_v45, %v3638_v42  ;;  %v3878_v42 = vmax.bf16 %v3380_v19, %v3186_v50 }
 0x183   :  { %v1947_v63 = vmax.bf16 %v1937_v3, %v3571_v57 }
 0x184   :  { %v2323_v30 = vcombine.low %v3735_v18, %v3738_v36  ;;  %v1938_v17 = vmax.bf16 %v3878_v42, %v3461_v1 }
 0x185   :  { %2000 = vrot.lane.b32.xlu1 %v1872_v6, %s2659_s10  ;;  %v960_v16 = vpop.f32.mrb[8].mxu1  ;;  %v3758_v1 = vmax.bf16 %v1947_v63, %v3651_v46 }
 0x186   :  { %v2351_v24 = vadd.f32 %v1768_v32, %v960_v16  ;;  %v1778_v48 = vpop.f32.mrb[12].mxu0  ;;  %v962_v56 = vpop.f32.mrb[9].mxu1  ;;  %v1948_v32 = vmax.bf16 %v1938_v17, %v3576_v31 }
 0x187   :  { %v2352_v34 = vadd.f32 %v1770_v13, %v962_v56  ;;  %v1780_v27 = vpop.f32.mrb[13].mxu0  ;;  %v964_v5 = vpop.f32.mrb[10].mxu1 }
 0x188   :  { %v1837_v43 = vadd.f32 %v2351_v24, %v3687_v11  ;;  %v2353_v15 = vadd.f32 %v1772_v39, %v964_v5  ;;  %v1782_v20 = vpop.f32.mrb[14].mxu0  ;;  %v966_v52 = vpop.f32.mrb[11].mxu1  ;;  %v3761_v39 = vmax.bf16 %v1948_v32, %v3656_v29 }
 0x189   :  { %v1838_v28 = vadd.f32 %v2352_v34, %v3689_v12  ;;  %v2354_v0 = vadd.f32 %v1774_v41, %v966_v52  ;;  %v1784_v40 = vpop.f32.mrb[15].mxu0 }
 0x18a   :  { %v1839_v62 = vadd.f32 %v2353_v15, %v3687_v11  ;;  %v1857_v4 = vmax.f32 %v1837_v43, 0.0  ;;  %v2324_v44 = vcombine.low %v3758_v1, %v3761_v39 }
 0x18b   :  { %v1840_v33 = vadd.f32 %v2354_v0, %v3689_v12  ;;  %v1858_v9 = vmax.f32 %v1838_v28, 0.0 }
 0x18c   :  { %v1859_v2 = vmax.f32 %v1839_v62, 0.0 }
 0x18d   :  { %v1860_v8 = vmax.f32 %v1840_v33, 0.0  ;;  %v970_v47 = vpop.f32.mrb[12].mxu1 }
 0x18e   :  { %v2355_v49 = vadd.f32 %v1778_v48, %v970_v47  ;;  %v1788_v10 = vpop.f32.mrb[16].mxu0  ;;  %v972_v58 = vpop.f32.mrb[13].mxu1  ;;  %v1873_v23 = vpack.c.bf16 %v1859_v2, %v1857_v4 }
 0x18f   :  { %v2356_v13 = vadd.f32 %v1780_v27, %v972_v58  ;;  %v1790_v53 = vpop.f32.mrb[17].mxu0  ;;  %v974_v51 = vpop.f32.mrb[14].mxu1  ;;  %v1874_v35 = vpack.c.bf16 %v1860_v8, %v1858_v9 }
 0x190   :  { %v1841_v55 = vadd.f32 %v2355_v49, %v3687_v11  ;;  %v2357_v25 = vadd.f32 %v1782_v20, %v974_v51  ;;  %v1792_v50 = vpop.f32.mrb[18].mxu0  ;;  %2002 = vrot.lane.b32.xlu0 %v1873_v23, %s2659_s10  ;;  %v976_v19 = vpop.f32.mrb[15].mxu1 }
 0x191   :  { %v1842_v57 = vadd.f32 %v2356_v13, %v3689_v12  ;;  %v1794_v31 = vpop.f32.mrb[19].mxu0  ;;  %v2358_v6 = vadd.f32 %v1784_v40, %v976_v19  ;;  %2004 = vrot.lane.b32.xlu1 %v1874_v35, %s2659_s10 }
 0x192   :  { %v1843_v41 = vadd.f32 %v2357_v25, %v3687_v11  ;;  %v1861_v16 = vmax.f32 %v1841_v55, 0.0 }
 0x193   :  { %v1844_v14 = vadd.f32 %v2358_v6, %v3689_v12  ;;  %v1862_v46 = vmax.f32 %v1842_v57, 0.0 }
 0x194   :  { %v1863_v24 = vmax.f32 %v1843_v41, 0.0 }
 0x195   :  { %v1864_v48 = vmax.f32 %v1844_v14, 0.0  ;;  %v980_v56 = vpop.f32.mrb[16].mxu1 }
 0x196   :  { %v2359_v29 = vadd.f32 %v1788_v10, %v980_v56  ;;  %v982_v26 = vpop.f32.mrb[17].mxu1  ;;  %v1875_v45 = vpack.c.bf16 %v1863_v24, %v1861_v16 }
 0x197   :  { %v2360_v34 = vadd.f32 %v1790_v53, %v982_v26  ;;  %v984_v27 = vpop.f32.mrb[18].mxu1  ;;  %v1876_v5 = vpack.c.bf16 %v1864_v48, %v1862_v46 }
 0x198   :  { %v1845_v43 = vadd.f32 %v2359_v29, %v3687_v11  ;;  %v2361_v15 = vadd.f32 %v1792_v50, %v984_v27  ;;  %2006 = vrot.lane.b32.xlu0 %v1875_v45, %s2659_s10  ;;  %v986_v20 = vpop.f32.mrb[19].mxu1 }
 0x199   :  { %v1846_v52 = vadd.f32 %v2360_v34, %v3689_v12  ;;  %v2362_v28 = vadd.f32 %v1794_v31, %v986_v20  ;;  %2008 = vrot.lane.b32.xlu1 %v1876_v5, %s2659_s10 }
 0x19a   :  { %v1847_v0 = vadd.f32 %v2361_v15, %v3687_v11  ;;  %v1865_v62 = vmax.f32 %v1845_v43, 0.0 }
 0x19b   :  { %v1848_v40 = vadd.f32 %v2362_v28, %v3689_v12  ;;  %v1866_v4 = vmax.f32 %v1846_v52, 0.0 }
 0x19c   :  { %v1867_v33 = vmax.f32 %v1847_v0, 0.0 }
 0x19d   :  { %v1868_v2 = vmax.f32 %v1848_v40, 0.0 }
 0x19e   :  { %v1877_v3 = vpack.c.bf16 %v1867_v33, %v1865_v62 }
 0x19f   :  { %v1878_v42 = vpack.c.bf16 %v1868_v2, %v1866_v4 }
 0x1a0   :  { %2010 = vrot.lane.b32.xlu0 %v1877_v3, %s2659_s10 }
 0x1a1   :  { %2012 = vrot.lane.b32.xlu1 %v1878_v42, %s2659_s10 }
 0x1eb   :  { %v1995_v17 = vpop.permute.xlu0 %1994 }
 0x1ec   :  { %v2022_v8 = vsel %vm141_vm0, %v2320_v54, %v1995_v17 }
 0x1ef   :  { %v1997_v9 = vpop.permute.xlu0 %1996 }
 0x1f0   :  { %v2015_v11 = vsel %vm141_vm0, %v1995_v17, %v1997_v9 }
 0x1f1   :  { %v2325_v12 = vcombine.low %v2022_v8, %v2015_v11  ;;  %v2326_v47 = vcombine.high %v2022_v8, %v2015_v11 }
 0x1f3   :  { %2080 = vst [vmem:[%s3843_s11] sm:$0xff] %v2325_v12  ;;  %2081 = vst [vmem:[%s3843_s11 + $0x8] sm:$0xff] %v2326_v47  ;;  %v1999_v49 = vpop.permute.xlu1 %1998 }
 0x1f4   :  { %v2025_v38 = vsel %vm141_vm0, %v2321_v7, %v1999_v49 }
 0x1f7   :  { %v2001_v10 = vpop.permute.xlu1 %2000 }
 0x1f8   :  { %v2016_v22 = vsel %vm141_vm0, %v1999_v49, %v2001_v10 }
 0x1f9   :  { %v2327_v54 = vcombine.low %v2025_v38, %v2016_v22  ;;  %v2328_v58 = vcombine.high %v2025_v38, %v2016_v22 }
 0x1fb   :  { %2082 = vst [vmem:[%s3843_s11 + $0x10] sm:$0xff] %v2327_v54  ;;  %2083 = vst [vmem:[%s3843_s11 + $0x18] sm:$0xff] %v2328_v58 }
 0x202   :  { %v2003_v23 = vpop.permute.xlu0 %2002 }
 0x203   :  { %v2028_v61 = vsel %vm141_vm0, %v2322_v37, %v2003_v23  ;;  %v2005_v59 = vpop.permute.xlu1 %2004 }
 0x204   :  { %v2017_v7 = vsel %vm141_vm0, %v2003_v23, %v2005_v59 }
 0x205   :  { %v2329_v63 = vcombine.low %v2028_v61, %v2017_v7  ;;  %v2330_v32 = vcombine.high %v2028_v61, %v2017_v7 }
 0x207   :  { %2084 = vst [vmem:[%s3843_s11 + $0x20] sm:$0xff] %v2329_v63  ;;  %2085 = vst [vmem:[%s3843_s11 + $0x28] sm:$0xff] %v2330_v32 }
 0x20a   :  { %v2007_v13 = vpop.permute.xlu0 %2006 }
 0x20b   :  { %v2031_v21 = vsel %vm141_vm0, %v2323_v30, %v2007_v13  ;;  %v2009_v60 = vpop.permute.xlu1 %2008 }
 0x20c   :  { %v2018_v37 = vsel %vm141_vm0, %v2007_v13, %v2009_v60 }
 0x20d   :  { %v2331_v53 = vcombine.low %v2031_v21, %v2018_v37  ;;  %v2332_v51 = vcombine.high %v2031_v21, %v2018_v37 }
 0x20f   :  { %2086 = vst [vmem:[%s3843_s11 + $0x30] sm:$0xff] %v2331_v53  ;;  %2087 = vst [vmem:[%s3843_s11 + $0x38] sm:$0xff] %v2332_v51 }
 0x212   :  { %v2011_v35 = vpop.permute.xlu0 %2010 }
 0x213   :  { %v2034_v18 = vsel %vm141_vm0, %v2324_v44, %v2011_v35  ;;  %v2013_v36 = vpop.permute.xlu1 %2012 }
 0x214   :  { %v2019_v30 = vsel %vm141_vm0, %v2011_v35, %v2013_v36 }
 0x215   :  { %v2333_v55 = vcombine.low %v2034_v18, %v2019_v30  ;;  %v2334_v25 = vcombine.high %v2034_v18, %v2019_v30 }
 0x217   :  { %2088 = vst [vmem:[%s3843_s11 + $0x40] sm:$0xff] %v2333_v55  ;;  %2089 = vst [vmem:[%s3843_s11 + $0x48] sm:$0xff] %v2334_v25 }

// kernel: stem_forward.14
= control target key start
LH: loop header
LB: loop body
LE: loop exit
PB: predicated region body
PF: predicated region fallthrough
CT: control target
= control target key end

     0   :  { %v1784_v0 = vmov 0.0   ;;  %vm1785_vm0 = vmmov 0   ;;  %vm119_vm1 = vcmask 523264   ;;  %s2213_s7 = inlined_call_operand.vmem [shape: bf16[7,64,128], index: 7, kind: input, shape index: {}]   ;;  %s2214_s1 = inlined_call_operand.vmem [shape: bf16[80,64], index: 1, kind: input, shape index: {}]   ;;  %s2215_s0 = inlined_call_operand.vmem [shape: bf16[80,64], index: 0, kind: input, shape index: {}]   ;;  %s2216_s2 = inlined_call_operand.vmem [shape: bf16[80,64], index: 2, kind: input, shape index: {}]   ;;  %s2217_s3 = inlined_call_operand.vmem [shape: bf16[80,64], index: 3, kind: input, shape index: {}]   ;;  %s2218_s4 = inlined_call_operand.vmem [shape: bf16[80,64], index: 4, kind: input, shape index: {}]   ;;  %s2219_s5 = inlined_call_operand.vmem [shape: bf16[80,64], index: 5, kind: input, shape index: {}]   ;;  %s2220_s6 = inlined_call_operand.vmem [shape: bf16[80,64], index: 6, kind: input, shape index: {}]   ;;  %s2221_s8 = inlined_call_operand.vmem [shape: f32[1,128], index: 8, kind: input, shape index: {}]   ;;  %s2222_s9 = inlined_call_operand.vmem [shape: bf16[80,128], index: 9, kind: output, shape index: {}]  }
   0x1   :  { %1711 = vmatprep.subr.bf16.mxu1 %v1784_v0  ;;  %v1721_v1 = vld [vmem:[%s2213_s7 + $0x20] sm:$0xff]   ;;  %1515 = vmatprep.subr.bf16.mxu0 %v1784_v0  ;;  %v1722_v2 = vld [vmem:[%s2213_s7 + $0x28] sm:$0xff]   ;;  %v1723_v3 = vld [vmem:[%s2213_s7 + $0x30] sm:$0xff]  }
   0x2   :  { %1531 = vmatprep.mubr.msk.bf16.mxu1 %vm1785_vm0, %v1784_v0  ;;  %1523 = vmatprep.mubr.msk.bf16.mxu0 %vm1785_vm0, %v1784_v0  ;;  %v1724_v4 = vld [vmem:[%s2213_s7 + $0x38] sm:$0xff]   ;;  %v1725_v5 = vld [vmem:[%s2214_s1 + $0x10] sm:$0xff]   ;;  %v1728_v6 = vld [vmem:[%s2214_s1] sm:$0xff]  }
   0x3   :  { %1715 = vmatpush3.bf16.msra.mxu1 %v1721_v1  ;;  %1516 = vmatpush3.bf16.msra.mxu0 %v1721_v1  ;;  %v1726_v7 = vld [vmem:[%s2213_s7] sm:$0xff]   ;;  %v1727_v9 = vld [vmem:[%s2213_s7 + $0x8] sm:$0xff]   ;;  %v1729_v11 = vld [vmem:[%s2214_s1 + $0x18] sm:$0xff]  }
   0x4   :  { %1712 = vmatprep.subr.bf16.mxu1 %v1784_v0  ;;  %1517 = vmatprep.subr.bf16.mxu0 %v1784_v0  ;;  %v1730_v8 = vld [vmem:[%s2213_s7 + $0x40] sm:$0xff]   ;;  %v1732_v10 = vld [vmem:[%s2213_s7 + $0x48] sm:$0xff]   ;;  %v1731_v13 = vld [vmem:[%s2213_s7 + $0x10] sm:$0xff]  }
   0x5   :  { %v1733_v12 = vld [vmem:[%s2214_s1 + $0x8] sm:$0xff]   ;;  %v1735_v14 = vld [vmem:[%s2213_s7 + $0x50] sm:$0xff]   ;;  %v1736_v15 = vld [vmem:[%s2213_s7 + $0x18] sm:$0xff]  }
   0x6   :  { %v1737_v16 = vld [vmem:[%s2213_s7 + $0x58] sm:$0xff]   ;;  %v1734_v17 = vld [vmem:[%s2214_s1 + $0x20] sm:$0xff]   ;;  %v1745_v20 = vld [vmem:[%s2213_s7 + $0x88] sm:$0xff]  }
   0x7   :  { %1716 = vmatpush3.bf16.msra.mxu1 %v1722_v2  ;;  %1518 = vmatpush3.bf16.msra.mxu0 %v1722_v2  ;;  %v1739_v18 = vld [vmem:[%s2216_s2] sm:$0xff]   ;;  %v1743_v23 = vld [vmem:[%s2216_s2 + $0x8] sm:$0xff]   ;;  %v1749_v24 = vld [vmem:[%s2213_s7 + $0x90] sm:$0xff]  }
   0x8   :  { %1713 = vmatprep.subr.bf16.mxu1 %v1784_v0  ;;  %1519 = vmatprep.subr.bf16.mxu0 %v1784_v0  ;;  %v1741_v19 = vld [vmem:[%s2213_s7 + $0x80] sm:$0xff]   ;;  %v1744_v25 = vld [vmem:[%s2213_s7 + $0x68] sm:$0xff]   ;;  %v1755_v26 = vld [vmem:[%s2213_s7 + $0x98] sm:$0xff]  }
   0x9   :  { %v1738_v21 = vld [vmem:[%s2215_s0] sm:$0xff]   ;;  %v1742_v27 = vld [vmem:[%s2215_s0 + $0x8] sm:$0xff]   ;;  %v1748_v28 = vld [vmem:[%s2213_s7 + $0x70] sm:$0xff]  }
   0xa   :  { %v1740_v22 = vld [vmem:[%s2213_s7 + $0x60] sm:$0xff]   ;;  %v1747_v29 = vld [vmem:[%s2216_s2 + $0x10] sm:$0xff]   ;;  %v1752_v30 = vld [vmem:[%s2213_s7 + $0x78] sm:$0xff]  }
   0xb   :  { %1717 = vmatpush3.bf16.msra.mxu1 %v1723_v3  ;;  %1520 = vmatpush3.bf16.msra.mxu0 %v1723_v3  ;;  %v1746_v31 = vld [vmem:[%s2215_s0 + $0x10] sm:$0xff]   ;;  %v1751_v32 = vld [vmem:[%s2216_s2 + $0x18] sm:$0xff]   ;;  %v1754_v34 = vld [vmem:[%s2216_s2 + $0x20] sm:$0xff]  }
   0xc   :  { %1714 = vmatprep.subr.bf16.mxu1 %v1784_v0  ;;  %1521 = vmatprep.subr.bf16.mxu0 %v1784_v0  ;;  %v1750_v33 = vld [vmem:[%s2215_s0 + $0x18] sm:$0xff]   ;;  %v1753_v35 = vld [vmem:[%s2215_s0 + $0x20] sm:$0xff]   ;;  %v1763_v38 = vld [vmem:[%s2213_s7 + $0xc8] sm:$0xff]  }
   0xd   :  { %v1757_v36 = vld [vmem:[%s2218_s4] sm:$0xff]   ;;  %v1761_v41 = vld [vmem:[%s2218_s4 + $0x8] sm:$0xff]   ;;  %v1767_v42 = vld [vmem:[%s2213_s7 + $0xd0] sm:$0xff]  }
   0xe   :  { %v1759_v37 = vld [vmem:[%s2213_s7 + $0xc0] sm:$0xff]   ;;  %v1762_v43 = vld [vmem:[%s2213_s7 + $0xa8] sm:$0xff]   ;;  %v1773_v44 = vld [vmem:[%s2213_s7 + $0xd8] sm:$0xff]  }
   0xf   :  { %1718 = vmatpush3.bf16.msra.mxu1 %v1724_v4  ;;  %1522 = vmatpush3.bf16.msra.mxu0 %v1724_v4  ;;  %v1756_v39 = vld [vmem:[%s2217_s3] sm:$0xff]   ;;  %v1760_v45 = vld [vmem:[%s2217_s3 + $0x8] sm:$0xff]   ;;  %v1766_v46 = vld [vmem:[%s2213_s7 + $0xb0] sm:$0xff]  }
  0x10   :  { %1543 = vmatprep.subr.bf16.mxu1 %v1784_v0  ;;  %1571 = vmatprep.subr.bf16.mxu0 %v1784_v0  ;;  %v1758_v40 = vld [vmem:[%s2213_s7 + $0xa0] sm:$0xff]   ;;  %v1765_v47 = vld [vmem:[%s2218_s4 + $0x10] sm:$0xff]   ;;  %v1770_v48 = vld [vmem:[%s2213_s7 + $0xb8] sm:$0xff]  }
  0x11   :  { %v1764_v49 = vld [vmem:[%s2217_s3 + $0x10] sm:$0xff]   ;;  %v1769_v50 = vld [vmem:[%s2218_s4 + $0x18] sm:$0xff]   ;;  %v1772_v52 = vld [vmem:[%s2218_s4 + $0x20] sm:$0xff]  }
  0x12   :  { %1532 = vmatmul.mubr.msk.bf16.vlgmr.msra.gmra.mrb[0].mxu1 %vm119_vm1, %v1725_v5  ;;  %1524 = vmatmul.mubr.msk.bf16.vlgmr.msra.gmra.mrb[0].mxu0 %vm119_vm1, %v1728_v6  ;;  %v1768_v51 = vld [vmem:[%s2217_s3 + $0x18] sm:$0xff]   ;;  %v1771_v53 = vld [vmem:[%s2217_s3 + $0x20] sm:$0xff]   ;;  %v1777_v56 = vld [vmem:[%s2220_s6 + $0x8] sm:$0xff]  }
  0x13   :  { %1544 = vmatpush3.bf16.msra.mxu1 %v1726_v7  ;;  %1535 = vmatprep.mubr.msk.bf16.mxu1 %vm1785_vm0, %v1784_v0  ;;  %v1775_v54 = vld [vmem:[%s2220_s6] sm:$0xff]   ;;  %v1776_v57 = vld [vmem:[%s2219_s5 + $0x8] sm:$0xff]   ;;  %v1779_v58 = vld [vmem:[%s2220_s6 + $0x10] sm:$0xff]  }
  0x14   :  { %1545 = vmatprep.subr.bf16.mxu1 %v1784_v0  ;;  %1572 = vmatpush3.bf16.msra.mxu0 %v1730_v8  ;;  %v1774_v55 = vld [vmem:[%s2219_s5] sm:$0xff]   ;;  %v1778_v59 = vld [vmem:[%s2219_s5 + $0x10] sm:$0xff]   ;;  %v1781_v60 = vld [vmem:[%s2220_s6 + $0x18] sm:$0xff]  }
  0x15   :  { %1573 = vmatprep.subr.bf16.mxu0 %v1784_v0  ;;  %1527 = vmatprep.mubr.msk.bf16.mxu0 %vm1785_vm0, %v1784_v0  ;;  %v1780_v61 = vld [vmem:[%s2219_s5 + $0x18] sm:$0xff]   ;;  %v1783_v62 = vld [vmem:[%s2220_s6 + $0x20] sm:$0xff]  }
  0x16   :  { %v1782_v63 = vld [vmem:[%s2219_s5 + $0x20] sm:$0xff]  }
  0x17   :  { %1546 = vmatpush3.bf16.msra.mxu1 %v1727_v9 }
  0x18   :  { %1547 = vmatprep.subr.bf16.mxu1 %v1784_v0  ;;  %1574 = vmatpush3.bf16.msra.mxu0 %v1732_v10 }
  0x19   :  { %1575 = vmatprep.subr.bf16.mxu0 %v1784_v0 }
  0x1a   :  { %1536 = vmatmul.mubr.msk.bf16.gmra.mrb[4].mxu1 %vm119_vm1, %v1729_v11  ;;  %1528 = vmatmul.mubr.msk.bf16.gmra.mrb[4].mxu0 %vm119_vm1, %v1733_v12 }
  0x1b   :  { %1548 = vmatpush3.bf16.msra.mxu1 %v1731_v13  ;;  %1539 = vmatprep.mubr.msk.bf16.mxu1 %vm1785_vm0, %v1784_v0 }
  0x1c   :  { %1576 = vmatpush3.bf16.msra.mxu0 %v1735_v14  ;;  %1549 = vmatprep.subr.bf16.mxu1 %v1784_v0 }
  0x1d   :  { %1577 = vmatprep.subr.bf16.mxu0 %v1784_v0  ;;  %1579 = vmatprep.mubr.msk.bf16.mxu0 %vm1785_vm0, %v1784_v0 }
  0x1f   :  { %1550 = vmatpush3.bf16.msra.mxu1 %v1736_v15 }
  0x20   :  { %1578 = vmatpush3.bf16.msra.mxu0 %v1737_v16  ;;  %1599 = vmatprep.subr.bf16.mxu1 %v1784_v0 }
  0x21   :  { %1627 = vmatprep.subr.bf16.mxu0 %v1784_v0 }
  0x22   :  { %1540 = vmatmul.mubr.msk.bf16.gmra.mrb[8].mxu1 %vm119_vm1, %v1734_v17 }
  0x23   :  { %1551 = vmatprep.mubr.msk.bf16.mxu1 %vm1785_vm0, %v1784_v0  ;;  %1580 = vmatmul.mubr.msk.bf16.vlgmr.msra.gmra.mrb[8].mxu0 %vm119_vm1, %v1739_v18 }
  0x24   :  { %1628 = vmatpush3.bf16.msra.mxu0 %v1741_v19  ;;  %1583 = vmatprep.mubr.msk.bf16.mxu0 %vm1785_vm0, %v1784_v0 }
  0x25   :  { %1629 = vmatprep.subr.bf16.mxu0 %v1784_v0 }
  0x28   :  { %1630 = vmatpush3.bf16.msra.mxu0 %v1745_v20 }
  0x29   :  { %1631 = vmatprep.subr.bf16.mxu0 %v1784_v0 }
  0x2a   :  { %1552 = vmatmul.mubr.msk.bf16.vlgmr.msra.gmra.mrb[12].mxu1 %vm119_vm1, %v1738_v21 }
  0x2b   :  { %1600 = vmatpush3.bf16.msra.mxu1 %v1740_v22  ;;  %1555 = vmatprep.mubr.msk.bf16.mxu1 %vm1785_vm0, %v1784_v0 }
  0x2c   :  { %1584 = vmatmul.mubr.msk.bf16.gmra.mrb[12].mxu0 %vm119_vm1, %v1743_v23  ;;  %1601 = vmatprep.subr.bf16.mxu1 %v1784_v0 }
  0x2d   :  { %1587 = vmatprep.mubr.msk.bf16.mxu0 %vm1785_vm0, %v1784_v0  ;;  %1632 = vmatpush3.bf16.msra.mxu0 %v1749_v24 }
  0x2e   :  { %1633 = vmatprep.subr.bf16.mxu0 %v1784_v0 }
  0x2f   :  { %1602 = vmatpush3.bf16.msra.mxu1 %v1744_v25 }
  0x30   :  { %1603 = vmatprep.subr.bf16.mxu1 %v1784_v0 }
  0x31   :  { %1634 = vmatpush3.bf16.msra.mxu0 %v1755_v26 }
  0x32   :  { %1556 = vmatmul.mubr.msk.bf16.gmra.mrb[16].mxu1 %vm119_vm1, %v1742_v27  ;;  %1683 = vmatprep.subr.bf16.mxu0 %v1784_v0 }
  0x33   :  { %1559 = vmatprep.mubr.msk.bf16.mxu1 %vm1785_vm0, %v1784_v0  ;;  %1604 = vmatpush3.bf16.msra.mxu1 %v1748_v28 }
  0x34   :  { %1588 = vmatmul.mubr.msk.bf16.gmra.mrb[16].mxu0 %vm119_vm1, %v1747_v29  ;;  %1605 = vmatprep.subr.bf16.mxu1 %v1784_v0 }
  0x35   :  { %1591 = vmatprep.mubr.msk.bf16.mxu0 %vm1785_vm0, %v1784_v0 }
  0x37   :  { %1606 = vmatpush3.bf16.msra.mxu1 %v1752_v30 }
  0x38   :  { %1655 = vmatprep.subr.bf16.mxu1 %v1784_v0 }
  0x3a   :  { %1560 = vmatmul.mubr.msk.bf16.gmra.mrb[20].mxu1 %vm119_vm1, %v1746_v31 }
  0x3b   :  { %1563 = vmatprep.mubr.msk.bf16.mxu1 %vm1785_vm0, %v1784_v0 }
  0x3c   :  { %1592 = vmatmul.mubr.msk.bf16.gmra.mrb[20].mxu0 %vm119_vm1, %v1751_v32 }
  0x3d   :  { %1595 = vmatprep.mubr.msk.bf16.mxu0 %vm1785_vm0, %v1784_v0 }
  0x42   :  { %1564 = vmatmul.mubr.msk.bf16.gmra.mrb[24].mxu1 %vm119_vm1, %v1750_v33 }
  0x43   :  { %1567 = vmatprep.mubr.msk.bf16.mxu1 %vm1785_vm0, %v1784_v0 }
  0x44   :  { %1596 = vmatmul.mubr.msk.bf16.gmra.mrb[24].mxu0 %vm119_vm1, %v1754_v34 }
  0x45   :  { %1635 = vmatprep.mubr.msk.bf16.mxu0 %vm1785_vm0, %v1784_v0 }
  0x4a   :  { %1568 = vmatmul.mubr.msk.bf16.gmra.mrb[28].mxu1 %vm119_vm1, %v1753_v35 }
  0x4b   :  { %1607 = vmatprep.mubr.msk.bf16.mxu1 %vm1785_vm0, %v1784_v0 }
  0x4c   :  { %1636 = vmatmul.mubr.msk.bf16.vlgmr.msra.gmra.mrb[28].mxu0 %vm119_vm1, %v1757_v36 }
  0x4d   :  { %1684 = vmatpush3.bf16.msra.mxu0 %v1759_v37  ;;  %1639 = vmatprep.mubr.msk.bf16.mxu0 %vm1785_vm0, %v1784_v0 }
  0x4e   :  { %1685 = vmatprep.subr.bf16.mxu0 %v1784_v0 }
  0x51   :  { %1686 = vmatpush3.bf16.msra.mxu0 %v1763_v38 }
  0x52   :  { %1608 = vmatmul.mubr.msk.bf16.vlgmr.msra.gmra.mrb[32].mxu1 %vm119_vm1, %v1756_v39  ;;  %1687 = vmatprep.subr.bf16.mxu0 %v1784_v0 }
  0x53   :  { %1656 = vmatpush3.bf16.msra.mxu1 %v1758_v40  ;;  %1611 = vmatprep.mubr.msk.bf16.mxu1 %vm1785_vm0, %v1784_v0 }
  0x54   :  { %1640 = vmatmul.mubr.msk.bf16.gmra.mrb[32].mxu0 %vm119_vm1, %v1761_v41  ;;  %1657 = vmatprep.subr.bf16.mxu1 %v1784_v0 }
  0x55   :  { %1643 = vmatprep.mubr.msk.bf16.mxu0 %vm1785_vm0, %v1784_v0  ;;  %1688 = vmatpush3.bf16.msra.mxu0 %v1767_v42 }
  0x56   :  { %1689 = vmatprep.subr.bf16.mxu0 %v1784_v0 }
  0x57   :  { %1658 = vmatpush3.bf16.msra.mxu1 %v1762_v43 }
  0x58   :  { %1659 = vmatprep.subr.bf16.mxu1 %v1784_v0 }
  0x59   :  { %1690 = vmatpush3.bf16.msra.mxu0 %v1773_v44 }
  0x5a   :  { %1612 = vmatmul.mubr.msk.bf16.gmra.mrb[36].mxu1 %vm119_vm1, %v1760_v45 }
  0x5b   :  { %1615 = vmatprep.mubr.msk.bf16.mxu1 %vm1785_vm0, %v1784_v0  ;;  %1660 = vmatpush3.bf16.msra.mxu1 %v1766_v46 }
  0x5c   :  { %1644 = vmatmul.mubr.msk.bf16.gmra.mrb[36].mxu0 %vm119_vm1, %v1765_v47  ;;  %1661 = vmatprep.subr.bf16.mxu1 %v1784_v0 }
  0x5d   :  { %1647 = vmatprep.mubr.msk.bf16.mxu0 %vm1785_vm0, %v1784_v0 }
  0x5f   :  { %1662 = vmatpush3.bf16.msra.mxu1 %v1770_v48 }
  0x62   :  { %1616 = vmatmul.mubr.msk.bf16.gmra.mrb[40].mxu1 %vm119_vm1, %v1764_v49 }
  0x63   :  { %1619 = vmatprep.mubr.msk.bf16.mxu1 %vm1785_vm0, %v1784_v0 }
  0x64   :  { %1648 = vmatmul.mubr.msk.bf16.gmra.mrb[40].mxu0 %vm119_vm1, %v1769_v50 }
  0x65   :  { %1651 = vmatprep.mubr.msk.bf16.mxu0 %vm1785_vm0, %v1784_v0 }
  0x6a   :  { %1620 = vmatmul.mubr.msk.bf16.gmra.mrb[44].mxu1 %vm119_vm1, %v1768_v51 }
  0x6b   :  { %1623 = vmatprep.mubr.msk.bf16.mxu1 %vm1785_vm0, %v1784_v0 }
  0x6c   :  { %1652 = vmatmul.mubr.msk.bf16.gmra.mrb[44].mxu0 %vm119_vm1, %v1772_v52 }
  0x6d   :  { %1691 = vmatprep.mubr.msk.bf16.mxu0 %vm1785_vm0, %v1784_v0 }
  0x72   :  { %1624 = vmatmul.mubr.msk.bf16.gmra.mrb[48].mxu1 %vm119_vm1, %v1771_v53 }
  0x73   :  { %1663 = vmatprep.mubr.msk.bf16.mxu1 %vm1785_vm0, %v1784_v0 }
  0x74   :  { %1692 = vmatmul.mubr.msk.bf16.vlgmr.msra.gmra.mrb[48].mxu0 %vm119_vm1, %v1775_v54 }
  0x75   :  { %1695 = vmatprep.mubr.msk.bf16.mxu0 %vm1785_vm0, %v1784_v0 }
  0x7a   :  { %1664 = vmatmul.mubr.msk.bf16.vlgmr.msra.gmra.mrb[52].mxu1 %vm119_vm1, %v1774_v55 }
  0x7b   :  { %1667 = vmatprep.mubr.msk.bf16.mxu1 %vm1785_vm0, %v1784_v0 }
  0x7c   :  { %1696 = vmatmul.mubr.msk.bf16.gmra.mrb[52].mxu0 %vm119_vm1, %v1777_v56 }
  0x7d   :  { %1699 = vmatprep.mubr.msk.bf16.mxu0 %vm1785_vm0, %v1784_v0 }
  0x82   :  { %1668 = vmatmul.mubr.msk.bf16.gmra.mrb[56].mxu1 %vm119_vm1, %v1776_v57 }
  0x83   :  { %1671 = vmatprep.mubr.msk.bf16.mxu1 %vm1785_vm0, %v1784_v0 }
  0x84   :  { %1700 = vmatmul.mubr.msk.bf16.gmra.mrb[56].mxu0 %vm119_vm1, %v1779_v58 }
  0x85   :  { %1703 = vmatprep.mubr.msk.bf16.mxu0 %vm1785_vm0, %v1784_v0 }
  0x8a   :  { %1672 = vmatmul.mubr.msk.bf16.gmra.mrb[60].mxu1 %vm119_vm1, %v1778_v59 }
  0x8b   :  { %1675 = vmatprep.mubr.msk.bf16.mxu1 %vm1785_vm0, %v1784_v0 }
  0x8c   :  { %1704 = vmatmul.mubr.msk.bf16.gmra.mrb[60].mxu0 %vm119_vm1, %v1781_v60 }
  0x8d   :  { %1707 = vmatprep.mubr.msk.bf16.mxu0 %vm1785_vm0, %v1784_v0 }
  0x92   :  { %1676 = vmatmul.mubr.msk.bf16.gmra.mrb[64].mxu1 %vm119_vm1, %v1780_v61 }
  0x93   :  { %1679 = vmatprep.mubr.msk.bf16.mxu1 %vm1785_vm0, %v1784_v0 }
  0x94   :  { %1708 = vmatmul.mubr.msk.bf16.gmra.mrb[64].mxu0 %vm119_vm1, %v1783_v62 }
  0x9a   :  { %1680 = vmatmul.mubr.msk.bf16.gmra.mrb[68].mxu1 %vm119_vm1, %v1782_v63 }
  0xe5   :  { %v185_v1 = vpop.f32.mrb[0].mxu1  ;;  %v169_v2 = vpop.f32.mrb[0].mxu0 }
  0xe6   :  { %v1533_v3 = vpop.f32.mrb[1].mxu1  ;;  %v1525_v4 = vpop.f32.mrb[1].mxu0 }
  0xe7   :  { %v188_v5 = vpop.f32.mrb[2].mxu1  ;;  %v172_v6 = vpop.f32.mrb[2].mxu0 }
  0xe8   :  { %v1534_v7 = vpop.f32.mrb[3].mxu1  ;;  %v1526_v8 = vpop.f32.mrb[3].mxu0 }
  0xed   :  { %v193_v9 = vpop.f32.mrb[4].mxu1  ;;  %v177_v10 = vpop.f32.mrb[4].mxu0 }
  0xee   :  { %v1537_v11 = vpop.f32.mrb[5].mxu1  ;;  %v1529_v0 = vpop.f32.mrb[5].mxu0 }
  0xef   :  { %v196_v12 = vpop.f32.mrb[6].mxu1  ;;  %v180_v13 = vpop.f32.mrb[6].mxu0 }
  0xf0   :  { %v1538_v14 = vpop.f32.mrb[7].mxu1  ;;  %v1530_v15 = vpop.f32.mrb[7].mxu0 }
  0xf5   :  { %v201_v16 = vpop.f32.mrb[8].mxu1 }
  0xf6   :  { %v1541_v17 = vpop.f32.mrb[9].mxu1  ;;  %v462_v18 = vpop.f32.mrb[8].mxu0 }
  0xf7   :  { %v204_v19 = vpop.f32.mrb[10].mxu1  ;;  %v1581_v20 = vpop.f32.mrb[9].mxu0 }
  0xf8   :  { %v1542_v21 = vpop.f32.mrb[11].mxu1  ;;  %v465_v22 = vpop.f32.mrb[10].mxu0 }
  0xf9   :  { %v1582_v23 = vpop.f32.mrb[11].mxu0 }
  0xfd   :  { %v306_v24 = vpop.f32.mrb[12].mxu1 }
  0xfe   :  { %v307_v25 = vadd.f32 %v306_v24, %v169_v2  ;;  %v1553_v26 = vpop.f32.mrb[13].mxu1 }
  0xff   :  { %v309_v27 = vpop.f32.mrb[14].mxu1  ;;  %v470_v28 = vpop.f32.mrb[12].mxu0 }
 0x100   :  { %v501_v29 = vadd.f32 %v462_v18, %v307_v25  ;;  %v310_v30 = vadd.f32 %v309_v27, %v172_v6  ;;  %v1554_v31 = vpop.f32.mrb[15].mxu1  ;;  %v1585_v32 = vpop.f32.mrb[13].mxu0 }
 0x101   :  { %v473_v33 = vpop.f32.mrb[14].mxu0 }
 0x102   :  { %v502_v34 = vadd.f32 %v465_v22, %v310_v30  ;;  %v1586_v35 = vpop.f32.mrb[15].mxu0 }
 0x105   :  { %v314_v36 = vpop.f32.mrb[16].mxu1 }
 0x106   :  { %v315_v37 = vadd.f32 %v314_v36, %v177_v10  ;;  %v1557_v38 = vpop.f32.mrb[17].mxu1 }
 0x107   :  { %v317_v39 = vpop.f32.mrb[18].mxu1  ;;  %v478_v40 = vpop.f32.mrb[16].mxu0 }
 0x108   :  { %v503_v41 = vadd.f32 %v470_v28, %v315_v37  ;;  %v318_v42 = vadd.f32 %v317_v39, %v180_v13  ;;  %v1558_v43 = vpop.f32.mrb[19].mxu1  ;;  %v1589_v44 = vpop.f32.mrb[17].mxu0 }
 0x109   :  { %v481_v45 = vpop.f32.mrb[18].mxu0 }
 0x10a   :  { %v504_v46 = vadd.f32 %v473_v33, %v318_v42  ;;  %v1590_v47 = vpop.f32.mrb[19].mxu0 }
 0x10d   :  { %v322_v48 = vpop.f32.mrb[20].mxu1 }
 0x10e   :  { %v323_v49 = vadd.f32 %v322_v48, %v185_v1  ;;  %v1561_v50 = vpop.f32.mrb[21].mxu1 }
 0x10f   :  { %v325_v51 = vpop.f32.mrb[22].mxu1  ;;  %v486_v52 = vpop.f32.mrb[20].mxu0 }
 0x110   :  { %v505_v53 = vadd.f32 %v478_v40, %v323_v49  ;;  %v326_v54 = vadd.f32 %v325_v51, %v188_v5  ;;  %v1562_v55 = vpop.f32.mrb[23].mxu1  ;;  %v1593_v56 = vpop.f32.mrb[21].mxu0 }
 0x111   :  { %v489_v57 = vpop.f32.mrb[22].mxu0 }
 0x112   :  { %v506_v58 = vadd.f32 %v481_v45, %v326_v54  ;;  %v1594_v59 = vpop.f32.mrb[23].mxu0 }
 0x115   :  { %v330_v60 = vpop.f32.mrb[24].mxu1 }
 0x116   :  { %v331_v61 = vadd.f32 %v330_v60, %v193_v9  ;;  %v1565_v62 = vpop.f32.mrb[25].mxu1 }
 0x117   :  { %v333_v63 = vpop.f32.mrb[26].mxu1  ;;  %v494_v2 = vpop.f32.mrb[24].mxu0 }
 0x118   :  { %v507_v3 = vadd.f32 %v486_v52, %v331_v61  ;;  %v334_v4 = vadd.f32 %v333_v63, %v196_v12  ;;  %v1566_v6 = vpop.f32.mrb[27].mxu1  ;;  %v1597_v7 = vpop.f32.mrb[25].mxu0 }
 0x119   :  { %v497_v1 = vpop.f32.mrb[26].mxu0 }
 0x11a   :  { %v508_v8 = vadd.f32 %v489_v57, %v334_v4  ;;  %v1598_v10 = vpop.f32.mrb[27].mxu0 }
 0x11d   :  { %v338_v11 = vpop.f32.mrb[28].mxu1 }
 0x11e   :  { %v339_v0 = vadd.f32 %v338_v11, %v201_v16  ;;  %v1569_v5 = vpop.f32.mrb[29].mxu1 }
 0x11f   :  { %v341_v13 = vpop.f32.mrb[30].mxu1  ;;  %v794_v14 = vpop.f32.mrb[28].mxu0 }
 0x120   :  { %v509_v15 = vadd.f32 %v494_v2, %v339_v0  ;;  %v342_v17 = vadd.f32 %v341_v13, %v204_v19  ;;  %v1570_v18 = vpop.f32.mrb[31].mxu1  ;;  %v1637_v20 = vpop.f32.mrb[29].mxu0 }
 0x121   :  { %v797_v9 = vpop.f32.mrb[30].mxu0 }
 0x122   :  { %v510_v21 = vadd.f32 %v497_v1, %v342_v17  ;;  %v1638_v22 = vpop.f32.mrb[31].mxu0 }
 0x125   :  { %v628_v23 = vpop.f32.mrb[32].mxu1 }
 0x126   :  { %v667_v24 = vadd.f32 %v628_v23, %v501_v29  ;;  %v1609_v12 = vpop.f32.mrb[33].mxu1 }
 0x127   :  { %v631_v25 = vpop.f32.mrb[34].mxu1  ;;  %v802_v26 = vpop.f32.mrb[32].mxu0 }
 0x128   :  { %v833_v27 = vadd.f32 %v794_v14, %v667_v24  ;;  %v668_v28 = vadd.f32 %v631_v25, %v502_v34  ;;  %v1610_v30 = vpop.f32.mrb[35].mxu1  ;;  %v1641_v31 = vpop.f32.mrb[33].mxu0  ;;  %v2179_v24 = vld [vmem:[%s2221_s8] ss:$0 sm:$0xff] }
 0x129   :  { %v805_v16 = vpop.f32.mrb[34].mxu0 }
 0x12a   :  { %v834_v32 = vadd.f32 %v797_v9, %v668_v28  ;;  %v1642_v33 = vpop.f32.mrb[35].mxu0 }
 0x12d   :  { %v636_v35 = vpop.f32.mrb[36].mxu1 }
 0x12e   :  { %v669_v36 = vadd.f32 %v636_v35, %v503_v41  ;;  %v1613_v19 = vpop.f32.mrb[37].mxu1 }
 0x12f   :  { %v639_v37 = vpop.f32.mrb[38].mxu1  ;;  %v810_v38 = vpop.f32.mrb[36].mxu0 }
 0x130   :  { %v835_v39 = vadd.f32 %v802_v26, %v669_v36  ;;  %v670_v40 = vadd.f32 %v639_v37, %v504_v46  ;;  %v1614_v42 = vpop.f32.mrb[39].mxu1  ;;  %v1645_v43 = vpop.f32.mrb[37].mxu0 }
 0x131   :  { %v813_v29 = vpop.f32.mrb[38].mxu0 }
 0x132   :  { %v2162_v44 = vadd.f32 %v805_v16, %v670_v40  ;;  %v1646_v45 = vpop.f32.mrb[39].mxu0 }
 0x135   :  { %v644_v47 = vpop.f32.mrb[40].mxu1 }
 0x136   :  { %v671_v34 = vadd.f32 %v644_v47, %v505_v53  ;;  %v1617_v48 = vpop.f32.mrb[41].mxu1 }
 0x137   :  { %v647_v49 = vpop.f32.mrb[42].mxu1  ;;  %v818_v50 = vpop.f32.mrb[40].mxu0 }
 0x138   :  { %v2164_v51 = vadd.f32 %v810_v38, %v671_v34  ;;  %v672_v52 = vadd.f32 %v647_v49, %v506_v58  ;;  %v1618_v41 = vpop.f32.mrb[43].mxu1  ;;  %v1649_v54 = vpop.f32.mrb[41].mxu0 }
 0x139   :  { %v821_v55 = vpop.f32.mrb[42].mxu0 }
 0x13a   :  { %v2166_v56 = vadd.f32 %v813_v29, %v672_v52  ;;  %v1650_v46 = vpop.f32.mrb[43].mxu0 }
 0x13d   :  { %v652_v57 = vpop.f32.mrb[44].mxu1 }
 0x13e   :  { %v673_v59 = vadd.f32 %v652_v57, %v507_v3  ;;  %v1621_v60 = vpop.f32.mrb[45].mxu1 }
 0x13f   :  { %v655_v61 = vpop.f32.mrb[46].mxu1  ;;  %v826_v62 = vpop.f32.mrb[44].mxu0 }
 0x140   :  { %v2168_v63 = vadd.f32 %v818_v50, %v673_v59  ;;  %v674_v53 = vadd.f32 %v655_v61, %v508_v8  ;;  %v1622_v2 = vpop.f32.mrb[47].mxu1  ;;  %v1653_v4 = vpop.f32.mrb[45].mxu0 }
 0x141   :  { %v829_v6 = vpop.f32.mrb[46].mxu0 }
 0x142   :  { %v2170_v7 = vadd.f32 %v821_v55, %v674_v53  ;;  %v1654_v58 = vpop.f32.mrb[47].mxu0 }
 0x145   :  { %v660_v1 = vpop.f32.mrb[48].mxu1 }
 0x146   :  { %v675_v10 = vadd.f32 %v660_v1, %v509_v15  ;;  %v1625_v11 = vpop.f32.mrb[49].mxu1 }
 0x147   :  { %v663_v0 = vpop.f32.mrb[50].mxu1  ;;  %v1126_v5 = vpop.f32.mrb[48].mxu0 }
 0x148   :  { %v2172_v13 = vadd.f32 %v826_v62, %v675_v10  ;;  %v676_v3 = vadd.f32 %v663_v0, %v510_v21  ;;  %v1626_v14 = vpop.f32.mrb[51].mxu1  ;;  %v1693_v17 = vpop.f32.mrb[49].mxu0 }
 0x149   :  { %v1129_v18 = vpop.f32.mrb[50].mxu0 }
 0x14a   :  { %v2174_v20 = vadd.f32 %v829_v6, %v676_v3  ;;  %v1694_v8 = vpop.f32.mrb[51].mxu0 }
 0x14d   :  { %v960_v9 = vpop.f32.mrb[52].mxu1 }
 0x14e   :  { %v999_v22 = vadd.f32 %v960_v9, %v833_v27  ;;  %v1665_v23 = vpop.f32.mrb[53].mxu1 }
 0x14f   :  { %v963_v15 = vpop.f32.mrb[54].mxu1  ;;  %v1134_v12 = vpop.f32.mrb[52].mxu0 }
 0x150   :  { %v1165_v25 = vadd.f32 %v1126_v5, %v999_v22  ;;  %v1000_v26 = vadd.f32 %v963_v15, %v834_v32  ;;  %v1666_v28 = vpop.f32.mrb[55].mxu1  ;;  %v1697_v21 = vpop.f32.mrb[53].mxu0 }
 0x151   :  { %v1137_v30 = vpop.f32.mrb[54].mxu0 }
 0x152   :  { %v1182_v31 = vadd.f32 %v2179_v24, %v1165_v25  ;;  %v1166_v16 = vadd.f32 %v1129_v18, %v1000_v26  ;;  %v1698_v33 = vpop.f32.mrb[55].mxu0 }
 0x154   :  { %v1183_v35 = vadd.f32 %v2179_v24, %v1166_v16  ;;  %v1192_v36 = vmax.f32 %v1182_v31, 0.0 }
 0x155   :  { %v968_v27 = vpop.f32.mrb[56].mxu1 }
 0x156   :  { %v1193_v19 = vmax.f32 %v1183_v35, 0.0  ;;  %v1001_v37 = vadd.f32 %v968_v27, %v835_v39  ;;  %v1669_v38 = vpop.f32.mrb[57].mxu1 }
 0x157   :  { %v971_v40 = vpop.f32.mrb[58].mxu1  ;;  %v1142_v42 = vpop.f32.mrb[56].mxu0 }
 0x158   :  { %v1426_v43 = vpack.c.bf16 %v1193_v19, %v1192_v36  ;;  %v1167_v29 = vadd.f32 %v1134_v12, %v1001_v37  ;;  %v1002_v32 = vadd.f32 %v971_v40, %v2162_v44  ;;  %v1670_v45 = vpop.f32.mrb[59].mxu1  ;;  %v1701_v47 = vpop.f32.mrb[57].mxu0 }
 0x159   :  { %v1145_v34 = vpop.f32.mrb[58].mxu0 }
 0x15a   :  { %1427 = vst [vmem:[%s2222_s9] sm:$0xff] %v1426_v43   ;;  %v1184_v48 = vadd.f32 %v2179_v24, %v1167_v29  ;;  %v1168_v49 = vadd.f32 %v1137_v30, %v1002_v32  ;;  %v1702_v50 = vpop.f32.mrb[59].mxu0 }
 0x15c   :  { %v1185_v39 = vadd.f32 %v2179_v24, %v1168_v49  ;;  %v1194_v41 = vmax.f32 %v1184_v48, 0.0 }
 0x15d   :  { %v976_v52 = vpop.f32.mrb[60].mxu1 }
 0x15e   :  { %v1195_v54 = vmax.f32 %v1185_v39, 0.0  ;;  %v1003_v55 = vadd.f32 %v976_v52, %v2164_v51  ;;  %v1673_v46 = vpop.f32.mrb[61].mxu1 }
 0x15f   :  { %v979_v44 = vpop.f32.mrb[62].mxu1  ;;  %v1150_v57 = vpop.f32.mrb[60].mxu0 }
 0x160   :  { %v1431_v59 = vpack.c.bf16 %v1195_v54, %v1194_v41  ;;  %v1169_v60 = vadd.f32 %v1142_v42, %v1003_v55  ;;  %v1004_v61 = vadd.f32 %v979_v44, %v2166_v56  ;;  %v1674_v62 = vpop.f32.mrb[63].mxu1  ;;  %v1705_v53 = vpop.f32.mrb[61].mxu0 }
 0x161   :  { %v1153_v2 = vpop.f32.mrb[62].mxu0 }
 0x162   :  { %1448 = vst [vmem:[%s2222_s9 + $0x8] sm:$0xff] %v1431_v59   ;;  %v1186_v4 = vadd.f32 %v2179_v24, %v1169_v60  ;;  %v1170_v6 = vadd.f32 %v1145_v34, %v1004_v61  ;;  %v1706_v58 = vpop.f32.mrb[63].mxu0 }
 0x164   :  { %v1187_v51 = vadd.f32 %v2179_v24, %v1170_v6  ;;  %v1196_v10 = vmax.f32 %v1186_v4, 0.0 }
 0x165   :  { %v984_v1 = vpop.f32.mrb[64].mxu1 }
 0x166   :  { %v1197_v11 = vmax.f32 %v1187_v51, 0.0  ;;  %v1005_v0 = vadd.f32 %v984_v1, %v2168_v63  ;;  %v1677_v5 = vpop.f32.mrb[65].mxu1 }
 0x167   :  { %v987_v56 = vpop.f32.mrb[66].mxu1  ;;  %v1158_v3 = vpop.f32.mrb[64].mxu0 }
 0x168   :  { %v1436_v14 = vpack.c.bf16 %v1197_v11, %v1196_v10  ;;  %v1171_v17 = vadd.f32 %v1150_v57, %v1005_v0  ;;  %v1006_v18 = vadd.f32 %v987_v56, %v2170_v7  ;;  %v1678_v8 = vpop.f32.mrb[67].mxu1  ;;  %v1709_v9 = vpop.f32.mrb[65].mxu0 }
 0x169   :  { %v1161_v22 = vpop.f32.mrb[66].mxu0 }
 0x16a   :  { %1449 = vst [vmem:[%s2222_s9 + $0x10] sm:$0xff] %v1436_v14   ;;  %v1188_v23 = vadd.f32 %v2179_v24, %v1171_v17  ;;  %v1172_v15 = vadd.f32 %v1153_v2, %v1006_v18  ;;  %v1710_v12 = vpop.f32.mrb[67].mxu0 }
 0x16c   :  { %v1189_v63 = vadd.f32 %v2179_v24, %v1172_v15  ;;  %v1198_v26 = vmax.f32 %v1188_v23, 0.0 }
 0x16d   :  { %v992_v25 = vpop.f32.mrb[68].mxu1 }
 0x16e   :  { %v1199_v28 = vmax.f32 %v1189_v63, 0.0  ;;  %v1007_v21 = vadd.f32 %v992_v25, %v2172_v13  ;;  %v1681_v30 = vpop.f32.mrb[69].mxu1 }
 0x16f   :  { %v995_v7 = vpop.f32.mrb[70].mxu1 }
 0x170   :  { %v1441_v31 = vpack.c.bf16 %v1199_v28, %v1198_v26  ;;  %v1173_v16 = vadd.f32 %v1158_v3, %v1007_v21  ;;  %v1008_v33 = vadd.f32 %v995_v7, %v2174_v20  ;;  %v1682_v35 = vpop.f32.mrb[71].mxu1 }
 0x172   :  { %1450 = vst [vmem:[%s2222_s9 + $0x18] sm:$0xff] %v1441_v31   ;;  %v1190_v27 = vadd.f32 %v2179_v24, %v1173_v16  ;;  %v1174_v36 = vadd.f32 %v1161_v22, %v1008_v33 }
 0x174   :  { %v1191_v19 = vadd.f32 %v2179_v24, %v1174_v36  ;;  %v1200_v37 = vmax.f32 %v1190_v27, 0.0 }
 0x176   :  { %v1201_v38 = vmax.f32 %v1191_v19, 0.0 }
 0x178   :  { %v1446_v40 = vpack.c.bf16 %v1201_v38, %v1200_v37 }
 0x17a   :  { %1451 = vst [vmem:[%s2222_s9 + $0x20] sm:$0xff] %v1446_v40  }

// kernel: stem_forward.16
= control target key start
LH: loop header
LB: loop body
LE: loop exit
PB: predicated region body
PF: predicated region fallthrough
CT: control target
= control target key end

     0   :  { %v3199_v1 = vmov 0   ;;  %vm141_vm0 = vcmask 523264   ;;  %s3932_s18 = inlined_call_operand.vmem [shape: bf16[18,64,256], index: 18, kind: input, shape index: {}]   ;;  %s3933_s1 = inlined_call_operand.vmem [shape: bf16[32,64], index: 1, kind: input, shape index: {}]   ;;  %s3934_s9 = inlined_call_operand.vmem [shape: bf16[32,64], index: 9, kind: input, shape index: {}]   ;;  %s3935_s0 = inlined_call_operand.vmem [shape: bf16[32,64], index: 0, kind: input, shape index: {}]   ;;  %s3936_s10 = inlined_call_operand.vmem [shape: bf16[32,64], index: 10, kind: input, shape index: {}]   ;;  %s3937_s2 = inlined_call_operand.vmem [shape: bf16[32,64], index: 2, kind: input, shape index: {}]   ;;  %s3938_s11 = inlined_call_operand.vmem [shape: bf16[32,64], index: 11, kind: input, shape index: {}]   ;;  %s3939_s3 = inlined_call_operand.vmem [shape: bf16[32,64], index: 3, kind: input, shape index: {}]   ;;  %s3940_s12 = inlined_call_operand.vmem [shape: bf16[32,64], index: 12, kind: input, shape index: {}]   ;;  %s3941_s4 = inlined_call_operand.vmem [shape: bf16[32,64], index: 4, kind: input, shape index: {}]   ;;  %s3942_s13 = inlined_call_operand.vmem [shape: bf16[32,64], index: 13, kind: input, shape index: {}]   ;;  %s3943_s5 = inlined_call_operand.vmem [shape: bf16[32,64], index: 5, kind: input, shape index: {}]   ;;  %s3944_s14 = inlined_call_operand.vmem [shape: bf16[32,64], index: 14, kind: input, shape index: {}]   ;;  %s3945_s6 = inlined_call_operand.vmem [shape: bf16[32,64], index: 6, kind: input, shape index: {}]   ;;  %s3946_s15 = inlined_call_operand.vmem [shape: bf16[32,64], index: 15, kind: input, shape index: {}]   ;;  %s3947_s7 = inlined_call_operand.vmem [shape: bf16[32,64], index: 7, kind: input, shape index: {}]   ;;  %s3948_s16 = inlined_call_operand.vmem [shape: bf16[32,64], index: 16, kind: input, shape index: {}]   ;;  %s3949_s8 = inlined_call_operand.vmem [shape: bf16[32,64], index: 8, kind: input, shape index: {}]   ;;  %s3950_s17 = inlined_call_operand.vmem [shape: bf16[32,64], index: 17, kind: input, shape index: {}]   ;;  %s3951_s19 = inlined_call_operand.vmem [shape: f32[1,256], index: 19, kind: input, shape index: {}]   ;;  %s3952_s20 = inlined_call_operand.vmem [shape: bf16[32,256], index: 20, kind: output, shape index: {}]  }
   0x1   :  { %3958 = sst [smem:[#allocation2_spill]] %s3932_s18  ;;  %180 = vmatprep.mubr.bf16.mxu1 %v3199_v1  ;;  %1321 = vmatprep.mubr.bf16.mxu0 %v3199_v1  ;;  %v3027_v57 = vld [vmem:[%s3937_s2] sm:$0xff]  }
   0x2   :  { %3959 = sst [smem:[#allocation3_spill]] %s3933_s1  ;;  %s3963_s23 = sld [smem:[#allocation2_spill]]  ;;  %v3031_v61 = vld [vmem:[%s3938_s11] sm:$0xff]  }
   0x3   :  { %3960 = sst [smem:[#allocation4_spill]] %s3934_s9  ;;  %s3964_s26 = sld [smem:[#allocation3_spill]] }
   0x4   :  { %3961 = sst [smem:[#allocation5_spill]] %s3935_s0  ;;  %s3965_s30 = sld [smem:[#allocation4_spill]] }
   0x5   :  { %3962 = sst [smem:[#allocation6_spill]] %s3936_s10  ;;  %s3966_s10 = sld [smem:[#allocation5_spill]] }
   0x6   :  { %s3967_s9 = sld [smem:[#allocation6_spill]] }
   0x8   :  { %v2947_v0 = vld [vmem:[%s3963_s23 + $0x44] ss:$8 sps:$4 sm:$0xff]   ;;  %v2951_v3 = vld [vmem:[%s3963_s23 + $0x40] ss:$8 sps:$4 sm:$0xff]   ;;  %v2953_v5 = vld [vmem:[%s3963_s23 + $0x54] ss:$8 sps:$4 sm:$0xff]  }
   0x9   :  { %v2949_v2 = vld [vmem:[%s3963_s23 + $0x244] ss:$8 sps:$4 sm:$0xff]   ;;  %148 = vmatprep.subr.bf16.mxu1 %v2947_v0  ;;  %v2952_v4 = vld [vmem:[%s3963_s23 + $0x240] ss:$8 sps:$4 sm:$0xff]   ;;  %v2955_v6 = vld [vmem:[%s3963_s23 + $0x254] ss:$8 sps:$4 sm:$0xff]  }
   0xa   :  { %1289 = vmatprep.subr.bf16.mxu0 %v2949_v2  ;;  %149 = vmatpush1.bf16.msra.mxu1 %v2951_v3  ;;  %v2957_v7 = vld [vmem:[%s3963_s23 + $0x50] ss:$8 sps:$4 sm:$0xff]   ;;  %v2959_v9 = vld [vmem:[%s3963_s23 + $0x64] ss:$8 sps:$4 sm:$0xff]   ;;  %v2963_v11 = vld [vmem:[%s3963_s23 + $0x60] ss:$8 sps:$4 sm:$0xff]  }
   0xb   :  { %1290 = vmatpush1.bf16.msra.mxu0 %v2952_v4  ;;  %150 = vmatprep.subr.bf16.mxu1 %v2953_v5  ;;  %v2958_v8 = vld [vmem:[%s3963_s23 + $0x250] ss:$8 sps:$4 sm:$0xff]   ;;  %v2961_v10 = vld [vmem:[%s3963_s23 + $0x264] ss:$8 sps:$4 sm:$0xff]   ;;  %v2964_v12 = vld [vmem:[%s3963_s23 + $0x260] ss:$8 sps:$4 sm:$0xff]  }
   0xc   :  { %1291 = vmatprep.subr.bf16.mxu0 %v2955_v6  ;;  %v2965_v13 = vld [vmem:[%s3963_s23 + $0x74] ss:$8 sps:$4 sm:$0xff]   ;;  %v2969_v15 = vld [vmem:[%s3963_s23 + $0x70] ss:$8 sps:$4 sm:$0xff]   ;;  %v2971_v17 = vld [vmem:[%s3964_s26] sm:$0xff]  }
   0xd   :  { %v2967_v14 = vld [vmem:[%s3963_s23 + $0x274] ss:$8 sps:$4 sm:$0xff]   ;;  %v2970_v16 = vld [vmem:[%s3963_s23 + $0x270] ss:$8 sps:$4 sm:$0xff]   ;;  %v2974_v18 = vld [vmem:[%s3963_s23 + $0x4] ss:$8 sps:$4 sm:$0xff]  }
   0xe   :  { %151 = vmatpush1.bf16.msra.mxu1 %v2957_v7  ;;  %v2975_v19 = vld [vmem:[%s3965_s30] sm:$0xff]   ;;  %v2981_v23 = vld [vmem:[%s3963_s23 + $0x14] ss:$8 sps:$4 sm:$0xff]   ;;  %v2979_v25 = vld [vmem:[%s3963_s23 + $0x10] ss:$8 sps:$4 sm:$0xff]  }
   0xf   :  { %1292 = vmatpush1.bf16.msra.mxu0 %v2958_v8  ;;  %152 = vmatprep.subr.bf16.mxu1 %v2959_v9  ;;  %v2978_v20 = vld [vmem:[%s3963_s23 + $0x284] ss:$8 sps:$4 sm:$0xff]   ;;  %v2972_v21 = vld [vmem:[%s3963_s23] ss:$8 sps:$4 sm:$0xff]   ;;  %v2984_v24 = vld [vmem:[%s3963_s23 + $0x294] ss:$8 sps:$4 sm:$0xff]  }
  0x10   :  { %1293 = vmatprep.subr.bf16.mxu0 %v2961_v10  ;;  %v2976_v22 = vld [vmem:[%s3963_s23 + $0x280] ss:$8 sps:$4 sm:$0xff]   ;;  %v2982_v26 = vld [vmem:[%s3963_s23 + $0x290] ss:$8 sps:$4 sm:$0xff]   ;;  %v2988_v28 = vld [vmem:[%s3963_s23 + $0x24] ss:$8 sps:$4 sm:$0xff]  }
  0x11   :  { %v2985_v27 = vld [vmem:[%s3964_s26 + $0x8] sm:$0xff]   ;;  %v2995_v33 = vld [vmem:[%s3963_s23 + $0x34] ss:$8 sps:$4 sm:$0xff]   ;;  %v2993_v35 = vld [vmem:[%s3963_s23 + $0x30] ss:$8 sps:$4 sm:$0xff]  }
  0x12   :  { %153 = vmatpush1.bf16.msra.mxu1 %v2963_v11  ;;  %v2986_v29 = vld [vmem:[%s3963_s23 + $0x20] ss:$8 sps:$4 sm:$0xff]   ;;  %v2992_v30 = vld [vmem:[%s3963_s23 + $0x2a4] ss:$8 sps:$4 sm:$0xff]   ;;  %v2998_v34 = vld [vmem:[%s3963_s23 + $0x2b4] ss:$8 sps:$4 sm:$0xff]  }
  0x13   :  { %1294 = vmatpush1.bf16.msra.mxu0 %v2964_v12  ;;  %154 = vmatprep.subr.bf16.mxu1 %v2965_v13  ;;  %v2989_v31 = vld [vmem:[%s3965_s30 + $0x8] sm:$0xff]   ;;  %v2996_v36 = vld [vmem:[%s3963_s23 + $0x2b0] ss:$8 sps:$4 sm:$0xff]   ;;  %v2999_v37 = vld [vmem:[%s3966_s10] sm:$0xff]  }
  0x14   :  { %1295 = vmatprep.subr.bf16.mxu0 %v2967_v14  ;;  %v2990_v32 = vld [vmem:[%s3963_s23 + $0x2a0] ss:$8 sps:$4 sm:$0xff]   ;;  %v3002_v38 = vld [vmem:[%s3963_s23 + $0x84] ss:$8 sps:$4 sm:$0xff]   ;;  %v3009_v43 = vld [vmem:[%s3963_s23 + $0x94] ss:$8 sps:$4 sm:$0xff]  }
  0x15   :  { %v3006_v39 = vld [vmem:[%s3963_s23 + $0x2c4] ss:$8 sps:$4 sm:$0xff]   ;;  %v3000_v40 = vld [vmem:[%s3963_s23 + $0x80] ss:$8 sps:$4 sm:$0xff]   ;;  %v3012_v44 = vld [vmem:[%s3963_s23 + $0x2d4] ss:$8 sps:$4 sm:$0xff]  }
  0x16   :  { %155 = vmatpush1.bf16.msra.mxu1 %v2969_v15  ;;  %v3003_v41 = vld [vmem:[%s3967_s9] sm:$0xff]   ;;  %v3007_v45 = vld [vmem:[%s3963_s23 + $0x90] ss:$8 sps:$4 sm:$0xff]   ;;  %v3013_v49 = vld [vmem:[%s3966_s10 + $0x8] sm:$0xff]  }
  0x17   :  { %1296 = vmatpush1.bf16.msra.mxu0 %v2970_v16  ;;  %257 = vmatprep.subr.bf16.mxu1 %v2974_v18  ;;  %v3004_v42 = vld [vmem:[%s3963_s23 + $0x2c0] ss:$8 sps:$4 sm:$0xff]   ;;  %v3010_v46 = vld [vmem:[%s3963_s23 + $0x2d0] ss:$8 sps:$4 sm:$0xff]   ;;  %v3016_v47 = vld [vmem:[%s3963_s23 + $0xa4] ss:$8 sps:$4 sm:$0xff]  }
  0x18   :  { %1419 = vmatprep.subr.bf16.mxu0 %v2978_v20  ;;  %v3020_v48 = vld [vmem:[%s3963_s23 + $0x2e4] ss:$8 sps:$4 sm:$0xff]   ;;  %v3014_v50 = vld [vmem:[%s3963_s23 + $0xa0] ss:$8 sps:$4 sm:$0xff]   ;;  %v3023_v53 = vld [vmem:[%s3963_s23 + $0xb4] ss:$8 sps:$4 sm:$0xff]  }
  0x19   :  { %2468 = vmatmul.mubr.msk.bf16.vlgmr.msra.gmra.mrb[0].mxu1 %vm141_vm0, %v2971_v17  ;;  %v3017_v51 = vld [vmem:[%s3967_s9 + $0x8] sm:$0xff]   ;;  %v3026_v54 = vld [vmem:[%s3963_s23 + $0x2f4] ss:$8 sps:$4 sm:$0xff]   ;;  %v3021_v55 = vld [vmem:[%s3963_s23 + $0xb0] ss:$8 sps:$4 sm:$0xff]  }
  0x1a   :  { %2640 = vmatmul.mubr.msk.bf16.vlgmr.msra.gmra.mrb[0].mxu0 %vm141_vm0, %v2975_v19  ;;  %258 = vmatpush1.bf16.msra.mxu1 %v2972_v21  ;;  %v3018_v52 = vld [vmem:[%s3963_s23 + $0x2e0] ss:$8 sps:$4 sm:$0xff]   ;;  %v3024_v56 = vld [vmem:[%s3963_s23 + $0x2f0] ss:$8 sps:$4 sm:$0xff]   ;;  %v3030_v58 = vld [vmem:[%s3963_s23 + $0xc4] ss:$8 sps:$4 sm:$0xff]  }
  0x1b   :  { %1420 = vmatpush1.bf16.msra.mxu0 %v2976_v22  ;;  %259 = vmatprep.subr.bf16.mxu1 %v2981_v23  ;;  %v3034_v59 = vld [vmem:[%s3963_s23 + $0x304] ss:$8 sps:$4 sm:$0xff]   ;;  %v3028_v60 = vld [vmem:[%s3963_s23 + $0xc0] ss:$8 sps:$4 sm:$0xff]   ;;  %v3037_v63 = vld [vmem:[%s3963_s23 + $0xd4] ss:$8 sps:$4 sm:$0xff]  }
  0x1c   :  { %1421 = vmatprep.subr.bf16.mxu0 %v2984_v24  ;;  %190 = vmatprep.mubr.bf16.mxu1 %v3199_v1  ;;  %v3032_v62 = vld [vmem:[%s3963_s23 + $0x300] ss:$8 sps:$4 sm:$0xff]   ;;  %v3040_v0 = vld [vmem:[%s3963_s23 + $0x314] ss:$8 sps:$4 sm:$0xff]   ;;  %v3035_v2 = vld [vmem:[%s3963_s23 + $0xd0] ss:$8 sps:$4 sm:$0xff]  }
  0x1d   :  { %1331 = vmatprep.mubr.bf16.mxu0 %v3199_v1  ;;  %v3038_v3 = vld [vmem:[%s3963_s23 + $0x310] ss:$8 sps:$4 sm:$0xff]   ;;  %v3044_v4 = vld [vmem:[%s3963_s23 + $0xe4] ss:$8 sps:$4 sm:$0xff]   ;;  %v3042_v7 = vld [vmem:[%s3963_s23 + $0xe0] ss:$8 sps:$4 sm:$0xff]  }
  0x1e   :  { %260 = vmatpush1.bf16.msra.mxu1 %v2979_v25  ;;  %v3048_v5 = vld [vmem:[%s3963_s23 + $0x324] ss:$8 sps:$4 sm:$0xff]   ;;  %v3046_v9 = vld [vmem:[%s3963_s23 + $0x320] ss:$8 sps:$4 sm:$0xff]   ;;  %v3051_v10 = vld [vmem:[%s3963_s23 + $0xf4] ss:$8 sps:$4 sm:$0xff]  }
  0x1f   :  { %1422 = vmatpush1.bf16.msra.mxu0 %v2982_v26  ;;  %261 = vmatprep.subr.bf16.mxu1 %v2988_v28  ;;  %v3041_v6 = vld [vmem:[%s3937_s2 + $0x8] sm:$0xff]   ;;  %v3054_v11 = vld [vmem:[%s3963_s23 + $0x334] ss:$8 sps:$4 sm:$0xff]   ;;  %v3049_v12 = vld [vmem:[%s3963_s23 + $0xf0] ss:$8 sps:$4 sm:$0xff]  }
  0x20   :  { %1423 = vmatprep.subr.bf16.mxu0 %v2992_v30  ;;  %v3045_v8 = vld [vmem:[%s3938_s11 + $0x8] sm:$0xff]   ;;  %v3052_v13 = vld [vmem:[%s3963_s23 + $0x330] ss:$8 sps:$4 sm:$0xff]   ;;  %v3055_v14 = vld [vmem:[%s3939_s3] sm:$0xff]  }
  0x21   :  { %2469 = vmatmul.mubr.msk.bf16.gmra.mrb[4].mxu1 %vm141_vm0, %v2985_v27  ;;  %v3058_v15 = vld [vmem:[%s3963_s23 + $0x104] ss:$8 sps:$4 sm:$0xff]   ;;  %v3056_v17 = vld [vmem:[%s3963_s23 + $0x100] ss:$8 sps:$4 sm:$0xff]   ;;  %v3065_v20 = vld [vmem:[%s3963_s23 + $0x114] ss:$8 sps:$4 sm:$0xff]  }
  0x22   :  { %2641 = vmatmul.mubr.msk.bf16.gmra.mrb[4].mxu0 %vm141_vm0, %v2989_v31  ;;  %262 = vmatpush1.bf16.msra.mxu1 %v2986_v29  ;;  %v3062_v16 = vld [vmem:[%s3963_s23 + $0x344] ss:$8 sps:$4 sm:$0xff]   ;;  %v3060_v19 = vld [vmem:[%s3963_s23 + $0x340] ss:$8 sps:$4 sm:$0xff]   ;;  %v3068_v21 = vld [vmem:[%s3963_s23 + $0x354] ss:$8 sps:$4 sm:$0xff]  }
  0x23   :  { %1424 = vmatpush1.bf16.msra.mxu0 %v2990_v32  ;;  %263 = vmatprep.subr.bf16.mxu1 %v2995_v33  ;;  %v3059_v18 = vld [vmem:[%s3940_s12] sm:$0xff]   ;;  %v3063_v22 = vld [vmem:[%s3963_s23 + $0x110] ss:$8 sps:$4 sm:$0xff]   ;;  %v3069_v26 = vld [vmem:[%s3939_s3 + $0x8] sm:$0xff]  }
  0x24   :  { %1425 = vmatprep.subr.bf16.mxu0 %v2998_v34  ;;  %289 = vmatprep.mubr.bf16.mxu1 %v3199_v1  ;;  %v3066_v23 = vld [vmem:[%s3963_s23 + $0x350] ss:$8 sps:$4 sm:$0xff]   ;;  %v3072_v24 = vld [vmem:[%s3963_s23 + $0x124] ss:$8 sps:$4 sm:$0xff]   ;;  %v3070_v27 = vld [vmem:[%s3963_s23 + $0x120] ss:$8 sps:$4 sm:$0xff]  }
  0x25   :  { %1451 = vmatprep.mubr.bf16.mxu0 %v3199_v1  ;;  %v3076_v25 = vld [vmem:[%s3963_s23 + $0x364] ss:$8 sps:$4 sm:$0xff]   ;;  %v3074_v29 = vld [vmem:[%s3963_s23 + $0x360] ss:$8 sps:$4 sm:$0xff]   ;;  %v3079_v30 = vld [vmem:[%s3963_s23 + $0x134] ss:$8 sps:$4 sm:$0xff]  }
  0x26   :  { %264 = vmatpush1.bf16.msra.mxu1 %v2993_v35  ;;  %v3073_v28 = vld [vmem:[%s3940_s12 + $0x8] sm:$0xff]   ;;  %v3082_v31 = vld [vmem:[%s3963_s23 + $0x374] ss:$8 sps:$4 sm:$0xff]   ;;  %v3077_v32 = vld [vmem:[%s3963_s23 + $0x130] ss:$8 sps:$4 sm:$0xff]  }
  0x27   :  { %1426 = vmatpush1.bf16.msra.mxu0 %v2996_v36  ;;  %379 = vmatprep.subr.bf16.mxu1 %v3002_v38  ;;  %v3080_v33 = vld [vmem:[%s3963_s23 + $0x370] ss:$8 sps:$4 sm:$0xff]   ;;  %v3086_v34 = vld [vmem:[%s3963_s23 + $0x144] ss:$8 sps:$4 sm:$0xff]  }
  0x28   :  { %1549 = vmatprep.subr.bf16.mxu0 %v3006_v39  ;;  %v3083_v35 = vld [vmem:[%s3941_s4] sm:$0xff]  }
  0x29   :  { %2480 = vmatmul.mubr.msk.bf16.vlgmr.msra.gmra.mrb[0].mxu1 %vm141_vm0, %v2999_v37  ;;  %v3090_v36 = vld [vmem:[%s3963_s23 + $0x384] ss:$8 sps:$4 sm:$0xff]   ;;  %v3084_v37 = vld [vmem:[%s3963_s23 + $0x140] ss:$8 sps:$4 sm:$0xff]  }
  0x2a   :  { %2660 = vmatmul.mubr.msk.bf16.vlgmr.msra.gmra.mrb[0].mxu0 %vm141_vm0, %v3003_v41  ;;  %380 = vmatpush1.bf16.msra.mxu1 %v3000_v40  ;;  %v3087_v38 = vld [vmem:[%s3942_s13] sm:$0xff]   ;;  %v3093_v40 = vld [vmem:[%s3963_s23 + $0x154] ss:$8 sps:$4 sm:$0xff]  }
  0x2b   :  { %1550 = vmatpush1.bf16.msra.mxu0 %v3004_v42  ;;  %381 = vmatprep.subr.bf16.mxu1 %v3009_v43  ;;  %v3088_v39 = vld [vmem:[%s3963_s23 + $0x380] ss:$8 sps:$4 sm:$0xff]   ;;  %v3096_v41 = vld [vmem:[%s3963_s23 + $0x394] ss:$8 sps:$4 sm:$0xff]   ;;  %v3091_v42 = vld [vmem:[%s3963_s23 + $0x150] ss:$8 sps:$4 sm:$0xff]  }
  0x2c   :  { %1551 = vmatprep.subr.bf16.mxu0 %v3012_v44  ;;  %299 = vmatprep.mubr.bf16.mxu1 %v3199_v1  ;;  %v3094_v43 = vld [vmem:[%s3963_s23 + $0x390] ss:$8 sps:$4 sm:$0xff]   ;;  %v3100_v44 = vld [vmem:[%s3963_s23 + $0x164] ss:$8 sps:$4 sm:$0xff]  }
  0x2d   :  { %1461 = vmatprep.mubr.bf16.mxu0 %v3199_v1 }
  0x2e   :  { %382 = vmatpush1.bf16.msra.mxu1 %v3007_v45  ;;  %v3104_v45 = vld [vmem:[%s3963_s23 + $0x3a4] ss:$8 sps:$4 sm:$0xff]  }
  0x2f   :  { %1552 = vmatpush1.bf16.msra.mxu0 %v3010_v46  ;;  %383 = vmatprep.subr.bf16.mxu1 %v3016_v47  ;;  %v3097_v46 = vld [vmem:[%s3941_s4 + $0x8] sm:$0xff]  }
  0x30   :  { %1553 = vmatprep.subr.bf16.mxu0 %v3020_v48  ;;  %v3101_v47 = vld [vmem:[%s3942_s13 + $0x8] sm:$0xff]  }
  0x31   :  { %2481 = vmatmul.mubr.msk.bf16.gmra.mrb[4].mxu1 %vm141_vm0, %v3013_v49  ;;  %v3098_v48 = vld [vmem:[%s3963_s23 + $0x160] ss:$8 sps:$4 sm:$0xff]  }
  0x32   :  { %2661 = vmatmul.mubr.msk.bf16.gmra.mrb[4].mxu0 %vm141_vm0, %v3017_v51  ;;  %384 = vmatpush1.bf16.msra.mxu1 %v3014_v50  ;;  %v3102_v49 = vld [vmem:[%s3963_s23 + $0x3a0] ss:$8 sps:$4 sm:$0xff]   ;;  %v3107_v50 = vld [vmem:[%s3963_s23 + $0x174] ss:$8 sps:$4 sm:$0xff]  }
  0x33   :  { %1554 = vmatpush1.bf16.msra.mxu0 %v3018_v52  ;;  %385 = vmatprep.subr.bf16.mxu1 %v3023_v53  ;;  %v3110_v51 = vld [vmem:[%s3963_s23 + $0x3b4] ss:$8 sps:$4 sm:$0xff]   ;;  %v3105_v52 = vld [vmem:[%s3963_s23 + $0x170] ss:$8 sps:$4 sm:$0xff]  }
  0x34   :  { %1555 = vmatprep.subr.bf16.mxu0 %v3026_v54  ;;  %411 = vmatprep.mubr.bf16.mxu1 %v3199_v1  ;;  %v3108_v53 = vld [vmem:[%s3963_s23 + $0x3b0] ss:$8 sps:$4 sm:$0xff]   ;;  %v3111_v54 = vld [vmem:[%s3943_s5] sm:$0xff]  }
  0x35   :  { %1581 = vmatprep.mubr.bf16.mxu0 %v3199_v1 }
  0x36   :  { %386 = vmatpush1.bf16.msra.mxu1 %v3021_v55  ;;  %v3114_v55 = vld [vmem:[%s3963_s23 + $0x184] ss:$8 sps:$4 sm:$0xff]  }
  0x37   :  { %1556 = vmatpush1.bf16.msra.mxu0 %v3024_v56  ;;  %509 = vmatprep.subr.bf16.mxu1 %v3030_v58  ;;  %v3118_v56 = vld [vmem:[%s3963_s23 + $0x3c4] ss:$8 sps:$4 sm:$0xff]  }
  0x38   :  { %1679 = vmatprep.subr.bf16.mxu0 %v3034_v59  ;;  %v3115_v58 = vld [vmem:[%s3944_s14] sm:$0xff]  }
  0x39   :  { %2500 = vmatmul.mubr.msk.bf16.vlgmr.msra.gmra.mrb[0].mxu1 %vm141_vm0, %v3027_v57  ;;  %v3112_v57 = vld [vmem:[%s3963_s23 + $0x180] ss:$8 sps:$4 sm:$0xff]  }
  0x3a   :  { %2680 = vmatmul.mubr.msk.bf16.vlgmr.msra.gmra.mrb[0].mxu0 %vm141_vm0, %v3031_v61  ;;  %510 = vmatpush1.bf16.msra.mxu1 %v3028_v60  ;;  %v3116_v59 = vld [vmem:[%s3963_s23 + $0x3c0] ss:$8 sps:$4 sm:$0xff]   ;;  %v3121_v60 = vld [vmem:[%s3963_s23 + $0x194] ss:$8 sps:$4 sm:$0xff]  }
  0x3b   :  { %1680 = vmatpush1.bf16.msra.mxu0 %v3032_v62  ;;  %511 = vmatprep.subr.bf16.mxu1 %v3037_v63  ;;  %v3124_v61 = vld [vmem:[%s3963_s23 + $0x3d4] ss:$8 sps:$4 sm:$0xff]   ;;  %v3119_v62 = vld [vmem:[%s3963_s23 + $0x190] ss:$8 sps:$4 sm:$0xff]  }
  0x3c   :  { %1681 = vmatprep.subr.bf16.mxu0 %v3040_v0  ;;  %421 = vmatprep.mubr.bf16.mxu1 %v3199_v1  ;;  %v3122_v63 = vld [vmem:[%s3963_s23 + $0x3d0] ss:$8 sps:$4 sm:$0xff]   ;;  %v3128_v0 = vld [vmem:[%s3963_s23 + $0x1a4] ss:$8 sps:$4 sm:$0xff]  }
  0x3d   :  { %1591 = vmatprep.mubr.bf16.mxu0 %v3199_v1 }
  0x3e   :  { %512 = vmatpush1.bf16.msra.mxu1 %v3035_v2  ;;  %v3132_v2 = vld [vmem:[%s3963_s23 + $0x3e4] ss:$8 sps:$4 sm:$0xff]  }
  0x3f   :  { %1682 = vmatpush1.bf16.msra.mxu0 %v3038_v3  ;;  %513 = vmatprep.subr.bf16.mxu1 %v3044_v4  ;;  %v3125_v3 = vld [vmem:[%s3943_s5 + $0x8] sm:$0xff]  }
  0x40   :  { %1683 = vmatprep.subr.bf16.mxu0 %v3048_v5  ;;  %v3129_v4 = vld [vmem:[%s3944_s14 + $0x8] sm:$0xff]  }
  0x41   :  { %2501 = vmatmul.mubr.msk.bf16.gmra.mrb[4].mxu1 %vm141_vm0, %v3041_v6  ;;  %v3126_v5 = vld [vmem:[%s3963_s23 + $0x1a0] ss:$8 sps:$4 sm:$0xff]  }
  0x42   :  { %2681 = vmatmul.mubr.msk.bf16.gmra.mrb[4].mxu0 %vm141_vm0, %v3045_v8  ;;  %514 = vmatpush1.bf16.msra.mxu1 %v3042_v7  ;;  %v3130_v6 = vld [vmem:[%s3963_s23 + $0x3e0] ss:$8 sps:$4 sm:$0xff]   ;;  %v3135_v7 = vld [vmem:[%s3963_s23 + $0x1b4] ss:$8 sps:$4 sm:$0xff]  }
  0x43   :  { %1684 = vmatpush1.bf16.msra.mxu0 %v3046_v9  ;;  %515 = vmatprep.subr.bf16.mxu1 %v3051_v10  ;;  %v3138_v8 = vld [vmem:[%s3963_s23 + $0x3f4] ss:$8 sps:$4 sm:$0xff]   ;;  %v3133_v9 = vld [vmem:[%s3963_s23 + $0x1b0] ss:$8 sps:$4 sm:$0xff]  }
  0x44   :  { %1685 = vmatprep.subr.bf16.mxu0 %v3054_v11  ;;  %541 = vmatprep.mubr.bf16.mxu1 %v3199_v1  ;;  %v3136_v10 = vld [vmem:[%s3963_s23 + $0x3f0] ss:$8 sps:$4 sm:$0xff]   ;;  %v3142_v11 = vld [vmem:[%s3963_s23 + $0x1c4] ss:$8 sps:$4 sm:$0xff]  }
  0x45   :  { %1711 = vmatprep.mubr.bf16.mxu0 %v3199_v1 }
  0x46   :  { %516 = vmatpush1.bf16.msra.mxu1 %v3049_v12  ;;  %v3146_v12 = vld [vmem:[%s3963_s23 + $0x404] ss:$8 sps:$4 sm:$0xff]  }
  0x47   :  { %1686 = vmatpush1.bf16.msra.mxu0 %v3052_v13  ;;  %639 = vmatprep.subr.bf16.mxu1 %v3058_v15  ;;  %v3139_v13 = vld [vmem:[%s3945_s6] sm:$0xff]  }
  0x48   :  { %1809 = vmatprep.subr.bf16.mxu0 %v3062_v16  ;;  %v3143_v15 = vld [vmem:[%s3946_s15] sm:$0xff]  }
  0x49   :  { %2520 = vmatmul.mubr.msk.bf16.vlgmr.msra.gmra.mrb[0].mxu1 %vm141_vm0, %v3055_v14  ;;  %v3140_v14 = vld [vmem:[%s3963_s23 + $0x1c0] ss:$8 sps:$4 sm:$0xff]  }
  0x4a   :  { %2700 = vmatmul.mubr.msk.bf16.vlgmr.msra.gmra.mrb[0].mxu0 %vm141_vm0, %v3059_v18  ;;  %640 = vmatpush1.bf16.msra.mxu1 %v3056_v17  ;;  %v3144_v16 = vld [vmem:[%s3963_s23 + $0x400] ss:$8 sps:$4 sm:$0xff]   ;;  %v3149_v17 = vld [vmem:[%s3963_s23 + $0x1d4] ss:$8 sps:$4 sm:$0xff]  }
  0x4b   :  { %1810 = vmatpush1.bf16.msra.mxu0 %v3060_v19  ;;  %641 = vmatprep.subr.bf16.mxu1 %v3065_v20  ;;  %v3152_v18 = vld [vmem:[%s3963_s23 + $0x414] ss:$8 sps:$4 sm:$0xff]   ;;  %v3147_v19 = vld [vmem:[%s3963_s23 + $0x1d0] ss:$8 sps:$4 sm:$0xff]  }
  0x4c   :  { %1811 = vmatprep.subr.bf16.mxu0 %v3068_v21  ;;  %551 = vmatprep.mubr.bf16.mxu1 %v3199_v1  ;;  %v3150_v20 = vld [vmem:[%s3963_s23 + $0x410] ss:$8 sps:$4 sm:$0xff]   ;;  %v3153_v21 = vld [vmem:[%s3945_s6 + $0x8] sm:$0xff]  }
  0x4d   :  { %1721 = vmatprep.mubr.bf16.mxu0 %v3199_v1 }
  0x4e   :  { %642 = vmatpush1.bf16.msra.mxu1 %v3063_v22  ;;  %v3156_v22 = vld [vmem:[%s3963_s23 + $0x1e4] ss:$8 sps:$4 sm:$0xff]  }
  0x4f   :  { %1812 = vmatpush1.bf16.msra.mxu0 %v3066_v23  ;;  %643 = vmatprep.subr.bf16.mxu1 %v3072_v24  ;;  %v3160_v23 = vld [vmem:[%s3963_s23 + $0x424] ss:$8 sps:$4 sm:$0xff]   ;;  %v3154_v24 = vld [vmem:[%s3963_s23 + $0x1e0] ss:$8 sps:$4 sm:$0xff]  }
  0x50   :  { %1813 = vmatprep.subr.bf16.mxu0 %v3076_v25  ;;  %v3157_v25 = vld [vmem:[%s3946_s15 + $0x8] sm:$0xff]  }
  0x51   :  { %2521 = vmatmul.mubr.msk.bf16.gmra.mrb[4].mxu1 %vm141_vm0, %v3069_v26  ;;  %v3158_v26 = vld [vmem:[%s3963_s23 + $0x420] ss:$8 sps:$4 sm:$0xff]  }
  0x52   :  { %2701 = vmatmul.mubr.msk.bf16.gmra.mrb[4].mxu0 %vm141_vm0, %v3073_v28  ;;  %644 = vmatpush1.bf16.msra.mxu1 %v3070_v27  ;;  %v3163_v27 = vld [vmem:[%s3963_s23 + $0x1f4] ss:$8 sps:$4 sm:$0xff]  }
  0x53   :  { %1814 = vmatpush1.bf16.msra.mxu0 %v3074_v29  ;;  %645 = vmatprep.subr.bf16.mxu1 %v3079_v30  ;;  %v3166_v28 = vld [vmem:[%s3963_s23 + $0x434] ss:$8 sps:$4 sm:$0xff]   ;;  %v3161_v29 = vld [vmem:[%s3963_s23 + $0x1f0] ss:$8 sps:$4 sm:$0xff]  }
  0x54   :  { %1815 = vmatprep.subr.bf16.mxu0 %v3082_v31  ;;  %671 = vmatprep.mubr.bf16.mxu1 %v3199_v1  ;;  %v3164_v30 = vld [vmem:[%s3963_s23 + $0x430] ss:$8 sps:$4 sm:$0xff]   ;;  %v3170_v31 = vld [vmem:[%s3963_s23 + $0x204] ss:$8 sps:$4 sm:$0xff]  }
  0x55   :  { %1841 = vmatprep.mubr.bf16.mxu0 %v3199_v1 }
  0x56   :  { %646 = vmatpush1.bf16.msra.mxu1 %v3077_v32  ;;  %v3174_v32 = vld [vmem:[%s3963_s23 + $0x444] ss:$8 sps:$4 sm:$0xff]  }
  0x57   :  { %1816 = vmatpush1.bf16.msra.mxu0 %v3080_v33  ;;  %769 = vmatprep.subr.bf16.mxu1 %v3086_v34  ;;  %v3167_v33 = vld [vmem:[%s3947_s7] sm:$0xff]  }
  0x58   :  { %1939 = vmatprep.subr.bf16.mxu0 %v3090_v36  ;;  %v3168_v34 = vld [vmem:[%s3963_s23 + $0x200] ss:$8 sps:$4 sm:$0xff]  }
  0x59   :  { %2540 = vmatmul.mubr.msk.bf16.vlgmr.msra.gmra.mrb[0].mxu1 %vm141_vm0, %v3083_v35  ;;  %v3171_v35 = vld [vmem:[%s3948_s16] sm:$0xff]  }
  0x5a   :  { %2720 = vmatmul.mubr.msk.bf16.vlgmr.msra.gmra.mrb[0].mxu0 %vm141_vm0, %v3087_v38  ;;  %770 = vmatpush1.bf16.msra.mxu1 %v3084_v37  ;;  %v3172_v36 = vld [vmem:[%s3963_s23 + $0x440] ss:$8 sps:$4 sm:$0xff]   ;;  %v3177_v37 = vld [vmem:[%s3963_s23 + $0x214] ss:$8 sps:$4 sm:$0xff]  }
  0x5b   :  { %1940 = vmatpush1.bf16.msra.mxu0 %v3088_v39  ;;  %771 = vmatprep.subr.bf16.mxu1 %v3093_v40  ;;  %v3180_v38 = vld [vmem:[%s3963_s23 + $0x454] ss:$8 sps:$4 sm:$0xff]   ;;  %v3175_v39 = vld [vmem:[%s3963_s23 + $0x210] ss:$8 sps:$4 sm:$0xff]  }
  0x5c   :  { %1941 = vmatprep.subr.bf16.mxu0 %v3096_v41  ;;  %681 = vmatprep.mubr.bf16.mxu1 %v3199_v1  ;;  %v3178_v40 = vld [vmem:[%s3963_s23 + $0x450] ss:$8 sps:$4 sm:$0xff]   ;;  %v3184_v41 = vld [vmem:[%s3963_s23 + $0x224] ss:$8 sps:$4 sm:$0xff]  }
  0x5d   :  { %1851 = vmatprep.mubr.bf16.mxu0 %v3199_v1 }
  0x5e   :  { %772 = vmatpush1.bf16.msra.mxu1 %v3091_v42  ;;  %v3188_v42 = vld [vmem:[%s3963_s23 + $0x464] ss:$8 sps:$4 sm:$0xff]  }
  0x5f   :  { %1942 = vmatpush1.bf16.msra.mxu0 %v3094_v43  ;;  %773 = vmatprep.subr.bf16.mxu1 %v3100_v44  ;;  %v3181_v43 = vld [vmem:[%s3947_s7 + $0x8] sm:$0xff]  }
  0x60   :  { %1943 = vmatprep.subr.bf16.mxu0 %v3104_v45  ;;  %v3185_v44 = vld [vmem:[%s3948_s16 + $0x8] sm:$0xff]  }
  0x61   :  { %2541 = vmatmul.mubr.msk.bf16.gmra.mrb[4].mxu1 %vm141_vm0, %v3097_v46  ;;  %v3182_v45 = vld [vmem:[%s3963_s23 + $0x220] ss:$8 sps:$4 sm:$0xff]  }
  0x62   :  { %2721 = vmatmul.mubr.msk.bf16.gmra.mrb[4].mxu0 %vm141_vm0, %v3101_v47  ;;  %774 = vmatpush1.bf16.msra.mxu1 %v3098_v48  ;;  %v3186_v46 = vld [vmem:[%s3963_s23 + $0x460] ss:$8 sps:$4 sm:$0xff]   ;;  %v3191_v47 = vld [vmem:[%s3963_s23 + $0x234] ss:$8 sps:$4 sm:$0xff]  }
  0x63   :  { %1944 = vmatpush1.bf16.msra.mxu0 %v3102_v49  ;;  %775 = vmatprep.subr.bf16.mxu1 %v3107_v50  ;;  %v3194_v48 = vld [vmem:[%s3963_s23 + $0x474] ss:$8 sps:$4 sm:$0xff]   ;;  %v3189_v49 = vld [vmem:[%s3963_s23 + $0x230] ss:$8 sps:$4 sm:$0xff]  }
  0x64   :  { %1945 = vmatprep.subr.bf16.mxu0 %v3110_v51  ;;  %801 = vmatprep.mubr.bf16.mxu1 %v3199_v1  ;;  %v3192_v50 = vld [vmem:[%s3963_s23 + $0x470] ss:$8 sps:$4 sm:$0xff]   ;;  %v3195_v51 = vld [vmem:[%s3949_s8] sm:$0xff]  }
  0x65   :  { %1971 = vmatprep.mubr.bf16.mxu0 %v3199_v1 }
  0x66   :  { %776 = vmatpush1.bf16.msra.mxu1 %v3105_v52  ;;  %v3196_v52 = vld [vmem:[%s3950_s17] sm:$0xff]  }
  0x67   :  { %1946 = vmatpush1.bf16.msra.mxu0 %v3108_v53  ;;  %899 = vmatprep.subr.bf16.mxu1 %v3114_v55  ;;  %v3197_v53 = vld [vmem:[%s3949_s8 + $0x8] sm:$0xff]   ;;  %v2392_v55 = vlaneseq }
  0x68   :  { %2069 = vmatprep.subr.bf16.mxu0 %v3118_v56 }
  0x69   :  { %2560 = vmatmul.mubr.msk.bf16.vlgmr.msra.gmra.mrb[0].mxu1 %vm141_vm0, %v3111_v54  ;;  %v3198_v54 = vld [vmem:[%s3950_s17 + $0x8] sm:$0xff]   ;;  %v2393_v56 = vshrl.u32 %v2392_v55, 7 }
  0x6a   :  { %2740 = vmatmul.mubr.msk.bf16.vlgmr.msra.gmra.mrb[0].mxu0 %vm141_vm0, %v3115_v58  ;;  %900 = vmatpush1.bf16.msra.mxu1 %v3112_v57  ;;  %v2390_v58 = vld [vmem:[%s3951_s19] sm:$0x3] }
  0x6b   :  { %2070 = vmatpush1.bf16.msra.mxu0 %v3116_v59  ;;  %901 = vmatprep.subr.bf16.mxu1 %v3121_v60  ;;  %v2394_v57 = vsub.s32 0, %v2393_v56 }
  0x6c   :  { %2071 = vmatprep.subr.bf16.mxu0 %v3124_v61  ;;  %811 = vmatprep.mubr.bf16.mxu1 %v3199_v1 }
  0x6d   :  { %1981 = vmatprep.mubr.bf16.mxu0 %v3199_v1  ;;  %v2395_v59 = vrot.slane %v2390_v58, %v2394_v57 }
  0x6e   :  { %902 = vmatpush1.bf16.msra.mxu1 %v3119_v62 }
  0x6f   :  { %2072 = vmatpush1.bf16.msra.mxu0 %v3122_v63  ;;  %903 = vmatprep.subr.bf16.mxu1 %v3128_v0 }
  0x70   :  { %2073 = vmatprep.subr.bf16.mxu0 %v3132_v2 }
  0x71   :  { %2561 = vmatmul.mubr.msk.bf16.gmra.mrb[4].mxu1 %vm141_vm0, %v3125_v3 }
  0x72   :  { %2741 = vmatmul.mubr.msk.bf16.gmra.mrb[4].mxu0 %vm141_vm0, %v3129_v4  ;;  %904 = vmatpush1.bf16.msra.mxu1 %v3126_v5 }
  0x73   :  { %2074 = vmatpush1.bf16.msra.mxu0 %v3130_v6  ;;  %905 = vmatprep.subr.bf16.mxu1 %v3135_v7 }
  0x74   :  { %2075 = vmatprep.subr.bf16.mxu0 %v3138_v8  ;;  %931 = vmatprep.mubr.bf16.mxu1 %v3199_v1 }
  0x75   :  { %2101 = vmatprep.mubr.bf16.mxu0 %v3199_v1 }
  0x76   :  { %906 = vmatpush1.bf16.msra.mxu1 %v3133_v9 }
  0x77   :  { %2076 = vmatpush1.bf16.msra.mxu0 %v3136_v10  ;;  %1029 = vmatprep.subr.bf16.mxu1 %v3142_v11 }
  0x78   :  { %2199 = vmatprep.subr.bf16.mxu0 %v3146_v12 }
  0x79   :  { %2580 = vmatmul.mubr.msk.bf16.vlgmr.msra.gmra.mrb[0].mxu1 %vm141_vm0, %v3139_v13 }
  0x7a   :  { %2760 = vmatmul.mubr.msk.bf16.vlgmr.msra.gmra.mrb[0].mxu0 %vm141_vm0, %v3143_v15  ;;  %1030 = vmatpush1.bf16.msra.mxu1 %v3140_v14 }
  0x7b   :  { %2200 = vmatpush1.bf16.msra.mxu0 %v3144_v16  ;;  %1031 = vmatprep.subr.bf16.mxu1 %v3149_v17 }
  0x7c   :  { %2201 = vmatprep.subr.bf16.mxu0 %v3152_v18  ;;  %941 = vmatprep.mubr.bf16.mxu1 %v3199_v1 }
  0x7d   :  { %2111 = vmatprep.mubr.bf16.mxu0 %v3199_v1 }
  0x7e   :  { %1032 = vmatpush1.bf16.msra.mxu1 %v3147_v19 }
  0x7f   :  { %2202 = vmatpush1.bf16.msra.mxu0 %v3150_v20  ;;  %1033 = vmatprep.subr.bf16.mxu1 %v3156_v22 }
  0x80   :  { %2203 = vmatprep.subr.bf16.mxu0 %v3160_v23 }
  0x81   :  { %2581 = vmatmul.mubr.msk.bf16.gmra.mrb[4].mxu1 %vm141_vm0, %v3153_v21 }
  0x82   :  { %2761 = vmatmul.mubr.msk.bf16.gmra.mrb[4].mxu0 %vm141_vm0, %v3157_v25  ;;  %1034 = vmatpush1.bf16.msra.mxu1 %v3154_v24 }
  0x83   :  { %2204 = vmatpush1.bf16.msra.mxu0 %v3158_v26  ;;  %1035 = vmatprep.subr.bf16.mxu1 %v3163_v27 }
  0x84   :  { %2205 = vmatprep.subr.bf16.mxu0 %v3166_v28  ;;  %1061 = vmatprep.mubr.bf16.mxu1 %v3199_v1 }
  0x85   :  { %2231 = vmatprep.mubr.bf16.mxu0 %v3199_v1 }
  0x86   :  { %1036 = vmatpush1.bf16.msra.mxu1 %v3161_v29 }
  0x87   :  { %2206 = vmatpush1.bf16.msra.mxu0 %v3164_v30  ;;  %1159 = vmatprep.subr.bf16.mxu1 %v3170_v31 }
  0x88   :  { %2329 = vmatprep.subr.bf16.mxu0 %v3174_v32 }
  0x89   :  { %2600 = vmatmul.mubr.msk.bf16.vlgmr.msra.gmra.mrb[0].mxu1 %vm141_vm0, %v3167_v33 }
  0x8a   :  { %2780 = vmatmul.mubr.msk.bf16.vlgmr.msra.gmra.mrb[0].mxu0 %vm141_vm0, %v3171_v35  ;;  %1160 = vmatpush1.bf16.msra.mxu1 %v3168_v34 }
  0x8b   :  { %2330 = vmatpush1.bf16.msra.mxu0 %v3172_v36  ;;  %1161 = vmatprep.subr.bf16.mxu1 %v3177_v37 }
  0x8c   :  { %2331 = vmatprep.subr.bf16.mxu0 %v3180_v38  ;;  %1071 = vmatprep.mubr.bf16.mxu1 %v3199_v1 }
  0x8d   :  { %2241 = vmatprep.mubr.bf16.mxu0 %v3199_v1 }
  0x8e   :  { %1162 = vmatpush1.bf16.msra.mxu1 %v3175_v39 }
  0x8f   :  { %2332 = vmatpush1.bf16.msra.mxu0 %v3178_v40  ;;  %1163 = vmatprep.subr.bf16.mxu1 %v3184_v41 }
  0x90   :  { %2333 = vmatprep.subr.bf16.mxu0 %v3188_v42 }
  0x91   :  { %2601 = vmatmul.mubr.msk.bf16.gmra.mrb[4].mxu1 %vm141_vm0, %v3181_v43 }
  0x92   :  { %2781 = vmatmul.mubr.msk.bf16.gmra.mrb[4].mxu0 %vm141_vm0, %v3185_v44  ;;  %1164 = vmatpush1.bf16.msra.mxu1 %v3182_v45 }
  0x93   :  { %2334 = vmatpush1.bf16.msra.mxu0 %v3186_v46  ;;  %1165 = vmatprep.subr.bf16.mxu1 %v3191_v47 }
  0x94   :  { %2335 = vmatprep.subr.bf16.mxu0 %v3194_v48  ;;  %1191 = vmatprep.mubr.bf16.mxu1 %v3199_v1 }
  0x95   :  { %2361 = vmatprep.mubr.bf16.mxu0 %v3199_v1 }
  0x96   :  { %1166 = vmatpush1.bf16.msra.mxu1 %v3189_v49 }
  0x97   :  { %2336 = vmatpush1.bf16.msra.mxu0 %v3192_v50 }
  0x99   :  { %2620 = vmatmul.mubr.msk.bf16.vlgmr.msra.gmra.mrb[0].mxu1 %vm141_vm0, %v3195_v51 }
  0x9a   :  { %2800 = vmatmul.mubr.msk.bf16.vlgmr.msra.gmra.mrb[0].mxu0 %vm141_vm0, %v3196_v52  ;;  %1201 = vmatprep.mubr.bf16.mxu1 %v3199_v1 }
  0x9b   :  { %2371 = vmatprep.mubr.bf16.mxu0 %v3199_v1  ;;  %v2398_v1 = vsub.s32 1, %v2393_v56 }
  0x9d   :  { %v2399_v62 = vrot.slane %v2390_v58, %v2398_v1 }
  0xa1   :  { %2621 = vmatmul.mubr.msk.bf16.gmra.mrb[4].mxu1 %vm141_vm0, %v3197_v53 }
  0xa2   :  { %2801 = vmatmul.mubr.msk.bf16.gmra.mrb[4].mxu0 %vm141_vm0, %v3198_v54 }
 0x16c   :  { %v1193_v60 = vpop.f32.mrb[0].mxu1 }
 0x16d   :  { %v2363_v61 = vpop.f32.mrb[0].mxu0  ;;  %v1195_v0 = vpop.f32.mrb[1].mxu1 }
 0x16e   :  { %v2810_v63 = vadd.f32 %v2363_v61, %v1193_v60  ;;  %v2365_v2 = vpop.f32.mrb[1].mxu0  ;;  %v1197_v4 = vpop.f32.mrb[2].mxu1 }
 0x16f   :  { %v2811_v3 = vadd.f32 %v2365_v2, %v1195_v0  ;;  %v2367_v5 = vpop.f32.mrb[2].mxu0  ;;  %v1199_v8 = vpop.f32.mrb[3].mxu1 }
 0x170   :  { %v2402_v6 = vadd.f32 %v2810_v63, %v2395_v59  ;;  %v2812_v7 = vadd.f32 %v2367_v5, %v1197_v4  ;;  %v2369_v9 = vpop.f32.mrb[3].mxu0 }
 0x171   :  { %v2403_v10 = vadd.f32 %v2811_v3, %v2399_v62  ;;  %v2813_v11 = vadd.f32 %v2369_v9, %v1199_v8 }
 0x172   :  { %v2410_v12 = vmax.f32 %v2402_v6, 0.0  ;;  %v2404_v13 = vadd.f32 %v2812_v7, %v2395_v59 }
 0x173   :  { %v2411_v14 = vmax.f32 %v2403_v10, 0.0  ;;  %v2405_v15 = vadd.f32 %v2813_v11, %v2399_v62 }
 0x174   :  { %v2412_v16 = vmax.f32 %v2404_v13, 0.0  ;;  %v1203_v19 = vpop.f32.mrb[4].mxu1 }
 0x175   :  { %v2806_v17 = vpack.c.bf16 %v2411_v14, %v2410_v12  ;;  %v2413_v18 = vmax.f32 %v2405_v15, 0.0  ;;  %v2373_v20 = vpop.f32.mrb[4].mxu0  ;;  %v1205_v22 = vpop.f32.mrb[5].mxu1 }
 0x176   :  { %v2814_v21 = vadd.f32 %v2373_v20, %v1203_v19  ;;  %v2375_v23 = vpop.f32.mrb[5].mxu0  ;;  %v1207_v26 = vpop.f32.mrb[6].mxu1 }
 0x177   :  { %2442 = vst [vmem:[%s3952_s20] sm:$0xff] %v2806_v17  ;;  %v2807_v24 = vpack.c.bf16 %v2413_v18, %v2412_v16  ;;  %v2815_v25 = vadd.f32 %v2375_v23, %v1205_v22  ;;  %v2377_v27 = vpop.f32.mrb[6].mxu0  ;;  %v1209_v30 = vpop.f32.mrb[7].mxu1 }
 0x178   :  { %v2406_v28 = vadd.f32 %v2814_v21, %v2395_v59  ;;  %v2816_v29 = vadd.f32 %v2377_v27, %v1207_v26  ;;  %v2379_v31 = vpop.f32.mrb[7].mxu0 }
 0x179   :  { %2443 = vst [vmem:[%s3952_s20 + $0x8] sm:$0xff] %v2807_v24  ;;  %v2407_v32 = vadd.f32 %v2815_v25, %v2399_v62  ;;  %v2817_v33 = vadd.f32 %v2379_v31, %v1209_v30 }
 0x17a   :  { %v2414_v34 = vmax.f32 %v2406_v28, 0.0  ;;  %v2408_v35 = vadd.f32 %v2816_v29, %v2395_v59 }
 0x17b   :  { %v2415_v36 = vmax.f32 %v2407_v32, 0.0  ;;  %v2409_v37 = vadd.f32 %v2817_v33, %v2399_v62 }
 0x17c   :  { %v2416_v38 = vmax.f32 %v2408_v35, 0.0 }
 0x17d   :  { %v2808_v39 = vpack.c.bf16 %v2415_v36, %v2414_v34  ;;  %v2417_v40 = vmax.f32 %v2409_v37, 0.0 }
 0x17f   :  { %2444 = vst [vmem:[%s3952_s20 + $0x10] sm:$0xff] %v2808_v39  ;;  %v2809_v41 = vpack.c.bf16 %v2417_v40, %v2416_v38 }
 0x181   :  { %2445 = vst [vmem:[%s3952_s20 + $0x18] sm:$0xff] %v2809_v41 }

// kernel: stem_forward.17
= control target key start
LH: loop header
LB: loop body
LE: loop exit
PB: predicated region body
PF: predicated region fallthrough
CT: control target
= control target key end

     0   :  { %vm221_vm0 = vcmask 523264   ;;  %s2782_s24 = smov 64   ;;  %s3670_s9 = inlined_call_operand.vmem [shape: bf16[9,192,192], index: 9, kind: input, shape index: {}]   ;;  %s3671_s0 = inlined_call_operand.vmem [shape: bf16[16,192], index: 0, kind: input, shape index: {}]   ;;  %s3672_s1 = inlined_call_operand.vmem [shape: bf16[16,192], index: 1, kind: input, shape index: {}]   ;;  %s3673_s2 = inlined_call_operand.vmem [shape: bf16[16,192], index: 2, kind: input, shape index: {}]   ;;  %s3674_s3 = inlined_call_operand.vmem [shape: bf16[16,192], index: 3, kind: input, shape index: {}]   ;;  %s3675_s4 = inlined_call_operand.vmem [shape: bf16[16,192], index: 4, kind: input, shape index: {}]   ;;  %s3676_s5 = inlined_call_operand.vmem [shape: bf16[16,192], index: 5, kind: input, shape index: {}]   ;;  %s3677_s6 = inlined_call_operand.vmem [shape: bf16[16,192], index: 6, kind: input, shape index: {}]   ;;  %s3678_s7 = inlined_call_operand.vmem [shape: bf16[16,192], index: 7, kind: input, shape index: {}]   ;;  %s3679_s8 = inlined_call_operand.vmem [shape: bf16[16,192], index: 8, kind: input, shape index: {}]   ;;  %s3680_s11 = inlined_call_operand.vmem [shape: bf16[16,384], index: 11, kind: output, shape index: {}]   ;;  %s3681_s10 = inlined_call_operand.vmem [shape: f32[1,192], index: 10, kind: input, shape index: {}]  }
   0x1   :  { %v2438_v0 = vld [vmem:[%s3670_s9 + $0xc4] ss:$8 sps:$4 sm:$0xff]   ;;  %v2442_v2 = vld [vmem:[%s3670_s9 + $0xc0] ss:$8 sps:$4 sm:$0xff]   ;;  %v2444_v4 = vld [vmem:[%s3670_s9 + $0xd4] ss:$8 sps:$4 sm:$0xff]  }
   0x2   :  { %v2440_v1 = vld [vmem:[%s3670_s9 + $0x304] ss:$8 sps:$4 sm:$0xff]   ;;  %225 = vmatprep.subr.bf16.mxu1 %v2438_v0  ;;  %v2443_v3 = vld [vmem:[%s3670_s9 + $0x300] ss:$8 sps:$4 sm:$0xff]   ;;  %v2446_v5 = vld [vmem:[%s3670_s9 + $0x314] ss:$8 sps:$4 sm:$0xff]  }
   0x3   :  { %1014 = vmatprep.subr.bf16.mxu0 %v2440_v1  ;;  %226 = vmatpush1.bf16.msra.mxu1 %v2442_v2  ;;  %v2448_v6 = vld [vmem:[%s3670_s9 + $0xd0] ss:$8 sps:$4 sm:$0xff]   ;;  %v2450_v8 = vld [vmem:[%s3670_s9 + $0xe4] ss:$8 sps:$4 sm:$0xff]   ;;  %v2454_v10 = vld [vmem:[%s3670_s9 + $0xe0] ss:$8 sps:$4 sm:$0xff]  }
   0x4   :  { %1015 = vmatpush1.bf16.msra.mxu0 %v2443_v3  ;;  %227 = vmatprep.subr.bf16.mxu1 %v2444_v4  ;;  %v2449_v7 = vld [vmem:[%s3670_s9 + $0x310] ss:$8 sps:$4 sm:$0xff]   ;;  %v2452_v9 = vld [vmem:[%s3670_s9 + $0x324] ss:$8 sps:$4 sm:$0xff]   ;;  %v2455_v11 = vld [vmem:[%s3670_s9 + $0x320] ss:$8 sps:$4 sm:$0xff]  }
   0x5   :  { %1016 = vmatprep.subr.bf16.mxu0 %v2446_v5  ;;  %v2456_v12 = vld [vmem:[%s3670_s9 + $0xf4] ss:$8 sps:$4 sm:$0xff]   ;;  %v2460_v14 = vld [vmem:[%s3670_s9 + $0xf0] ss:$8 sps:$4 sm:$0xff]   ;;  %v2462_v16 = vld [vmem:[%s3670_s9 + $0x104] ss:$8 sps:$4 sm:$0xff]  }
   0x6   :  { %v2458_v13 = vld [vmem:[%s3670_s9 + $0x334] ss:$8 sps:$4 sm:$0xff]   ;;  %v2461_v15 = vld [vmem:[%s3670_s9 + $0x330] ss:$8 sps:$4 sm:$0xff]   ;;  %v2464_v17 = vld [vmem:[%s3670_s9 + $0x344] ss:$8 sps:$4 sm:$0xff]  }
   0x7   :  { %228 = vmatpush1.bf16.msra.mxu1 %v2448_v6  ;;  %v2466_v18 = vld [vmem:[%s3670_s9 + $0x100] ss:$8 sps:$4 sm:$0xff]   ;;  %v2468_v20 = vld [vmem:[%s3670_s9 + $0x114] ss:$8 sps:$4 sm:$0xff]   ;;  %v2472_v22 = vld [vmem:[%s3670_s9 + $0x110] ss:$8 sps:$4 sm:$0xff]  }
   0x8   :  { %1017 = vmatpush1.bf16.msra.mxu0 %v2449_v7  ;;  %229 = vmatprep.subr.bf16.mxu1 %v2450_v8  ;;  %v2467_v19 = vld [vmem:[%s3670_s9 + $0x340] ss:$8 sps:$4 sm:$0xff]   ;;  %v2470_v21 = vld [vmem:[%s3670_s9 + $0x354] ss:$8 sps:$4 sm:$0xff]   ;;  %v2473_v23 = vld [vmem:[%s3670_s9 + $0x350] ss:$8 sps:$4 sm:$0xff]  }
   0x9   :  { %1018 = vmatprep.subr.bf16.mxu0 %v2452_v9  ;;  %v2474_v24 = vld [vmem:[%s3670_s9 + $0x124] ss:$8 sps:$4 sm:$0xff]   ;;  %v2478_v26 = vld [vmem:[%s3670_s9 + $0x120] ss:$8 sps:$4 sm:$0xff]   ;;  %v2480_v28 = vld [vmem:[%s3670_s9 + $0x134] ss:$8 sps:$4 sm:$0xff]  }
   0xa   :  { %v2476_v25 = vld [vmem:[%s3670_s9 + $0x364] ss:$8 sps:$4 sm:$0xff]   ;;  %v2479_v27 = vld [vmem:[%s3670_s9 + $0x360] ss:$8 sps:$4 sm:$0xff]   ;;  %v2482_v29 = vld [vmem:[%s3670_s9 + $0x374] ss:$8 sps:$4 sm:$0xff]  }
   0xb   :  { %230 = vmatpush1.bf16.msra.mxu1 %v2454_v10  ;;  %v2484_v30 = vld [vmem:[%s3670_s9 + $0x130] ss:$8 sps:$4 sm:$0xff]   ;;  %v2486_v32 = vld [vmem:[%s3670_s9 + $0x144] ss:$8 sps:$4 sm:$0xff]   ;;  %v2490_v34 = vld [vmem:[%s3670_s9 + $0x140] ss:$8 sps:$4 sm:$0xff]  }
   0xc   :  { %1019 = vmatpush1.bf16.msra.mxu0 %v2455_v11  ;;  %231 = vmatprep.subr.bf16.mxu1 %v2456_v12  ;;  %v2485_v31 = vld [vmem:[%s3670_s9 + $0x370] ss:$8 sps:$4 sm:$0xff]   ;;  %v2488_v33 = vld [vmem:[%s3670_s9 + $0x384] ss:$8 sps:$4 sm:$0xff]   ;;  %v2491_v35 = vld [vmem:[%s3670_s9 + $0x380] ss:$8 sps:$4 sm:$0xff]  }
   0xd   :  { %1020 = vmatprep.subr.bf16.mxu0 %v2458_v13  ;;  %v2492_v36 = vld [vmem:[%s3670_s9 + $0x154] ss:$8 sps:$4 sm:$0xff]   ;;  %v2957_v37 = vld [vmem:[%s3671_s0] sm:$0xff]  ;;  %v2970_v40 = vld [vmem:[%s3671_s0 + $0x8] sm:$0xff] }
   0xe   :  { %v2962_v38 = vld [vmem:[%s3672_s1] sm:$0xff]  ;;  %v2494_v39 = vld [vmem:[%s3670_s9 + $0x394] ss:$8 sps:$4 sm:$0xff]   ;;  %v2975_v41 = vld [vmem:[%s3672_s1 + $0x8] sm:$0xff] }
   0xf   :  { %232 = vmatpush1.bf16.msra.mxu1 %v2460_v14  ;;  %v1907_v42 = vmax.bf16 %v2962_v38, %v2957_v37  ;;  %v2496_v43 = vld [vmem:[%s3670_s9 + $0x150] ss:$8 sps:$4 sm:$0xff]   ;;  %v1989_v45 = vcombine.high %v2962_v38, %v2975_v41  ;;  %v2990_v46 = vld [vmem:[%s3673_s2] sm:$0xff]  ;;  %v1908_v47 = vmax.bf16 %v2975_v41, %v2970_v40  ;;  %v3003_v50 = vld [vmem:[%s3673_s2 + $0x8] sm:$0xff]  ;;  %v1988_v12 = vcombine.low %v2962_v38, %v2975_v41 }
  0x10   :  { %1021 = vmatpush1.bf16.msra.mxu0 %v2461_v15  ;;  %233 = vmatprep.subr.bf16.mxu1 %v2462_v16  ;;  %v2497_v44 = vld [vmem:[%s3670_s9 + $0x390] ss:$8 sps:$4 sm:$0xff]   ;;  %v2498_v48 = vld [vmem:[%s3670_s9 + $0x164] ss:$8 sps:$4 sm:$0xff]   ;;  %v2502_v59 = vld [vmem:[%s3670_s9 + $0x160] ss:$8 sps:$4 sm:$0xff]   ;;  %v2016_v16 = vcombine.high %v2957_v37, %v2970_v40 }
  0x11   :  { %1022 = vmatprep.subr.bf16.mxu0 %v2464_v17  ;;  %v2500_v49 = vld [vmem:[%s3670_s9 + $0x3a4] ss:$8 sps:$4 sm:$0xff]   ;;  %v1909_v51 = vmax.bf16 %v1907_v42, %v2990_v46  ;;  %v1910_v52 = vmax.bf16 %v1908_v47, %v3003_v50  ;;  %v2503_v60 = vld [vmem:[%s3670_s9 + $0x3a0] ss:$8 sps:$4 sm:$0xff]   ;;  %2014 = vmatprep.mubr.msk.bf16.mxu1 %vm221_vm0, %v1989_v45  ;;  %v2504_v62 = vld [vmem:[%s3670_s9 + $0x174] ss:$8 sps:$4 sm:$0xff]  }
  0x12   :  { %v3010_v53 = vld [vmem:[%s3674_s3] sm:$0xff]  ;;  %v856_v55 = vld [vmem:[%s3675_s4 + $0x8] sm:$0xff]  ;;  %v2506_v63 = vld [vmem:[%s3670_s9 + $0x3b4] ss:$8 sps:$4 sm:$0xff]  }
  0x13   :  { %234 = vmatpush1.bf16.msra.mxu1 %v2466_v18  ;;  %v855_v54 = vld [vmem:[%s3675_s4] sm:$0xff]  ;;  %v3021_v56 = vld [vmem:[%s3674_s3 + $0x8] sm:$0xff]  ;;  %v1911_v58 = vmax.bf16 %v1909_v51, %v3010_v53  ;;  %v2508_v6 = vld [vmem:[%s3670_s9 + $0x170] ss:$8 sps:$4 sm:$0xff]  }
  0x14   :  { %1023 = vmatpush1.bf16.msra.mxu0 %v2467_v19  ;;  %235 = vmatprep.subr.bf16.mxu1 %v2468_v20  ;;  %v2169_v57 = vcombine.high %v855_v54, %v856_v55  ;;  %v1912_v61 = vmax.bf16 %v1910_v52, %v3021_v56  ;;  %v3044_v1 = vld [vmem:[%s3676_s5] sm:$0xff]  ;;  %v3051_v3 = vld [vmem:[%s3676_s5 + $0x8] sm:$0xff]  ;;  %v2509_v7 = vld [vmem:[%s3670_s9 + $0x3b0] ss:$8 sps:$4 sm:$0xff]   ;;  %v2168_v13 = vcombine.low %v855_v54, %v856_v55 }
  0x15   :  { %1024 = vmatprep.subr.bf16.mxu0 %v2470_v21  ;;  %v3039_v0 = vmax.bf16 %v1911_v58, %v855_v54  ;;  %v2513_v8 = vld [vmem:[%s3670_s9 + $0x4] ss:$8 sps:$4 sm:$0xff]   ;;  %v2511_v10 = vld [vmem:[%s3670_s9] ss:$8 sps:$4 sm:$0xff]   ;;  %v2522_v14 = vld [vmem:[%s3670_s9 + $0x14] ss:$8 sps:$4 sm:$0xff]   ;;  %v2220_v17 = vcombine.high %v3044_v1, %v3051_v3 }
  0x16   :  { %2194 = vmatprep.mubr.msk.bf16.mxu0 %vm221_vm0, %v2169_v57  ;;  %v3046_v2 = vmax.bf16 %v1912_v61, %v856_v55  ;;  %v2517_v9 = vld [vmem:[%s3670_s9 + $0x3c4] ss:$8 sps:$4 sm:$0xff]   ;;  %v2515_v11 = vld [vmem:[%s3670_s9 + $0x3c0] ss:$8 sps:$4 sm:$0xff]   ;;  %v2525_v15 = vld [vmem:[%s3670_s9 + $0x3d4] ss:$8 sps:$4 sm:$0xff]  }
  0x17   :  { %236 = vmatpush1.bf16.msra.mxu1 %v2472_v22  ;;  %v1915_v4 = vmax.bf16 %v3039_v0, %v3044_v1  ;;  %v2520_v18 = vld [vmem:[%s3670_s9 + $0x10] ss:$8 sps:$4 sm:$0xff]   ;;  %v2528_v20 = vld [vmem:[%s3670_s9 + $0x24] ss:$8 sps:$4 sm:$0xff]   ;;  %v2526_v22 = vld [vmem:[%s3670_s9 + $0x20] ss:$8 sps:$4 sm:$0xff]  }
  0x18   :  { %1025 = vmatpush1.bf16.msra.mxu0 %v2473_v23  ;;  %237 = vmatprep.subr.bf16.mxu1 %v2474_v24  ;;  %v1916_v5 = vmax.bf16 %v3046_v2, %v3051_v3  ;;  %v2523_v19 = vld [vmem:[%s3670_s9 + $0x3d0] ss:$8 sps:$4 sm:$0xff]   ;;  %v2531_v21 = vld [vmem:[%s3670_s9 + $0x3e4] ss:$8 sps:$4 sm:$0xff]   ;;  %v2529_v23 = vld [vmem:[%s3670_s9 + $0x3e0] ss:$8 sps:$4 sm:$0xff]  }
  0x19   :  { %1026 = vmatprep.subr.bf16.mxu0 %v2476_v25  ;;  %v2534_v24 = vld [vmem:[%s3670_s9 + $0x34] ss:$8 sps:$4 sm:$0xff]   ;;  %v2555_v38 = vld [vmem:[%s3670_s9 + $0x424] ss:$8 sps:$4 sm:$0xff]   ;;  %v2553_v41 = vld [vmem:[%s3670_s9 + $0x420] ss:$8 sps:$4 sm:$0xff]  }
  0x1a   :  { %v2537_v25 = vld [vmem:[%s3670_s9 + $0x3f4] ss:$8 sps:$4 sm:$0xff]   ;;  %v2559_v45 = vld [vmem:[%s3670_s9 + $0x430] ss:$8 sps:$4 sm:$0xff]   ;;  %v2564_v47 = vld [vmem:[%s3670_s9 + $0x84] ss:$8 sps:$4 sm:$0xff]  }
  0x1b   :  { %238 = vmatpush1.bf16.msra.mxu1 %v2478_v26  ;;  %v2532_v26 = vld [vmem:[%s3670_s9 + $0x30] ss:$8 sps:$4 sm:$0xff]   ;;  %v2558_v42 = vld [vmem:[%s3670_s9 + $0x74] ss:$8 sps:$4 sm:$0xff]   ;;  %v2565_v51 = vld [vmem:[%s3670_s9 + $0x440] ss:$8 sps:$4 sm:$0xff]  }
  0x1c   :  { %1027 = vmatpush1.bf16.msra.mxu0 %v2479_v27  ;;  %239 = vmatprep.subr.bf16.mxu1 %v2480_v28  ;;  %v2535_v27 = vld [vmem:[%s3670_s9 + $0x3f0] ss:$8 sps:$4 sm:$0xff]   ;;  %v2540_v28 = vld [vmem:[%s3670_s9 + $0x44] ss:$8 sps:$4 sm:$0xff]   ;;  %v2570_v52 = vld [vmem:[%s3670_s9 + $0x94] ss:$8 sps:$4 sm:$0xff]  }
  0x1d   :  { %1028 = vmatprep.subr.bf16.mxu0 %v2482_v29  ;;  %v2543_v29 = vld [vmem:[%s3670_s9 + $0x404] ss:$8 sps:$4 sm:$0xff]   ;;  %v2573_v54 = vld [vmem:[%s3670_s9 + $0x454] ss:$8 sps:$4 sm:$0xff]   ;;  %v2568_v55 = vld [vmem:[%s3670_s9 + $0x90] ss:$8 sps:$4 sm:$0xff]  }
  0x1e   :  { %v2571_v57 = vld [vmem:[%s3670_s9 + $0x450] ss:$8 sps:$4 sm:$0xff]   ;;  %v2576_v58 = vld [vmem:[%s3670_s9 + $0xa4] ss:$8 sps:$4 sm:$0xff]   ;;  %v2577_v61 = vld [vmem:[%s3670_s9 + $0x460] ss:$8 sps:$4 sm:$0xff]  }
  0x1f   :  { %240 = vmatpush1.bf16.msra.mxu1 %v2484_v30  ;;  %v2538_v30 = vld [vmem:[%s3670_s9 + $0x40] ss:$8 sps:$4 sm:$0xff]  }
  0x20   :  { %1029 = vmatpush1.bf16.msra.mxu0 %v2485_v31  ;;  %241 = vmatprep.subr.bf16.mxu1 %v2486_v32  ;;  %v2541_v31 = vld [vmem:[%s3670_s9 + $0x400] ss:$8 sps:$4 sm:$0xff]   ;;  %v2546_v32 = vld [vmem:[%s3670_s9 + $0x54] ss:$8 sps:$4 sm:$0xff]  }
  0x21   :  { %1030 = vmatprep.subr.bf16.mxu0 %v2488_v33  ;;  %v2549_v33 = vld [vmem:[%s3670_s9 + $0x414] ss:$8 sps:$4 sm:$0xff]  }
  0x23   :  { %242 = vmatpush1.bf16.msra.mxu1 %v2490_v34  ;;  %v2544_v34 = vld [vmem:[%s3670_s9 + $0x50] ss:$8 sps:$4 sm:$0xff]  }
  0x24   :  { %1031 = vmatpush1.bf16.msra.mxu0 %v2491_v35  ;;  %243 = vmatprep.subr.bf16.mxu1 %v2492_v36  ;;  %v2547_v35 = vld [vmem:[%s3670_s9 + $0x410] ss:$8 sps:$4 sm:$0xff]   ;;  %v2552_v36 = vld [vmem:[%s3670_s9 + $0x64] ss:$8 sps:$4 sm:$0xff]  }
  0x25   :  { %1032 = vmatprep.subr.bf16.mxu0 %v2494_v39  ;;  %v2550_v39 = vld [vmem:[%s3670_s9 + $0x60] ss:$8 sps:$4 sm:$0xff]  }
  0x27   :  { %244 = vmatpush1.bf16.msra.mxu1 %v2496_v43  ;;  %v2561_v43 = vld [vmem:[%s3670_s9 + $0x434] ss:$8 sps:$4 sm:$0xff]  }
  0x28   :  { %1033 = vmatpush1.bf16.msra.mxu0 %v2497_v44  ;;  %245 = vmatprep.subr.bf16.mxu1 %v2498_v48  ;;  %v2556_v44 = vld [vmem:[%s3670_s9 + $0x70] ss:$8 sps:$4 sm:$0xff]   ;;  %v2567_v48 = vld [vmem:[%s3670_s9 + $0x444] ss:$8 sps:$4 sm:$0xff]  }
  0x29   :  { %1034 = vmatprep.subr.bf16.mxu0 %v2500_v49  ;;  %v2562_v49 = vld [vmem:[%s3670_s9 + $0x80] ss:$8 sps:$4 sm:$0xff]  }
  0x2b   :  { %246 = vmatpush1.bf16.msra.mxu1 %v2502_v59  ;;  %v2579_v59 = vld [vmem:[%s3670_s9 + $0x464] ss:$8 sps:$4 sm:$0xff]  }
  0x2c   :  { %1035 = vmatpush1.bf16.msra.mxu0 %v2503_v60  ;;  %247 = vmatprep.subr.bf16.mxu1 %v2504_v62  ;;  %v2574_v60 = vld [vmem:[%s3670_s9 + $0xa0] ss:$8 sps:$4 sm:$0xff]   ;;  %v2582_v62 = vld [vmem:[%s3670_s9 + $0xb4] ss:$8 sps:$4 sm:$0xff]  }
  0x2d   :  { %1036 = vmatprep.subr.bf16.mxu0 %v2506_v63  ;;  %v2585_v63 = vld [vmem:[%s3670_s9 + $0x474] ss:$8 sps:$4 sm:$0xff]  }
  0x2f   :  { %248 = vmatpush1.bf16.msra.mxu1 %v2508_v6  ;;  %v2580_v6 = vld [vmem:[%s3670_s9 + $0xb0] ss:$8 sps:$4 sm:$0xff]  }
  0x30   :  { %1037 = vmatpush1.bf16.msra.mxu0 %v2509_v7  ;;  %400 = vmatprep.subr.bf16.mxu1 %v2513_v8  ;;  %v2583_v7 = vld [vmem:[%s3670_s9 + $0x470] ss:$8 sps:$4 sm:$0xff]   ;;  %v2589_v8 = vld [vmem:[%s3670_s9 + $0x184] ss:$8 sps:$4 sm:$0xff]  }
  0x31   :  { %1220 = vmatprep.subr.bf16.mxu0 %v2517_v9  ;;  %v2593_v9 = vld [vmem:[%s3670_s9 + $0x484] ss:$8 sps:$4 sm:$0xff]  }
  0x32   :  { %258 = vmatmul.mubr.bf16.vlgmr.msra.gmra.mrb[0].mxu1 %v1988_v12  ;;  %v2015_v12 = vcombine.low %v2957_v37, %v2970_v40  ;;  %v2596_v37 = vld [vmem:[%s3670_s9 + $0x190] ss:$8 sps:$4 sm:$0xff]  }
  0x33   :  { %1047 = vmatmul.mubr.bf16.vlgmr.msra.gmra.mrb[0].mxu0 %v2168_v13  ;;  %401 = vmatpush1.bf16.msra.mxu1 %v2511_v10  ;;  %v2587_v10 = vld [vmem:[%s3670_s9 + $0x180] ss:$8 sps:$4 sm:$0xff]   ;;  %v2219_v13 = vcombine.low %v3044_v1, %v3051_v3  ;;  %v2599_v40 = vld [vmem:[%s3670_s9 + $0x490] ss:$8 sps:$4 sm:$0xff]   ;;  %v2118_v1 = vcombine.high %v3010_v53, %v3021_v56  ;;  %v2680_v53 = vld [vmem:[%s3670_s9 + $0x264] ss:$8 sps:$4 sm:$0xff]  }
  0x34   :  { %1221 = vmatpush1.bf16.msra.mxu0 %v2515_v11  ;;  %402 = vmatprep.subr.bf16.mxu1 %v2522_v14  ;;  %v2591_v11 = vld [vmem:[%s3670_s9 + $0x480] ss:$8 sps:$4 sm:$0xff]   ;;  %v2598_v14 = vld [vmem:[%s3670_s9 + $0x194] ss:$8 sps:$4 sm:$0xff]   ;;  %v2672_v3 = vld [vmem:[%s3670_s9 + $0x250] ss:$8 sps:$4 sm:$0xff]  }
  0x35   :  { %1222 = vmatprep.subr.bf16.mxu0 %v2525_v15  ;;  %2041 = vmatprep.mubr.msk.bf16.mxu1 %vm221_vm0, %v2016_v16  ;;  %v2601_v15 = vld [vmem:[%s3670_s9 + $0x494] ss:$8 sps:$4 sm:$0xff]   ;;  %v2067_v16 = vcombine.high %v2990_v46, %v3003_v50  ;;  %v2683_v56 = vld [vmem:[%s3670_s9 + $0x564] ss:$8 sps:$4 sm:$0xff]  }
  0x36   :  { %2245 = vmatprep.mubr.msk.bf16.mxu0 %vm221_vm0, %v2220_v17  ;;  %v2604_v17 = vld [vmem:[%s3670_s9 + $0x1a4] ss:$8 sps:$4 sm:$0xff]  }
  0x37   :  { %403 = vmatpush1.bf16.msra.mxu1 %v2520_v18  ;;  %v2607_v18 = vld [vmem:[%s3670_s9 + $0x4a4] ss:$8 sps:$4 sm:$0xff]  }
  0x38   :  { %1223 = vmatpush1.bf16.msra.mxu0 %v2523_v19  ;;  %404 = vmatprep.subr.bf16.mxu1 %v2528_v20  ;;  %v3254_v19 = vld [vmem:[%s3677_s6] sm:$0xff]  ;;  %v3259_v20 = vld [vmem:[%s3677_s6 + $0x8] sm:$0xff] }
  0x39   :  { %1224 = vmatprep.subr.bf16.mxu0 %v2531_v21  ;;  %v2271_v21 = vcombine.high %v3254_v19, %v3259_v20  ;;  %v1918_v0 = vmax.bf16 %v1916_v5, %v3259_v20  ;;  %v2675_v5 = vld [vmem:[%s3670_s9 + $0x550] ss:$8 sps:$4 sm:$0xff]  }
  0x3b   :  { %405 = vmatpush1.bf16.msra.mxu1 %v2526_v22  ;;  %v2602_v22 = vld [vmem:[%s3670_s9 + $0x1a0] ss:$8 sps:$4 sm:$0xff]  }
  0x3c   :  { %1225 = vmatpush1.bf16.msra.mxu0 %v2529_v23  ;;  %406 = vmatprep.subr.bf16.mxu1 %v2534_v24  ;;  %v2605_v23 = vld [vmem:[%s3670_s9 + $0x4a0] ss:$8 sps:$4 sm:$0xff]   ;;  %v2610_v24 = vld [vmem:[%s3670_s9 + $0x1b4] ss:$8 sps:$4 sm:$0xff]  }
  0x3d   :  { %1226 = vmatprep.subr.bf16.mxu0 %v2537_v25  ;;  %v2613_v25 = vld [vmem:[%s3670_s9 + $0x4b4] ss:$8 sps:$4 sm:$0xff]  }
  0x3f   :  { %407 = vmatpush1.bf16.msra.mxu1 %v2532_v26  ;;  %v2608_v26 = vld [vmem:[%s3670_s9 + $0x1b0] ss:$8 sps:$4 sm:$0xff]  }
  0x40   :  { %1227 = vmatpush1.bf16.msra.mxu0 %v2535_v27  ;;  %408 = vmatprep.subr.bf16.mxu1 %v2540_v28  ;;  %v2611_v27 = vld [vmem:[%s3670_s9 + $0x4b0] ss:$8 sps:$4 sm:$0xff]   ;;  %v2616_v28 = vld [vmem:[%s3670_s9 + $0x1c4] ss:$8 sps:$4 sm:$0xff]  }
  0x41   :  { %1228 = vmatprep.subr.bf16.mxu0 %v2543_v29  ;;  %v2619_v29 = vld [vmem:[%s3670_s9 + $0x4c4] ss:$8 sps:$4 sm:$0xff]  }
  0x43   :  { %409 = vmatpush1.bf16.msra.mxu1 %v2538_v30  ;;  %v2614_v30 = vld [vmem:[%s3670_s9 + $0x1c0] ss:$8 sps:$4 sm:$0xff]  }
  0x44   :  { %1229 = vmatpush1.bf16.msra.mxu0 %v2541_v31  ;;  %410 = vmatprep.subr.bf16.mxu1 %v2546_v32  ;;  %v2617_v31 = vld [vmem:[%s3670_s9 + $0x4c0] ss:$8 sps:$4 sm:$0xff]   ;;  %v2622_v32 = vld [vmem:[%s3670_s9 + $0x1d4] ss:$8 sps:$4 sm:$0xff]  }
  0x45   :  { %1230 = vmatprep.subr.bf16.mxu0 %v2549_v33  ;;  %v2625_v33 = vld [vmem:[%s3670_s9 + $0x4d4] ss:$8 sps:$4 sm:$0xff]  }
  0x47   :  { %411 = vmatpush1.bf16.msra.mxu1 %v2544_v34  ;;  %v2620_v34 = vld [vmem:[%s3670_s9 + $0x1d0] ss:$8 sps:$4 sm:$0xff]  }
  0x48   :  { %1231 = vmatpush1.bf16.msra.mxu0 %v2547_v35  ;;  %412 = vmatprep.subr.bf16.mxu1 %v2552_v36  ;;  %v2623_v35 = vld [vmem:[%s3670_s9 + $0x4d0] ss:$8 sps:$4 sm:$0xff]   ;;  %v2628_v36 = vld [vmem:[%s3670_s9 + $0x1e4] ss:$8 sps:$4 sm:$0xff]  }
  0x49   :  { %1232 = vmatprep.subr.bf16.mxu0 %v2555_v38  ;;  %v2631_v38 = vld [vmem:[%s3670_s9 + $0x4e4] ss:$8 sps:$4 sm:$0xff]  }
  0x4b   :  { %413 = vmatpush1.bf16.msra.mxu1 %v2550_v39  ;;  %v2626_v39 = vld [vmem:[%s3670_s9 + $0x1e0] ss:$8 sps:$4 sm:$0xff]  }
  0x4c   :  { %1233 = vmatpush1.bf16.msra.mxu0 %v2553_v41  ;;  %414 = vmatprep.subr.bf16.mxu1 %v2558_v42  ;;  %v2629_v41 = vld [vmem:[%s3670_s9 + $0x4e0] ss:$8 sps:$4 sm:$0xff]   ;;  %v2634_v42 = vld [vmem:[%s3670_s9 + $0x1f4] ss:$8 sps:$4 sm:$0xff]  }
  0x4d   :  { %1234 = vmatprep.subr.bf16.mxu0 %v2561_v43  ;;  %v2637_v43 = vld [vmem:[%s3670_s9 + $0x4f4] ss:$8 sps:$4 sm:$0xff]  }
  0x4f   :  { %415 = vmatpush1.bf16.msra.mxu1 %v2556_v44  ;;  %v2632_v44 = vld [vmem:[%s3670_s9 + $0x1f0] ss:$8 sps:$4 sm:$0xff]  }
  0x50   :  { %1235 = vmatpush1.bf16.msra.mxu0 %v2559_v45  ;;  %416 = vmatprep.subr.bf16.mxu1 %v2564_v47  ;;  %v2635_v45 = vld [vmem:[%s3670_s9 + $0x4f0] ss:$8 sps:$4 sm:$0xff]   ;;  %v2640_v47 = vld [vmem:[%s3670_s9 + $0x204] ss:$8 sps:$4 sm:$0xff]  }
  0x51   :  { %1236 = vmatprep.subr.bf16.mxu0 %v2567_v48  ;;  %v2643_v48 = vld [vmem:[%s3670_s9 + $0x504] ss:$8 sps:$4 sm:$0xff]  }
  0x53   :  { %417 = vmatpush1.bf16.msra.mxu1 %v2562_v49  ;;  %v2638_v49 = vld [vmem:[%s3670_s9 + $0x200] ss:$8 sps:$4 sm:$0xff]  }
  0x54   :  { %1237 = vmatpush1.bf16.msra.mxu0 %v2565_v51  ;;  %418 = vmatprep.subr.bf16.mxu1 %v2570_v52  ;;  %v2641_v51 = vld [vmem:[%s3670_s9 + $0x500] ss:$8 sps:$4 sm:$0xff]   ;;  %v2646_v52 = vld [vmem:[%s3670_s9 + $0x214] ss:$8 sps:$4 sm:$0xff]  }
  0x55   :  { %1238 = vmatprep.subr.bf16.mxu0 %v2573_v54  ;;  %v2649_v54 = vld [vmem:[%s3670_s9 + $0x514] ss:$8 sps:$4 sm:$0xff]  }
  0x57   :  { %419 = vmatpush1.bf16.msra.mxu1 %v2568_v55  ;;  %v2644_v55 = vld [vmem:[%s3670_s9 + $0x210] ss:$8 sps:$4 sm:$0xff]  }
  0x58   :  { %1239 = vmatpush1.bf16.msra.mxu0 %v2571_v57  ;;  %420 = vmatprep.subr.bf16.mxu1 %v2576_v58  ;;  %v2647_v57 = vld [vmem:[%s3670_s9 + $0x510] ss:$8 sps:$4 sm:$0xff]   ;;  %v2652_v58 = vld [vmem:[%s3670_s9 + $0x224] ss:$8 sps:$4 sm:$0xff]  }
  0x59   :  { %1240 = vmatprep.subr.bf16.mxu0 %v2579_v59  ;;  %v2655_v59 = vld [vmem:[%s3670_s9 + $0x524] ss:$8 sps:$4 sm:$0xff]  }
  0x5b   :  { %421 = vmatpush1.bf16.msra.mxu1 %v2574_v60  ;;  %v2650_v60 = vld [vmem:[%s3670_s9 + $0x220] ss:$8 sps:$4 sm:$0xff]  }
  0x5c   :  { %1241 = vmatpush1.bf16.msra.mxu0 %v2577_v61  ;;  %422 = vmatprep.subr.bf16.mxu1 %v2582_v62  ;;  %v2653_v61 = vld [vmem:[%s3670_s9 + $0x520] ss:$8 sps:$4 sm:$0xff]   ;;  %v2658_v62 = vld [vmem:[%s3670_s9 + $0x234] ss:$8 sps:$4 sm:$0xff]  }
  0x5d   :  { %1242 = vmatprep.subr.bf16.mxu0 %v2585_v63  ;;  %v2661_v63 = vld [vmem:[%s3670_s9 + $0x534] ss:$8 sps:$4 sm:$0xff]  }
  0x5f   :  { %423 = vmatpush1.bf16.msra.mxu1 %v2580_v6  ;;  %v2656_v6 = vld [vmem:[%s3670_s9 + $0x230] ss:$8 sps:$4 sm:$0xff]  }
  0x60   :  { %1243 = vmatpush1.bf16.msra.mxu0 %v2583_v7  ;;  %602 = vmatprep.subr.bf16.mxu1 %v2589_v8  ;;  %v2659_v7 = vld [vmem:[%s3670_s9 + $0x530] ss:$8 sps:$4 sm:$0xff]   ;;  %v2665_v8 = vld [vmem:[%s3670_s9 + $0x244] ss:$8 sps:$4 sm:$0xff]  }
  0x61   :  { %1426 = vmatprep.subr.bf16.mxu0 %v2593_v9  ;;  %v2669_v9 = vld [vmem:[%s3670_s9 + $0x544] ss:$8 sps:$4 sm:$0xff]  }
  0x62   :  { %433 = vmatmul.mubr.bf16.vlgmr.msra.gmra.mrb[0].mxu1 %v2015_v12  ;;  %v1917_v12 = vmax.bf16 %v1915_v4, %v3254_v19 }
  0x63   :  { %1253 = vmatmul.mubr.bf16.vlgmr.msra.gmra.mrb[0].mxu0 %v2219_v13  ;;  %603 = vmatpush1.bf16.msra.mxu1 %v2587_v10  ;;  %v2663_v10 = vld [vmem:[%s3670_s9 + $0x240] ss:$8 sps:$4 sm:$0xff]   ;;  %v2066_v13 = vcombine.low %v2990_v46, %v3003_v50  ;;  %v2674_v46 = vld [vmem:[%s3670_s9 + $0x254] ss:$8 sps:$4 sm:$0xff]  }
  0x64   :  { %1427 = vmatpush1.bf16.msra.mxu0 %v2591_v11  ;;  %604 = vmatprep.subr.bf16.mxu1 %v2598_v14  ;;  %v2667_v11 = vld [vmem:[%s3670_s9 + $0x540] ss:$8 sps:$4 sm:$0xff]   ;;  %v2270_v14 = vcombine.low %v3254_v19, %v3259_v20  ;;  %v2677_v50 = vld [vmem:[%s3670_s9 + $0x554] ss:$8 sps:$4 sm:$0xff]  }
  0x65   :  { %1428 = vmatprep.subr.bf16.mxu0 %v2601_v15  ;;  %2092 = vmatprep.mubr.msk.bf16.mxu1 %vm221_vm0, %v2067_v16  ;;  %v3402_v15 = vld [vmem:[%s3678_s7] sm:$0xff]  ;;  %v3407_v16 = vld [vmem:[%s3678_s7 + $0x8] sm:$0xff] }
  0x66   :  { %2296 = vmatprep.mubr.msk.bf16.mxu0 %vm221_vm0, %v2271_v21  ;;  %v2322_v4 = vcombine.high %v3402_v15, %v3407_v16  ;;  %v1919_v2 = vmax.bf16 %v1917_v12, %v3402_v15  ;;  %v2678_v21 = vld [vmem:[%s3670_s9 + $0x260] ss:$8 sps:$4 sm:$0xff]  }
  0x67   :  { %605 = vmatpush1.bf16.msra.mxu1 %v2596_v37  ;;  %v1920_v37 = vmax.bf16 %v1918_v0, %v3407_v16 }
  0x68   :  { %1429 = vmatpush1.bf16.msra.mxu0 %v2599_v40  ;;  %606 = vmatprep.subr.bf16.mxu1 %v2604_v17  ;;  %v3440_v40 = vld [vmem:[%s3679_s8] sm:$0xff]  ;;  %v3445_v17 = vld [vmem:[%s3679_s8 + $0x8] sm:$0xff] }
  0x69   :  { %1430 = vmatprep.subr.bf16.mxu0 %v2607_v18  ;;  %v2372_v18 = vcombine.low %v3440_v40, %v3445_v17  ;;  %v1921_v19 = vmax.bf16 %v1919_v2, %v3440_v40  ;;  %v1922_v20 = vmax.bf16 %v1920_v37, %v3445_v17  ;;  %v2373_v0 = vcombine.high %v3440_v40, %v3445_v17  ;;  %v2756_v2 = vld [vmem:[%s3670_s9 + $0x644] ss:$8 sps:$4 sm:$0xff]   ;;  %v2757_v37 = vld [vmem:[%s3670_s9 + $0x650] ss:$8 sps:$4 sm:$0xff]  }
  0x6a   :  { %v1887_v40 = vlaneseq }
  0x6b   :  { %607 = vmatpush1.bf16.msra.mxu1 %v2602_v22  ;;  %v2681_v22 = vld [vmem:[%s3670_s9 + $0x560] ss:$8 sps:$4 sm:$0xff]  }
  0x6c   :  { %1431 = vmatpush1.bf16.msra.mxu0 %v2605_v23  ;;  %608 = vmatprep.subr.bf16.mxu1 %v2610_v24  ;;  %v2686_v23 = vld [vmem:[%s3670_s9 + $0x274] ss:$8 sps:$4 sm:$0xff]   ;;  %v1888_v17 = vshrl.u32 %v1887_v40, 7 }
  0x6d   :  { %1432 = vmatprep.subr.bf16.mxu0 %v2613_v25  ;;  %v2689_v24 = vld [vmem:[%s3670_s9 + $0x574] ss:$8 sps:$4 sm:$0xff]   ;;  %v2399_v25 = vcombine.low %v1921_v19, %v1922_v20 }
  0x6f   :  { %609 = vmatpush1.bf16.msra.mxu1 %v2608_v26  ;;  %v2400_v26 = vcombine.high %v1921_v19, %v1922_v20  ;;  %1931 = vrot.lane.b32.xlu0 %v2399_v25, %s2782_s24  ;;  %v2765_v19 = vld [vmem:[%s3670_s9 + $0x674] ss:$8 sps:$4 sm:$0xff]   ;;  %v2763_v20 = vld [vmem:[%s3670_s9 + $0x670] ss:$8 sps:$4 sm:$0xff]   ;;  %v2774_v25 = vld [vmem:[%s3670_s9 + $0x6a4] ss:$8 sps:$4 sm:$0xff]  }
  0x70   :  { %1433 = vmatpush1.bf16.msra.mxu0 %v2611_v27  ;;  %610 = vmatprep.subr.bf16.mxu1 %v2616_v28  ;;  %v2684_v27 = vld [vmem:[%s3670_s9 + $0x270] ss:$8 sps:$4 sm:$0xff]  }
  0x71   :  { %1434 = vmatprep.subr.bf16.mxu0 %v2619_v29  ;;  %v2687_v28 = vld [vmem:[%s3670_s9 + $0x570] ss:$8 sps:$4 sm:$0xff]   ;;  %v2692_v29 = vld [vmem:[%s3670_s9 + $0x284] ss:$8 sps:$4 sm:$0xff]  }
  0x73   :  { %611 = vmatpush1.bf16.msra.mxu1 %v2614_v30  ;;  %v2695_v30 = vld [vmem:[%s3670_s9 + $0x584] ss:$8 sps:$4 sm:$0xff]   ;;  %1933 = vrot.lane.b32.xlu0 %v2400_v26, %s2782_s24  ;;  %v2772_v26 = vld [vmem:[%s3670_s9 + $0x6a0] ss:$8 sps:$4 sm:$0xff]  }
  0x74   :  { %1435 = vmatpush1.bf16.msra.mxu0 %v2617_v31  ;;  %612 = vmatprep.subr.bf16.mxu1 %v2622_v32  ;;  %v2690_v31 = vld [vmem:[%s3670_s9 + $0x280] ss:$8 sps:$4 sm:$0xff]  }
  0x75   :  { %1436 = vmatprep.subr.bf16.mxu0 %v2625_v33  ;;  %v2693_v32 = vld [vmem:[%s3670_s9 + $0x580] ss:$8 sps:$4 sm:$0xff]   ;;  %v2698_v33 = vld [vmem:[%s3670_s9 + $0x294] ss:$8 sps:$4 sm:$0xff]  }
  0x77   :  { %613 = vmatpush1.bf16.msra.mxu1 %v2620_v34  ;;  %v2701_v34 = vld [vmem:[%s3670_s9 + $0x594] ss:$8 sps:$4 sm:$0xff]  }
  0x78   :  { %1437 = vmatpush1.bf16.msra.mxu0 %v2623_v35  ;;  %614 = vmatprep.subr.bf16.mxu1 %v2628_v36  ;;  %v2696_v35 = vld [vmem:[%s3670_s9 + $0x290] ss:$8 sps:$4 sm:$0xff]  }
  0x79   :  { %1438 = vmatprep.subr.bf16.mxu0 %v2631_v38  ;;  %v2699_v36 = vld [vmem:[%s3670_s9 + $0x590] ss:$8 sps:$4 sm:$0xff]   ;;  %v2704_v38 = vld [vmem:[%s3670_s9 + $0x2a4] ss:$8 sps:$4 sm:$0xff]  }
  0x7b   :  { %615 = vmatpush1.bf16.msra.mxu1 %v2626_v39  ;;  %v2707_v39 = vld [vmem:[%s3670_s9 + $0x5a4] ss:$8 sps:$4 sm:$0xff]  }
  0x7c   :  { %1439 = vmatpush1.bf16.msra.mxu0 %v2629_v41  ;;  %616 = vmatprep.subr.bf16.mxu1 %v2634_v42  ;;  %v2702_v41 = vld [vmem:[%s3670_s9 + $0x2a0] ss:$8 sps:$4 sm:$0xff]  }
  0x7d   :  { %1440 = vmatprep.subr.bf16.mxu0 %v2637_v43  ;;  %v2705_v42 = vld [vmem:[%s3670_s9 + $0x5a0] ss:$8 sps:$4 sm:$0xff]   ;;  %v2710_v43 = vld [vmem:[%s3670_s9 + $0x2b4] ss:$8 sps:$4 sm:$0xff]  }
  0x7f   :  { %617 = vmatpush1.bf16.msra.mxu1 %v2632_v44  ;;  %v2713_v44 = vld [vmem:[%s3670_s9 + $0x5b4] ss:$8 sps:$4 sm:$0xff]  }
  0x80   :  { %1441 = vmatpush1.bf16.msra.mxu0 %v2635_v45  ;;  %618 = vmatprep.subr.bf16.mxu1 %v2640_v47  ;;  %v2708_v45 = vld [vmem:[%s3670_s9 + $0x2b0] ss:$8 sps:$4 sm:$0xff]  }
  0x81   :  { %1442 = vmatprep.subr.bf16.mxu0 %v2643_v48  ;;  %v2711_v47 = vld [vmem:[%s3670_s9 + $0x5b0] ss:$8 sps:$4 sm:$0xff]   ;;  %v2716_v48 = vld [vmem:[%s3670_s9 + $0x2c4] ss:$8 sps:$4 sm:$0xff]  }
  0x83   :  { %619 = vmatpush1.bf16.msra.mxu1 %v2638_v49  ;;  %v2719_v49 = vld [vmem:[%s3670_s9 + $0x5c4] ss:$8 sps:$4 sm:$0xff]  }
  0x84   :  { %1443 = vmatpush1.bf16.msra.mxu0 %v2641_v51  ;;  %620 = vmatprep.subr.bf16.mxu1 %v2646_v52  ;;  %v2714_v51 = vld [vmem:[%s3670_s9 + $0x2c0] ss:$8 sps:$4 sm:$0xff]  }
  0x85   :  { %1444 = vmatprep.subr.bf16.mxu0 %v2649_v54  ;;  %v2717_v52 = vld [vmem:[%s3670_s9 + $0x5c0] ss:$8 sps:$4 sm:$0xff]   ;;  %v2722_v54 = vld [vmem:[%s3670_s9 + $0x2d4] ss:$8 sps:$4 sm:$0xff]  }
  0x87   :  { %621 = vmatpush1.bf16.msra.mxu1 %v2644_v55  ;;  %v2725_v55 = vld [vmem:[%s3670_s9 + $0x5d4] ss:$8 sps:$4 sm:$0xff]  }
  0x88   :  { %1445 = vmatpush1.bf16.msra.mxu0 %v2647_v57  ;;  %622 = vmatprep.subr.bf16.mxu1 %v2652_v58  ;;  %v2720_v57 = vld [vmem:[%s3670_s9 + $0x2d0] ss:$8 sps:$4 sm:$0xff]  }
  0x89   :  { %1446 = vmatprep.subr.bf16.mxu0 %v2655_v59  ;;  %v2723_v58 = vld [vmem:[%s3670_s9 + $0x5d0] ss:$8 sps:$4 sm:$0xff]   ;;  %v2728_v59 = vld [vmem:[%s3670_s9 + $0x2e4] ss:$8 sps:$4 sm:$0xff]  }
  0x8b   :  { %623 = vmatpush1.bf16.msra.mxu1 %v2650_v60  ;;  %v2731_v60 = vld [vmem:[%s3670_s9 + $0x5e4] ss:$8 sps:$4 sm:$0xff]  }
  0x8c   :  { %1447 = vmatpush1.bf16.msra.mxu0 %v2653_v61  ;;  %624 = vmatprep.subr.bf16.mxu1 %v2658_v62  ;;  %v2726_v61 = vld [vmem:[%s3670_s9 + $0x2e0] ss:$8 sps:$4 sm:$0xff]  }
  0x8d   :  { %1448 = vmatprep.subr.bf16.mxu0 %v2661_v63  ;;  %v2729_v62 = vld [vmem:[%s3670_s9 + $0x5e0] ss:$8 sps:$4 sm:$0xff]   ;;  %v2734_v63 = vld [vmem:[%s3670_s9 + $0x2f4] ss:$8 sps:$4 sm:$0xff]  }
  0x8f   :  { %625 = vmatpush1.bf16.msra.mxu1 %v2656_v6  ;;  %v2737_v6 = vld [vmem:[%s3670_s9 + $0x5f4] ss:$8 sps:$4 sm:$0xff]  }
  0x90   :  { %1449 = vmatpush1.bf16.msra.mxu0 %v2659_v7  ;;  %808 = vmatprep.subr.bf16.mxu1 %v2665_v8  ;;  %v2732_v7 = vld [vmem:[%s3670_s9 + $0x2f0] ss:$8 sps:$4 sm:$0xff]  }
  0x91   :  { %1632 = vmatprep.subr.bf16.mxu0 %v2669_v9  ;;  %v2735_v8 = vld [vmem:[%s3670_s9 + $0x5f0] ss:$8 sps:$4 sm:$0xff]   ;;  %v2743_v9 = vld [vmem:[%s3670_s9 + $0x604] ss:$8 sps:$4 sm:$0xff]  }
  0x92   :  { %635 = vmatmul.mubr.bf16.vlgmr.msra.gmra.mrb[0].mxu1 %v2066_v13  ;;  %v2321_v13 = vcombine.low %v3402_v15, %v3407_v16  ;;  %v2745_v15 = vld [vmem:[%s3670_s9 + $0x610] ss:$8 sps:$4 sm:$0xff]   ;;  %v2750_v16 = vld [vmem:[%s3670_s9 + $0x624] ss:$8 sps:$4 sm:$0xff]  }
  0x93   :  { %1459 = vmatmul.mubr.bf16.vlgmr.msra.gmra.mrb[0].mxu0 %v2270_v14  ;;  %809 = vmatpush1.bf16.msra.mxu1 %v2663_v10  ;;  %v2780_v10 = vld [vmem:[%s3674_s3] sm:$0xff] }
  0x94   :  { %1633 = vmatpush1.bf16.msra.mxu0 %v2667_v11  ;;  %810 = vmatprep.subr.bf16.mxu1 %v2674_v46  ;;  %v2781_v11 = vld [vmem:[%s3674_s3 + $0x8] sm:$0xff]  ;;  %v2747_v46 = vld [vmem:[%s3670_s9 + $0x614] ss:$8 sps:$4 sm:$0xff]  }
  0x95   :  { %1634 = vmatprep.subr.bf16.mxu0 %v2677_v50  ;;  %2143 = vmatprep.mubr.msk.bf16.mxu1 %vm221_vm0, %v2118_v1  ;;  %v2117_v12 = vcombine.low %v2780_v10, %v2781_v11  ;;  %v2741_v14 = vld [vmem:[%s3670_s9 + $0x600] ss:$8 sps:$4 sm:$0xff]   ;;  %v2753_v1 = vld [vmem:[%s3670_s9 + $0x634] ss:$8 sps:$4 sm:$0xff]  }
  0x96   :  { %2347 = vmatprep.mubr.msk.bf16.mxu0 %vm221_vm0, %v2322_v4  ;;  %v2748_v50 = vld [vmem:[%s3670_s9 + $0x620] ss:$8 sps:$4 sm:$0xff]   ;;  %v2751_v4 = vld [vmem:[%s3670_s9 + $0x630] ss:$8 sps:$4 sm:$0xff]  }
  0x97   :  { %811 = vmatpush1.bf16.msra.mxu1 %v2672_v3  ;;  %v2754_v3 = vld [vmem:[%s3670_s9 + $0x640] ss:$8 sps:$4 sm:$0xff]  }
  0x98   :  { %1635 = vmatpush1.bf16.msra.mxu0 %v2675_v5  ;;  %812 = vmatprep.subr.bf16.mxu1 %v2680_v53  ;;  %v2759_v5 = vld [vmem:[%s3670_s9 + $0x654] ss:$8 sps:$4 sm:$0xff]   ;;  %v2762_v53 = vld [vmem:[%s3670_s9 + $0x664] ss:$8 sps:$4 sm:$0xff]  }
  0x99   :  { %1636 = vmatprep.subr.bf16.mxu0 %v2683_v56  ;;  %v2760_v56 = vld [vmem:[%s3670_s9 + $0x660] ss:$8 sps:$4 sm:$0xff]  }
  0x9b   :  { %813 = vmatpush1.bf16.msra.mxu1 %v2678_v21  ;;  %v2768_v21 = vld [vmem:[%s3670_s9 + $0x684] ss:$8 sps:$4 sm:$0xff]  }
  0x9c   :  { %1637 = vmatpush1.bf16.msra.mxu0 %v2681_v22  ;;  %814 = vmatprep.subr.bf16.mxu1 %v2686_v23  ;;  %v2766_v22 = vld [vmem:[%s3670_s9 + $0x680] ss:$8 sps:$4 sm:$0xff]   ;;  %v2771_v23 = vld [vmem:[%s3670_s9 + $0x694] ss:$8 sps:$4 sm:$0xff]  }
  0x9d   :  { %1638 = vmatprep.subr.bf16.mxu0 %v2689_v24  ;;  %v2769_v24 = vld [vmem:[%s3670_s9 + $0x690] ss:$8 sps:$4 sm:$0xff]  }
  0x9f   :  { %815 = vmatpush1.bf16.msra.mxu1 %v2684_v27  ;;  %v2777_v27 = vld [vmem:[%s3670_s9 + $0x6b4] ss:$8 sps:$4 sm:$0xff]  }
  0xa0   :  { %1639 = vmatpush1.bf16.msra.mxu0 %v2687_v28  ;;  %816 = vmatprep.subr.bf16.mxu1 %v2692_v29  ;;  %v2775_v28 = vld [vmem:[%s3670_s9 + $0x6b0] ss:$8 sps:$4 sm:$0xff]  }
  0xa1   :  { %1640 = vmatprep.subr.bf16.mxu0 %v2695_v30 }
  0xa3   :  { %817 = vmatpush1.bf16.msra.mxu1 %v2690_v31 }
  0xa4   :  { %1641 = vmatpush1.bf16.msra.mxu0 %v2693_v32  ;;  %818 = vmatprep.subr.bf16.mxu1 %v2698_v33 }
  0xa5   :  { %1642 = vmatprep.subr.bf16.mxu0 %v2701_v34 }
  0xa7   :  { %819 = vmatpush1.bf16.msra.mxu1 %v2696_v35 }
  0xa8   :  { %1643 = vmatpush1.bf16.msra.mxu0 %v2699_v36  ;;  %820 = vmatprep.subr.bf16.mxu1 %v2704_v38 }
  0xa9   :  { %1644 = vmatprep.subr.bf16.mxu0 %v2707_v39  ;;  %v1885_v39 = vld [vmem:[%s3681_s10] sm:$0x3] }
  0xab   :  { %821 = vmatpush1.bf16.msra.mxu1 %v2702_v41  ;;  %v1893_v41 = vsub.s32 1, %v1888_v17 }
  0xac   :  { %1645 = vmatpush1.bf16.msra.mxu0 %v2705_v42  ;;  %822 = vmatprep.subr.bf16.mxu1 %v2710_v43 }
  0xad   :  { %1646 = vmatprep.subr.bf16.mxu0 %v2713_v44  ;;  %v1894_v44 = vrot.slane %v1885_v39, %v1893_v41 }
  0xaf   :  { %823 = vmatpush1.bf16.msra.mxu1 %v2708_v45 }
  0xb0   :  { %1647 = vmatpush1.bf16.msra.mxu0 %v2711_v47  ;;  %824 = vmatprep.subr.bf16.mxu1 %v2716_v48 }
  0xb1   :  { %1648 = vmatprep.subr.bf16.mxu0 %v2719_v49 }
  0xb3   :  { %825 = vmatpush1.bf16.msra.mxu1 %v2714_v51 }
  0xb4   :  { %1649 = vmatpush1.bf16.msra.mxu0 %v2717_v52  ;;  %826 = vmatprep.subr.bf16.mxu1 %v2722_v54 }
  0xb5   :  { %1650 = vmatprep.subr.bf16.mxu0 %v2725_v55 }
  0xb7   :  { %827 = vmatpush1.bf16.msra.mxu1 %v2720_v57 }
  0xb8   :  { %1651 = vmatpush1.bf16.msra.mxu0 %v2723_v58  ;;  %828 = vmatprep.subr.bf16.mxu1 %v2728_v59 }
  0xb9   :  { %1652 = vmatprep.subr.bf16.mxu0 %v2731_v60 }
  0xbb   :  { %829 = vmatpush1.bf16.msra.mxu1 %v2726_v61 }
  0xbc   :  { %1653 = vmatpush1.bf16.msra.mxu0 %v2729_v62  ;;  %830 = vmatprep.subr.bf16.mxu1 %v2734_v63 }
  0xbd   :  { %1654 = vmatprep.subr.bf16.mxu0 %v2737_v6 }
  0xbf   :  { %831 = vmatpush1.bf16.msra.mxu1 %v2732_v7 }
  0xc0   :  { %1655 = vmatpush1.bf16.msra.mxu0 %v2735_v8 }
  0xc1   :  { %1838 = vmatprep.subr.bf16.mxu0 %v2743_v9 }
  0xc2   :  { %841 = vmatmul.mubr.bf16.vlgmr.msra.gmra.mrb[0].mxu1 %v2117_v12 }
  0xc3   :  { %1665 = vmatmul.mubr.bf16.vlgmr.msra.gmra.mrb[0].mxu0 %v2321_v13 }
  0xc4   :  { %1839 = vmatpush1.bf16.msra.mxu0 %v2741_v14  ;;  %2398 = vmatprep.mubr.msk.bf16.mxu0 %vm221_vm0, %v2373_v0 }
  0xc5   :  { %1840 = vmatprep.subr.bf16.mxu0 %v2747_v46 }
  0xc8   :  { %1841 = vmatpush1.bf16.msra.mxu0 %v2745_v15 }
  0xc9   :  { %1842 = vmatprep.subr.bf16.mxu0 %v2750_v16 }
  0xcc   :  { %1843 = vmatpush1.bf16.msra.mxu0 %v2748_v50 }
  0xcd   :  { %1844 = vmatprep.subr.bf16.mxu0 %v2753_v1 }
  0xd0   :  { %1845 = vmatpush1.bf16.msra.mxu0 %v2751_v4 }
  0xd1   :  { %1846 = vmatprep.subr.bf16.mxu0 %v2756_v2 }
  0xd4   :  { %1847 = vmatpush1.bf16.msra.mxu0 %v2754_v3 }
  0xd5   :  { %1848 = vmatprep.subr.bf16.mxu0 %v2759_v5 }
  0xd8   :  { %1849 = vmatpush1.bf16.msra.mxu0 %v2757_v37 }
  0xd9   :  { %1850 = vmatprep.subr.bf16.mxu0 %v2762_v53 }
  0xdc   :  { %1851 = vmatpush1.bf16.msra.mxu0 %v2760_v56 }
  0xdd   :  { %1852 = vmatprep.subr.bf16.mxu0 %v2765_v19 }
  0xe0   :  { %1853 = vmatpush1.bf16.msra.mxu0 %v2763_v20 }
  0xe1   :  { %1854 = vmatprep.subr.bf16.mxu0 %v2768_v21  ;;  %v1932_v29 = vpop.permute.xlu0 %1931 }
  0xe4   :  { %1855 = vmatpush1.bf16.msra.mxu0 %v2766_v22 }
  0xe5   :  { %1856 = vmatprep.subr.bf16.mxu0 %v2771_v23  ;;  %v1934_v30 = vpop.permute.xlu0 %1933 }
  0xe6   :  { %v1936_v31 = vsel %vm221_vm0, %v1932_v29, %v1934_v30 }
  0xe7   :  { %v2402_v32 = vcombine.low %v1936_v31, %v1936_v31  ;;  %v2404_v33 = vcombine.high %v1936_v31, %v1936_v31 }
  0xe8   :  { %1857 = vmatpush1.bf16.msra.mxu0 %v2769_v24 }
  0xe9   :  { %1858 = vmatprep.subr.bf16.mxu0 %v2774_v25  ;;  %1957 = vst [vmem:[%s3680_s11 + $0x8] sm:$0xf] %v2402_v32  ;;  %1959 = vst [vmem:[%s3680_s11 + $0x14] sm:$0xf] %v2404_v33 }
  0xec   :  { %1859 = vmatpush1.bf16.msra.mxu0 %v2772_v26 }
  0xed   :  { %1860 = vmatprep.subr.bf16.mxu0 %v2777_v27 }
  0xf0   :  { %1861 = vmatpush1.bf16.msra.mxu0 %v2775_v28 }
  0xf3   :  { %1871 = vmatmul.mubr.bf16.vlgmr.msra.gmra.mrb[0].mxu0 %v2372_v18  ;;  %v1889_v18 = vsub.s32 0, %v1888_v17 }
  0xf5   :  { %v1890_v42 = vrot.slane %v1885_v39, %v1889_v18 }
 0x195   :  { %v842_v34 = vpop.f32.mrb[0].mxu1 }
 0x196   :  { %v844_v35 = vpop.f32.mrb[1].mxu1 }
 0x197   :  { %v846_v36 = vpop.f32.mrb[2].mxu1 }
 0x198   :  { %v848_v38 = vpop.f32.mrb[3].mxu1 }
 0x1c6   :  { %v1872_v43 = vpop.f32.mrb[0].mxu0 }
 0x1c7   :  { %v2405_v45 = vadd.f32 %v1872_v43, %v842_v34  ;;  %v1874_v47 = vpop.f32.mrb[1].mxu0 }
 0x1c8   :  { %v2406_v48 = vadd.f32 %v1874_v47, %v844_v35  ;;  %v1876_v49 = vpop.f32.mrb[2].mxu0 }
 0x1c9   :  { %v1897_v51 = vadd.f32 %v2405_v45, %v1890_v42  ;;  %v2407_v52 = vadd.f32 %v1876_v49, %v846_v36  ;;  %v1878_v54 = vpop.f32.mrb[3].mxu0 }
 0x1ca   :  { %v1898_v55 = vadd.f32 %v2406_v48, %v1894_v44  ;;  %v2408_v57 = vadd.f32 %v1878_v54, %v848_v38 }
 0x1cb   :  { %v1899_v58 = vadd.f32 %v2407_v52, %v1890_v42  ;;  %v1901_v60 = vmax.f32 %v1897_v51, 0.0 }
 0x1cc   :  { %v1900_v59 = vadd.f32 %v2408_v57, %v1894_v44  ;;  %v1902_v62 = vmax.f32 %v1898_v55, 0.0 }
 0x1cd   :  { %v1903_v61 = vmax.f32 %v1899_v58, 0.0 }
 0x1ce   :  { %v1904_v63 = vmax.f32 %v1900_v59, 0.0 }
 0x1cf   :  { %v1905_v6 = vpack.c.bf16 %v1903_v61, %v1901_v60 }
 0x1d0   :  { %v1906_v7 = vpack.c.bf16 %v1904_v63, %v1902_v62 }
 0x1d2   :  { %v1939_v8 = vsel %vm221_vm0, %v1906_v7, %v1932_v29 }
 0x1d3   :  { %v2401_v9 = vcombine.low %v1905_v6, %v1939_v8  ;;  %v2403_v10 = vcombine.high %v1905_v6, %v1939_v8 }
 0x1d5   :  { %1956 = vst [vmem:[%s3680_s11] sm:$0xff] %v2401_v9  ;;  %1958 = vst [vmem:[%s3680_s11 + $0xc] sm:$0xff] %v2403_v10 }

</bundles_post_ra>
